<compile_context>
chip_gen: v7x
topology: tpu7x:2x2x1
jax: 0.10.0
libtpu: 0.0.40
codegen_flags: <defaults>
</compile_context>

<pallas_src>
import math
import numpy as np
import jax
import jax.numpy as jnp
from jax.experimental import pallas as pl
from jax.experimental.pallas import tpu as pltpu

DIM = 3
KERNEL_SIZE = 3
DEGREE = 1
K = KERNEL_SIZE ** DIM          # 27 kernel weight matrices per Spline
S = (DEGREE + 1) ** DIM         # 8 nonzero basis functions per edge


def _round_up(a, b):
    return (a + b - 1) // b * b


# ---------------------------------------------------------------------------
# spline basis (degree-1 open B-spline), matching torch_spline_conv semantics
# ---------------------------------------------------------------------------
def spline_basis(pseudo, kernel_size, is_open_spline, degree=DEGREE):
    E, D = pseudo.shape
    n_s = (degree + 1) ** D
    kmods = np.zeros((n_s, D), dtype=np.int32)
    for s in range(n_s):
        k = s
        for d in range(D):
            kmods[s, d] = k % (degree + 1)
            k //= (degree + 1)
    kmods = jnp.asarray(kmods)                                   # (S, D)
    ks_f = jnp.asarray(kernel_size, dtype=jnp.float32)           # (D,)
    open_f = jnp.asarray(is_open_spline, dtype=jnp.float32)      # (D,)
    v = pseudo * (ks_f - degree * open_f)                        # (E, D)
    v_floor = jnp.floor(v)
    frac = v - v_floor                                           # (E, D)
    km = kmods[None, :, :].astype(jnp.float32)                   # (1, S, D)
    fb = frac[:, None, :]                                        # (E, 1, D)
    # degree-1 basis: (1 - f) for k_mod == 0, f for k_mod == 1
    bd = 1.0 - fb - km + 2.0 * fb * km
    basis = jnp.prod(bd, axis=-1)                                # (E, S)
    ks_i = jnp.asarray(kernel_size, dtype=jnp.int32)
    offsets = jnp.asarray(
        [int(np.prod(kernel_size[:d])) for d in range(D)], dtype=jnp.int32)
    vi = v_floor.astype(jnp.int32)[:, None, :]                   # (E, 1, D)
    wi = jnp.sum(((vi + kmods[None, :, :]) % ks_i) * offsets, axis=-1)  # (E, S)
    return basis, wi


# ---------------------------------------------------------------------------
# Fused GCGRU-cell kernel
# grid = (node tiles ["parallel"], edge blocks owned by that tile ["arbitrary"])
# scalar prefetch: blk_tbl (flattened [n_ntile*maxb]) and nblk [n_ntile]
# ---------------------------------------------------------------------------
def gcgru_kernel(blk_tbl_ref, nblk_ref,
                 edge_ref, row_ref, xh_ref, h_ref, invdeg_ref,
                 wflat_ref, rootcat_ref, biascat_ref,
                 out_ref, acc_ref):
    C = out_ref.shape[-1]
    TN = acc_ref.shape[0]
    i = pl.program_id(0)
    j = pl.program_id(1)

    @pl.when(j == 0)
    def _init():
        acc_ref[...] = jnp.zeros_like(acc_ref)

    # Only accumulate edge blocks that this node tile actually owns; clamped
    # duplicate blocks (j >= nblk[i]) are skipped.
    @pl.when(j < nblk_ref[i])
    def _accumulate():
        edge = edge_ref[...]                       # (TE, K + 2C) f32
        b = edge[:, :K]                            # (TE, K)   basis per slot
        feat = edge[:, K:]                         # (TE, 2C)  gathered [x|h][col]

        # Khatri-Rao operand (lane-axis concat of K scaled copies) -> ONE wide
        # matmul with K*2C contraction depth instead of 27 depth-2C pushes.
        op = jnp.concatenate([feat * b[:, k:k + 1] for k in range(K)], axis=-1)
        out_e = jnp.dot(op.astype(jnp.bfloat16), wflat_ref[...],
                        preferred_element_type=jnp.float32)        # (TE, 4C)

        # One-hot scatter onto this node tile: broadcast (TN,1) ids vs (1,TE)
        # rows (no 2-D iota).  Padded edges carry row = -1 and never match;
        # edges owned by a neighboring tile are masked out the same way.
        node_ids = i * TN + jax.lax.broadcasted_iota(jnp.int32, (TN, 1), 0)
        scat = (node_ids == row_ref[...]).astype(jnp.bfloat16)     # (TN, TE)
        acc_ref[...] += jnp.dot(scat, out_e.astype(jnp.bfloat16),
                                preferred_element_type=jnp.float32)

    @pl.when(j == pl.num_programs(1) - 1)
    def _finalize():
        # degree norm + root term + bias for all gates in one shot (4C slab:
        # [xr | xz+hz | xn | hr])
        g = acc_ref[...] * invdeg_ref[...]                         # (TN, 4C)
        g = g + jnp.dot(xh_ref[...], rootcat_ref[...],
                        preferred_element_type=jnp.float32)
        g = g + biascat_ref[...]
        h = h_ref[...]
        hr = g[:, 3 * C:4 * C]
        r = jax.nn.sigmoid(g[:, 0 * C:1 * C] + hr)
        z = jax.nn.sigmoid(g[:, 1 * C:2 * C])
        # PyTorch GCGRUCell reuses hr (not hn) in the candidate gate.
        n = jnp.tanh(g[:, 2 * C:3 * C] + r * hr)
        out_ref[...] = (1.0 - z) * n + z * h                       # fused store


# ---------------------------------------------------------------------------
# Parameter init (mirrors Spline.reset_parameters: uniform(+-1/sqrt(C*K)))
# ---------------------------------------------------------------------------
def init_spline_params(key, in_c, out_c, k):
    bound = 1.0 / math.sqrt(in_c * k)
    kw, kr, kb = jax.random.split(key, 3)
    return {
        "weight": jax.random.uniform(kw, (k, in_c, out_c), jnp.float32, -bound, bound),
        "root":   jax.random.uniform(kr, (in_c, out_c), jnp.float32, -bound, bound),
        "bias":   jax.random.uniform(kb, (out_c,), jnp.float32, -bound, bound),
    }


def init_correction_params(key, latent_dim):
    # hn is created (as in the PyTorch __init__) but never used in forward.
    names = ["xr", "hr", "xz", "hz", "xn", "hn"]
    keys = jax.random.split(key, len(names))
    return {n: init_spline_params(k, latent_dim, latent_dim, K) for n, k in zip(names, keys)}


def _pack_gate_params(params, C):
    # 4C gate slab [xr | xz+hz | xn | hr]; hz shares xz's output columns since
    # the two pre-activations are only ever summed.
    zK = jnp.zeros((K, C, C), jnp.float32)
    w_x = jnp.concatenate([params["xr"]["weight"], params["xz"]["weight"],
                           params["xn"]["weight"], zK], axis=2)          # (K, C, 4C)
    w_h = jnp.concatenate([zK, params["hz"]["weight"], zK,
                           params["hr"]["weight"]], axis=2)              # (K, C, 4C)
    w_cat = jnp.concatenate([w_x, w_h], axis=1)                          # (K, 2C, 4C)
    # flatten k-major to match the in-kernel concat([feat*b_k for k]) ordering
    w_flat = w_cat.reshape(K * 2 * C, 4 * C).astype(jnp.bfloat16)

    zC = jnp.zeros((C, C), jnp.float32)
    r_x = jnp.concatenate([params["xr"]["root"], params["xz"]["root"],
                           params["xn"]["root"], zC], axis=1)            # (C, 4C)
    r_h = jnp.concatenate([zC, params["hz"]["root"], zC,
                           params["hr"]["root"]], axis=1)                # (C, 4C)
    root_cat = jnp.concatenate([r_x, r_h], axis=0)                       # (2C, 4C)

    bias_cat = jnp.concatenate([params["xr"]["bias"],
                                params["xz"]["bias"] + params["hz"]["bias"],
                                params["xn"]["bias"],
                                params["hr"]["bias"]])[None, :]          # (1, 4C)
    return w_flat, root_cat, bias_cat


# ---------------------------------------------------------------------------
# Wrapper: host-side graph preprocessing (edge sort + per-tile block tables),
# cheap XLA glue (basis, gathers, degree, gate packing), one Pallas kernel.
# ---------------------------------------------------------------------------
def correction_forward(params, x, hidden, edge_index, edge_attr):
    N, C = x.shape
    row = np.asarray(edge_index[0], dtype=np.int32)
    col = np.asarray(edge_index[1], dtype=np.int32)
    E = int(row.shape[0])

    # ---- tile sizes ----
    # TE large to amortize per-grid-step overhead; TN so the "parallel" node
    # axis has >= 2 tiles whenever possible (v7x has 2 TensorCores).
    TE = min(1024, _round_up(max(E, 1), 128))
    TN = min(256, max(8, _round_up((N + 1) // 2, 8)))
    N_pad = _round_up(N, TN)
    n_ntile = N_pad // TN
    E_pad = _round_up(max(E, 1), TE)
    n_eblk = E_pad // TE

    # ---- host-side: sort edges by destination row, build per-node-tile edge
    # block tables for scalar prefetch (each edge streamed/computed ONCE) ----
    order = np.argsort(row, kind="stable")
    row_s = row[order]
    tile_lo = np.arange(n_ntile, dtype=np.int64) * TN
    seg_start = np.searchsorted(row_s, tile_lo, side="left")
    seg_end = np.searchsorted(row_s, tile_lo + TN, side="left")
    blk_lo = seg_start // TE
    blk_hi = np.where(seg_end > seg_start, (seg_end - 1) // TE, blk_lo - 1)
    nblk_np = np.maximum(blk_hi - blk_lo + 1, 0).astype(np.int32)
    maxb = max(int(nblk_np.max()), 1)
    blk_tbl_np = np.minimum(blk_lo[:, None] + np.arange(maxb)[None, :],
                            n_eblk - 1).astype(np.int32).reshape(-1)   # 1-D SMEM

    # ---- device-side per-edge quantities (computed once, sorted order) ----
    edge_attr_s = jnp.asarray(edge_attr)[order]
    col_s = col[order]
    basis, wi = spline_basis(edge_attr_s, [KERNEL_SIZE] * DIM, [1] * DIM, DEGREE)
    b_full = jnp.sum(jax.nn.one_hot(wi, K, dtype=jnp.float32) * basis[:, :, None],
                     axis=1)                                      # (E, K)
    feat_e = jnp.concatenate([x[col_s], hidden[col_s]], axis=1)   # (E, 2C)
    edge_feat = jnp.concatenate([b_full, feat_e], axis=1)         # (E, K+2C) one stream

    deg = jnp.zeros((N,), jnp.float32).at[jnp.asarray(row_s)].add(1.0)
    inv_deg = (1.0 / jnp.maximum(deg, 1.0))[:, None]              # (N, 1)
    xh = jnp.concatenate([x, hidden], axis=1)                     # (N, 2C)

    # ---- padding ----
    edge_feat_p = jnp.pad(edge_feat, ((0, E_pad - E), (0, 0)))
    row_p = jnp.pad(jnp.asarray(row_s, dtype=jnp.int32), (0, E_pad - E),
                    constant_values=-1)[None, :]                  # (1, E_pad)
    xh_p = jnp.pad(xh, ((0, N_pad - N), (0, 0)))
    h_p = jnp.pad(hidden, ((0, N_pad - N), (0, 0)))
    invdeg_p = jnp.pad(inv_deg, ((0, N_pad - N), (0, 0)), constant_values=1.0)

    w_flat, root_cat, bias_cat = _pack_gate_params(params, C)

    # ---- advisory cost model (edges streamed once; no xN/TN factor) ----
    tot_blk = int(nblk_np.sum())
    flops = (2 * tot_blk * TE * (K * 2 * C) * (4 * C)   # wide edge matmul
             + 2 * tot_blk * TE * TN * (4 * C)          # one-hot scatter matmul
             + 2 * N_pad * (2 * C) * (4 * C))           # root term
    bytes_accessed = (4 * tot_blk * TE * (K + 2 * C + 1)
                      + 4 * N_pad * (2 * C + C + 1 + C)
                      + 2 * (K * 2 * C * 4 * C) + 4 * (2 * C * 4 * C + 4 * C))
    transcendentals = 3 * N_pad * C

    grid = (n_ntile, maxb)

    out_p = pl.pallas_call(
        gcgru_kernel,
        out_shape=jax.ShapeDtypeStruct((N_pad, C), jnp.float32),
        grid_spec=pltpu.PrefetchScalarGridSpec(
            num_scalar_prefetch=2,
            grid=grid,
            in_specs=[
                # combined [b_full | x[col] | h[col]] edge stream, data-dependent block
                pl.BlockSpec((TE, K + 2 * C),
                             lambda i, j, blk, nb: (blk[i * maxb + j], 0)),
                # sorted destination rows
                pl.BlockSpec((1, TE),
                             lambda i, j, blk, nb: (0, blk[i * maxb + j])),
                pl.BlockSpec((TN, 2 * C), lambda i, j, blk, nb: (i, 0)),   # [x|h]
                pl.BlockSpec((TN, C),     lambda i, j, blk, nb: (i, 0)),   # hidden
                pl.BlockSpec((TN, 1),     lambda i, j, blk, nb: (i, 0)),   # inv_deg
                pl.BlockSpec((K * 2 * C, 4 * C), lambda i, j, blk, nb: (0, 0)),
                pl.BlockSpec((2 * C, 4 * C),     lambda i, j, blk, nb: (0, 0)),
                pl.BlockSpec((1, 4 * C),         lambda i, j, blk, nb: (0, 0)),
            ],
            out_specs=pl.BlockSpec((TN, C), lambda i, j, blk, nb: (i, 0)),
            scratch_shapes=[pltpu.VMEM((TN, 4 * C), jnp.float32)],
        ),
        compiler_params=pltpu.CompilerParams(
            dimension_semantics=("parallel", "arbitrary"),
            vmem_limit_bytes=48 * 1024 * 1024,   # headroom on v7x's 64 MiB/TC
        ),
        cost_estimate=pl.CostEstimate(flops=flops,
                                      transcendentals=transcendentals,
                                      bytes_accessed=bytes_accessed),
    )(jnp.asarray(blk_tbl_np), jnp.asarray(nblk_np),
      edge_feat_p, row_p, xh_p, h_p, invdeg_p, w_flat, root_cat, bias_cat)

    return out_p[:N]


# ---------------------------------------------------------------------------
# Pure-JAX reference (faithful to the PyTorch formulation) for validation
# ---------------------------------------------------------------------------
def ref_spline(feat, row, col, basis, wi, p, n_nodes):
    w, root, bias = p["weight"], p["root"], p["bias"]
    x_col = feat[col]                                    # (E, Cin)
    wg = w[wi]                                           # (E, S, Cin, Cout)
    out_e = jnp.einsum('es,ec,escm->em', basis, x_col, wg,
                       precision=jax.lax.Precision.HIGHEST)
    out = jnp.zeros((n_nodes, w.shape[-1]), jnp.float32).at[row].add(out_e)
    deg = jnp.zeros((n_nodes,), jnp.float32).at[row].add(1.0)
    out = out / jnp.maximum(deg, 1.0)[:, None]
    out = out + jnp.dot(feat, root, precision=jax.lax.Precision.HIGHEST) + bias
    return out


def ref_correction(params, x, hidden, edge_index, edge_attr):
    row, col = edge_index[0], edge_index[1]
    n_nodes = x.shape[0]
    basis, wi = spline_basis(edge_attr, [KERNEL_SIZE] * DIM, [1] * DIM, DEGREE)
    sp = lambda name, feat: ref_spline(feat, row, col, basis, wi, params[name], n_nodes)
    r = jax.nn.sigmoid(sp("xr", x) + sp("hr", hidden))
    z = jax.nn.sigmoid(sp("xz", x) + sp("hz", hidden))
    n = jnp.tanh(sp("xn", x) + r * sp("hr", hidden))
    return (1.0 - z) * n + z * hidden


if __name__ == "__main__":
    key = jax.random.PRNGKey(0)
    kp, kx, kh, ke, ka = jax.random.split(key, 5)

    latent_dim = 8
    n_nodes = 12
    n_edges = 20

    params = init_correction_params(kp, latent_dim)
    x = jax.random.normal(kx, (n_nodes, latent_dim), jnp.float32)
    hidden = jax.random.normal(kh, (n_nodes, latent_dim), jnp.float32)
    edge_index = jax.random.randint(ke, (2, n_edges), 0, n_nodes, dtype=jnp.int32)
    edge_attr = jax.random.uniform(ka, (n_edges, DIM), dtype=jnp.float32)  # pseudo in [0,1)

    out = correction_forward(params, x, hidden, edge_index, edge_attr)
    out = jax.block_until_ready(out)

    ref = ref_correction(params, x, hidden, edge_index, edge_attr)
    assert out.shape == (n_nodes, latent_dim)
    # bf16 MXU operands (f32 accumulation) vs HIGHEST-precision reference
    assert jnp.allclose(out, ref, atol=2e-3, rtol=2e-3), float(jnp.max(jnp.abs(out - ref)))

    print("KERNEL_OK")
</pallas_src>

<mosaic_0001>
module attributes {stable_mosaic.version = 11 : i64} {
  func.func @gcgru_kernel(%arg0: i32, %arg1: i32, %arg2: memref<2xi32, #tpu.memory_space<smem>>, %arg3: memref<2xi32, #tpu.memory_space<smem>>, %arg4: memref<128x43xf32, #tpu.memory_space<vmem>>, %arg5: memref<1x128xi32, #tpu.memory_space<vmem>>, %arg6: memref<8x16xf32, #tpu.memory_space<vmem>>, %arg7: memref<8x8xf32, #tpu.memory_space<vmem>>, %arg8: memref<8x1xf32, #tpu.memory_space<vmem>>, %arg9: memref<432x32xbf16, #tpu.memory_space<vmem>>, %arg10: memref<16x32xf32, #tpu.memory_space<vmem>>, %arg11: memref<1x32xf32, #tpu.memory_space<vmem>>, %arg12: memref<8x8xf32, #tpu.memory_space<vmem>>, %arg13: memref<8x32xf32, #tpu.memory_space<vmem>>) attributes {dimension_semantics = [#tpu.dimension_semantics<parallel>, #tpu.dimension_semantics<arbitrary>], iteration_bounds = array<i64: 2, 1>, scalar_prefetch = 2 : i64, scratch_operands = 1 : i64, tpu.core_type = #tpu.core_type<tc>, window_params = [{transform_indices = @transform_0, window_bounds = array<i64: 128, 43>}, {transform_indices = @transform_1, window_bounds = array<i64: 1, 128>}, {transform_indices = @transform_2, window_bounds = array<i64: 8, 16>}, {transform_indices = @transform_3, window_bounds = array<i64: 8, 8>}, {transform_indices = @transform_4, window_bounds = array<i64: 8, 1>}, {pipeline_mode = #tpu.pipeline_mode<synchronous>, transform_indices = @transform_5, window_bounds = array<i64: 432, 32>}, {pipeline_mode = #tpu.pipeline_mode<synchronous>, transform_indices = @transform_6, window_bounds = array<i64: 16, 32>}, {pipeline_mode = #tpu.pipeline_mode<synchronous>, transform_indices = @transform_7, window_bounds = array<i64: 1, 32>}, {transform_indices = @transform_8, window_bounds = array<i64: 8, 8>}]} {
    %c0_i32 = arith.constant 0 : i32
    %0 = arith.cmpi eq, %arg1, %c0_i32 : i32
    %1 = arith.extui %0 : i1 to i32
    %c0_i32_0 = arith.constant 0 : i32
    %2 = arith.cmpi ne, %1, %c0_i32_0 : i32
    scf.if %2 {
      %cst = arith.constant 0.000000e+00 : f32
      %11 = vector.broadcast %cst : f32 to vector<8x32xf32>
      %c0 = arith.constant 0 : index
      %c0_4 = arith.constant 0 : index
      %12 = vector.load %arg13[%c0, %c0_4] : memref<8x32xf32, #tpu.memory_space<vmem>>, vector<8x32xf32>
      tpu.vector_store %arg13[%c0, %c0_4], %11 {strides = array<i32>} : memref<8x32xf32, #tpu.memory_space<vmem>>, vector<8x32xf32>,
    } else {
    }
    %3 = arith.index_cast %arg0 : i32 to index
    %4 = memref.load %arg3[%3] : memref<2xi32, #tpu.memory_space<smem>>
    %5 = arith.cmpi slt, %arg1, %4 : i32
    %6 = arith.extui %5 : i1 to i32
    %c0_i32_1 = arith.constant 0 : i32
    %7 = arith.cmpi ne, %6, %c0_i32_1 : i32
    scf.if %7 {
      %c0 = arith.constant 0 : index
      %c0_4 = arith.constant 0 : index
      %11 = vector.load %arg4[%c0, %c0_4] : memref<128x43xf32, #tpu.memory_space<vmem>>, vector<128x43xf32>
      %12 = vector.extract_strided_slice %11 {offsets = [0, 0], sizes = [128, 27], strides = [1, 1]} : vector<128x43xf32> to vector<128x27xf32>
      %13 = vector.extract_strided_slice %11 {offsets = [0, 27], sizes = [128, 16], strides = [1, 1]} : vector<128x43xf32> to vector<128x16xf32>
      %14 = vector.extract_strided_slice %12 {offsets = [0, 0], sizes = [128, 1], strides = [1, 1]} : vector<128x27xf32> to vector<128x1xf32>
      %15 = vector.broadcast %14 : vector<128x1xf32> to vector<128x16xf32>
      %16 = arith.mulf %13, %15 : vector<128x16xf32>
      %17 = vector.extract_strided_slice %12 {offsets = [0, 1], sizes = [128, 1], strides = [1, 1]} : vector<128x27xf32> to vector<128x1xf32>
      %18 = vector.broadcast %17 : vector<128x1xf32> to vector<128x16xf32>
      %19 = arith.mulf %13, %18 : vector<128x16xf32>
      %20 = vector.extract_strided_slice %12 {offsets = [0, 2], sizes = [128, 1], strides = [1, 1]} : vector<128x27xf32> to vector<128x1xf32>
      %21 = vector.broadcast %20 : vector<128x1xf32> to vector<128x16xf32>
      %22 = arith.mulf %13, %21 : vector<128x16xf32>
      %23 = vector.extract_strided_slice %12 {offsets = [0, 3], sizes = [128, 1], strides = [1, 1]} : vector<128x27xf32> to vector<128x1xf32>
      %24 = vector.broadcast %23 : vector<128x1xf32> to vector<128x16xf32>
      %25 = arith.mulf %13, %24 : vector<128x16xf32>
      %26 = vector.extract_strided_slice %12 {offsets = [0, 4], sizes = [128, 1], strides = [1, 1]} : vector<128x27xf32> to vector<128x1xf32>
      %27 = vector.broadcast %26 : vector<128x1xf32> to vector<128x16xf32>
      %28 = arith.mulf %13, %27 : vector<128x16xf32>
      %29 = vector.extract_strided_slice %12 {offsets = [0, 5], sizes = [128, 1], strides = [1, 1]} : vector<128x27xf32> to vector<128x1xf32>
      %30 = vector.broadcast %29 : vector<128x1xf32> to vector<128x16xf32>
      %31 = arith.mulf %13, %30 : vector<128x16xf32>
      %32 = vector.extract_strided_slice %12 {offsets = [0, 6], sizes = [128, 1], strides = [1, 1]} : vector<128x27xf32> to vector<128x1xf32>
      %33 = vector.broadcast %32 : vector<128x1xf32> to vector<128x16xf32>
      %34 = arith.mulf %13, %33 : vector<128x16xf32>
      %35 = vector.extract_strided_slice %12 {offsets = [0, 7], sizes = [128, 1], strides = [1, 1]} : vector<128x27xf32> to vector<128x1xf32>
      %36 = vector.broadcast %35 : vector<128x1xf32> to vector<128x16xf32>
      %37 = arith.mulf %13, %36 : vector<128x16xf32>
      %38 = vector.extract_strided_slice %12 {offsets = [0, 8], sizes = [128, 1], strides = [1, 1]} : vector<128x27xf32> to vector<128x1xf32>
      %39 = vector.broadcast %38 : vector<128x1xf32> to vector<128x16xf32>
      %40 = arith.mulf %13, %39 : vector<128x16xf32>
      %41 = vector.extract_strided_slice %12 {offsets = [0, 9], sizes = [128, 1], strides = [1, 1]} : vector<128x27xf32> to vector<128x1xf32>
      %42 = vector.broadcast %41 : vector<128x1xf32> to vector<128x16xf32>
      %43 = arith.mulf %13, %42 : vector<128x16xf32>
      %44 = vector.extract_strided_slice %12 {offsets = [0, 10], sizes = [128, 1], strides = [1, 1]} : vector<128x27xf32> to vector<128x1xf32>
      %45 = vector.broadcast %44 : vector<128x1xf32> to vector<128x16xf32>
      %46 = arith.mulf %13, %45 : vector<128x16xf32>
      %47 = vector.extract_strided_slice %12 {offsets = [0, 11], sizes = [128, 1], strides = [1, 1]} : vector<128x27xf32> to vector<128x1xf32>
      %48 = vector.broadcast %47 : vector<128x1xf32> to vector<128x16xf32>
      %49 = arith.mulf %13, %48 : vector<128x16xf32>
      %50 = vector.extract_strided_slice %12 {offsets = [0, 12], sizes = [128, 1], strides = [1, 1]} : vector<128x27xf32> to vector<128x1xf32>
      %51 = vector.broadcast %50 : vector<128x1xf32> to vector<128x16xf32>
      %52 = arith.mulf %13, %51 : vector<128x16xf32>
      %53 = vector.extract_strided_slice %12 {offsets = [0, 13], sizes = [128, 1], strides = [1, 1]} : vector<128x27xf32> to vector<128x1xf32>
      %54 = vector.broadcast %53 : vector<128x1xf32> to vector<128x16xf32>
      %55 = arith.mulf %13, %54 : vector<128x16xf32>
      %56 = vector.extract_strided_slice %12 {offsets = [0, 14], sizes = [128, 1], strides = [1, 1]} : vector<128x27xf32> to vector<128x1xf32>
      %57 = vector.broadcast %56 : vector<128x1xf32> to vector<128x16xf32>
      %58 = arith.mulf %13, %57 : vector<128x16xf32>
      %59 = vector.extract_strided_slice %12 {offsets = [0, 15], sizes = [128, 1], strides = [1, 1]} : vector<128x27xf32> to vector<128x1xf32>
      %60 = vector.broadcast %59 : vector<128x1xf32> to vector<128x16xf32>
      %61 = arith.mulf %13, %60 : vector<128x16xf32>
      %62 = vector.extract_strided_slice %12 {offsets = [0, 16], sizes = [128, 1], strides = [1, 1]} : vector<128x27xf32> to vector<128x1xf32>
      %63 = vector.broadcast %62 : vector<128x1xf32> to vector<128x16xf32>
      %64 = arith.mulf %13, %63 : vector<128x16xf32>
      %65 = vector.extract_strided_slice %12 {offsets = [0, 17], sizes = [128, 1], strides = [1, 1]} : vector<128x27xf32> to vector<128x1xf32>
      %66 = vector.broadcast %65 : vector<128x1xf32> to vector<128x16xf32>
      %67 = arith.mulf %13, %66 : vector<128x16xf32>
      %68 = vector.extract_strided_slice %12 {offsets = [0, 18], sizes = [128, 1], strides = [1, 1]} : vector<128x27xf32> to vector<128x1xf32>
      %69 = vector.broadcast %68 : vector<128x1xf32> to vector<128x16xf32>
      %70 = arith.mulf %13, %69 : vector<128x16xf32>
      %71 = vector.extract_strided_slice %12 {offsets = [0, 19], sizes = [128, 1], strides = [1, 1]} : vector<128x27xf32> to vector<128x1xf32>
      %72 = vector.broadcast %71 : vector<128x1xf32> to vector<128x16xf32>
      %73 = arith.mulf %13, %72 : vector<128x16xf32>
      %74 = vector.extract_strided_slice %12 {offsets = [0, 20], sizes = [128, 1], strides = [1, 1]} : vector<128x27xf32> to vector<128x1xf32>
      %75 = vector.broadcast %74 : vector<128x1xf32> to vector<128x16xf32>
      %76 = arith.mulf %13, %75 : vector<128x16xf32>
      %77 = vector.extract_strided_slice %12 {offsets = [0, 21], sizes = [128, 1], strides = [1, 1]} : vector<128x27xf32> to vector<128x1xf32>
      %78 = vector.broadcast %77 : vector<128x1xf32> to vector<128x16xf32>
      %79 = arith.mulf %13, %78 : vector<128x16xf32>
      %80 = vector.extract_strided_slice %12 {offsets = [0, 22], sizes = [128, 1], strides = [1, 1]} : vector<128x27xf32> to vector<128x1xf32>
      %81 = vector.broadcast %80 : vector<128x1xf32> to vector<128x16xf32>
      %82 = arith.mulf %13, %81 : vector<128x16xf32>
      %83 = vector.extract_strided_slice %12 {offsets = [0, 23], sizes = [128, 1], strides = [1, 1]} : vector<128x27xf32> to vector<128x1xf32>
      %84 = vector.broadcast %83 : vector<128x1xf32> to vector<128x16xf32>
      %85 = arith.mulf %13, %84 : vector<128x16xf32>
      %86 = vector.extract_strided_slice %12 {offsets = [0, 24], sizes = [128, 1], strides = [1, 1]} : vector<128x27xf32> to vector<128x1xf32>
      %87 = vector.broadcast %86 : vector<128x1xf32> to vector<128x16xf32>
      %88 = arith.mulf %13, %87 : vector<128x16xf32>
      %89 = vector.extract_strided_slice %12 {offsets = [0, 25], sizes = [128, 1], strides = [1, 1]} : vector<128x27xf32> to vector<128x1xf32>
      %90 = vector.broadcast %89 : vector<128x1xf32> to vector<128x16xf32>
      %91 = arith.mulf %13, %90 : vector<128x16xf32>
      %92 = vector.extract_strided_slice %12 {offsets = [0, 26], sizes = [128, 1], strides = [1, 1]} : vector<128x27xf32> to vector<128x1xf32>
      %93 = vector.broadcast %92 : vector<128x1xf32> to vector<128x16xf32>
      %94 = arith.mulf %13, %93 : vector<128x16xf32>
      %95 = tpu.concatenate %16, %19, %22, %25, %28, %31, %34, %37, %40, %43, %46, %49, %52, %55, %58, %61 in 1 : vector<128x16xf32>, vector<128x16xf32>, vector<128x16xf32>, vector<128x16xf32>, vector<128x16xf32>, vector<128x16xf32>, vector<128x16xf32>, vector<128x16xf32>, vector<128x16xf32>, vector<128x16xf32>, vector<128x16xf32>, vector<128x16xf32>, vector<128x16xf32>, vector<128x16xf32>, vector<128x16xf32>, vector<128x16xf32> -> vector<128x256xf32>
      %96 = tpu.concatenate %64, %67, %70, %73, %76, %79, %82, %85, %88, %91, %94 in 1 : vector<128x16xf32>, vector<128x16xf32>, vector<128x16xf32>, vector<128x16xf32>, vector<128x16xf32>, vector<128x16xf32>, vector<128x16xf32>, vector<128x16xf32>, vector<128x16xf32>, vector<128x16xf32>, vector<128x16xf32> -> vector<128x176xf32>
      %97 = tpu.concatenate %95, %96 in 1 : vector<128x256xf32>, vector<128x176xf32> -> vector<128x432xf32>
      %98 = arith.truncf %97 : vector<128x432xf32> to vector<128x432xbf16>
      %c0_5 = arith.constant 0 : index
      %c0_6 = arith.constant 0 : index
      %99 = vector.load %arg9[%c0_5, %c0_6] : memref<432x32xbf16, #tpu.memory_space<vmem>>, vector<432x32xbf16>
      %cst = arith.constant dense<0.000000e+00> : vector<128x32xf32>
      %100 = tpu.matmul %98, %99, %cst {dimension_numbers = #tpu.dot_dimension_numbers<[1], [0], [0], [1], [0, 0, 1, 1], [], []>} : vector<128x432xbf16>, vector<432x32xbf16>, vector<128x32xf32> -> vector<128x32xf32>
      %c8_i32 = arith.constant 8 : i32
      %101 = arith.muli %arg0, %c8_i32 : i32
      %102 = tpu.iota {dimensions = array<i32: 0>} : vector<8x1xi32>
      %103 = vector.broadcast %101 : i32 to vector<8x1xi32>
      %104 = arith.addi %103, %102 : vector<8x1xi32>
      %c0_7 = arith.constant 0 : index
      %c0_8 = arith.constant 0 : index
      %105 = vector.load %arg5[%c0_7, %c0_8] : memref<1x128xi32, #tpu.memory_space<vmem>>, vector<1x128xi32>
      %106 = vector.broadcast %104 : vector<8x1xi32> to vector<8x128xi32>
      %107 = vector.broadcast %105 : vector<1x128xi32> to vector<8x128xi32>
      %108 = arith.cmpi eq, %106, %107 : vector<8x128xi32>
      %109 = arith.extui %108 : vector<8x128xi1> to vector<8x128xi32>
      %110 = arith.sitofp %109 : vector<8x128xi32> to vector<8x128xf32>
      %111 = arith.truncf %110 : vector<8x128xf32> to vector<8x128xbf16>
      %c0_9 = arith.constant 0 : index
      %c0_10 = arith.constant 0 : index
      %112 = vector.load %arg13[%c0_9, %c0_10] : memref<8x32xf32, #tpu.memory_space<vmem>>, vector<8x32xf32>
      %113 = arith.truncf %100 : vector<128x32xf32> to vector<128x32xbf16>
      %cst_11 = arith.constant dense<0.000000e+00> : vector<8x32xf32>
      %114 = tpu.matmul %111, %113, %cst_11 {dimension_numbers = #tpu.dot_dimension_numbers<[1], [0], [0], [1], [0, 0, 1, 1], [], []>} : vector<8x128xbf16>, vector<128x32xbf16>, vector<8x32xf32> -> vector<8x32xf32>
      %115 = arith.addf %112, %114 : vector<8x32xf32>
      %c0_12 = arith.constant 0 : index
      %c0_13 = arith.constant 0 : index
      %116 = vector.load %arg13[%c0_12, %c0_13] : memref<8x32xf32, #tpu.memory_space<vmem>>, vector<8x32xf32>
      tpu.vector_store %arg13[%c0_12, %c0_13], %115 {strides = array<i32>} : memref<8x32xf32, #tpu.memory_space<vmem>>, vector<8x32xf32>,
    } else {
    }
    %c0_i32_2 = arith.constant 0 : i32
    %8 = arith.cmpi eq, %arg1, %c0_i32_2 : i32
    %9 = arith.extui %8 : i1 to i32
    %c0_i32_3 = arith.constant 0 : i32
    %10 = arith.cmpi ne, %9, %c0_i32_3 : i32
    scf.if %10 {
      %c0 = arith.constant 0 : index
      %c0_4 = arith.constant 0 : index
      %11 = vector.load %arg13[%c0, %c0_4] : memref<8x32xf32, #tpu.memory_space<vmem>>, vector<8x32xf32>
      %c0_5 = arith.constant 0 : index
      %c0_6 = arith.constant 0 : index
      %12 = vector.load %arg8[%c0_5, %c0_6] : memref<8x1xf32, #tpu.memory_space<vmem>>, vector<8x1xf32>
      %13 = vector.broadcast %12 : vector<8x1xf32> to vector<8x32xf32>
      %14 = arith.mulf %11, %13 : vector<8x32xf32>
      %c0_7 = arith.constant 0 : index
      %c0_8 = arith.constant 0 : index
      %15 = vector.load %arg6[%c0_7, %c0_8] : memref<8x16xf32, #tpu.memory_space<vmem>>, vector<8x16xf32>
      %c0_9 = arith.constant 0 : index
      %c0_10 = arith.constant 0 : index
      %16 = vector.load %arg10[%c0_9, %c0_10] : memref<16x32xf32, #tpu.memory_space<vmem>>, vector<16x32xf32>
      %cst = arith.constant dense<0.000000e+00> : vector<8x32xf32>
      %17 = tpu.matmul %15, %16, %cst {dimension_numbers = #tpu.dot_dimension_numbers<[1], [0], [0], [1], [0, 0, 1, 1], [], []>} : vector<8x16xf32>, vector<16x32xf32>, vector<8x32xf32> -> vector<8x32xf32>
      %18 = arith.addf %14, %17 : vector<8x32xf32>
      %c0_11 = arith.constant 0 : index
      %c0_12 = arith.constant 0 : index
      %19 = vector.load %arg11[%c0_11, %c0_12] : memref<1x32xf32, #tpu.memory_space<vmem>>, vector<1x32xf32>
      %20 = vector.broadcast %19 : vector<1x32xf32> to vector<8x32xf32>
      %21 = arith.addf %18, %20 : vector<8x32xf32>
      %c0_13 = arith.constant 0 : index
      %c0_14 = arith.constant 0 : index
      %22 = vector.load %arg7[%c0_13, %c0_14] : memref<8x8xf32, #tpu.memory_space<vmem>>, vector<8x8xf32>
      %23 = vector.extract_strided_slice %21 {offsets = [0, 24], sizes = [8, 8], strides = [1, 1]} : vector<8x32xf32> to vector<8x8xf32>
      %24 = vector.extract_strided_slice %21 {offsets = [0, 0], sizes = [8, 8], strides = [1, 1]} : vector<8x32xf32> to vector<8x8xf32>
      %25 = arith.addf %24, %23 : vector<8x8xf32>
      %26 = arith.negf %25 : vector<8x8xf32>
      %27 = math.exp %26 : vector<8x8xf32>
      %cst_15 = arith.constant 1.000000e+00 : f32
      %28 = vector.broadcast %cst_15 : f32 to vector<8x8xf32>
      %29 = arith.addf %28, %27 : vector<8x8xf32>
      %30 = arith.divf %28, %29 : vector<8x8xf32>
      %31 = vector.extract_strided_slice %21 {offsets = [0, 8], sizes = [8, 8], strides = [1, 1]} : vector<8x32xf32> to vector<8x8xf32>
      %32 = arith.negf %31 : vector<8x8xf32>
      %33 = math.exp %32 : vector<8x8xf32>
      %cst_16 = arith.constant 1.000000e+00 : f32
      %34 = vector.broadcast %cst_16 : f32 to vector<8x8xf32>
      %35 = arith.addf %34, %33 : vector<8x8xf32>
      %36 = arith.divf %34, %35 : vector<8x8xf32>
      %37 = vector.extract_strided_slice %21 {offsets = [0, 16], sizes = [8, 8], strides = [1, 1]} : vector<8x32xf32> to vector<8x8xf32>
      %38 = arith.mulf %30, %23 : vector<8x8xf32>
      %39 = arith.addf %37, %38 : vector<8x8xf32>
      %40 = math.tanh %39 : vector<8x8xf32>
      %cst_17 = arith.constant 1.000000e+00 : f32
      %41 = vector.broadcast %cst_17 : f32 to vector<8x8xf32>
      %42 = arith.subf %41, %36 : vector<8x8xf32>
      %43 = arith.mulf %42, %40 : vector<8x8xf32>
      %44 = arith.mulf %36, %22 : vector<8x8xf32>
      %45 = arith.addf %43, %44 : vector<8x8xf32>
      %c0_18 = arith.constant 0 : index
      %c0_19 = arith.constant 0 : index
      %46 = vector.load %arg12[%c0_18, %c0_19] : memref<8x8xf32, #tpu.memory_space<vmem>>, vector<8x8xf32>
      tpu.vector_store %arg12[%c0_18, %c0_19], %45 {strides = array<i32>} : memref<8x8xf32, #tpu.memory_space<vmem>>, vector<8x8xf32>,
    } else {
    }
    return
  }
  func.func @transform_0(%arg0: i32, %arg1: i32, %arg2: memref<2xi32, #tpu.memory_space<smem>>, %arg3: memref<2xi32, #tpu.memory_space<smem>>) -> (i32, i32) {
    %c1_i32 = arith.constant 1 : i32
    %0 = arith.muli %arg0, %c1_i32 : i32
    %1 = arith.addi %0, %arg1 : i32
    %2 = arith.index_cast %1 : i32 to index
    %3 = memref.load %arg2[%2] : memref<2xi32, #tpu.memory_space<smem>>
    %c0_i32 = arith.constant 0 : i32
    %c0_i32_0 = arith.constant 0 : i32
    return %3, %c0_i32 : i32, i32
  }
  func.func @transform_1(%arg0: i32, %arg1: i32, %arg2: memref<2xi32, #tpu.memory_space<smem>>, %arg3: memref<2xi32, #tpu.memory_space<smem>>) -> (i32, i32) {
    %c1_i32 = arith.constant 1 : i32
    %0 = arith.muli %arg0, %c1_i32 : i32
    %1 = arith.addi %0, %arg1 : i32
    %2 = arith.index_cast %1 : i32 to index
    %3 = memref.load %arg2[%2] : memref<2xi32, #tpu.memory_space<smem>>
    %c0_i32 = arith.constant 0 : i32
    %c0_i32_0 = arith.constant 0 : i32
    return %c0_i32, %3 : i32, i32
  }
  func.func @transform_2(%arg0: i32, %arg1: i32, %arg2: memref<2xi32, #tpu.memory_space<smem>>, %arg3: memref<2xi32, #tpu.memory_space<smem>>) -> (i32, i32) {
    %c0_i32 = arith.constant 0 : i32
    %c0_i32_0 = arith.constant 0 : i32
    return %arg0, %c0_i32 : i32, i32
  }
  func.func @transform_3(%arg0: i32, %arg1: i32, %arg2: memref<2xi32, #tpu.memory_space<smem>>, %arg3: memref<2xi32, #tpu.memory_space<smem>>) -> (i32, i32) {
    %c0_i32 = arith.constant 0 : i32
    %c0_i32_0 = arith.constant 0 : i32
    return %arg0, %c0_i32 : i32, i32
  }
  func.func @transform_4(%arg0: i32, %arg1: i32, %arg2: memref<2xi32, #tpu.memory_space<smem>>, %arg3: memref<2xi32, #tpu.memory_space<smem>>) -> (i32, i32) {
    %c0_i32 = arith.constant 0 : i32
    %c0_i32_0 = arith.constant 0 : i32
    return %arg0, %c0_i32 : i32, i32
  }
  func.func @transform_5(%arg0: i32, %arg1: i32, %arg2: memref<2xi32, #tpu.memory_space<smem>>, %arg3: memref<2xi32, #tpu.memory_space<smem>>) -> (i32, i32) {
    %c0_i32 = arith.constant 0 : i32
    %c0_i32_0 = arith.constant 0 : i32
    %c0_i32_1 = arith.constant 0 : i32
    return %c0_i32, %c0_i32_0 : i32, i32
  }
  func.func @transform_6(%arg0: i32, %arg1: i32, %arg2: memref<2xi32, #tpu.memory_space<smem>>, %arg3: memref<2xi32, #tpu.memory_space<smem>>) -> (i32, i32) {
    %c0_i32 = arith.constant 0 : i32
    %c0_i32_0 = arith.constant 0 : i32
    %c0_i32_1 = arith.constant 0 : i32
    return %c0_i32, %c0_i32_0 : i32, i32
  }
  func.func @transform_7(%arg0: i32, %arg1: i32, %arg2: memref<2xi32, #tpu.memory_space<smem>>, %arg3: memref<2xi32, #tpu.memory_space<smem>>) -> (i32, i32) {
    %c0_i32 = arith.constant 0 : i32
    %c0_i32_0 = arith.constant 0 : i32
    %c0_i32_1 = arith.constant 0 : i32
    return %c0_i32, %c0_i32_0 : i32, i32
  }
  func.func @transform_8(%arg0: i32, %arg1: i32, %arg2: memref<2xi32, #tpu.memory_space<smem>>, %arg3: memref<2xi32, #tpu.memory_space<smem>>) -> (i32, i32) {
    %c0_i32 = arith.constant 0 : i32
    %c0_i32_0 = arith.constant 0 : i32
    return %arg0, %c0_i32 : i32, i32
  }
}

</mosaic_0001>

<bundles_post_ra>
// kernel: tpu_custom_call.1
= control target key start
LH: loop header
LB: loop body
LE: loop exit
PB: predicated region body
PF: predicated region fallthrough
CT: control target
= control target key end

     0   :  { %s11205_s0 = inlined_call_operand.vmem [shape: s32[2], index: 0, kind: input, shape index: {}]   ;;  %s11206_s2 = inlined_call_operand.vmem [shape: f32[128,43], index: 2, kind: input, shape index: {}]   ;;  %s11207_s3 = inlined_call_operand.vmem [shape: s32[1,128], index: 3, kind: input, shape index: {}]   ;;  %s11208_s4 = inlined_call_operand.vmem [shape: f32[16,16], index: 4, kind: input, shape index: {}]   ;;  %s11209_s5 = inlined_call_operand.vmem [shape: f32[16,8], index: 5, kind: input, shape index: {}]   ;;  %s11210_s6 = inlined_call_operand.vmem [shape: f32[16,1], index: 6, kind: input, shape index: {}]   ;;  %s11211_s7 = inlined_call_operand.vmem [shape: bf16[432,32], index: 7, kind: input, shape index: {}]   ;;  %s11212_s8 = inlined_call_operand.vmem [shape: f32[16,32], index: 8, kind: input, shape index: {}]   ;;  %s11213_s9 = inlined_call_operand.vmem [shape: f32[1,32], index: 9, kind: input, shape index: {}]   ;;  %s11214_s10 = inlined_call_operand.vmem [shape: f32[16,8], index: 10, kind: output, shape index: {}]   ;;  %s11215_s1 = inlined_call_operand.vmem [shape: s32[2], index: 1, kind: input, shape index: {}]  }
   0x1   :  { %s15_s15 = sshll.u32 %s11205_s0, 4  ;;  %s19_s18 = sshll.u32 %s11215_s1, 4  ;;  %s16_s15 = int_to_ptr.vmem [resolvable:$true] %s15_s15  ;;  %s20_s18 = int_to_ptr.vmem [resolvable:$true] %s19_s18 }
   0x2   :  { %s6967_s19 = scalar_lea.vmem %s16_s15, 16  ;;  %p6972_p1 = scmp.lt.s32.totalorder %s16_s15, %s16_s15 }
   0x3   :  { %p6968_p0 = scmp.ne.s32.totalorder %s16_s15, %s6967_s19  ;;  %p6973_p2 = scmp.lt.s32.totalorder %s6967_s19, %s6967_s19 }
   0x5   :  { %p6974_p3 = por %p6973_p2, %p6972_p1 }
   0x7   :  { %p6975_p4 = pnand %p6974_p3, %p6968_p0 }
   0x9   :  { %6978 = shalt.err (!%p6975_p4)  }
   0xa   :  { %s7017_s20 = smov [#allocation4]   ;;  %s6979_s21 = scalar_lea.vmem %s20_s18, 16 }
   0xb   :  { %18 = dma.vmem_to_smem %s16_s15, 16, %s7017_s20, [#allocation3] }
   0xc   :  { %p6980_p5 = scmp.ne.s32.totalorder %s20_s18, %s6979_s21  ;;  %p6984_p6 = scmp.lt.s32.totalorder %s20_s18, %s20_s18 }
   0xd   :  { %p6985_p7 = scmp.lt.s32.totalorder %s6979_s21, %s6979_s21 }
   0xf   :  { %p6986_p8 = por %p6985_p7, %p6984_p6 }
  0x11   :  { %p6987_p9 = pnand %p6986_p8, %p6980_p5 }
  0x13   :  { %6990 = shalt.err (!%p6987_p9)  }
  0x14   :  { %s7018_s0 = smov [#allocation5]  }
  0x15   :  { %22 = dma.vmem_to_smem %s20_s18, 16, %s7018_s0, [#allocation3] }
  0x16   :  { %7003 = dma.done.wait [#allocation3], 32 }
  0x17   :  { %7004 = vsyncadd [#allocation3], 4294967264 }
  0x18   :  { %24 = sfence }
  0x19   :  { %s7126_s1 = smov 0   ;;  %s7128_s22 = smov 0  }
  0x1a   :  { %s7130_s23 = smov 0  }
  0x1b LB: > { %11336 = sst [smem:[#allocation7_spill]] %s7011_s22  ;;  %s42_s24 = sadd.s32 1, %s7011_s22  ;;  %s7015_s23 = sphi %s7130_s23, %s30_s23   ;;  %s7011_s22 = sphi %s7128_s22, %s12293_s22   ;;  %s7007_s1 = sphi %s7126_s1, %s12292_s1  }
  0x1c   : > { %p5511_p10 = scmp.ge.s32.totalorder %s7015_s23, 1  ;;  %p44_p11 = scmp.ge.s32.totalorder %s42_s24, 2 }
  0x1d   : > { %p338_p12 = scmp.lt.s32.totalorder %s7015_s23, 3 }
  0x1e   : > { %s12295_s24 = smov (%p44_p11, %s42_s24), 0 }
  0x1f   : > { %11337 = sst [smem:[#allocation8_spill]] %s12295_s24  ;;  %p339_p13 = pnand %p5511_p10, %p338_p12 }
  0x20   : > { %s391_s25 = sld [smem:[#allocation4 + %s7007_s1]] (!%p339_p13)  ;;  %vm428_vm0 = vcmask (!%p339_p13), 261120   ;;  %p407_p0 = scmp.lt.s32.totalorder (!%p339_p13), %s7007_s1, 1  ;;  %v11217_v0 = vmov (!%p339_p13), 0.0  }
  0x21   : > { %342 = sbr.rel (%p339_p13) target bundleno = 2725 (0xaa5), region = 52  ;;  %s401_s26 = sld [smem:[#allocation4 + %s7007_s1]] (!%p339_p13)  ;;  %429 = vst.msk [vmem:[#allocation2] sm:$0xff] (!%p339_p13), %vm428_vm0, %v11217_v0 }
  0x22   : > { %s430_s27 = sld [smem:[#allocation5 + %s7007_s1]] (!%p339_p13) }
  0x26   : > { %s5512_s30 = sshll.u32 (!%p339_p13), %s391_s25, 4 }
  0x27   : > { %p402_p1 = scmp.lt.s32.totalorder (!%p339_p13), %s401_s26, 0  ;;  %p393_p2 = scmp.lt.s32.totalorder (!%p339_p13), %s5512_s30, 15 }
  0x28   : > { %s408_s28 = scalar_select %p407_p0, %s7007_s1, 1 }
  0x29   : > { %s12297_s26 = smov (!%p402_p1, %s401_s26), 0  ;;  %s12299_s30 = smov (!%p393_p2, %s5512_s30), 15 }
  0x2a   : > { %s7153_s29 = sshll.u32 %s408_s28, 3  ;;  %s404_s16 = scalar_lea.vmem %s11207_s3, %s12297_s26 }
  0x2b   : > { %s414_s19 = scalar_lea.vmem %s11209_s5, %s7153_s29  ;;  %s5513_s20 = sshll.u32 %s12299_s30, 3 }
  0x2c   : > { %s418_s25 = scalar_lea.vmem %s11210_s6, %s7153_s29  ;;  %s7176_s12 = scalar_lea.vmem %s11206_s2, %s5513_s20 }
  0x2d   : > { %p5519_p3 = scmp.le.s32.totalorder %s430_s27, 0 }
  0x2f   : > { %434 = sbr.rel (%p5519_p3) target bundleno = 1995 (0x7cb), region = 60 }
  0x36   : > { %v7183_v1 = vld [vmem:[%s7176_s12 + $0x10] sm:$0xff]  ;;  %v7186_v2 = vld [vmem:[%s7176_s12] sm:$0xff]  ;;  %v11218_v3 = vmov 0   ;;  %v7193_v4 = vld [vmem:[%s7176_s12 + $0x18] sm:$0xff]  ;;  %v7021_v18 = vmov 1   ;;  %v7022_v19 = vmov 2  }
  0x37   : > { %5745 = vset.pattern.permute.xlu1 %v11218_v3  ;;  %5744 = vset.pattern.permute.xlu0 %v11218_v3  ;;  %v7196_v5 = vld [vmem:[%s7176_s12 + $0x8] sm:$0xff]  ;;  %v7203_v7 = vld [vmem:[%s7176_s12 + $0x20] sm:$0xff]  ;;  %v7208_v8 = vld [vmem:[%s7176_s12 + $0x38] sm:$0xff]  ;;  %v7023_v20 = vmov 3   ;;  %v7024_v22 = vmov 4   ;;  %v7025_v38 = vmov 5  }
  0x38   : > { %463 = vperm.xlu1 %5745, %v7183_v1   ;;  %453 = vperm.xlu0 %5744, %v7186_v2   ;;  %v7200_v6 = vld [vmem:[%s7176_s12 + $0x28] sm:$0xff]  ;;  %v7211_v9 = vld [vmem:[%s7176_s12 + $0x30] sm:$0xff]  ;;  %v7219_v11 = vld [vmem:[%s7176_s12 + $0x40] sm:$0xff]  ;;  %v7026_v55 = vmov 6   ;;  %v7027_v0 = vmov 7   ;;  %s7047_s24 = smov 101  }
  0x39   : > { %5099 = vmatprep.subr.bf16.mxu1 %v11218_v3  ;;  %v7216_v10 = vld [vmem:[%s7176_s12 + $0x48] sm:$0xff]  ;;  %v7224_v12 = vld [vmem:[%s7176_s12 + $0x58] sm:$0xff]  ;;  %v7227_v13 = vld [vmem:[%s7176_s12 + $0x50] sm:$0xff]  ;;  %s7048_s27 = smov 117   ;;  %s7049_s30 = smov 5   ;;  %vm3651_vm1 = vcmask 130048  }
  0x3a   : > { %v7234_v14 = vld [vmem:[%s7176_s12 + $0x68] sm:$0xff]  ;;  %v7237_v15 = vld [vmem:[%s7176_s12 + $0x60] sm:$0xff]  ;;  %v7242_v16 = vld [vmem:[%s7176_s12 + $0x78] sm:$0xff]  ;;  %s7050_s13 = smov 21   ;;  %s7051_s14 = smov 37   ;;  %vm3685_vm2 = vcmask 392192  }
  0x3b   : > { %v7245_v17 = vld [vmem:[%s7176_s12 + $0x70] sm:$0xff]  ;;  %s7052_s15 = smov 53   ;;  %s7053_s17 = smov 69   ;;  %vm3702_vm3 = vcmask 523264   ;;  %vm3719_vm4 = vcmask 654336   ;;  %vm3736_vm5 = vcmask 785408  }
  0x3c   : > { %468 = vperm.xlu1 %5745, %v7193_v4   ;;  %458 = vperm.xlu0 %5744, %v7196_v5   ;;  %s7054_s18 = smov 85   ;;  %vm3753_vm6 = vcmask 916480   ;;  %vm7056_vm7 = vmmov 0  }
  0x40   : > { %478 = vperm.xlu1 %5745, %v7200_v6   ;;  %473 = vperm.xlu0 %5744, %v7203_v7  }
  0x44   : > { %488 = vperm.xlu1 %5745, %v7208_v8   ;;  %483 = vperm.xlu0 %5744, %v7211_v9  }
  0x48   : > { %498 = vperm.xlu1 %5745, %v7216_v10   ;;  %493 = vperm.xlu0 %5744, %v7219_v11  }
  0x4c   : > { %508 = vperm.xlu1 %5745, %v7224_v12   ;;  %503 = vperm.xlu0 %5744, %v7227_v13  }
  0x50   : > { %518 = vperm.xlu1 %5745, %v7234_v14   ;;  %513 = vperm.xlu0 %5744, %v7237_v15  }
  0x54   : > { %528 = vperm.xlu1 %5745, %v7242_v16   ;;  %523 = vperm.xlu0 %5744, %v7245_v17  }
  0x58   : > { %5747 = vset.pattern.permute.xlu1 %v7021_v18  ;;  %5746 = vset.pattern.permute.xlu0 %v7021_v18 }
  0x59   : > { %552 = vperm.xlu1 %5747, %v7196_v5   ;;  %548 = vperm.xlu0 %5746, %v7186_v2  }
  0x5d   : > { %556 = vperm.xlu1 %5747, %v7183_v1   ;;  %560 = vperm.xlu0 %5746, %v7193_v4  }
  0x61   : > { %564 = vperm.xlu1 %5747, %v7203_v7   ;;  %568 = vperm.xlu0 %5746, %v7200_v6  }
  0x65   : > { %572 = vperm.xlu1 %5747, %v7211_v9   ;;  %576 = vperm.xlu0 %5746, %v7208_v8  }
  0x69   : > { %580 = vperm.xlu1 %5747, %v7219_v11   ;;  %584 = vperm.xlu0 %5746, %v7216_v10  }
  0x6d   : > { %588 = vperm.xlu1 %5747, %v7227_v13   ;;  %592 = vperm.xlu0 %5746, %v7224_v12  }
  0x71   : > { %596 = vperm.xlu1 %5747, %v7237_v15   ;;  %600 = vperm.xlu0 %5746, %v7234_v14  }
  0x75   : > { %604 = vperm.xlu1 %5747, %v7245_v17   ;;  %608 = vperm.xlu0 %5746, %v7242_v16  }
  0x79   : > { %5748 = vset.pattern.permute.xlu1 %v7022_v19  ;;  %5749 = vset.pattern.permute.xlu0 %v7022_v19 }
  0x7a   : > { %628 = vperm.xlu1 %5748, %v7186_v2   ;;  %632 = vperm.xlu0 %5749, %v7196_v5  }
  0x7e   : > { %636 = vperm.xlu1 %5748, %v7183_v1   ;;  %644 = vperm.xlu0 %5749, %v7203_v7  }
  0x82   : > { %640 = vperm.xlu1 %5748, %v7193_v4   ;;  %652 = vperm.xlu0 %5749, %v7211_v9  }
  0x86   : > { %648 = vperm.xlu1 %5748, %v7200_v6   ;;  %660 = vperm.xlu0 %5749, %v7219_v11  }
  0x8a   : > { %656 = vperm.xlu1 %5748, %v7208_v8   ;;  %668 = vperm.xlu0 %5749, %v7227_v13  }
  0x8e   : > { %664 = vperm.xlu1 %5748, %v7216_v10   ;;  %676 = vperm.xlu0 %5749, %v7237_v15  }
  0x92   : > { %672 = vperm.xlu1 %5748, %v7224_v12   ;;  %684 = vperm.xlu0 %5749, %v7245_v17  }
  0x96   : > { %680 = vperm.xlu1 %5748, %v7234_v14   ;;  %5750 = vset.pattern.permute.xlu0 %v7023_v20 }
  0x97   : > { %708 = vperm.xlu0 %5750, %v7186_v2  }
  0x9a   : > { %688 = vperm.xlu1 %5748, %v7242_v16  }
  0x9b   : > { %720 = vperm.xlu0 %5750, %v7193_v4  }
  0x9e   : > { %5751 = vset.pattern.permute.xlu1 %v7023_v20 }
  0x9f   : > { %712 = vperm.xlu1 %5751, %v7196_v5   ;;  %728 = vperm.xlu0 %5750, %v7200_v6  }
  0xa3   : > { %716 = vperm.xlu1 %5751, %v7183_v1   ;;  %736 = vperm.xlu0 %5750, %v7208_v8  }
  0xa7   : > { %724 = vperm.xlu1 %5751, %v7203_v7   ;;  %744 = vperm.xlu0 %5750, %v7216_v10  }
  0xab   : > { %732 = vperm.xlu1 %5751, %v7211_v9   ;;  %752 = vperm.xlu0 %5750, %v7224_v12  }
  0xaf   : > { %740 = vperm.xlu1 %5751, %v7219_v11   ;;  %760 = vperm.xlu0 %5750, %v7234_v14  }
  0xb3   : > { %748 = vperm.xlu1 %5751, %v7227_v13   ;;  %768 = vperm.xlu0 %5750, %v7242_v16  }
  0xb7   : > { %v7295_v21 = vpop.permute.xlu1 %463  ;;  %756 = vperm.xlu1 %5751, %v7237_v15   ;;  %5753 = vset.pattern.permute.xlu0 %v7024_v22  ;;  %v7298_v23 = vpop.permute.xlu0 %453 }
  0xb8   : > { %11338 = vst [vmem:[#allocation9_spill] sm:$0xff] %v7295_v21  ;;  %792 = vperm.xlu0 %5753, %v7196_v5  }
  0xbb   : > { %v7301_v24 = vpop.permute.xlu1 %468  ;;  %764 = vperm.xlu1 %5751, %v7245_v17   ;;  %v7304_v25 = vpop.permute.xlu0 %458 }
  0xbc   : > { %11339 = vst [vmem:[#allocation10_spill] sm:$0xff] %v7301_v24  ;;  %804 = vperm.xlu0 %5753, %v7203_v7  }
  0xbf   : > { %v7307_v26 = vpop.permute.xlu1 %478  ;;  %5752 = vset.pattern.permute.xlu1 %v7024_v22  ;;  %v7309_v27 = vpop.permute.xlu0 %473 }
  0xc0   : > { %788 = vperm.xlu1 %5752, %v7186_v2   ;;  %812 = vperm.xlu0 %5753, %v7211_v9  }
  0xc3   : > { %v7313_v28 = vpop.permute.xlu1 %488  ;;  %v7315_v29 = vpop.permute.xlu0 %483 }
  0xc4   : > { %11340 = vst [vmem:[#allocation11_spill] sm:$0xff] %v7313_v28  ;;  %11341 = vst [vmem:[#allocation12_spill] sm:$0xff] %v7315_v29  ;;  %796 = vperm.xlu1 %5752, %v7183_v1   ;;  %820 = vperm.xlu0 %5753, %v7219_v11  }
  0xc7   : > { %v7319_v30 = vpop.permute.xlu1 %498  ;;  %v7321_v31 = vpop.permute.xlu0 %493 }
  0xc8   : > { %800 = vperm.xlu1 %5752, %v7193_v4   ;;  %828 = vperm.xlu0 %5753, %v7227_v13  }
  0xcb   : > { %v7325_v32 = vpop.permute.xlu1 %508  ;;  %v7327_v33 = vpop.permute.xlu0 %503 }
  0xcc   : > { %11342 = vst [vmem:[#allocation13_spill] sm:$0xff] %v7325_v32  ;;  %11343 = vst [vmem:[#allocation14_spill] sm:$0xff] %v7327_v33  ;;  %808 = vperm.xlu1 %5752, %v7200_v6   ;;  %836 = vperm.xlu0 %5753, %v7237_v15  }
  0xcf   : > { %v7331_v34 = vpop.permute.xlu1 %518  ;;  %v7333_v35 = vpop.permute.xlu0 %513 }
  0xd0   : > { %816 = vperm.xlu1 %5752, %v7208_v8   ;;  %844 = vperm.xlu0 %5753, %v7245_v17  }
  0xd3   : > { %v7337_v36 = vpop.permute.xlu1 %528  ;;  %v7339_v37 = vpop.permute.xlu0 %523 }
  0xd4   : > { %11344 = vst [vmem:[#allocation15_spill] sm:$0xff] %v7337_v36  ;;  %11345 = vst [vmem:[#allocation16_spill] sm:$0xff] %v7339_v37  ;;  %824 = vperm.xlu1 %5752, %v7216_v10   ;;  %5754 = vset.pattern.permute.xlu0 %v7025_v38 }
  0xd5   : > { %868 = vperm.xlu0 %5754, %v7186_v2  }
  0xd8   : > { %v7343_v39 = vpop.permute.xlu1 %552  ;;  %832 = vperm.xlu1 %5752, %v7224_v12   ;;  %v7346_v40 = vpop.permute.xlu0 %548 }
  0xd9   : > { %880 = vperm.xlu0 %5754, %v7193_v4  }
  0xdc   : > { %v7349_v41 = vpop.permute.xlu1 %556  ;;  %840 = vperm.xlu1 %5752, %v7234_v14   ;;  %v7352_v42 = vpop.permute.xlu0 %560 }
  0xdd   : > { %11346 = vst [vmem:[#allocation17_spill] sm:$0xff] %v7349_v41  ;;  %11347 = vst [vmem:[#allocation18_spill] sm:$0xff] %v7352_v42  ;;  %888 = vperm.xlu0 %5754, %v7200_v6  }
  0xe0   : > { %v7355_v43 = vpop.permute.xlu1 %564  ;;  %848 = vperm.xlu1 %5752, %v7242_v16   ;;  %v7358_v44 = vpop.permute.xlu0 %568 }
  0xe1   : > { %896 = vperm.xlu0 %5754, %v7208_v8  }
  0xe4   : > { %v7361_v45 = vpop.permute.xlu1 %572  ;;  %5755 = vset.pattern.permute.xlu1 %v7025_v38  ;;  %v7363_v46 = vpop.permute.xlu0 %576 }
  0xe5   : > { %11348 = vst [vmem:[#allocation19_spill] sm:$0xff] %v7361_v45  ;;  %11349 = vst [vmem:[#allocation20_spill] sm:$0xff] %v7363_v46  ;;  %872 = vperm.xlu1 %5755, %v7196_v5   ;;  %904 = vperm.xlu0 %5754, %v7216_v10  }
  0xe8   : > { %v7367_v47 = vpop.permute.xlu1 %580  ;;  %v7369_v48 = vpop.permute.xlu0 %584 }
  0xe9   : > { %876 = vperm.xlu1 %5755, %v7183_v1   ;;  %912 = vperm.xlu0 %5754, %v7224_v12  }
  0xec   : > { %v7373_v49 = vpop.permute.xlu1 %588  ;;  %v7375_v50 = vpop.permute.xlu0 %592 }
  0xed   : > { %11350 = vst [vmem:[#allocation21_spill] sm:$0xff] %v7373_v49  ;;  %11351 = vst [vmem:[#allocation22_spill] sm:$0xff] %v7375_v50  ;;  %884 = vperm.xlu1 %5755, %v7203_v7   ;;  %920 = vperm.xlu0 %5754, %v7234_v14  }
  0xf0   : > { %v7379_v51 = vpop.permute.xlu1 %596  ;;  %v7381_v52 = vpop.permute.xlu0 %600 }
  0xf1   : > { %892 = vperm.xlu1 %5755, %v7211_v9   ;;  %928 = vperm.xlu0 %5754, %v7242_v16  }
  0xf4   : > { %v7385_v53 = vpop.permute.xlu1 %604  ;;  %v7387_v54 = vpop.permute.xlu0 %608 }
  0xf5   : > { %11352 = vst [vmem:[#allocation23_spill] sm:$0xff] %v7385_v53  ;;  %11353 = vst [vmem:[#allocation24_spill] sm:$0xff] %v7387_v54  ;;  %900 = vperm.xlu1 %5755, %v7219_v11   ;;  %5757 = vset.pattern.permute.xlu0 %v7026_v55 }
  0xf6   : > { %952 = vperm.xlu0 %5757, %v7196_v5  }
  0xf9   : > { %908 = vperm.xlu1 %5755, %v7227_v13   ;;  %v7392_v56 = vpop.permute.xlu1 %628  ;;  %v7394_v57 = vpop.permute.xlu0 %632 }
  0xfa   : > { %964 = vperm.xlu0 %5757, %v7203_v7  }
  0xfd   : > { %916 = vperm.xlu1 %5755, %v7237_v15   ;;  %v7398_v58 = vpop.permute.xlu1 %636  ;;  %v7400_v59 = vpop.permute.xlu0 %644 }
  0xfe   : > { %11354 = vst [vmem:[#allocation25_spill] sm:$0xff] %v7398_v58  ;;  %972 = vperm.xlu0 %5757, %v7211_v9  }
 0x101   : > { %924 = vperm.xlu1 %5755, %v7245_v17   ;;  %v7404_v60 = vpop.permute.xlu1 %640  ;;  %v7406_v61 = vpop.permute.xlu0 %652 }
 0x102   : > { %11355 = vst [vmem:[#allocation26_spill] sm:$0xff] %v7404_v60  ;;  %11356 = vst [vmem:[#allocation27_spill] sm:$0xff] %v7406_v61  ;;  %980 = vperm.xlu0 %5757, %v7219_v11  }
 0x105   : > { %5756 = vset.pattern.permute.xlu1 %v7026_v55  ;;  %v7409_v62 = vpop.permute.xlu1 %648  ;;  %v7411_v63 = vpop.permute.xlu0 %660 }
 0x106   : > { %948 = vperm.xlu1 %5756, %v7186_v2   ;;  %988 = vperm.xlu0 %5757, %v7227_v13  }
 0x109   : > { %v7415_v18 = vpop.permute.xlu1 %656  ;;  %v7417_v19 = vpop.permute.xlu0 %668 }
 0x10a   : > { %11357 = vst [vmem:[#allocation28_spill] sm:$0xff] %v7415_v18  ;;  %11358 = vst [vmem:[#allocation29_spill] sm:$0xff] %v7417_v19  ;;  %956 = vperm.xlu1 %5756, %v7183_v1   ;;  %996 = vperm.xlu0 %5757, %v7237_v15  }
 0x10d   : > { %v7421_v20 = vpop.permute.xlu1 %664  ;;  %v7423_v22 = vpop.permute.xlu0 %676 }
 0x10e   : > { %960 = vperm.xlu1 %5756, %v7193_v4   ;;  %1004 = vperm.xlu0 %5757, %v7245_v17  }
 0x111   : > { %v7427_v38 = vpop.permute.xlu1 %672  ;;  %v7429_v55 = vpop.permute.xlu0 %684 }
 0x112   : > { %11359 = vst [vmem:[#allocation30_spill] sm:$0xff] %v7427_v38  ;;  %11360 = vst [vmem:[#allocation31_spill] sm:$0xff] %v7429_v55  ;;  %968 = vperm.xlu1 %5756, %v7200_v6   ;;  %5758 = vset.pattern.permute.xlu0 %v7027_v0 }
 0x113   : > { %1028 = vperm.xlu0 %5758, %v7186_v2  }
 0x115   : > { %v7433_v3 = vpop.permute.xlu1 %680 }
 0x116   : > { %976 = vperm.xlu1 %5756, %v7208_v8   ;;  %v7436_v19 = vpop.permute.xlu0 %708 }
 0x117   : > { %1040 = vperm.xlu0 %5758, %v7193_v4  }
 0x119   : > { %v7439_v61 = vpop.permute.xlu1 %688 }
 0x11a   : > { %11361 = vst [vmem:[#allocation32_spill] sm:$0xff] %v7439_v61  ;;  %984 = vperm.xlu1 %5756, %v7216_v10   ;;  %v7442_v38 = vpop.permute.xlu0 %720 }
 0x11b   : > { %11362 = vst [vmem:[#allocation33_spill] sm:$0xff] %v7442_v38  ;;  %1048 = vperm.xlu0 %5758, %v7200_v6  }
 0x11e   : > { %992 = vperm.xlu1 %5756, %v7224_v12   ;;  %v7446_v55 = vpop.permute.xlu1 %712  ;;  %v7448_v18 = vpop.permute.xlu0 %728 }
 0x11f   : > { %1056 = vperm.xlu0 %5758, %v7208_v8  }
 0x122   : > { %1000 = vperm.xlu1 %5756, %v7234_v14   ;;  %v7452_v58 = vpop.permute.xlu1 %716  ;;  %v7454_v60 = vpop.permute.xlu0 %736 }
 0x123   : > { %11363 = vst [vmem:[#allocation34_spill] sm:$0xff] %v7452_v58  ;;  %11364 = vst [vmem:[#allocation35_spill] sm:$0xff] %v7454_v60  ;;  %1064 = vperm.xlu0 %5758, %v7216_v10  }
 0x126   : > { %1008 = vperm.xlu1 %5756, %v7242_v16   ;;  %v7458_v38 = vpop.permute.xlu1 %724  ;;  %v7460_v61 = vpop.permute.xlu0 %744 }
 0x127   : > { %1072 = vperm.xlu0 %5758, %v7224_v12  }
 0x12a   : > { %5759 = vset.pattern.permute.xlu1 %v7027_v0  ;;  %v7463_v54 = vpop.permute.xlu1 %732  ;;  %v7465_v53 = vpop.permute.xlu0 %752  ;;  %v7028_v0 = vmov 8  }
 0x12b   : > { %11365 = vst [vmem:[#allocation36_spill] sm:$0xff] %v7463_v54  ;;  %11366 = vst [vmem:[#allocation37_spill] sm:$0xff] %v7465_v53  ;;  %1032 = vperm.xlu1 %5759, %v7196_v5   ;;  %1080 = vperm.xlu0 %5758, %v7234_v14  }
 0x12e   : > { %v7469_v60 = vpop.permute.xlu1 %740  ;;  %v7471_v58 = vpop.permute.xlu0 %760 }
 0x12f   : > { %1036 = vperm.xlu1 %5759, %v7183_v1   ;;  %1088 = vperm.xlu0 %5758, %v7242_v16  }
 0x132   : > { %v7475_v50 = vpop.permute.xlu1 %748  ;;  %v7477_v49 = vpop.permute.xlu0 %768 }
 0x133   : > { %11367 = vst [vmem:[#allocation38_spill] sm:$0xff] %v7475_v50  ;;  %11368 = vst [vmem:[#allocation39_spill] sm:$0xff] %v7477_v49  ;;  %1044 = vperm.xlu1 %5759, %v7203_v7   ;;  %5761 = vset.pattern.permute.xlu0 %v7028_v0 }
 0x134   : > { %1112 = vperm.xlu0 %5761, %v7196_v5  }
 0x136   : > { %v7481_v53 = vpop.permute.xlu1 %756 }
 0x137   : > { %1052 = vperm.xlu1 %5759, %v7211_v9   ;;  %v7484_v54 = vpop.permute.xlu0 %792 }
 0x138   : > { %1124 = vperm.xlu0 %5761, %v7203_v7  }
 0x13a   : > { %v7487_v46 = vpop.permute.xlu1 %764 }
 0x13b   : > { %11369 = vst [vmem:[#allocation40_spill] sm:$0xff] %v7487_v46  ;;  %1060 = vperm.xlu1 %5759, %v7219_v11   ;;  %v7490_v50 = vpop.permute.xlu0 %804 }
 0x13c   : > { %1132 = vperm.xlu0 %5761, %v7211_v9  }
 0x13f   : > { %1068 = vperm.xlu1 %5759, %v7227_v13   ;;  %v7494_v49 = vpop.permute.xlu1 %788  ;;  %v7496_v45 = vpop.permute.xlu0 %812 }
 0x140   : > { %11370 = vst [vmem:[#allocation41_spill] sm:$0xff] %v7496_v45  ;;  %1140 = vperm.xlu0 %5761, %v7219_v11  }
 0x143   : > { %1076 = vperm.xlu1 %5759, %v7237_v15   ;;  %v7500_v42 = vpop.permute.xlu1 %796  ;;  %v7502_v41 = vpop.permute.xlu0 %820 }
 0x144   : > { %11371 = vst [vmem:[#allocation42_spill] sm:$0xff] %v7500_v42  ;;  %1148 = vperm.xlu0 %5761, %v7227_v13  }
 0x147   : > { %1084 = vperm.xlu1 %5759, %v7245_v17   ;;  %v7506_v46 = vpop.permute.xlu1 %800  ;;  %v7508_v37 = vpop.permute.xlu0 %828 }
 0x148   : > { %11372 = vst [vmem:[#allocation43_spill] sm:$0xff] %v7506_v46  ;;  %11373 = vst [vmem:[#allocation44_spill] sm:$0xff] %v7508_v37  ;;  %1156 = vperm.xlu0 %5761, %v7237_v15   ;;  %v7029_v46 = vmov 9  }
 0x14b   : > { %5760 = vset.pattern.permute.xlu1 %v7028_v0  ;;  %v7511_v45 = vpop.permute.xlu1 %808  ;;  %v7513_v36 = vpop.permute.xlu0 %836 }
 0x14c   : > { %1108 = vperm.xlu1 %5760, %v7186_v2   ;;  %1164 = vperm.xlu0 %5761, %v7245_v17  }
 0x14f   : > { %v7517_v42 = vpop.permute.xlu1 %816  ;;  %v7519_v33 = vpop.permute.xlu0 %844 }
 0x150   : > { %11374 = vst [vmem:[#allocation45_spill] sm:$0xff] %v7517_v42  ;;  %11375 = vst [vmem:[#allocation46_spill] sm:$0xff] %v7519_v33  ;;  %1116 = vperm.xlu1 %5760, %v7183_v1   ;;  %5762 = vset.pattern.permute.xlu0 %v7029_v46 }
 0x151   : > { %1188 = vperm.xlu0 %5762, %v7186_v2  }
 0x153   : > { %v7523_v37 = vpop.permute.xlu1 %824 }
 0x154   : > { %1120 = vperm.xlu1 %5760, %v7193_v4   ;;  %v7526_v0 = vpop.permute.xlu0 %868 }
 0x155   : > { %11376 = vst [vmem:[#allocation47_spill] sm:$0xff] %v7526_v0  ;;  %1200 = vperm.xlu0 %5762, %v7193_v4  }
 0x157   : > { %v7529_v32 = vpop.permute.xlu1 %832 }
 0x158   : > { %11377 = vst [vmem:[#allocation48_spill] sm:$0xff] %v7529_v32  ;;  %1128 = vperm.xlu1 %5760, %v7200_v6   ;;  %v7532_v42 = vpop.permute.xlu0 %880 }
 0x159   : > { %11378 = vst [vmem:[#allocation49_spill] sm:$0xff] %v7532_v42  ;;  %1208 = vperm.xlu0 %5762, %v7200_v6  }
 0x15b   : > { %v7535_v33 = vpop.permute.xlu1 %840 }
 0x15c   : > { %1136 = vperm.xlu1 %5760, %v7208_v8   ;;  %v7538_v29 = vpop.permute.xlu0 %888 }
 0x15d   : > { %11379 = vst [vmem:[#allocation50_spill] sm:$0xff] %v7538_v29  ;;  %1216 = vperm.xlu0 %5762, %v7208_v8  }
 0x15f   : > { %v7541_v28 = vpop.permute.xlu1 %848 }
 0x160   : > { %11380 = vst [vmem:[#allocation51_spill] sm:$0xff] %v7541_v28  ;;  %1144 = vperm.xlu1 %5760, %v7216_v10   ;;  %v7544_v21 = vpop.permute.xlu0 %896 }
 0x161   : > { %11381 = vst [vmem:[#allocation52_spill] sm:$0xff] %v7544_v21  ;;  %1224 = vperm.xlu0 %5762, %v7216_v10  }
 0x164   : > { %1152 = vperm.xlu1 %5760, %v7224_v12   ;;  %v7548_v42 = vpop.permute.xlu1 %872  ;;  %v7550_v32 = vpop.permute.xlu0 %904 }
 0x165   : > { %11382 = vst [vmem:[#allocation53_spill] sm:$0xff] %v7548_v42  ;;  %11383 = vst [vmem:[#allocation54_spill] sm:$0xff] %v7550_v32  ;;  %1232 = vperm.xlu0 %5762, %v7224_v12   ;;  %v7031_v42 = vmov 11  }
 0x168   : > { %1160 = vperm.xlu1 %5760, %v7234_v14   ;;  %v7554_v24 = vpop.permute.xlu1 %876  ;;  %v7556_v29 = vpop.permute.xlu0 %912 }
 0x169   : > { %11384 = vst [vmem:[#allocation55_spill] sm:$0xff] %v7554_v24  ;;  %11385 = vst [vmem:[#allocation56_spill] sm:$0xff] %v7556_v29  ;;  %1240 = vperm.xlu0 %5762, %v7234_v14   ;;  %v7030_v24 = vmov 10  }
 0x16c   : > { %1168 = vperm.xlu1 %5760, %v7242_v16   ;;  %v7560_v21 = vpop.permute.xlu1 %884  ;;  %v7562_v28 = vpop.permute.xlu0 %920 }
 0x16d   : > { %11386 = vst [vmem:[#allocation57_spill] sm:$0xff] %v7560_v21  ;;  %11387 = vst [vmem:[#allocation58_spill] sm:$0xff] %v7562_v28  ;;  %1248 = vperm.xlu0 %5762, %v7242_v16  }
 0x170   : > { %5763 = vset.pattern.permute.xlu1 %v7029_v46  ;;  %v7565_v32 = vpop.permute.xlu1 %892  ;;  %v7567_v0 = vpop.permute.xlu0 %928 }
 0x171   : > { %11388 = vst [vmem:[#allocation59_spill] sm:$0xff] %v7565_v32  ;;  %11389 = vst [vmem:[#allocation60_spill] sm:$0xff] %v7567_v0  ;;  %1192 = vperm.xlu1 %5763, %v7196_v5   ;;  %5765 = vset.pattern.permute.xlu0 %v7030_v24 }
 0x172   : > { %1272 = vperm.xlu0 %5765, %v7196_v5  }
 0x174   : > { %v7571_v29 = vpop.permute.xlu1 %900 }
 0x175   : > { %11390 = vst [vmem:[#allocation61_spill] sm:$0xff] %v7571_v29  ;;  %1196 = vperm.xlu1 %5763, %v7183_v1   ;;  %v7574_v21 = vpop.permute.xlu0 %952 }
 0x176   : > { %11391 = vst [vmem:[#allocation62_spill] sm:$0xff] %v7574_v21  ;;  %1284 = vperm.xlu0 %5765, %v7203_v7  }
 0x178   : > { %v7577_v28 = vpop.permute.xlu1 %908 }
 0x179   : > { %11392 = vst [vmem:[#allocation63_spill] sm:$0xff] %v7577_v28  ;;  %1204 = vperm.xlu1 %5763, %v7203_v7   ;;  %v7580_v46 = vpop.permute.xlu0 %964 }
 0x17a   : > { %11393 = vst [vmem:[#allocation64_spill] sm:$0xff] %v7580_v46  ;;  %1292 = vperm.xlu0 %5765, %v7211_v9  }
 0x17c   : > { %v7583_v0 = vpop.permute.xlu1 %916 }
 0x17d   : > { %11394 = vst [vmem:[#allocation65_spill] sm:$0xff] %v7583_v0  ;;  %1212 = vperm.xlu1 %5763, %v7211_v9   ;;  %v7586_v32 = vpop.permute.xlu0 %972 }
 0x17e   : > { %11395 = vst [vmem:[#allocation66_spill] sm:$0xff] %v7586_v32  ;;  %1300 = vperm.xlu0 %5765, %v7219_v11  }
 0x180   : > { %v7589_v29 = vpop.permute.xlu1 %924 }
 0x181   : > { %11396 = vst [vmem:[#allocation67_spill] sm:$0xff] %v7589_v29  ;;  %1220 = vperm.xlu1 %5763, %v7219_v11   ;;  %v7592_v21 = vpop.permute.xlu0 %980 }
 0x182   : > { %11397 = vst [vmem:[#allocation68_spill] sm:$0xff] %v7592_v21  ;;  %1308 = vperm.xlu0 %5765, %v7227_v13  }
 0x185   : > { %1228 = vperm.xlu1 %5763, %v7227_v13   ;;  %v7596_v28 = vpop.permute.xlu1 %948  ;;  %v7598_v46 = vpop.permute.xlu0 %988 }
 0x186   : > { %11398 = vst [vmem:[#allocation69_spill] sm:$0xff] %v7596_v28  ;;  %11399 = vst [vmem:[#allocation70_spill] sm:$0xff] %v7598_v46  ;;  %1316 = vperm.xlu0 %5765, %v7237_v15  }
 0x189   : > { %1236 = vperm.xlu1 %5763, %v7237_v15   ;;  %v7602_v32 = vpop.permute.xlu1 %956  ;;  %v7604_v0 = vpop.permute.xlu0 %996 }
 0x18a   : > { %11400 = vst [vmem:[#allocation71_spill] sm:$0xff] %v7602_v32  ;;  %11401 = vst [vmem:[#allocation72_spill] sm:$0xff] %v7604_v0  ;;  %1324 = vperm.xlu0 %5765, %v7245_v17  }
 0x18d   : > { %1244 = vperm.xlu1 %5763, %v7245_v17   ;;  %v7608_v29 = vpop.permute.xlu1 %960  ;;  %v7610_v21 = vpop.permute.xlu0 %1004 }
 0x18e   : > { %11402 = vst [vmem:[#allocation73_spill] sm:$0xff] %v7608_v29  ;;  %11403 = vst [vmem:[#allocation74_spill] sm:$0xff] %v7610_v21  ;;  %5766 = vset.pattern.permute.xlu0 %v7031_v42 }
 0x18f   : > { %1348 = vperm.xlu0 %5766, %v7186_v2  }
 0x191   : > { %5764 = vset.pattern.permute.xlu1 %v7030_v24  ;;  %v7613_v46 = vpop.permute.xlu1 %968 }
 0x192   : > { %11404 = vst [vmem:[#allocation75_spill] sm:$0xff] %v7613_v46  ;;  %1268 = vperm.xlu1 %5764, %v7186_v2   ;;  %v7616_v32 = vpop.permute.xlu0 %1028 }
 0x193   : > { %11405 = vst [vmem:[#allocation76_spill] sm:$0xff] %v7616_v32  ;;  %1360 = vperm.xlu0 %5766, %v7193_v4  }
 0x195   : > { %v7619_v0 = vpop.permute.xlu1 %976 }
 0x196   : > { %11406 = vst [vmem:[#allocation77_spill] sm:$0xff] %v7619_v0  ;;  %1276 = vperm.xlu1 %5764, %v7183_v1   ;;  %v7622_v29 = vpop.permute.xlu0 %1040 }
 0x197   : > { %11407 = vst [vmem:[#allocation78_spill] sm:$0xff] %v7622_v29  ;;  %1368 = vperm.xlu0 %5766, %v7200_v6  }
 0x199   : > { %v7625_v21 = vpop.permute.xlu1 %984 }
 0x19a   : > { %11408 = vst [vmem:[#allocation79_spill] sm:$0xff] %v7625_v21  ;;  %1280 = vperm.xlu1 %5764, %v7193_v4   ;;  %v7628_v24 = vpop.permute.xlu0 %1048 }
 0x19b   : > { %11409 = vst [vmem:[#allocation80_spill] sm:$0xff] %v7628_v24  ;;  %1376 = vperm.xlu0 %5766, %v7208_v8  }
 0x19d   : > { %v7631_v46 = vpop.permute.xlu1 %992 }
 0x19e   : > { %11410 = vst [vmem:[#allocation81_spill] sm:$0xff] %v7631_v46  ;;  %1288 = vperm.xlu1 %5764, %v7200_v6   ;;  %v7634_v32 = vpop.permute.xlu0 %1056 }
 0x19f   : > { %11411 = vst [vmem:[#allocation82_spill] sm:$0xff] %v7634_v32  ;;  %1384 = vperm.xlu0 %5766, %v7216_v10  }
 0x1a1   : > { %v7637_v0 = vpop.permute.xlu1 %1000 }
 0x1a2   : > { %11412 = vst [vmem:[#allocation83_spill] sm:$0xff] %v7637_v0  ;;  %1296 = vperm.xlu1 %5764, %v7208_v8   ;;  %v7640_v29 = vpop.permute.xlu0 %1064 }
 0x1a3   : > { %11413 = vst [vmem:[#allocation84_spill] sm:$0xff] %v7640_v29  ;;  %1392 = vperm.xlu0 %5766, %v7224_v12  }
 0x1a5   : > { %v7643_v21 = vpop.permute.xlu1 %1008 }
 0x1a6   : > { %11414 = vst [vmem:[#allocation85_spill] sm:$0xff] %v7643_v21  ;;  %1304 = vperm.xlu1 %5764, %v7216_v10   ;;  %v7646_v24 = vpop.permute.xlu0 %1072  ;;  %v7032_v21 = vmov 12  }
 0x1a7   : > { %11415 = vst [vmem:[#allocation86_spill] sm:$0xff] %v7646_v24  ;;  %1400 = vperm.xlu0 %5766, %v7234_v14  }
 0x1aa   : > { %1312 = vperm.xlu1 %5764, %v7224_v12   ;;  %v7650_v32 = vpop.permute.xlu1 %1032  ;;  %v7652_v46 = vpop.permute.xlu0 %1080 }
 0x1ab   : > { %11416 = vst [vmem:[#allocation87_spill] sm:$0xff] %v7650_v32  ;;  %11417 = vst [vmem:[#allocation88_spill] sm:$0xff] %v7652_v46  ;;  %1408 = vperm.xlu0 %5766, %v7242_v16  }
 0x1ae   : > { %1320 = vperm.xlu1 %5764, %v7234_v14   ;;  %v7656_v29 = vpop.permute.xlu1 %1036  ;;  %v7658_v0 = vpop.permute.xlu0 %1088 }
 0x1af   : > { %11418 = vst [vmem:[#allocation89_spill] sm:$0xff] %v7656_v29  ;;  %11419 = vst [vmem:[#allocation90_spill] sm:$0xff] %v7658_v0  ;;  %5769 = vset.pattern.permute.xlu0 %v7032_v21 }
 0x1b0   : > { %1432 = vperm.xlu0 %5769, %v7196_v5  }
 0x1b2   : > { %1328 = vperm.xlu1 %5764, %v7242_v16   ;;  %v7662_v24 = vpop.permute.xlu1 %1044 }
 0x1b3   : > { %11420 = vst [vmem:[#allocation91_spill] sm:$0xff] %v7662_v24  ;;  %v7664_v28 = vpop.permute.xlu0 %1112 }
 0x1b4   : > { %11421 = vst [vmem:[#allocation92_spill] sm:$0xff] %v7664_v28  ;;  %1444 = vperm.xlu0 %5769, %v7203_v7  }
 0x1b6   : > { %5767 = vset.pattern.permute.xlu1 %v7031_v42  ;;  %v7667_v46 = vpop.permute.xlu1 %1052 }
 0x1b7   : > { %11422 = vst [vmem:[#allocation93_spill] sm:$0xff] %v7667_v46  ;;  %1352 = vperm.xlu1 %5767, %v7196_v5   ;;  %v7670_v29 = vpop.permute.xlu0 %1124 }
 0x1b8   : > { %11423 = vst [vmem:[#allocation94_spill] sm:$0xff] %v7670_v29  ;;  %1452 = vperm.xlu0 %5769, %v7211_v9  }
 0x1ba   : > { %v7673_v0 = vpop.permute.xlu1 %1060 }
 0x1bb   : > { %11424 = vst [vmem:[#allocation95_spill] sm:$0xff] %v7673_v0  ;;  %1356 = vperm.xlu1 %5767, %v7183_v1   ;;  %v7676_v32 = vpop.permute.xlu0 %1132 }
 0x1bc   : > { %11425 = vst [vmem:[#allocation96_spill] sm:$0xff] %v7676_v32  ;;  %1460 = vperm.xlu0 %5769, %v7219_v11  }
 0x1be   : > { %v7679_v28 = vpop.permute.xlu1 %1068 }
 0x1bf   : > { %11426 = vst [vmem:[#allocation97_spill] sm:$0xff] %v7679_v28  ;;  %1364 = vperm.xlu1 %5767, %v7203_v7   ;;  %v7682_v42 = vpop.permute.xlu0 %1140 }
 0x1c0   : > { %11427 = vst [vmem:[#allocation98_spill] sm:$0xff] %v7682_v42  ;;  %1468 = vperm.xlu0 %5769, %v7227_v13  }
 0x1c2   : > { %v7685_v46 = vpop.permute.xlu1 %1076 }
 0x1c3   : > { %11428 = vst [vmem:[#allocation99_spill] sm:$0xff] %v7685_v46  ;;  %1372 = vperm.xlu1 %5767, %v7211_v9   ;;  %v7688_v29 = vpop.permute.xlu0 %1148  ;;  %v7033_v46 = vmov 13  }
 0x1c4   : > { %11429 = vst [vmem:[#allocation100_spill] sm:$0xff] %v7688_v29  ;;  %1476 = vperm.xlu0 %5769, %v7237_v15  }
 0x1c6   : > { %v7691_v0 = vpop.permute.xlu1 %1084 }
 0x1c7   : > { %11430 = vst [vmem:[#allocation101_spill] sm:$0xff] %v7691_v0  ;;  %1380 = vperm.xlu1 %5767, %v7219_v11   ;;  %v7694_v32 = vpop.permute.xlu0 %1156 }
 0x1c8   : > { %11431 = vst [vmem:[#allocation102_spill] sm:$0xff] %v7694_v32  ;;  %1484 = vperm.xlu0 %5769, %v7245_v17  }
 0x1cb   : > { %1388 = vperm.xlu1 %5767, %v7227_v13   ;;  %v7698_v28 = vpop.permute.xlu1 %1108  ;;  %v7700_v42 = vpop.permute.xlu0 %1164 }
 0x1cc   : > { %11432 = vst [vmem:[#allocation103_spill] sm:$0xff] %v7698_v28  ;;  %11433 = vst [vmem:[#allocation104_spill] sm:$0xff] %v7700_v42  ;;  %5770 = vset.pattern.permute.xlu0 %v7033_v46 }
 0x1cd   : > { %1508 = vperm.xlu0 %5770, %v7186_v2  }
 0x1cf   : > { %1396 = vperm.xlu1 %5767, %v7237_v15   ;;  %v7704_v29 = vpop.permute.xlu1 %1116 }
 0x1d0   : > { %11434 = vst [vmem:[#allocation105_spill] sm:$0xff] %v7704_v29  ;;  %v7706_v0 = vpop.permute.xlu0 %1188 }
 0x1d1   : > { %11435 = vst [vmem:[#allocation106_spill] sm:$0xff] %v7706_v0  ;;  %1520 = vperm.xlu0 %5770, %v7193_v4  }
 0x1d3   : > { %1404 = vperm.xlu1 %5767, %v7245_v17   ;;  %v7710_v32 = vpop.permute.xlu1 %1120 }
 0x1d4   : > { %11436 = vst [vmem:[#allocation107_spill] sm:$0xff] %v7710_v32  ;;  %v7712_v24 = vpop.permute.xlu0 %1200 }
 0x1d5   : > { %11437 = vst [vmem:[#allocation108_spill] sm:$0xff] %v7712_v24  ;;  %1528 = vperm.xlu0 %5770, %v7200_v6  }
 0x1d7   : > { %5768 = vset.pattern.permute.xlu1 %v7032_v21  ;;  %v7715_v42 = vpop.permute.xlu1 %1128 }
 0x1d8   : > { %11438 = vst [vmem:[#allocation109_spill] sm:$0xff] %v7715_v42  ;;  %1428 = vperm.xlu1 %5768, %v7186_v2   ;;  %v7718_v28 = vpop.permute.xlu0 %1208 }
 0x1d9   : > { %11439 = vst [vmem:[#allocation110_spill] sm:$0xff] %v7718_v28  ;;  %1536 = vperm.xlu0 %5770, %v7208_v8  }
 0x1db   : > { %v7721_v29 = vpop.permute.xlu1 %1136 }
 0x1dc   : > { %11440 = vst [vmem:[#allocation111_spill] sm:$0xff] %v7721_v29  ;;  %1436 = vperm.xlu1 %5768, %v7183_v1   ;;  %v7724_v0 = vpop.permute.xlu0 %1216 }
 0x1dd   : > { %11441 = vst [vmem:[#allocation112_spill] sm:$0xff] %v7724_v0  ;;  %1544 = vperm.xlu0 %5770, %v7216_v10  }
 0x1df   : > { %v7727_v24 = vpop.permute.xlu1 %1144 }
 0x1e0   : > { %11442 = vst [vmem:[#allocation113_spill] sm:$0xff] %v7727_v24  ;;  %1440 = vperm.xlu1 %5768, %v7193_v4   ;;  %v7730_v21 = vpop.permute.xlu0 %1224 }
 0x1e1   : > { %11443 = vst [vmem:[#allocation114_spill] sm:$0xff] %v7730_v21  ;;  %1552 = vperm.xlu0 %5770, %v7224_v12  }
 0x1e3   : > { %v7733_v32 = vpop.permute.xlu1 %1152 }
 0x1e4   : > { %11444 = vst [vmem:[#allocation115_spill] sm:$0xff] %v7733_v32  ;;  %1448 = vperm.xlu1 %5768, %v7200_v6   ;;  %v7736_v28 = vpop.permute.xlu0 %1232  ;;  %v7034_v32 = vmov 14  }
 0x1e5   : > { %11445 = vst [vmem:[#allocation116_spill] sm:$0xff] %v7736_v28  ;;  %1560 = vperm.xlu0 %5770, %v7234_v14  }
 0x1e7   : > { %v7739_v29 = vpop.permute.xlu1 %1160 }
 0x1e8   : > { %11446 = vst [vmem:[#allocation117_spill] sm:$0xff] %v7739_v29  ;;  %1456 = vperm.xlu1 %5768, %v7208_v8   ;;  %v7742_v0 = vpop.permute.xlu0 %1240 }
 0x1e9   : > { %11447 = vst [vmem:[#allocation118_spill] sm:$0xff] %v7742_v0  ;;  %1568 = vperm.xlu0 %5770, %v7242_v16  }
 0x1eb   : > { %v7745_v24 = vpop.permute.xlu1 %1168 }
 0x1ec   : > { %11448 = vst [vmem:[#allocation119_spill] sm:$0xff] %v7745_v24  ;;  %1464 = vperm.xlu1 %5768, %v7216_v10   ;;  %v7748_v21 = vpop.permute.xlu0 %1248 }
 0x1ed   : > { %11449 = vst [vmem:[#allocation120_spill] sm:$0xff] %v7748_v21  ;;  %5773 = vset.pattern.permute.xlu0 %v7034_v32 }
 0x1ee   : > { %1592 = vperm.xlu0 %5773, %v7196_v5  }
 0x1f0   : > { %1472 = vperm.xlu1 %5768, %v7224_v12   ;;  %v7752_v28 = vpop.permute.xlu1 %1192 }
 0x1f1   : > { %11450 = vst [vmem:[#allocation121_spill] sm:$0xff] %v7752_v28  ;;  %v7754_v29 = vpop.permute.xlu0 %1272 }
 0x1f2   : > { %11451 = vst [vmem:[#allocation122_spill] sm:$0xff] %v7754_v29  ;;  %1604 = vperm.xlu0 %5773, %v7203_v7  }
 0x1f4   : > { %1480 = vperm.xlu1 %5768, %v7234_v14   ;;  %v7758_v0 = vpop.permute.xlu1 %1196 }
 0x1f5   : > { %11452 = vst [vmem:[#allocation123_spill] sm:$0xff] %v7758_v0  ;;  %v7760_v24 = vpop.permute.xlu0 %1284 }
 0x1f6   : > { %11453 = vst [vmem:[#allocation124_spill] sm:$0xff] %v7760_v24  ;;  %1612 = vperm.xlu0 %5773, %v7211_v9  }
 0x1f8   : > { %1488 = vperm.xlu1 %5768, %v7242_v16   ;;  %v7764_v21 = vpop.permute.xlu1 %1204 }
 0x1f9   : > { %11454 = vst [vmem:[#allocation125_spill] sm:$0xff] %v7764_v21  ;;  %v7766_v42 = vpop.permute.xlu0 %1292 }
 0x1fa   : > { %11455 = vst [vmem:[#allocation126_spill] sm:$0xff] %v7766_v42  ;;  %1620 = vperm.xlu0 %5773, %v7219_v11  }
 0x1fc   : > { %5771 = vset.pattern.permute.xlu1 %v7033_v46  ;;  %v7769_v29 = vpop.permute.xlu1 %1212 }
 0x1fd   : > { %11456 = vst [vmem:[#allocation127_spill] sm:$0xff] %v7769_v29  ;;  %1512 = vperm.xlu1 %5771, %v7196_v5   ;;  %v7772_v28 = vpop.permute.xlu0 %1300  ;;  %v7876_v29 = vld [vmem:[%s7176_s12 + $0x30] sm:$0xff] }
 0x1fe   : > { %11457 = vst [vmem:[#allocation128_spill] sm:$0xff] %v7772_v28  ;;  %1628 = vperm.xlu0 %5773, %v7227_v13  }
 0x200   : > { %v7775_v24 = vpop.permute.xlu1 %1220 }
 0x201   : > { %11458 = vst [vmem:[#allocation129_spill] sm:$0xff] %v7775_v24  ;;  %1516 = vperm.xlu1 %5771, %v7183_v1   ;;  %v7778_v0 = vpop.permute.xlu0 %1308  ;;  %v11220_v24 = vmov 15  }
 0x202   : > { %11459 = vst [vmem:[#allocation130_spill] sm:$0xff] %v7778_v0  ;;  %1636 = vperm.xlu0 %5773, %v7237_v15   ;;  %v7839_v0 = vld [vmem:[%s7176_s12 + $0x18] sm:$0xff] }
 0x204   : > { %v7781_v42 = vpop.permute.xlu1 %1228 }
 0x205   : > { %11460 = vst [vmem:[#allocation131_spill] sm:$0xff] %v7781_v42  ;;  %1524 = vperm.xlu1 %5771, %v7203_v7   ;;  %v7784_v46 = vpop.permute.xlu0 %1316 }
 0x206   : > { %11461 = vst [vmem:[#allocation132_spill] sm:$0xff] %v7784_v46  ;;  %1644 = vperm.xlu0 %5773, %v7245_v17  }
 0x208   : > { %v7787_v5 = vpop.permute.xlu1 %1236 }
 0x209   : > { %11462 = vst [vmem:[#allocation133_spill] sm:$0xff] %v7787_v5  ;;  %1532 = vperm.xlu1 %5771, %v7211_v9   ;;  %v7790_v28 = vpop.permute.xlu0 %1324  ;;  %v7830_v5 = vld [vmem:[%s7176_s12 + $0x10] sm:$0xff] }
 0x20a   : > { %11463 = vst [vmem:[#allocation134_spill] sm:$0xff] %v7790_v28  ;;  %5774 = vset.pattern.permute.xlu0 %v11220_v24  ;;  %v7821_v28 = vld [vmem:[%s7176_s12] sm:$0xff] }
 0x20b   : > { %1668 = vperm.xlu0 %5774, %v7186_v2  }
 0x20c   : > { %v7794_v1 = vpop.permute.xlu1 %1244 }
 0x20d   : > { %11464 = vst [vmem:[#allocation135_spill] sm:$0xff] %v7794_v1  ;;  %1540 = vperm.xlu1 %5771, %v7219_v11  }
 0x20e   : > { %v7797_v7 = vpop.permute.xlu0 %1348 }
 0x20f   : > { %11465 = vst [vmem:[#allocation136_spill] sm:$0xff] %v7797_v7  ;;  %1680 = vperm.xlu0 %5774, %v7193_v4   ;;  %v7867_v7 = vld [vmem:[%s7176_s12 + $0x20] sm:$0xff] }
 0x211   : > { %1548 = vperm.xlu1 %5771, %v7227_v13   ;;  %v7801_v46 = vpop.permute.xlu1 %1268 }
 0x212   : > { %11466 = vst [vmem:[#allocation137_spill] sm:$0xff] %v7801_v46  ;;  %v7803_v9 = vpop.permute.xlu0 %1360 }
 0x213   : > { %11467 = vst [vmem:[#allocation138_spill] sm:$0xff] %v7803_v9  ;;  %1688 = vperm.xlu0 %5774, %v7200_v6   ;;  %v11221_v9 = vmov 16  }
 0x215   : > { %1556 = vperm.xlu1 %5771, %v7237_v15   ;;  %v7807_v2 = vpop.permute.xlu1 %1276 }
 0x216   : > { %11468 = vst [vmem:[#allocation139_spill] sm:$0xff] %v7807_v2  ;;  %v7809_v24 = vpop.permute.xlu0 %1368  ;;  %v7885_v2 = vld [vmem:[%s7176_s12 + $0x40] sm:$0xff] }
 0x217   : > { %11469 = vst [vmem:[#allocation140_spill] sm:$0xff] %v7809_v24  ;;  %1696 = vperm.xlu0 %5774, %v7208_v8  }
 0x219   : > { %1564 = vperm.xlu1 %5771, %v7245_v17   ;;  %v7813_v4 = vpop.permute.xlu1 %1280 }
 0x21a   : > { %11470 = vst [vmem:[#allocation141_spill] sm:$0xff] %v7813_v4  ;;  %v7815_v11 = vpop.permute.xlu0 %1376  ;;  %v11507_v4 = vmov 16  }
 0x21b   : > { %11471 = vst [vmem:[#allocation142_spill] sm:$0xff] %v7815_v11  ;;  %1704 = vperm.xlu0 %5774, %v7216_v10  }
 0x21d   : > { %5772 = vset.pattern.permute.xlu1 %v7034_v32  ;;  %v7818_v6 = vpop.permute.xlu1 %1288 }
 0x21e   : > { %11472 = vst [vmem:[#allocation143_spill] sm:$0xff] %v7818_v6  ;;  %1588 = vperm.xlu1 %5772, %v7821_v28   ;;  %v7824_v1 = vpop.permute.xlu0 %1384  ;;  %v7848_v6 = vld [vmem:[%s7176_s12 + $0x28] sm:$0xff] }
 0x21f   : > { %11473 = vst [vmem:[#allocation144_spill] sm:$0xff] %v7824_v1  ;;  %1712 = vperm.xlu0 %5774, %v7224_v12   ;;  %v536_v21 = vmul.f32 %v7848_v6, %v7307_v26 }
 0x221   : > { %v7827_v8 = vpop.permute.xlu1 %1296 }
 0x222   : > { %11474 = vst [vmem:[#allocation145_spill] sm:$0xff] %v7827_v8  ;;  %1596 = vperm.xlu1 %5772, %v7830_v5   ;;  %v7833_v11 = vpop.permute.xlu0 %1392  ;;  %v7861_v8 = vld [vmem:[%s7176_s12 + $0x38] sm:$0xff] }
 0x223   : > { %11475 = vst [vmem:[#allocation146_spill] sm:$0xff] %v7833_v11  ;;  %1720 = vperm.xlu0 %5774, %v7234_v14  }
 0x225   : > { %v7836_v32 = vpop.permute.xlu1 %1304 }
 0x226   : > { %11476 = vst [vmem:[#allocation147_spill] sm:$0xff] %v7836_v32  ;;  %1600 = vperm.xlu1 %5772, %v7839_v0   ;;  %v7842_v1 = vpop.permute.xlu0 %1400  ;;  %v7855_v32 = vld [vmem:[%s7176_s12 + $0x8] sm:$0xff] }
 0x227   : > { %11477 = vst [vmem:[#allocation148_spill] sm:$0xff] %v7842_v1  ;;  %1728 = vperm.xlu0 %5774, %v7242_v16  }
 0x229   : > { %v7845_v42 = vpop.permute.xlu1 %1312 }
 0x22a   : > { %11478 = vst [vmem:[#allocation149_spill] sm:$0xff] %v7845_v42  ;;  %1608 = vperm.xlu1 %5772, %v7848_v6   ;;  %v7851_v11 = vpop.permute.xlu0 %1408 }
 0x22b   : > { %11479 = vst [vmem:[#allocation150_spill] sm:$0xff] %v7851_v11  ;;  %5777 = vset.pattern.permute.xlu0 %v11221_v9 }
 0x22c   : > { %1752 = vperm.xlu0 %5777, %v7855_v32  }
 0x22d   : > { %v7858_v1 = vpop.permute.xlu1 %1320 }
 0x22e   : > { %11480 = vst [vmem:[#allocation151_spill] sm:$0xff] %v7858_v1  ;;  %1616 = vperm.xlu1 %5772, %v7861_v8  }
 0x22f   : > { %v7864_v42 = vpop.permute.xlu0 %1432 }
 0x230   : > { %11481 = vst [vmem:[#allocation152_spill] sm:$0xff] %v7864_v42  ;;  %1764 = vperm.xlu0 %5777, %v7867_v7   ;;  %v11526_v42 = vmov 17  }
 0x231   : > { %v7870_v11 = vpop.permute.xlu1 %1328 }
 0x232   : > { %11482 = vst [vmem:[#allocation153_spill] sm:$0xff] %v7870_v11  ;;  %1624 = vperm.xlu1 %5772, %v7216_v10  }
 0x233   : > { %v7873_v9 = vpop.permute.xlu0 %1444 }
 0x234   : > { %11483 = vst [vmem:[#allocation154_spill] sm:$0xff] %v7873_v9  ;;  %1772 = vperm.xlu0 %5777, %v7876_v29  }
 0x236   : > { %1632 = vperm.xlu1 %5772, %v7224_v12   ;;  %v7880_v1 = vpop.permute.xlu1 %1352 }
 0x237   : > { %11484 = vst [vmem:[#allocation155_spill] sm:$0xff] %v7880_v1  ;;  %v7882_v24 = vpop.permute.xlu0 %1452 }
 0x238   : > { %11485 = vst [vmem:[#allocation156_spill] sm:$0xff] %v7882_v24  ;;  %1780 = vperm.xlu0 %5777, %v7885_v2   ;;  %v11490_v24 = vmov 15  }
 0x23a   : > { %1640 = vperm.xlu1 %5772, %v7234_v14   ;;  %v7889_v11 = vpop.permute.xlu1 %1356 }
 0x23b   : > { %11486 = vst [vmem:[#allocation157_spill] sm:$0xff] %v7889_v11  ;;  %v7891_v10 = vpop.permute.xlu0 %1460  ;;  %v7941_v11 = vld [vmem:[%s7176_s12 + $0x48] sm:$0xff] }
 0x23c   : > { %11487 = vst [vmem:[#allocation158_spill] sm:$0xff] %v7891_v10  ;;  %1788 = vperm.xlu0 %5777, %v7227_v13  }
 0x23e   : > { %1648 = vperm.xlu1 %5772, %v7242_v16   ;;  %v7895_v9 = vpop.permute.xlu1 %1364  ;;  %v11222_v16 = vmov 17  }
 0x23f   : > { %11488 = vst [vmem:[#allocation159_spill] sm:$0xff] %v7895_v9  ;;  %v7897_v12 = vpop.permute.xlu0 %1468 }
 0x240   : > { %11489 = vst [vmem:[#allocation160_spill] sm:$0xff] %v7897_v12  ;;  %1796 = vperm.xlu0 %5777, %v7237_v15  }
 0x242   : > { %5775 = vset.pattern.permute.xlu1 %v11490_v24  ;;  %v7901_v1 = vpop.permute.xlu1 %1372 }
 0x243   : > { %11491 = vst [vmem:[#allocation161_spill] sm:$0xff] %v7901_v1  ;;  %1672 = vperm.xlu1 %5775, %v7855_v32   ;;  %v7904_v14 = vpop.permute.xlu0 %1476 }
 0x244   : > { %11492 = vst [vmem:[#allocation162_spill] sm:$0xff] %v7904_v14  ;;  %1804 = vperm.xlu0 %5777, %v7245_v17  }
 0x246   : > { %v7907_v10 = vpop.permute.xlu1 %1380 }
 0x247   : > { %11493 = vst [vmem:[#allocation163_spill] sm:$0xff] %v7907_v10  ;;  %1676 = vperm.xlu1 %5775, %v7830_v5   ;;  %v7910_v13 = vpop.permute.xlu0 %1484  ;;  %v7933_v10 = vld [vmem:[%s7176_s12 + $0x50] sm:$0xff] }
 0x248   : > { %11494 = vst [vmem:[#allocation164_spill] sm:$0xff] %v7910_v13  ;;  %5778 = vset.pattern.permute.xlu0 %v11222_v16 }
 0x249   : > { %1828 = vperm.xlu0 %5778, %v7821_v28  }
 0x24a   : > { %v7914_v24 = vpop.permute.xlu1 %1388 }
 0x24b   : > { %11495 = vst [vmem:[#allocation165_spill] sm:$0xff] %v7914_v24  ;;  %1684 = vperm.xlu1 %5775, %v7867_v7  }
 0x24c   : > { %v7917_v14 = vpop.permute.xlu0 %1508 }
 0x24d   : > { %11496 = vst [vmem:[#allocation166_spill] sm:$0xff] %v7917_v14  ;;  %1840 = vperm.xlu0 %5778, %v7839_v0   ;;  %v7950_v14 = vld [vmem:[%s7176_s12 + $0x58] sm:$0xff] }
 0x24e   : > { %v7920_v12 = vpop.permute.xlu1 %1396 }
 0x24f   : > { %11497 = vst [vmem:[#allocation167_spill] sm:$0xff] %v7920_v12  ;;  %1692 = vperm.xlu1 %5775, %v7876_v29  }
 0x250   : > { %v7923_v13 = vpop.permute.xlu0 %1520 }
 0x251   : > { %11498 = vst [vmem:[#allocation168_spill] sm:$0xff] %v7923_v13  ;;  %1848 = vperm.xlu0 %5778, %v7848_v6   ;;  %v7959_v13 = vld [vmem:[%s7176_s12 + $0x68] sm:$0xff] }
 0x252   : > { %v7926_v16 = vpop.permute.xlu1 %1404 }
 0x253   : > { %11499 = vst [vmem:[#allocation169_spill] sm:$0xff] %v7926_v16  ;;  %1700 = vperm.xlu1 %5775, %v7885_v2  }
 0x254   : > { %v7929_v24 = vpop.permute.xlu0 %1528 }
 0x255   : > { %11500 = vst [vmem:[#allocation170_spill] sm:$0xff] %v7929_v24  ;;  %1856 = vperm.xlu0 %5778, %v7861_v8  }
 0x257   : > { %1708 = vperm.xlu1 %5775, %v7933_v10   ;;  %v7936_v12 = vpop.permute.xlu1 %1428 }
 0x258   : > { %11501 = vst [vmem:[#allocation171_spill] sm:$0xff] %v7936_v12  ;;  %v7938_v1 = vpop.permute.xlu0 %1536  ;;  %v8018_v12 = vld [vmem:[%s7176_s12 + $0x70] sm:$0xff] }
 0x259   : > { %11502 = vst [vmem:[#allocation172_spill] sm:$0xff] %v7938_v1  ;;  %1864 = vperm.xlu0 %5778, %v7941_v11  }
 0x25b   : > { %1716 = vperm.xlu1 %5775, %v7237_v15   ;;  %v7945_v16 = vpop.permute.xlu1 %1436 }
 0x25c   : > { %11503 = vst [vmem:[#allocation173_spill] sm:$0xff] %v7945_v16  ;;  %v7947_v24 = vpop.permute.xlu0 %1544  ;;  %v7969_v16 = vld [vmem:[%s7176_s12 + $0x78] sm:$0xff] }
 0x25d   : > { %11504 = vst [vmem:[#allocation174_spill] sm:$0xff] %v7947_v24  ;;  %1872 = vperm.xlu0 %5778, %v7950_v14  }
 0x25f   : > { %1724 = vperm.xlu1 %5775, %v7245_v17   ;;  %v7954_v9 = vpop.permute.xlu1 %1440 }
 0x260   : > { %11505 = vst [vmem:[#allocation175_spill] sm:$0xff] %v7954_v9  ;;  %v7956_v1 = vpop.permute.xlu0 %1552  ;;  %v11223_v9 = vmov 18  }
 0x261   : > { %11506 = vst [vmem:[#allocation176_spill] sm:$0xff] %v7956_v1  ;;  %1880 = vperm.xlu0 %5778, %v7959_v13  }
 0x263   : > { %5776 = vset.pattern.permute.xlu1 %v11507_v4  ;;  %v7963_v15 = vpop.permute.xlu1 %1448 }
 0x264   : > { %11508 = vst [vmem:[#allocation177_spill] sm:$0xff] %v7963_v15  ;;  %1748 = vperm.xlu1 %5776, %v7821_v28   ;;  %v7966_v24 = vpop.permute.xlu0 %1560 }
 0x265   : > { %11509 = vst [vmem:[#allocation178_spill] sm:$0xff] %v7966_v24  ;;  %1888 = vperm.xlu0 %5778, %v7969_v16  }
 0x267   : > { %v7972_v17 = vpop.permute.xlu1 %1456 }
 0x268   : > { %11510 = vst [vmem:[#allocation179_spill] sm:$0xff] %v7972_v17  ;;  %1756 = vperm.xlu1 %5776, %v7830_v5   ;;  %v7975_v1 = vpop.permute.xlu0 %1568 }
 0x269   : > { %11511 = vst [vmem:[#allocation180_spill] sm:$0xff] %v7975_v1  ;;  %5781 = vset.pattern.permute.xlu0 %v11223_v9 }
 0x26a   : > { %1912 = vperm.xlu0 %5781, %v7855_v32  }
 0x26b   : > { %v7979_v4 = vpop.permute.xlu1 %1464 }
 0x26c   : > { %11512 = vst [vmem:[#allocation181_spill] sm:$0xff] %v7979_v4  ;;  %1760 = vperm.xlu1 %5776, %v7839_v0  }
 0x26d   : > { %v7982_v24 = vpop.permute.xlu0 %1592 }
 0x26e   : > { %11513 = vst [vmem:[#allocation182_spill] sm:$0xff] %v7982_v24  ;;  %1924 = vperm.xlu0 %5781, %v7867_v7   ;;  %v8009_v24 = vld [vmem:[%s7176_s12 + $0x60] sm:$0xff] }
 0x26f   : > { %v7985_v15 = vpop.permute.xlu1 %1472 }
 0x270   : > { %11514 = vst [vmem:[#allocation183_spill] sm:$0xff] %v7985_v15  ;;  %1768 = vperm.xlu1 %5776, %v7848_v6  }
 0x271   : > { %v7988_v17 = vpop.permute.xlu0 %1604 }
 0x272   : > { %11515 = vst [vmem:[#allocation184_spill] sm:$0xff] %v7988_v17  ;;  %1932 = vperm.xlu0 %5781, %v7876_v29  }
 0x273   : > { %v7991_v9 = vpop.permute.xlu1 %1480 }
 0x274   : > { %11516 = vst [vmem:[#allocation185_spill] sm:$0xff] %v7991_v9  ;;  %1776 = vperm.xlu1 %5776, %v7861_v8  }
 0x275   : > { %v7994_v1 = vpop.permute.xlu0 %1612 }
 0x276   : > { %11517 = vst [vmem:[#allocation186_spill] sm:$0xff] %v7994_v1  ;;  %1940 = vperm.xlu0 %5781, %v7885_v2  }
 0x277   : > { %v7997_v4 = vpop.permute.xlu1 %1488 }
 0x278   : > { %11518 = vst [vmem:[#allocation187_spill] sm:$0xff] %v7997_v4  ;;  %1784 = vperm.xlu1 %5776, %v7941_v11  }
 0x279   : > { %v8000_v15 = vpop.permute.xlu0 %1620 }
 0x27a   : > { %11519 = vst [vmem:[#allocation188_spill] sm:$0xff] %v8000_v15  ;;  %1948 = vperm.xlu0 %5781, %v7933_v10  }
 0x27c   : > { %1792 = vperm.xlu1 %5776, %v7950_v14   ;;  %v8004_v17 = vpop.permute.xlu1 %1512 }
 0x27d   : > { %11520 = vst [vmem:[#allocation189_spill] sm:$0xff] %v8004_v17  ;;  %v8006_v9 = vpop.permute.xlu0 %1628 }
 0x27e   : > { %11521 = vst [vmem:[#allocation190_spill] sm:$0xff] %v8006_v9  ;;  %1956 = vperm.xlu0 %5781, %v8009_v24   ;;  %v11224_v9 = vmov 19  }
 0x280   : > { %1800 = vperm.xlu1 %5776, %v7959_v13   ;;  %v8013_v1 = vpop.permute.xlu1 %1516 }
 0x281   : > { %11522 = vst [vmem:[#allocation191_spill] sm:$0xff] %v8013_v1  ;;  %v8015_v4 = vpop.permute.xlu0 %1636 }
 0x282   : > { %11523 = vst [vmem:[#allocation192_spill] sm:$0xff] %v8015_v4  ;;  %1964 = vperm.xlu0 %5781, %v8018_v12  }
 0x284   : > { %1808 = vperm.xlu1 %5776, %v7969_v16   ;;  %v8022_v15 = vpop.permute.xlu1 %1524 }
 0x285   : > { %11524 = vst [vmem:[#allocation193_spill] sm:$0xff] %v8022_v15  ;;  %v8024_v17 = vpop.permute.xlu0 %1644 }
 0x286   : > { %11525 = vst [vmem:[#allocation194_spill] sm:$0xff] %v8024_v17  ;;  %5782 = vset.pattern.permute.xlu0 %v11224_v9 }
 0x287   : > { %1988 = vperm.xlu0 %5782, %v7821_v28  }
 0x288   : > { %5779 = vset.pattern.permute.xlu1 %v11526_v42  ;;  %v8029_v1 = vpop.permute.xlu1 %1532 }
 0x289   : > { %11527 = vst [vmem:[#allocation195_spill] sm:$0xff] %v8029_v1  ;;  %1832 = vperm.xlu1 %5779, %v7855_v32  }
 0x28a   : > { %v8032_v4 = vpop.permute.xlu0 %1668 }
 0x28b   : > { %11528 = vst [vmem:[#allocation196_spill] sm:$0xff] %v8032_v4  ;;  %2000 = vperm.xlu0 %5782, %v7839_v0   ;;  %v11225_v4 = vmov 20  }
 0x28c   : > { %v8035_v46 = vpop.permute.xlu1 %1540 }
 0x28d   : > { %11529 = vst [vmem:[#allocation197_spill] sm:$0xff] %v8035_v46  ;;  %1836 = vperm.xlu1 %5779, %v7830_v5  }
 0x28e   : > { %v8038_v17 = vpop.permute.xlu0 %1680 }
 0x28f   : > { %11530 = vst [vmem:[#allocation198_spill] sm:$0xff] %v8038_v17  ;;  %2008 = vperm.xlu0 %5782, %v7848_v6  }
 0x290   : > { %v8041_v9 = vpop.permute.xlu1 %1548 }
 0x291   : > { %11531 = vst [vmem:[#allocation199_spill] sm:$0xff] %v8041_v9  ;;  %1844 = vperm.xlu1 %5779, %v7867_v7  }
 0x292   : > { %v8044_v42 = vpop.permute.xlu0 %1688 }
 0x293   : > { %11532 = vst [vmem:[#allocation200_spill] sm:$0xff] %v8044_v42  ;;  %2016 = vperm.xlu0 %5782, %v7861_v8  }
 0x294   : > { %v8047_v15 = vpop.permute.xlu1 %1556 }
 0x295   : > { %11533 = vst [vmem:[#allocation201_spill] sm:$0xff] %v8047_v15  ;;  %1852 = vperm.xlu1 %5779, %v7876_v29  }
 0x296   : > { %v8050_v1 = vpop.permute.xlu0 %1696 }
 0x297   : > { %11534 = vst [vmem:[#allocation202_spill] sm:$0xff] %v8050_v1  ;;  %2024 = vperm.xlu0 %5782, %v7941_v11  }
 0x298   : > { %v8053_v46 = vpop.permute.xlu1 %1564 }
 0x299   : > { %11535 = vst [vmem:[#allocation203_spill] sm:$0xff] %v8053_v46  ;;  %1860 = vperm.xlu1 %5779, %v7885_v2  }
 0x29a   : > { %v8056_v17 = vpop.permute.xlu0 %1704 }
 0x29b   : > { %11536 = vst [vmem:[#allocation204_spill] sm:$0xff] %v8056_v17  ;;  %2032 = vperm.xlu0 %5782, %v7950_v14  }
 0x29d   : > { %1868 = vperm.xlu1 %5779, %v7933_v10   ;;  %v8060_v9 = vpop.permute.xlu1 %1588 }
 0x29e   : > { %11537 = vst [vmem:[#allocation205_spill] sm:$0xff] %v8060_v9  ;;  %v8062_v42 = vpop.permute.xlu0 %1712 }
 0x29f   : > { %11538 = vst [vmem:[#allocation206_spill] sm:$0xff] %v8062_v42  ;;  %2040 = vperm.xlu0 %5782, %v7959_v13   ;;  %v11543_v42 = vmov 18  }
 0x2a1   : > { %1876 = vperm.xlu1 %5779, %v8009_v24   ;;  %v8066_v1 = vpop.permute.xlu1 %1596 }
 0x2a2   : > { %11539 = vst [vmem:[#allocation207_spill] sm:$0xff] %v8066_v1  ;;  %v8068_v15 = vpop.permute.xlu0 %1720 }
 0x2a3   : > { %11540 = vst [vmem:[#allocation208_spill] sm:$0xff] %v8068_v15  ;;  %2048 = vperm.xlu0 %5782, %v7969_v16  }
 0x2a5   : > { %1884 = vperm.xlu1 %5779, %v8018_v12   ;;  %v8072_v17 = vpop.permute.xlu1 %1600 }
 0x2a6   : > { %11541 = vst [vmem:[#allocation209_spill] sm:$0xff] %v8072_v17  ;;  %v8074_v46 = vpop.permute.xlu0 %1728 }
 0x2a7   : > { %11542 = vst [vmem:[#allocation210_spill] sm:$0xff] %v8074_v46  ;;  %5785 = vset.pattern.permute.xlu0 %v11225_v4 }
 0x2a8   : > { %2072 = vperm.xlu0 %5785, %v7855_v32  }
 0x2a9   : > { %5780 = vset.pattern.permute.xlu1 %v11543_v42  ;;  %v8079_v9 = vpop.permute.xlu1 %1608 }
 0x2aa   : > { %11544 = vst [vmem:[#allocation211_spill] sm:$0xff] %v8079_v9  ;;  %1908 = vperm.xlu1 %5780, %v7821_v28  }
 0x2ab   : > { %v8082_v15 = vpop.permute.xlu0 %1752 }
 0x2ac   : > { %11545 = vst [vmem:[#allocation212_spill] sm:$0xff] %v8082_v15  ;;  %2084 = vperm.xlu0 %5785, %v7867_v7  }
 0x2ad   : > { %v8085_v1 = vpop.permute.xlu1 %1616 }
 0x2ae   : > { %11546 = vst [vmem:[#allocation213_spill] sm:$0xff] %v8085_v1  ;;  %1916 = vperm.xlu1 %5780, %v7830_v5  }
 0x2af   : > { %v8088_v46 = vpop.permute.xlu0 %1764 }
 0x2b0   : > { %11547 = vst [vmem:[#allocation214_spill] sm:$0xff] %v8088_v46  ;;  %2092 = vperm.xlu0 %5785, %v7876_v29  }
 0x2b1   : > { %v8091_v4 = vpop.permute.xlu1 %1624 }
 0x2b2   : > { %11548 = vst [vmem:[#allocation215_spill] sm:$0xff] %v8091_v4  ;;  %1920 = vperm.xlu1 %5780, %v7839_v0  }
 0x2b3   : > { %v8094_v42 = vpop.permute.xlu0 %1772 }
 0x2b4   : > { %11549 = vst [vmem:[#allocation216_spill] sm:$0xff] %v8094_v42  ;;  %2100 = vperm.xlu0 %5785, %v7885_v2  }
 0x2b5   : > { %v8097_v17 = vpop.permute.xlu1 %1632 }
 0x2b6   : > { %11550 = vst [vmem:[#allocation217_spill] sm:$0xff] %v8097_v17  ;;  %1928 = vperm.xlu1 %5780, %v7848_v6  }
 0x2b7   : > { %v8100_v9 = vpop.permute.xlu0 %1780 }
 0x2b8   : > { %11551 = vst [vmem:[#allocation218_spill] sm:$0xff] %v8100_v9  ;;  %2108 = vperm.xlu0 %5785, %v7933_v10  }
 0x2b9   : > { %v8103_v1 = vpop.permute.xlu1 %1640 }
 0x2ba   : > { %11552 = vst [vmem:[#allocation219_spill] sm:$0xff] %v8103_v1  ;;  %1936 = vperm.xlu1 %5780, %v7861_v8   ;;  %v11226_v1 = vmov 21  }
 0x2bb   : > { %v8106_v46 = vpop.permute.xlu0 %1788 }
 0x2bc   : > { %11553 = vst [vmem:[#allocation220_spill] sm:$0xff] %v8106_v46  ;;  %2116 = vperm.xlu0 %5785, %v8009_v24  }
 0x2bd   : > { %v8109_v4 = vpop.permute.xlu1 %1648 }
 0x2be   : > { %11554 = vst [vmem:[#allocation221_spill] sm:$0xff] %v8109_v4  ;;  %1944 = vperm.xlu1 %5780, %v7941_v11  }
 0x2bf   : > { %v8112_v42 = vpop.permute.xlu0 %1796 }
 0x2c0   : > { %11555 = vst [vmem:[#allocation222_spill] sm:$0xff] %v8112_v42  ;;  %2124 = vperm.xlu0 %5785, %v8018_v12  }
 0x2c2   : > { %1952 = vperm.xlu1 %5780, %v7950_v14   ;;  %v8116_v9 = vpop.permute.xlu1 %1672 }
 0x2c3   : > { %11556 = vst [vmem:[#allocation223_spill] sm:$0xff] %v8116_v9  ;;  %v8118_v17 = vpop.permute.xlu0 %1804 }
 0x2c4   : > { %11557 = vst [vmem:[#allocation224_spill] sm:$0xff] %v8118_v17  ;;  %5786 = vset.pattern.permute.xlu0 %v11226_v1  ;;  %v11562_v17 = vmov 19  }
 0x2c5   : > { %2148 = vperm.xlu0 %5786, %v7821_v28  }
 0x2c6   : > { %1960 = vperm.xlu1 %5780, %v7959_v13   ;;  %v8123_v4 = vpop.permute.xlu1 %1676 }
 0x2c7   : > { %11558 = vst [vmem:[#allocation225_spill] sm:$0xff] %v8123_v4 }
 0x2c8   : > { %v8125_v46 = vpop.permute.xlu0 %1828 }
 0x2c9   : > { %11559 = vst [vmem:[#allocation226_spill] sm:$0xff] %v8125_v46  ;;  %2160 = vperm.xlu0 %5786, %v7839_v0  }
 0x2ca   : > { %1968 = vperm.xlu1 %5780, %v7969_v16   ;;  %v8129_v42 = vpop.permute.xlu1 %1684 }
 0x2cb   : > { %11560 = vst [vmem:[#allocation227_spill] sm:$0xff] %v8129_v42 }
 0x2cc   : > { %v8131_v9 = vpop.permute.xlu0 %1840 }
 0x2cd   : > { %11561 = vst [vmem:[#allocation228_spill] sm:$0xff] %v8131_v9  ;;  %2168 = vperm.xlu0 %5786, %v7848_v6  }
 0x2ce   : > { %5783 = vset.pattern.permute.xlu1 %v11562_v17  ;;  %v8135_v1 = vpop.permute.xlu1 %1692 }
 0x2cf   : > { %11563 = vst [vmem:[#allocation229_spill] sm:$0xff] %v8135_v1  ;;  %1992 = vperm.xlu1 %5783, %v7855_v32  }
 0x2d0   : > { %v8138_v15 = vpop.permute.xlu0 %1848 }
 0x2d1   : > { %11564 = vst [vmem:[#allocation230_spill] sm:$0xff] %v8138_v15  ;;  %2176 = vperm.xlu0 %5786, %v7861_v8  }
 0x2d2   : > { %v8141_v4 = vpop.permute.xlu1 %1700 }
 0x2d3   : > { %11565 = vst [vmem:[#allocation231_spill] sm:$0xff] %v8141_v4  ;;  %1996 = vperm.xlu1 %5783, %v7830_v5  }
 0x2d4   : > { %v8144_v46 = vpop.permute.xlu0 %1856 }
 0x2d5   : > { %11566 = vst [vmem:[#allocation232_spill] sm:$0xff] %v8144_v46  ;;  %2184 = vperm.xlu0 %5786, %v7941_v11  }
 0x2d6   : > { %v8147_v42 = vpop.permute.xlu1 %1708 }
 0x2d7   : > { %11567 = vst [vmem:[#allocation233_spill] sm:$0xff] %v8147_v42  ;;  %2004 = vperm.xlu1 %5783, %v7867_v7  }
 0x2d8   : > { %v8150_v17 = vpop.permute.xlu0 %1864 }
 0x2d9   : > { %11568 = vst [vmem:[#allocation234_spill] sm:$0xff] %v8150_v17  ;;  %2192 = vperm.xlu0 %5786, %v7950_v14  }
 0x2da   : > { %v8153_v1 = vpop.permute.xlu1 %1716 }
 0x2db   : > { %11569 = vst [vmem:[#allocation235_spill] sm:$0xff] %v8153_v1  ;;  %2012 = vperm.xlu1 %5783, %v7876_v29   ;;  %v11227_v1 = vmov 22  }
 0x2dc   : > { %v8156_v15 = vpop.permute.xlu0 %1872 }
 0x2dd   : > { %11570 = vst [vmem:[#allocation236_spill] sm:$0xff] %v8156_v15  ;;  %2200 = vperm.xlu0 %5786, %v7959_v13  }
 0x2de   : > { %v8159_v4 = vpop.permute.xlu1 %1724 }
 0x2df   : > { %11571 = vst [vmem:[#allocation237_spill] sm:$0xff] %v8159_v4  ;;  %2020 = vperm.xlu1 %5783, %v7885_v2  }
 0x2e0   : > { %v8162_v46 = vpop.permute.xlu0 %1880 }
 0x2e1   : > { %11572 = vst [vmem:[#allocation238_spill] sm:$0xff] %v8162_v46  ;;  %2208 = vperm.xlu0 %5786, %v7969_v16  }
 0x2e3   : > { %2028 = vperm.xlu1 %5783, %v7933_v10   ;;  %v8166_v42 = vpop.permute.xlu1 %1748 }
 0x2e4   : > { %11573 = vst [vmem:[#allocation239_spill] sm:$0xff] %v8166_v42  ;;  %v8168_v17 = vpop.permute.xlu0 %1888 }
 0x2e5   : > { %11574 = vst [vmem:[#allocation240_spill] sm:$0xff] %v8168_v17  ;;  %5789 = vset.pattern.permute.xlu0 %v11227_v1  ;;  %v11579_v17 = vmov 20  }
 0x2e6   : > { %2232 = vperm.xlu0 %5789, %v7855_v32  }
 0x2e7   : > { %2036 = vperm.xlu1 %5783, %v8009_v24   ;;  %v8173_v4 = vpop.permute.xlu1 %1756 }
 0x2e8   : > { %11575 = vst [vmem:[#allocation241_spill] sm:$0xff] %v8173_v4 }
 0x2e9   : > { %v8175_v15 = vpop.permute.xlu0 %1912 }
 0x2ea   : > { %11576 = vst [vmem:[#allocation242_spill] sm:$0xff] %v8175_v15  ;;  %2244 = vperm.xlu0 %5789, %v7867_v7  }
 0x2eb   : > { %2044 = vperm.xlu1 %5783, %v8018_v12   ;;  %v8179_v46 = vpop.permute.xlu1 %1760 }
 0x2ec   : > { %11577 = vst [vmem:[#allocation243_spill] sm:$0xff] %v8179_v46 }
 0x2ed   : > { %v8181_v9 = vpop.permute.xlu0 %1924 }
 0x2ee   : > { %11578 = vst [vmem:[#allocation244_spill] sm:$0xff] %v8181_v9  ;;  %2252 = vperm.xlu0 %5789, %v7876_v29  }
 0x2ef   : > { %5784 = vset.pattern.permute.xlu1 %v11579_v17  ;;  %v8185_v1 = vpop.permute.xlu1 %1768 }
 0x2f0   : > { %11580 = vst [vmem:[#allocation245_spill] sm:$0xff] %v8185_v1  ;;  %2068 = vperm.xlu1 %5784, %v7821_v28  }
 0x2f1   : > { %v8188_v42 = vpop.permute.xlu0 %1932 }
 0x2f2   : > { %11581 = vst [vmem:[#allocation246_spill] sm:$0xff] %v8188_v42  ;;  %2260 = vperm.xlu0 %5789, %v7885_v2  }
 0x2f3   : > { %v8191_v4 = vpop.permute.xlu1 %1776 }
 0x2f4   : > { %11582 = vst [vmem:[#allocation247_spill] sm:$0xff] %v8191_v4  ;;  %2076 = vperm.xlu1 %5784, %v7830_v5  }
 0x2f5   : > { %v8194_v15 = vpop.permute.xlu0 %1940 }
 0x2f6   : > { %11583 = vst [vmem:[#allocation248_spill] sm:$0xff] %v8194_v15  ;;  %2268 = vperm.xlu0 %5789, %v7933_v10  }
 0x2f7   : > { %v8197_v9 = vpop.permute.xlu1 %1784 }
 0x2f8   : > { %11584 = vst [vmem:[#allocation249_spill] sm:$0xff] %v8197_v9  ;;  %2080 = vperm.xlu1 %5784, %v7839_v0   ;;  %v11228_v9 = vmov 23  }
 0x2f9   : > { %v8200_v17 = vpop.permute.xlu0 %1948 }
 0x2fa   : > { %11585 = vst [vmem:[#allocation250_spill] sm:$0xff] %v8200_v17  ;;  %2276 = vperm.xlu0 %5789, %v8009_v24  }
 0x2fb   : > { %v8203_v46 = vpop.permute.xlu1 %1792 }
 0x2fc   : > { %11586 = vst [vmem:[#allocation251_spill] sm:$0xff] %v8203_v46  ;;  %2088 = vperm.xlu1 %5784, %v7848_v6  }
 0x2fd   : > { %v8206_v42 = vpop.permute.xlu0 %1956 }
 0x2fe   : > { %11587 = vst [vmem:[#allocation252_spill] sm:$0xff] %v8206_v42  ;;  %2284 = vperm.xlu0 %5789, %v8018_v12  }
 0x2ff   : > { %v8209_v4 = vpop.permute.xlu1 %1800 }
 0x300   : > { %11588 = vst [vmem:[#allocation253_spill] sm:$0xff] %v8209_v4  ;;  %2096 = vperm.xlu1 %5784, %v7861_v8  }
 0x301   : > { %v8212_v15 = vpop.permute.xlu0 %1964 }
 0x302   : > { %11589 = vst [vmem:[#allocation254_spill] sm:$0xff] %v8212_v15  ;;  %5790 = vset.pattern.permute.xlu0 %v11228_v9 }
 0x303   : > { %v8215_v17 = vpop.permute.xlu1 %1808  ;;  %2308 = vperm.xlu0 %5790, %v7821_v28  }
 0x304   : > { %11590 = vst [vmem:[#allocation255_spill] sm:$0xff] %v8215_v17  ;;  %2104 = vperm.xlu1 %5784, %v7941_v11  }
 0x306   : > { %v8219_v46 = vpop.permute.xlu0 %1988 }
 0x307   : > { %11591 = vst [vmem:[#allocation256_spill] sm:$0xff] %v8219_v46  ;;  %2320 = vperm.xlu0 %5790, %v7839_v0  }
 0x308   : > { %2112 = vperm.xlu1 %5784, %v7950_v14   ;;  %v8223_v4 = vpop.permute.xlu1 %1832 }
 0x309   : > { %11592 = vst [vmem:[#allocation257_spill] sm:$0xff] %v8223_v4  ;;  %v11598_v4 = vmov 21  }
 0x30a   : > { %v8225_v42 = vpop.permute.xlu0 %2000 }
 0x30b   : > { %11593 = vst [vmem:[#allocation258_spill] sm:$0xff] %v8225_v42  ;;  %2328 = vperm.xlu0 %5790, %v7848_v6  }
 0x30c   : > { %2120 = vperm.xlu1 %5784, %v7959_v13   ;;  %v8229_v9 = vpop.permute.xlu1 %1836 }
 0x30d   : > { %11594 = vst [vmem:[#allocation259_spill] sm:$0xff] %v8229_v9 }
 0x30e   : > { %v8231_v17 = vpop.permute.xlu0 %2008 }
 0x30f   : > { %11595 = vst [vmem:[#allocation260_spill] sm:$0xff] %v8231_v17  ;;  %2336 = vperm.xlu0 %5790, %v7861_v8  }
 0x310   : > { %2128 = vperm.xlu1 %5784, %v7969_v16   ;;  %v8235_v15 = vpop.permute.xlu1 %1844 }
 0x311   : > { %11596 = vst [vmem:[#allocation261_spill] sm:$0xff] %v8235_v15 }
 0x312   : > { %v8237_v46 = vpop.permute.xlu0 %2016 }
 0x313   : > { %11597 = vst [vmem:[#allocation262_spill] sm:$0xff] %v8237_v46  ;;  %2344 = vperm.xlu0 %5790, %v7941_v11  }
 0x314   : > { %5787 = vset.pattern.permute.xlu1 %v11598_v4  ;;  %v8241_v1 = vpop.permute.xlu1 %1852 }
 0x315   : > { %11599 = vst [vmem:[#allocation263_spill] sm:$0xff] %v8241_v1  ;;  %2152 = vperm.xlu1 %5787, %v7855_v32  }
 0x316   : > { %v8244_v42 = vpop.permute.xlu0 %2024 }
 0x317   : > { %11600 = vst [vmem:[#allocation264_spill] sm:$0xff] %v8244_v42  ;;  %2352 = vperm.xlu0 %5790, %v7950_v14  }
 0x318   : > { %v8247_v17 = vpop.permute.xlu1 %1860 }
 0x319   : > { %11601 = vst [vmem:[#allocation265_spill] sm:$0xff] %v8247_v17  ;;  %2156 = vperm.xlu1 %5787, %v7830_v5   ;;  %v11229_v17 = vmov 24  }
 0x31a   : > { %v8250_v9 = vpop.permute.xlu0 %2032 }
 0x31b   : > { %11602 = vst [vmem:[#allocation266_spill] sm:$0xff] %v8250_v9  ;;  %2360 = vperm.xlu0 %5790, %v7959_v13  }
 0x31c   : > { %v8253_v15 = vpop.permute.xlu1 %1868 }
 0x31d   : > { %11603 = vst [vmem:[#allocation267_spill] sm:$0xff] %v8253_v15  ;;  %2164 = vperm.xlu1 %5787, %v7867_v7  }
 0x31e   : > { %v8256_v4 = vpop.permute.xlu0 %2040 }
 0x31f   : > { %11604 = vst [vmem:[#allocation268_spill] sm:$0xff] %v8256_v4  ;;  %2368 = vperm.xlu0 %5790, %v7969_v16  }
 0x320   : > { %v8259_v46 = vpop.permute.xlu1 %1876 }
 0x321   : > { %11605 = vst [vmem:[#allocation269_spill] sm:$0xff] %v8259_v46  ;;  %2172 = vperm.xlu1 %5787, %v7876_v29  }
 0x322   : > { %v8262_v42 = vpop.permute.xlu0 %2048 }
 0x323   : > { %11606 = vst [vmem:[#allocation270_spill] sm:$0xff] %v8262_v42  ;;  %5793 = vset.pattern.permute.xlu0 %v11229_v17 }
 0x324   : > { %v8265_v9 = vpop.permute.xlu1 %1884  ;;  %2392 = vperm.xlu0 %5793, %v7855_v32  }
 0x325   : > { %11607 = vst [vmem:[#allocation271_spill] sm:$0xff] %v8265_v9  ;;  %2180 = vperm.xlu1 %5787, %v7885_v2  }
 0x327   : > { %v8269_v15 = vpop.permute.xlu0 %2072 }
 0x328   : > { %11608 = vst [vmem:[#allocation272_spill] sm:$0xff] %v8269_v15  ;;  %2404 = vperm.xlu0 %5793, %v7867_v7  }
 0x329   : > { %2188 = vperm.xlu1 %5787, %v7933_v10   ;;  %v8273_v4 = vpop.permute.xlu1 %1908 }
 0x32a   : > { %11609 = vst [vmem:[#allocation273_spill] sm:$0xff] %v8273_v4  ;;  %v11615_v4 = vmov 22  }
 0x32b   : > { %v8275_v46 = vpop.permute.xlu0 %2084 }
 0x32c   : > { %11610 = vst [vmem:[#allocation274_spill] sm:$0xff] %v8275_v46  ;;  %2412 = vperm.xlu0 %5793, %v7876_v29  }
 0x32d   : > { %2196 = vperm.xlu1 %5787, %v8009_v24   ;;  %v8279_v17 = vpop.permute.xlu1 %1916 }
 0x32e   : > { %11611 = vst [vmem:[#allocation275_spill] sm:$0xff] %v8279_v17 }
 0x32f   : > { %v8281_v42 = vpop.permute.xlu0 %2092 }
 0x330   : > { %11612 = vst [vmem:[#allocation276_spill] sm:$0xff] %v8281_v42  ;;  %2420 = vperm.xlu0 %5793, %v7885_v2  }
 0x331   : > { %2204 = vperm.xlu1 %5787, %v8018_v12   ;;  %v8285_v9 = vpop.permute.xlu1 %1920 }
 0x332   : > { %11613 = vst [vmem:[#allocation277_spill] sm:$0xff] %v8285_v9 }
 0x333   : > { %v8287_v1 = vpop.permute.xlu0 %2100 }
 0x334   : > { %11614 = vst [vmem:[#allocation278_spill] sm:$0xff] %v8287_v1  ;;  %2428 = vperm.xlu0 %5793, %v7933_v10  }
 0x335   : > { %5788 = vset.pattern.permute.xlu1 %v11615_v4  ;;  %v8291_v46 = vpop.permute.xlu1 %1928 }
 0x336   : > { %11616 = vst [vmem:[#allocation279_spill] sm:$0xff] %v8291_v46  ;;  %2228 = vperm.xlu1 %5788, %v7821_v28   ;;  %v11230_v46 = vmov 25  }
 0x337   : > { %v8294_v15 = vpop.permute.xlu0 %2108 }
 0x338   : > { %11617 = vst [vmem:[#allocation280_spill] sm:$0xff] %v8294_v15  ;;  %2436 = vperm.xlu0 %5793, %v8009_v24  }
 0x339   : > { %v8297_v42 = vpop.permute.xlu1 %1936 }
 0x33a   : > { %11618 = vst [vmem:[#allocation281_spill] sm:$0xff] %v8297_v42  ;;  %2236 = vperm.xlu1 %5788, %v7830_v5  }
 0x33b   : > { %v8300_v17 = vpop.permute.xlu0 %2116 }
 0x33c   : > { %11619 = vst [vmem:[#allocation282_spill] sm:$0xff] %v8300_v17  ;;  %2444 = vperm.xlu0 %5793, %v8018_v12  }
 0x33d   : > { %v8303_v1 = vpop.permute.xlu1 %1944 }
 0x33e   : > { %11620 = vst [vmem:[#allocation283_spill] sm:$0xff] %v8303_v1  ;;  %2240 = vperm.xlu1 %5788, %v7839_v0  }
 0x33f   : > { %v8306_v4 = vpop.permute.xlu0 %2124 }
 0x340   : > { %11621 = vst [vmem:[#allocation284_spill] sm:$0xff] %v8306_v4  ;;  %5794 = vset.pattern.permute.xlu0 %v11230_v46 }
 0x341   : > { %v8309_v15 = vpop.permute.xlu1 %1952  ;;  %2468 = vperm.xlu0 %5794, %v7821_v28  }
 0x342   : > { %11622 = vst [vmem:[#allocation285_spill] sm:$0xff] %v8309_v15  ;;  %2248 = vperm.xlu1 %5788, %v7848_v6  }
 0x344   : > { %v8313_v42 = vpop.permute.xlu0 %2148 }
 0x345   : > { %11623 = vst [vmem:[#allocation286_spill] sm:$0xff] %v8313_v42  ;;  %v8315_v17 = vpop.permute.xlu1 %1960  ;;  %2480 = vperm.xlu0 %5794, %v7839_v0  }
 0x346   : > { %11624 = vst [vmem:[#allocation287_spill] sm:$0xff] %v8315_v17  ;;  %2256 = vperm.xlu1 %5788, %v7861_v8  }
 0x348   : > { %v8319_v1 = vpop.permute.xlu0 %2160 }
 0x349   : > { %11625 = vst [vmem:[#allocation288_spill] sm:$0xff] %v8319_v1  ;;  %v8321_v4 = vpop.permute.xlu1 %1968  ;;  %2488 = vperm.xlu0 %5794, %v7848_v6  }
 0x34a   : > { %11626 = vst [vmem:[#allocation289_spill] sm:$0xff] %v8321_v4  ;;  %2264 = vperm.xlu1 %5788, %v7941_v11  }
 0x34c   : > { %v8325_v46 = vpop.permute.xlu0 %2168 }
 0x34d   : > { %11627 = vst [vmem:[#allocation290_spill] sm:$0xff] %v8325_v46  ;;  %2496 = vperm.xlu0 %5794, %v7861_v8  }
 0x34e   : > { %2272 = vperm.xlu1 %5788, %v7950_v14   ;;  %v8329_v15 = vpop.permute.xlu1 %1992 }
 0x34f   : > { %11628 = vst [vmem:[#allocation291_spill] sm:$0xff] %v8329_v15  ;;  %v11634_v15 = vmov 23  }
 0x350   : > { %v8331_v17 = vpop.permute.xlu0 %2176 }
 0x351   : > { %11629 = vst [vmem:[#allocation292_spill] sm:$0xff] %v8331_v17  ;;  %2504 = vperm.xlu0 %5794, %v7941_v11  }
 0x352   : > { %2280 = vperm.xlu1 %5788, %v7959_v13   ;;  %v8335_v42 = vpop.permute.xlu1 %1996 }
 0x353   : > { %11630 = vst [vmem:[#allocation293_spill] sm:$0xff] %v8335_v42 }
 0x354   : > { %v8337_v4 = vpop.permute.xlu0 %2184 }
 0x355   : > { %11631 = vst [vmem:[#allocation294_spill] sm:$0xff] %v8337_v4  ;;  %2512 = vperm.xlu0 %5794, %v7950_v14  }
 0x356   : > { %2288 = vperm.xlu1 %5788, %v7969_v16   ;;  %v8341_v46 = vpop.permute.xlu1 %2004 }
 0x357   : > { %11632 = vst [vmem:[#allocation295_spill] sm:$0xff] %v8341_v46  ;;  %v11231_v46 = vmov 26  }
 0x358   : > { %v8343_v1 = vpop.permute.xlu0 %2192 }
 0x359   : > { %11633 = vst [vmem:[#allocation296_spill] sm:$0xff] %v8343_v1  ;;  %2520 = vperm.xlu0 %5794, %v7959_v13  }
 0x35a   : > { %5791 = vset.pattern.permute.xlu1 %v11634_v15  ;;  %v8347_v17 = vpop.permute.xlu1 %2012 }
 0x35b   : > { %11635 = vst [vmem:[#allocation297_spill] sm:$0xff] %v8347_v17  ;;  %2312 = vperm.xlu1 %5791, %v7855_v32   ;;  %v531_v17 = vmul.f32 %v7821_v28, %v7298_v23 }
 0x35c   : > { %v8350_v9 = vpop.permute.xlu0 %2200 }
 0x35d   : > { %11636 = vst [vmem:[#allocation298_spill] sm:$0xff] %v8350_v9  ;;  %2528 = vperm.xlu0 %5794, %v7969_v16  }
 0x35e   : > { %v8353_v4 = vpop.permute.xlu1 %2020 }
 0x35f   : > { %11637 = vst [vmem:[#allocation299_spill] sm:$0xff] %v8353_v4  ;;  %2316 = vperm.xlu1 %5791, %v7830_v5  }
 0x360   : > { %v8356_v42 = vpop.permute.xlu0 %2208 }
 0x361   : > { %11638 = vst [vmem:[#allocation300_spill] sm:$0xff] %v8356_v42  ;;  %5797 = vset.pattern.permute.xlu0 %v11231_v46 }
 0x362   : > { %v8359_v1 = vpop.permute.xlu1 %2028  ;;  %2552 = vperm.xlu0 %5797, %v7855_v32  }
 0x363   : > { %11639 = vst [vmem:[#allocation301_spill] sm:$0xff] %v8359_v1  ;;  %2324 = vperm.xlu1 %5791, %v7867_v7  }
 0x365   : > { %v8363_v15 = vpop.permute.xlu0 %2232 }
 0x366   : > { %11640 = vst [vmem:[#allocation302_spill] sm:$0xff] %v8363_v15  ;;  %v8365_v9 = vpop.permute.xlu1 %2036  ;;  %2564 = vperm.xlu0 %5797, %v7867_v7  }
 0x367   : > { %11641 = vst [vmem:[#allocation303_spill] sm:$0xff] %v8365_v9  ;;  %2332 = vperm.xlu1 %5791, %v7876_v29  }
 0x369   : > { %v8369_v4 = vpop.permute.xlu0 %2244 }
 0x36a   : > { %11642 = vst [vmem:[#allocation304_spill] sm:$0xff] %v8369_v4  ;;  %v8371_v42 = vpop.permute.xlu1 %2044  ;;  %2572 = vperm.xlu0 %5797, %v7876_v29  }
 0x36b   : > { %11643 = vst [vmem:[#allocation305_spill] sm:$0xff] %v8371_v42  ;;  %2340 = vperm.xlu1 %5791, %v7885_v2  }
 0x36d   : > { %v8375_v46 = vpop.permute.xlu0 %2252 }
 0x36e   : > { %11644 = vst [vmem:[#allocation306_spill] sm:$0xff] %v8375_v46  ;;  %2580 = vperm.xlu0 %5797, %v7885_v2  }
 0x36f   : > { %2348 = vperm.xlu1 %5791, %v7933_v10   ;;  %v8379_v1 = vpop.permute.xlu1 %2068 }
 0x370   : > { %11645 = vst [vmem:[#allocation307_spill] sm:$0xff] %v8379_v1  ;;  %v11651_v1 = vmov 24  }
 0x371   : > { %v8381_v9 = vpop.permute.xlu0 %2260 }
 0x372   : > { %11646 = vst [vmem:[#allocation308_spill] sm:$0xff] %v8381_v9  ;;  %2588 = vperm.xlu0 %5797, %v7933_v10   ;;  %v532_v9 = vmul.f32 %v7855_v32, %v7304_v25 }
 0x373   : > { %2356 = vperm.xlu1 %5791, %v8009_v24   ;;  %v8385_v4 = vpop.permute.xlu1 %2076 }
 0x374   : > { %11647 = vst [vmem:[#allocation309_spill] sm:$0xff] %v8385_v4 }
 0x375   : > { %v8387_v42 = vpop.permute.xlu0 %2268 }
 0x376   : > { %11648 = vst [vmem:[#allocation310_spill] sm:$0xff] %v8387_v42  ;;  %2596 = vperm.xlu0 %5797, %v8009_v24   ;;  %v5798_v42 = vpack.i.bf16 %v532_v9, %v531_v17  ;;  %v539_v9 = vmul.f32 %v7885_v2, %v7321_v31 }
 0x377   : > { %2364 = vperm.xlu1 %5791, %v8018_v12   ;;  %v8391_v46 = vpop.permute.xlu1 %2080 }
 0x378   : > { %11649 = vst [vmem:[#allocation311_spill] sm:$0xff] %v8391_v46  ;;  %v535_v46 = vmul.f32 %v7867_v7, %v7309_v27 }
 0x379   : > { %v8397_v15 = vpop.permute.xlu0 %2276 }
 0x37a   : > { %11650 = vst [vmem:[#allocation312_spill] sm:$0xff] %v8397_v15  ;;  %2604 = vperm.xlu0 %5797, %v8018_v12   ;;  %v5808_v15 = vpack.i.bf16 %v536_v21, %v535_v46  ;;  %v543_v21 = vmul.f32 %v8009_v24, %v7333_v35 }
 0x37b   : > { %5792 = vset.pattern.permute.xlu1 %v11651_v1  ;;  %v8401_v4 = vpop.permute.xlu1 %2088  ;;  %v540_v1 = vmul.f32 %v7941_v11, %v7319_v30 }
 0x37c   : > { %2388 = vperm.xlu1 %5792, %v7821_v28  }
 0x37d   : > { %v8408_v23 = vpop.permute.xlu0 %2284  ;;  %v5818_v17 = vpack.i.bf16 %v540_v1, %v539_v9  ;;  %v611_v1 = vmul.f32 %v7821_v28, %v7346_v40 }
 0x37e   : > { %11652 = vst [vmem:[#allocation313_spill] sm:$0xff] %v8408_v23  ;;  %5799 = vrot.lane.b32.xlu0 %v5798_v42, %s7047_s24  ;;  %v544_v42 = vmul.f32 %v7959_v13, %v7331_v34  ;;  %v11693_v23 = vld [vmem:[#allocation75_spill] sm:$0xff] }
 0x37f   : > { %v8411_v25 = vpop.permute.xlu1 %2096 }
 0x380   : > { %11653 = vst [vmem:[#allocation314_spill] sm:$0xff] %v8411_v25  ;;  %2396 = vperm.xlu1 %5792, %v7830_v5   ;;  %v5828_v46 = vpack.i.bf16 %v544_v42, %v543_v21  ;;  %v616_v42 = vmul.f32 %v7848_v6, %v7358_v44  ;;  %v11743_v25 = vld [vmem:[#allocation117_spill] sm:$0xff] }
 0x382   : > { %5809 = vrot.lane.b32.xlu0 %v5808_v15, %s7047_s24  ;;  %v8419_v26 = vpop.permute.xlu0 %2308  ;;  %v612_v15 = vmul.f32 %v7855_v32, %v7343_v39 }
 0x383   : > { %v8421_v27 = vpop.permute.xlu1 %2104 }
 0x384   : > { %11654 = vst [vmem:[#allocation315_spill] sm:$0xff] %v8421_v27  ;;  %2400 = vperm.xlu1 %5792, %v7839_v0   ;;  %v5838_v9 = vpack.i.bf16 %v612_v15, %v611_v1  ;;  %v620_v15 = vmul.f32 %v7941_v11, %v7369_v48  ;;  %v624_v1 = vmul.f32 %v7959_v13, %v7381_v52 }
 0x386   : > { %5819 = vrot.lane.b32.xlu0 %v5818_v17, %s7047_s24  ;;  %v8429_v30 = vpop.permute.xlu0 %2320  ;;  %v615_v17 = vmul.f32 %v7867_v7, %v7355_v43 }
 0x387   : > { %v8431_v31 = vpop.permute.xlu1 %2112 }
 0x388   : > { %11655 = vst [vmem:[#allocation316_spill] sm:$0xff] %v8431_v31  ;;  %2408 = vperm.xlu1 %5792, %v7848_v6   ;;  %v5848_v21 = vpack.i.bf16 %v616_v42, %v615_v17  ;;  %v691_v17 = vmul.f32 %v7821_v28, %v7392_v56  ;;  %v692_v42 = vmul.f32 %v7855_v32, %v7394_v57 }
 0x38a   : > { %5829 = vrot.lane.b32.xlu0 %v5828_v46, %s7047_s24  ;;  %v8439_v34 = vpop.permute.xlu0 %2328  ;;  %v619_v46 = vmul.f32 %v7885_v2, %v7367_v47 }
 0x38b   : > { %v8441_v35 = vpop.permute.xlu1 %2120 }
 0x38c   : > { %11656 = vst [vmem:[#allocation317_spill] sm:$0xff] %v8441_v35  ;;  %2416 = vperm.xlu1 %5792, %v7861_v8   ;;  %v5858_v44 = vpack.i.bf16 %v620_v15, %v619_v46  ;;  %v623_v8 = vmul.f32 %v8009_v24, %v7379_v51  ;;  %v696_v46 = vmul.f32 %v7848_v6, %v7409_v62  ;;  %v11661_v62 = vmov 25  }
 0x38d   : > { %v695_v15 = vmul.f32 %v7867_v7, %v7400_v59 }
 0x38e   : > { %5839 = vrot.lane.b32.xlu0 %v5838_v9, %s7048_s27  ;;  %v8449_v39 = vpop.permute.xlu0 %2336  ;;  %v5868_v48 = vpack.i.bf16 %v624_v1, %v623_v8  ;;  %v700_v8 = vmul.f32 %v7941_v11, %v7421_v20  ;;  %v699_v1 = vmul.f32 %v7885_v2, %v7411_v63  ;;  %v703_v20 = vmul.f32 %v8009_v24, %v7423_v22 }
 0x38f   : > { %v8451_v40 = vpop.permute.xlu1 %2128 }
 0x390   : > { %11657 = vst [vmem:[#allocation318_spill] sm:$0xff] %v8451_v40  ;;  %2424 = vperm.xlu1 %5792, %v7941_v11  }
 0x392   : > { %5849 = vrot.lane.b32.xlu0 %v5848_v21, %s7048_s27  ;;  %v8459_v43 = vpop.permute.xlu0 %2344  ;;  %v5878_v21 = vpack.i.bf16 %v692_v42, %v691_v17  ;;  %v5898_v17 = vpack.i.bf16 %v700_v8, %v699_v1  ;;  %v704_v42 = vmul.f32 %v7959_v13, %v7433_v3  ;;  %v775_v1 = vmul.f32 %v7867_v7, %v7458_v38 }
 0x394   : > { %2432 = vperm.xlu1 %5792, %v7950_v14   ;;  %v8466_v9 = vpop.permute.xlu1 %2152 }
 0x396   : > { %5859 = vrot.lane.b32.xlu0 %v5858_v44, %s7048_s27  ;;  %v8469_v47 = vpop.permute.xlu0 %2352  ;;  %v5888_v44 = vpack.i.bf16 %v696_v46, %v695_v15  ;;  %v5908_v46 = vpack.i.bf16 %v704_v42, %v703_v20  ;;  %v772_v15 = vmul.f32 %v7855_v32, %v7446_v55  ;;  %v779_v42 = vmul.f32 %v7885_v2, %v7469_v60 }
 0x397   : > { %11658 = vst [vmem:[#allocation319_spill] sm:$0xff] %v8469_v47  ;;  %v780_v20 = vmul.f32 %v7941_v11, %v7460_v61  ;;  %v11722_v47 = vld [vmem:[#allocation99_spill] sm:$0xff] }
 0x398   : > { %2440 = vperm.xlu1 %5792, %v7959_v13   ;;  %v8476_v51 = vpop.permute.xlu1 %2156 }
 0x39a   : > { %5869 = vrot.lane.b32.xlu0 %v5868_v48, %s7048_s27  ;;  %v8479_v52 = vpop.permute.xlu0 %2360 }
 0x39b   : > { %11659 = vst [vmem:[#allocation320_spill] sm:$0xff] %v8479_v52 }
 0x39c   : > { %2448 = vperm.xlu1 %5792, %v7969_v16   ;;  %v8486_v56 = vpop.permute.xlu1 %2164 }
 0x39e   : > { %5879 = vrot.lane.b32.xlu0 %v5878_v21, %s7049_s30  ;;  %v8489_v57 = vpop.permute.xlu0 %2368 }
 0x39f   : > { %11660 = vst [vmem:[#allocation321_spill] sm:$0xff] %v8489_v57 }
 0x3a0   : > { %5795 = vset.pattern.permute.xlu1 %v11661_v62  ;;  %v8496_v48 = vpop.permute.xlu1 %2172  ;;  %v776_v62 = vmul.f32 %v7848_v6, %v7448_v18 }
 0x3a1   : > { %11662 = vst [vmem:[#allocation322_spill] sm:$0xff] %v8496_v48  ;;  %2472 = vperm.xlu1 %5795, %v7855_v32  }
 0x3a2   : > { %5889 = vrot.lane.b32.xlu0 %v5888_v44, %s7049_s30  ;;  %v771_v44 = vmul.f32 %v7821_v28, %v7436_v19  ;;  %v5928_v55 = vpack.i.bf16 %v776_v62, %v775_v1  ;;  %v852_v1 = vmul.f32 %v7855_v32, %v7484_v54  ;;  %v856_v62 = vmul.f32 %v7848_v6, %v7511_v45 }
 0x3a3   : > { %v8500_v59 = vpop.permute.xlu0 %2392  ;;  %v11670_v45 = vmov 26  }
 0x3a4   : > { %v8506_v21 = vpop.permute.xlu1 %2180  ;;  %v5918_v22 = vpack.i.bf16 %v772_v15, %v771_v44  ;;  %v784_v15 = vmul.f32 %v7959_v13, %v7471_v58 }
 0x3a5   : > { %11663 = vst [vmem:[#allocation323_spill] sm:$0xff] %v8506_v21  ;;  %2476 = vperm.xlu1 %5795, %v7830_v5  }
 0x3a6   : > { %5899 = vrot.lane.b32.xlu0 %v5898_v17, %s7049_s30 }
 0x3a7   : > { %v8510_v63 = vpop.permute.xlu0 %2404 }
 0x3a8   : > { %v8516_v8 = vpop.permute.xlu1 %2188 }
 0x3a9   : > { %11664 = vst [vmem:[#allocation324_spill] sm:$0xff] %v8516_v8  ;;  %2484 = vperm.xlu1 %5795, %v7867_v7   ;;  %v11703_v8 = vld [vmem:[#allocation13_spill] sm:$0xff] }
 0x3aa   : > { %5909 = vrot.lane.b32.xlu0 %v5908_v46, %s7049_s30  ;;  %v783_v46 = vmul.f32 %v8009_v24, %v7481_v53 }
 0x3ab   : > { %v8520_v3 = vpop.permute.xlu0 %2412 }
 0x3ac   : > { %v8526_v17 = vpop.permute.xlu1 %2196  ;;  %v5948_v44 = vpack.i.bf16 %v784_v15, %v783_v46  ;;  %v864_v15 = vmul.f32 %v7959_v13, %v7535_v33 }
 0x3ad   : > { %11665 = vst [vmem:[#allocation325_spill] sm:$0xff] %v8526_v17  ;;  %2492 = vperm.xlu1 %5795, %v7876_v29   ;;  %v5938_v29 = vpack.i.bf16 %v780_v20, %v779_v42  ;;  %v860_v42 = vmul.f32 %v7941_v11, %v7523_v37  ;;  %v859_v20 = vmul.f32 %v7885_v2, %v7502_v41 }
 0x3ae   : > { %5919 = vrot.lane.b32.xlu0 %v5918_v22, %s7050_s13  ;;  %v851_v22 = vmul.f32 %v7821_v28, %v7494_v49  ;;  %v863_v37 = vmul.f32 %v8009_v24, %v7513_v36 }
 0x3af   : > { %v8530_v19 = vpop.permute.xlu0 %2420  ;;  %v5978_v46 = vpack.i.bf16 %v860_v42, %v859_v20  ;;  %v11678_v20 = vld [vmem:[#allocation50_spill] sm:$0xff] }
 0x3b0   : > { %v8536_v38 = vpop.permute.xlu1 %2204 }
 0x3b1   : > { %11666 = vst [vmem:[#allocation326_spill] sm:$0xff] %v8536_v38  ;;  %2500 = vperm.xlu1 %5795, %v7885_v2   ;;  %v11702_v38 = vld [vmem:[#allocation83_spill] sm:$0xff] }
 0x3b2   : > { %5929 = vrot.lane.b32.xlu0 %v5928_v55, %s7050_s13  ;;  %v855_v55 = vmul.f32 %v7867_v7, %v7490_v50  ;;  %v1024_v52 = vmul.f32 %v7959_v13, %v11702_v38  ;;  %v11706_v38 = vld [vmem:[#allocation87_spill] sm:$0xff] }
 0x3b3   : > { %v8540_v18 = vpop.permute.xlu0 %2428 }
 0x3b4   : > { %11667 = vst [vmem:[#allocation327_spill] sm:$0xff] %v8540_v18  ;;  %v5968_v54 = vpack.i.bf16 %v856_v62, %v855_v55  ;;  %v11674_v62 = vld [vmem:[#allocation47_spill] sm:$0xff] }
 0x3b5   : > { %2508 = vperm.xlu1 %5795, %v7933_v10   ;;  %v8547_v60 = vpop.permute.xlu1 %2228  ;;  %v5958_v10 = vpack.i.bf16 %v852_v1, %v851_v22  ;;  %v5988_v22 = vpack.i.bf16 %v864_v15, %v863_v37  ;;  %v8613_v15 = vld [vmem:[%s7176_s12 + $0x28] sm:$0xff] }
 0x3b6   : > { %5939 = vrot.lane.b32.xlu0 %v5938_v29, %s7050_s13  ;;  %v11681_v37 = vld [vmem:[#allocation61_spill] sm:$0xff] }
 0x3b7   : > { %v8550_v61 = vpop.permute.xlu0 %2436 }
 0x3b8   : > { %11668 = vst [vmem:[#allocation328_spill] sm:$0xff] %v8550_v61 }
 0x3b9   : > { %2516 = vperm.xlu1 %5795, %v8009_v24   ;;  %v8557_v53 = vpop.permute.xlu1 %2236 }
 0x3ba   : > { %5949 = vrot.lane.b32.xlu0 %v5948_v44, %s7050_s13 }
 0x3bb   : > { %v8560_v58 = vpop.permute.xlu0 %2444 }
 0x3bc   : > { %11669 = vst [vmem:[#allocation329_spill] sm:$0xff] %v8560_v58 }
 0x3bd   : > { %2524 = vperm.xlu1 %5795, %v8018_v12   ;;  %v8567_v49 = vpop.permute.xlu1 %2240 }
 0x3be   : > { %5959 = vrot.lane.b32.xlu0 %v5958_v10, %s7051_s14  ;;  %v8594_v10 = vld [vmem:[%s7176_s12] sm:$0xff] }
 0x3bf   : > { %v931_v33 = vmul.f32 %v8594_v10, %v11674_v62  ;;  %v8626_v62 = vld [vmem:[%s7176_s12 + $0x38] sm:$0xff] }
 0x3c0   : > { %v8574_v29 = vpop.permute.xlu0 %2468 }
 0x3c1   : > { %5796 = vset.pattern.permute.xlu1 %v11670_v45  ;;  %v8577_v50 = vpop.permute.xlu1 %2248 }
 0x3c2   : > { %11671 = vst [vmem:[#allocation330_spill] sm:$0xff] %v8577_v50  ;;  %2548 = vperm.xlu1 %5796, %v7821_v28   ;;  %5969 = vrot.lane.b32.xlu0 %v5968_v54, %s7051_s14  ;;  %v11673_v28 = vld [vmem:[#allocation53_spill] sm:$0xff]  ;;  %v11746_v50 = vld [vmem:[#allocation30_spill] sm:$0xff] }
 0x3c3   : > { %v932_v1 = vmul.f32 %v7855_v32, %v11673_v28  ;;  %v11677_v54 = vld [vmem:[#allocation57_spill] sm:$0xff]  ;;  %v936_v32 = vmul.f32 %v7848_v6, %v11678_v20  ;;  %v11682_v28 = vld [vmem:[#allocation54_spill] sm:$0xff] }
 0x3c4   : > { %v8585_v44 = vpop.permute.xlu0 %2480  ;;  %v935_v42 = vmul.f32 %v7867_v7, %v11677_v54  ;;  %v940_v7 = vmul.f32 %v7941_v11, %v11682_v28  ;;  %v11689_v28 = vld [vmem:[#allocation69_spill] sm:$0xff] }
 0x3c5   : > { %v8587_v41 = vpop.permute.xlu1 %2256 }
 0x3c6   : > { %11672 = vst [vmem:[#allocation331_spill] sm:$0xff] %v8587_v41  ;;  %2556 = vperm.xlu1 %5796, %v7830_v5   ;;  %5979 = vrot.lane.b32.xlu0 %v5978_v46, %s7051_s14  ;;  %v5998_v5 = vpack.i.bf16 %v932_v1, %v931_v33 }
 0x3c8   : > { %v8598_v55 = vpop.permute.xlu0 %2488 }
 0x3c9   : > { %11675 = vst [vmem:[#allocation53_spill] sm:$0xff] %v8598_v55  ;;  %v8600_v36 = vpop.permute.xlu1 %2264 }
 0x3ca   : > { %11676 = vst [vmem:[#allocation47_spill] sm:$0xff] %v8600_v36  ;;  %2560 = vperm.xlu1 %5796, %v7839_v0   ;;  %5989 = vrot.lane.b32.xlu0 %v5988_v22, %s7051_s14  ;;  %v6008_v0 = vpack.i.bf16 %v936_v32, %v935_v42  ;;  %v939_v22 = vmul.f32 %v7885_v2, %v11681_v37  ;;  %v11686_v2 = vld [vmem:[#allocation58_spill] sm:$0xff]  ;;  %v11701_v36 = vld [vmem:[#allocation72_spill] sm:$0xff] }
 0x3cb   : > { %v944_v42 = vmul.f32 %v7959_v13, %v11686_v2 }
 0x3cc   : > { %v8608_v45 = vpop.permute.xlu0 %2496  ;;  %v6018_v33 = vpack.i.bf16 %v940_v7, %v939_v22  ;;  %v8643_v22 = vld [vmem:[%s7176_s12 + $0x8] sm:$0xff]  ;;  %v11690_v7 = vld [vmem:[#allocation62_spill] sm:$0xff] }
 0x3cd   : > { %11679 = vst [vmem:[#allocation57_spill] sm:$0xff] %v8608_v45  ;;  %v8610_v46 = vpop.permute.xlu1 %2272  ;;  %v11721_v45 = vld [vmem:[#allocation88_spill] sm:$0xff] }
 0x3ce   : > { %11680 = vst [vmem:[#allocation50_spill] sm:$0xff] %v8610_v46  ;;  %2568 = vperm.xlu1 %5796, %v8613_v15   ;;  %5999 = vrot.lane.b32.xlu0 %v5998_v5, %s7052_s15  ;;  %v11685_v5 = vld [vmem:[#allocation65_spill] sm:$0xff] }
 0x3cf   : > { %v943_v54 = vmul.f32 %v8009_v24, %v11685_v5  ;;  %v1012_v5 = vmul.f32 %v8643_v22, %v11690_v7 }
 0x3d0   : > { %v8621_v6 = vpop.permute.xlu0 %2504 }
 0x3d1   : > { %11683 = vst [vmem:[#allocation61_spill] sm:$0xff] %v8621_v6  ;;  %v8623_v1 = vpop.permute.xlu1 %2280  ;;  %v6028_v37 = vpack.i.bf16 %v944_v42, %v943_v54  ;;  %v8654_v54 = vld [vmem:[%s7176_s12 + $0x20] sm:$0xff] }
 0x3d2   : > { %11684 = vst [vmem:[#allocation54_spill] sm:$0xff] %v8623_v1  ;;  %2576 = vperm.xlu1 %5796, %v8626_v62   ;;  %6009 = vrot.lane.b32.xlu0 %v6008_v0, %s7052_s15  ;;  %v1011_v0 = vmul.f32 %v8594_v10, %v11689_v28  ;;  %v11692_v42 = vld [vmem:[#allocation64_spill] sm:$0xff]  ;;  %v11697_v1 = vld [vmem:[#allocation79_spill] sm:$0xff] }
 0x3d3   : > { %v1015_v28 = vmul.f32 %v8654_v54, %v11692_v42  ;;  %v8672_v42 = vld [vmem:[%s7176_s12 + $0x40] sm:$0xff]  ;;  %v1020_v17 = vmul.f32 %v7941_v11, %v11697_v1 }
 0x3d4   : > { %v8634_v20 = vpop.permute.xlu0 %2512 }
 0x3d5   : > { %11687 = vst [vmem:[#allocation65_spill] sm:$0xff] %v8634_v20  ;;  %v8636_v32 = vpop.permute.xlu1 %2288  ;;  %v8681_v20 = vld [vmem:[%s7176_s12 + $0x10] sm:$0xff] }
 0x3d6   : > { %11688 = vst [vmem:[#allocation58_spill] sm:$0xff] %v8636_v32  ;;  %2584 = vperm.xlu1 %5796, %v7941_v11   ;;  %6019 = vrot.lane.b32.xlu0 %v6018_v33, %s7052_s15  ;;  %v6038_v33 = vpack.i.bf16 %v1012_v5, %v1011_v0  ;;  %v1016_v32 = vmul.f32 %v8613_v15, %v11693_v23  ;;  %v11695_v0 = vld [vmem:[#allocation10_spill] sm:$0xff]  ;;  %v11700_v11 = vld [vmem:[#allocation12_spill] sm:$0xff] }
 0x3d8   : > { %v8647_v57 = vpop.permute.xlu0 %2520  ;;  %v6048_v40 = vpack.i.bf16 %v1016_v32, %v1015_v28  ;;  %v11699_v32 = vld [vmem:[#allocation11_spill] sm:$0xff]  ;;  %v8692_v28 = vld [vmem:[%s7176_s12 + $0x30] sm:$0xff] }
 0x3d9   : > { %11691 = vst [vmem:[#allocation69_spill] sm:$0xff] %v8647_v57  ;;  %v11696_v57 = vld [vmem:[#allocation68_spill] sm:$0xff]  ;;  %v537_v1 = vmul.f32 %v8692_v28, %v11700_v11  ;;  %v542_v11 = vmul.f32 %v7950_v14, %v11703_v8 }
 0x3da   : > { %2592 = vperm.xlu1 %5796, %v7950_v14   ;;  %v8650_v2 = vpop.permute.xlu1 %2312  ;;  %6029 = vrot.lane.b32.xlu0 %v6028_v37, %s7052_s15  ;;  %v8667_v37 = vld [vmem:[%s7176_s12 + $0x18] sm:$0xff]  ;;  %v1019_v23 = vmul.f32 %v8672_v42, %v11696_v57  ;;  %v538_v57 = vmul.f32 %v8626_v62, %v11699_v32 }
 0x3db   : > { %v534_v5 = vmul.f32 %v8667_v37, %v11695_v0  ;;  %v11708_v14 = vld [vmem:[#allocation15_spill] sm:$0xff] }
 0x3dc   : > { %v8660_v7 = vpop.permute.xlu0 %2528  ;;  %v6058_v46 = vpack.i.bf16 %v1020_v17, %v1019_v23  ;;  %v5813_v32 = vpack.i.bf16 %v538_v57, %v537_v1  ;;  %v11704_v17 = vld [vmem:[#allocation14_spill] sm:$0xff]  ;;  %v546_v8 = vmul.f32 %v7969_v16, %v11708_v14  ;;  %v11715_v14 = vld [vmem:[#allocation84_spill] sm:$0xff] }
 0x3dd   : > { %11694 = vst [vmem:[#allocation62_spill] sm:$0xff] %v8660_v7  ;;  %v11698_v7 = vld [vmem:[#allocation9_spill] sm:$0xff] }
 0x3de   : > { %2600 = vperm.xlu1 %5796, %v7959_v13   ;;  %v8663_v58 = vpop.permute.xlu1 %2316  ;;  %6039 = vrot.lane.b32.xlu0 %v6038_v33, %s7053_s17  ;;  %v533_v33 = vmul.f32 %v8681_v20, %v11698_v7  ;;  %v1023_v7 = vmul.f32 %v8009_v24, %v11701_v36 }
 0x3e0   : > { %v5803_v6 = vpack.i.bf16 %v534_v5, %v533_v33  ;;  %v8709_v5 = vld [vmem:[%s7176_s12 + $0x50] sm:$0xff]  ;;  %v6068_v23 = vpack.i.bf16 %v1024_v52, %v1023_v7  ;;  %v11705_v33 = vld [vmem:[#allocation76_spill] sm:$0xff] }
 0x3e1   : > { %v8678_v35 = vpop.permute.xlu0 %2552  ;;  %v541_v36 = vmul.f32 %v8709_v5, %v11704_v17  ;;  %v1091_v13 = vmul.f32 %v8594_v10, %v11705_v33  ;;  %v11710_v7 = vld [vmem:[#allocation80_spill] sm:$0xff]  ;;  %v11711_v33 = vld [vmem:[#allocation91_spill] sm:$0xff] }
 0x3e2   : > { %2608 = vperm.xlu1 %5796, %v7969_v16   ;;  %v8686_v0 = vpop.permute.xlu1 %2324  ;;  %6049 = vrot.lane.b32.xlu0 %v6048_v40, %s7053_s17  ;;  %v1096_v17 = vmul.f32 %v8613_v15, %v11710_v7  ;;  %v11716_v7 = vld [vmem:[#allocation95_spill] sm:$0xff] }
 0x3e3   : > { %v5823_v57 = vpack.i.bf16 %v542_v11, %v541_v36  ;;  %v11714_v36 = vld [vmem:[#allocation18_spill] sm:$0xff] }
 0x3e5   : > { %v8700_v61 = vpop.permute.xlu0 %2564 }
 0x3e6   : > { %5804 = vrot.lane.b32.xlu1 %v5803_v6, %s7047_s24  ;;  %v8703_v40 = vpop.permute.xlu1 %2332  ;;  %6059 = vrot.lane.b32.xlu0 %v6058_v46, %s7053_s17  ;;  %v1092_v6 = vmul.f32 %v8643_v22, %v11706_v38  ;;  %v11709_v46 = vld [vmem:[#allocation16_spill] sm:$0xff]  ;;  %v1095_v38 = vmul.f32 %v8654_v54, %v11711_v33 }
 0x3e7   : > { %v545_v52 = vmul.f32 %v8018_v12, %v11709_v46  ;;  %v11713_v12 = vld [vmem:[#allocation17_spill] sm:$0xff] }
 0x3e8   : > { %v6078_v1 = vpack.i.bf16 %v1092_v6, %v1091_v13  ;;  %v613_v11 = vmul.f32 %v8681_v20, %v11713_v12  ;;  %v6088_v13 = vpack.i.bf16 %v1096_v17, %v1095_v38  ;;  %v8742_v6 = vld [vmem:[%s7176_s12 + $0x48] sm:$0xff]  ;;  %v11720_v17 = vld [vmem:[#allocation20_spill] sm:$0xff] }
 0x3e9   : > { %v8717_v21 = vpop.permute.xlu0 %2572  ;;  %v5833_v16 = vpack.i.bf16 %v546_v8, %v545_v52  ;;  %v1100_v46 = vmul.f32 %v8742_v6, %v11715_v14  ;;  %v11719_v8 = vld [vmem:[#allocation19_spill] sm:$0xff]  ;;  %v618_v38 = vmul.f32 %v8626_v62, %v11720_v17  ;;  %v6932_v14 = vld [vmem:[%s7176_s12 + $0x68] sm:$0xff] }
 0x3ea   : > { %v8719_v31 = vpop.permute.xlu1 %2340  ;;  %5814 = vrot.lane.b32.xlu1 %v5813_v32, %s7047_s24  ;;  %6069 = vrot.lane.b32.xlu0 %v6068_v23, %s7053_s17  ;;  %v614_v23 = vmul.f32 %v8667_v37, %v11714_v36  ;;  %v617_v52 = vmul.f32 %v8692_v28, %v11719_v8  ;;  %v11725_v8 = vld [vmem:[#allocation21_spill] sm:$0xff]  ;;  %v11728_v17 = vld [vmem:[#allocation103_spill] sm:$0xff]  ;;  %v1184_v18 = vmul.f32 %v6932_v14, %v11743_v25 }
 0x3eb   : > { %11707 = vst [vmem:[#allocation64_spill] sm:$0xff] %v8719_v31  ;;  %v11748_v25 = vld [vmem:[#allocation121_spill] sm:$0xff] }
 0x3ec   : > { %v5843_v12 = vpack.i.bf16 %v614_v23, %v613_v11  ;;  %v621_v11 = vmul.f32 %v8709_v5, %v11725_v8  ;;  %v8771_v23 = vld [vmem:[%s7176_s12 + $0x58] sm:$0xff] }
 0x3ed   : > { %v8731_v27 = vpop.permute.xlu0 %2580 }
 0x3ee   : > { %v8733_v32 = vpop.permute.xlu1 %2348  ;;  %5824 = vrot.lane.b32.xlu1 %v5823_v57, %s7047_s24  ;;  %6079 = vrot.lane.b32.xlu0 %v6078_v1, %s7054_s18  ;;  %v1099_v57 = vmul.f32 %v8672_v42, %v11716_v7  ;;  %v1104_v7 = vmul.f32 %v6932_v14, %v11721_v45  ;;  %v11726_v45 = vld [vmem:[#allocation22_spill] sm:$0xff]  ;;  %v1252_v14 = vmul.f32 %v8643_v22, %v11748_v25 }
 0x3ef   : > { %11712 = vst [vmem:[#allocation75_spill] sm:$0xff] %v8733_v32 }
 0x3f0   : > { %v6098_v36 = vpack.i.bf16 %v1100_v46, %v1099_v57  ;;  %v622_v46 = vmul.f32 %v8771_v23, %v11726_v45 }
 0x3f1   : > { %v8748_v33 = vpop.permute.xlu0 %2588 }
 0x3f2   : > { %11717 = vst [vmem:[#allocation10_spill] sm:$0xff] %v8748_v33  ;;  %v8750_v1 = vpop.permute.xlu1 %2356  ;;  %5834 = vrot.lane.b32.xlu1 %v5833_v16, %s7047_s24  ;;  %6089 = vrot.lane.b32.xlu0 %v6088_v13, %s7054_s18  ;;  %v5853_v13 = vpack.i.bf16 %v618_v38, %v617_v52  ;;  %v8784_v52 = vld [vmem:[%s7176_s12 + $0x70] sm:$0xff]  ;;  %v11730_v38 = vld [vmem:[#allocation23_spill] sm:$0xff]  ;;  %v5863_v45 = vpack.i.bf16 %v622_v46, %v621_v11 }
 0x3f3   : > { %11718 = vst [vmem:[#allocation68_spill] sm:$0xff] %v8750_v1  ;;  %v1103_v1 = vmul.f32 %v8009_v24, %v11722_v47  ;;  %v11727_v24 = vld [vmem:[#allocation92_spill] sm:$0xff]  ;;  %v11736_v46 = vld [vmem:[#allocation98_spill] sm:$0xff] }
 0x3f4   : > { %v1172_v47 = vmul.f32 %v8643_v22, %v11727_v24  ;;  %v11732_v24 = vld [vmem:[#allocation94_spill] sm:$0xff] }
 0x3f5   : > { %v8762_v32 = vpop.permute.xlu0 %2596  ;;  %v6108_v57 = vpack.i.bf16 %v1104_v7, %v1103_v1  ;;  %v11731_v1 = vld [vmem:[#allocation24_spill] sm:$0xff] }
 0x3f6   : > { %11723 = vst [vmem:[#allocation79_spill] sm:$0xff] %v8762_v32  ;;  %v8764_v16 = vpop.permute.xlu1 %2364  ;;  %5844 = vrot.lane.b32.xlu1 %v5843_v12, %s7048_s27  ;;  %6099 = vrot.lane.b32.xlu0 %v6098_v36, %s7054_s18  ;;  %v625_v12 = vmul.f32 %v8784_v52, %v11730_v38  ;;  %v8789_v36 = vld [vmem:[%s7176_s12 + $0x78] sm:$0xff] }
 0x3f7   : > { %11724 = vst [vmem:[#allocation9_spill] sm:$0xff] %v8764_v16  ;;  %v1171_v16 = vmul.f32 %v8594_v10, %v11728_v17  ;;  %v626_v7 = vmul.f32 %v8789_v36, %v11731_v1  ;;  %v1175_v17 = vmul.f32 %v8654_v54, %v11732_v24  ;;  %v11735_v1 = vld [vmem:[#allocation26_spill] sm:$0xff]  ;;  %v1179_v24 = vmul.f32 %v8672_v42, %v11736_v46 }
 0x3f8   : > { %v694_v11 = vmul.f32 %v8667_v37, %v11735_v1  ;;  %v11742_v46 = vld [vmem:[#allocation102_spill] sm:$0xff] }
 0x3f9   : > { %v8779_v32 = vpop.permute.xlu0 %2604  ;;  %v5873_v38 = vpack.i.bf16 %v626_v7, %v625_v12  ;;  %v11741_v7 = vld [vmem:[#allocation27_spill] sm:$0xff] }
 0x3fa   : > { %11729 = vst [vmem:[#allocation11_spill] sm:$0xff] %v8779_v32  ;;  %5854 = vrot.lane.b32.xlu1 %v5853_v13, %s7048_s27  ;;  %6109 = vrot.lane.b32.xlu0 %v6108_v57, %s7054_s18  ;;  %v6118_v32 = vpack.i.bf16 %v1172_v47, %v1171_v16  ;;  %v11733_v13 = vld [vmem:[#allocation109_spill] sm:$0xff]  ;;  %v697_v1 = vmul.f32 %v8692_v28, %v11741_v7 }
 0x3fb   : > { %v8793_v8 = vpop.permute.xlu1 %2388  ;;  %v1176_v57 = vmul.f32 %v8613_v15, %v11733_v13  ;;  %v11737_v47 = vld [vmem:[#allocation113_spill] sm:$0xff] }
 0x3fc   : > { %v1180_v13 = vmul.f32 %v8742_v6, %v11737_v47 }
 0x3fd   : > { %v8799_v41 = vpop.permute.xlu0 %5799  ;;  %v6128_v16 = vpack.i.bf16 %v1176_v57, %v1175_v17  ;;  %v6936_v57 = vld [vmem:[%s7176_s12 + $0x60] sm:$0xff] }
 0x3fe   : > { %11734 = vst [vmem:[#allocation12_spill] sm:$0xff] %v8799_v41  ;;  %5864 = vrot.lane.b32.xlu1 %v5863_v45, %s7048_s27  ;;  %6119 = vrot.lane.b32.xlu0 %v6118_v32, %s7047_s24  ;;  %v11739_v41 = vld [vmem:[#allocation25_spill] sm:$0xff]  ;;  %v11740_v32 = vld [vmem:[#allocation28_spill] sm:$0xff]  ;;  %v1183_v47 = vmul.f32 %v6936_v57, %v11742_v46 }
 0x3ff   : > { %v8803_v33 = vpop.permute.xlu1 %2396  ;;  %v693_v45 = vmul.f32 %v8681_v20, %v11739_v41  ;;  %v698_v12 = vmul.f32 %v8626_v62, %v11740_v32 }
 0x401   : > { %v8811_v48 = vpop.permute.xlu0 %5809  ;;  %v5883_v17 = vpack.i.bf16 %v694_v11, %v693_v45  ;;  %v702_v11 = vmul.f32 %v8771_v23, %v11746_v50  ;;  %v11747_v45 = vld [vmem:[#allocation106_spill] sm:$0xff] }
 0x402   : > { %11738 = vst [vmem:[#allocation72_spill] sm:$0xff] %v8811_v48  ;;  %5874 = vrot.lane.b32.xlu1 %v5873_v38, %s7048_s27  ;;  %6129 = vrot.lane.b32.xlu0 %v6128_v16, %s7047_s24  ;;  %v6138_v48 = vpack.i.bf16 %v1180_v13, %v1179_v24  ;;  %v5893_v38 = vpack.i.bf16 %v698_v12, %v697_v1  ;;  %v11745_v16 = vld [vmem:[#allocation29_spill] sm:$0xff]  ;;  %v11751_v1 = vld [vmem:[#allocation31_spill] sm:$0xff] }
 0x403   : > { %v8821_v42 = vpop.permute.xlu1 %2400  ;;  %v701_v32 = vmul.f32 %v8709_v5, %v11745_v16  ;;  %v1251_v24 = vmul.f32 %v8594_v10, %v11747_v45  ;;  %v6148_v13 = vpack.i.bf16 %v1184_v18, %v1183_v47  ;;  %v11752_v16 = vld [vmem:[#allocation110_spill] sm:$0xff]  ;;  %v11753_v45 = vld [vmem:[#allocation125_spill] sm:$0xff] }
 0x404   : > { %v1256_v18 = vmul.f32 %v8613_v15, %v11752_v16  ;;  %v1255_v25 = vmul.f32 %v8654_v54, %v11753_v45  ;;  %v11758_v45 = vld [vmem:[#allocation137_spill] sm:$0xff] }
 0x405   : > { %v8826_v41 = vpop.permute.xlu0 %5819  ;;  %v5903_v46 = vpack.i.bf16 %v702_v11, %v701_v32  ;;  %v6158_v47 = vpack.i.bf16 %v1252_v14, %v1251_v24  ;;  %v11756_v32 = vld [vmem:[#allocation34_spill] sm:$0xff] }
 0x406   : > { %11744 = vst [vmem:[#allocation83_spill] sm:$0xff] %v8826_v41  ;;  %5884 = vrot.lane.b32.xlu1 %v5883_v17, %s7049_s30  ;;  %6139 = vrot.lane.b32.xlu0 %v6138_v48, %s7047_s24  ;;  %v11750_v48 = vld [vmem:[#allocation32_spill] sm:$0xff]  ;;  %v705_v17 = vmul.f32 %v8784_v52, %v11751_v1  ;;  %v773_v11 = vmul.f32 %v8681_v20, %v11756_v32  ;;  %v11757_v24 = vld [vmem:[#allocation122_spill] sm:$0xff] }
 0x407   : > { %v8832_v7 = vpop.permute.xlu1 %2408  ;;  %v706_v12 = vmul.f32 %v8789_v36, %v11750_v48  ;;  %v6168_v16 = vpack.i.bf16 %v1256_v18, %v1255_v25  ;;  %v1332_v14 = vmul.f32 %v8643_v22, %v11757_v24  ;;  %v1331_v41 = vmul.f32 %v8594_v10, %v11758_v45  ;;  %v11763_v32 = vld [vmem:[#allocation152_spill] sm:$0xff]  ;;  %v11764_v45 = vld [vmem:[#allocation171_spill] sm:$0xff] }
 0x408   : > { %v1492_v24 = vmul.f32 %v8643_v22, %v11763_v32 }
 0x409   : > { %v8840_v57 = vpop.permute.xlu0 %5829  ;;  %v6178_v25 = vpack.i.bf16 %v1332_v14, %v1331_v41  ;;  %v11769_v14 = vld [vmem:[#allocation212_spill] sm:$0xff] }
 0x40a   : > { %11749 = vst [vmem:[#allocation13_spill] sm:$0xff] %v8840_v57  ;;  %5894 = vrot.lane.b32.xlu1 %v5893_v38, %s7049_s30  ;;  %6149 = vrot.lane.b32.xlu0 %v6148_v13, %s7047_s24  ;;  %v5913_v38 = vpack.i.bf16 %v706_v12, %v705_v17  ;;  %v11755_v13 = vld [vmem:[#allocation33_spill] sm:$0xff]  ;;  %v11760_v12 = vld [vmem:[#allocation36_spill] sm:$0xff]  ;;  %v1812_v32 = vmul.f32 %v8643_v22, %v11769_v14 }
 0x40b   : > { %v8848_v50 = vpop.permute.xlu1 %2416  ;;  %v774_v48 = vmul.f32 %v8667_v37, %v11755_v13  ;;  %v777_v17 = vmul.f32 %v8692_v28, %v11760_v12  ;;  %v11776_v14 = vld [vmem:[#allocation205_spill] sm:$0xff] }
 0x40d   : > { %v8854_v57 = vpop.permute.xlu0 %5839  ;;  %v5923_v18 = vpack.i.bf16 %v774_v48, %v773_v11  ;;  %v11768_v48 = vld [vmem:[#allocation38_spill] sm:$0xff] }
 0x40e   : > { %11754 = vst [vmem:[#allocation14_spill] sm:$0xff] %v8854_v57  ;;  %5904 = vrot.lane.b32.xlu1 %v5903_v46, %s7049_s30  ;;  %6159 = vrot.lane.b32.xlu0 %v6158_v47, %s7048_s27  ;;  %v11761_v46 = vld [vmem:[#allocation35_spill] sm:$0xff]  ;;  %v781_v41 = vmul.f32 %v8709_v5, %v11768_v48 }
 0x40f   : > { %v8860_v1 = vpop.permute.xlu1 %2424  ;;  %v778_v47 = vmul.f32 %v8626_v62, %v11761_v46 }
 0x411   : > { %v8868_v57 = vpop.permute.xlu0 %5849 }
 0x412   : > { %11759 = vst [vmem:[#allocation76_spill] sm:$0xff] %v8868_v57  ;;  %5914 = vrot.lane.b32.xlu1 %v5913_v38, %s7049_s30  ;;  %6169 = vrot.lane.b32.xlu0 %v6168_v16, %s7048_s27  ;;  %v1491_v57 = vmul.f32 %v8594_v10, %v11764_v45  ;;  %v5933_v38 = vpack.i.bf16 %v778_v47, %v777_v17  ;;  %v11766_v16 = vld [vmem:[#allocation37_spill] sm:$0xff]  ;;  %v11770_v45 = vld [vmem:[#allocation239_spill] sm:$0xff]  ;;  %v11772_v17 = vld [vmem:[#allocation40_spill] sm:$0xff] }
 0x413   : > { %v8876_v13 = vpop.permute.xlu1 %2432  ;;  %v782_v12 = vmul.f32 %v8771_v23, %v11766_v16  ;;  %v785_v47 = vmul.f32 %v8784_v52, %v11772_v17 }
 0x414   : > { %11762 = vst [vmem:[#allocation87_spill] sm:$0xff] %v8876_v13  ;;  %v6188_v11 = vpack.i.bf16 %v1492_v24, %v1491_v57  ;;  %v11775_v24 = vld [vmem:[#allocation182_spill] sm:$0xff] }
 0x415   : > { %v8882_v55 = vpop.permute.xlu0 %5859  ;;  %v5943_v57 = vpack.i.bf16 %v782_v12, %v781_v41  ;;  %v1652_v48 = vmul.f32 %v8643_v22, %v11775_v24 }
 0x416   : > { %11765 = vst [vmem:[#allocation15_spill] sm:$0xff] %v8882_v55  ;;  %5924 = vrot.lane.b32.xlu1 %v5923_v18, %s7050_s13  ;;  %6179 = vrot.lane.b32.xlu0 %v6178_v25, %s7049_s30  ;;  %v1811_v55 = vmul.f32 %v8594_v10, %v11770_v45  ;;  %v11773_v18 = vld [vmem:[#allocation39_spill] sm:$0xff]  ;;  %v1651_v45 = vmul.f32 %v8594_v10, %v11776_v14 }
 0x417   : > { %v8888_v46 = vpop.permute.xlu1 %2440  ;;  %v786_v25 = vmul.f32 %v8789_v36, %v11773_v18  ;;  %v11779_v18 = vld [vmem:[#allocation196_spill] sm:$0xff] }
 0x418   : > { %11767 = vst [vmem:[#allocation16_spill] sm:$0xff] %v8888_v46  ;;  %v1731_v12 = vmul.f32 %v8594_v10, %v11779_v18  ;;  %v6208_v41 = vpack.i.bf16 %v1652_v48, %v1651_v45  ;;  %v11786_v18 = vld [vmem:[#allocation307_spill] sm:$0xff] }
 0x419   : > { %v8896_v13 = vpop.permute.xlu0 %5869 }
 0x41a   : > { %11771 = vst [vmem:[#allocation80_spill] sm:$0xff] %v8896_v13  ;;  %5934 = vrot.lane.b32.xlu1 %v5933_v38, %s7050_s13  ;;  %6189 = vrot.lane.b32.xlu0 %v6188_v11, %s7051_s14  ;;  %v6198_v13 = vpack.i.bf16 %v1812_v32, %v1811_v55  ;;  %v5953_v38 = vpack.i.bf16 %v786_v25, %v785_v47  ;;  %v11778_v11 = vld [vmem:[#allocation43_spill] sm:$0xff]  ;;  %v11782_v32 = vld [vmem:[#allocation42_spill] sm:$0xff]  ;;  %v11784_v25 = vld [vmem:[#allocation41_spill] sm:$0xff] }
 0x41b   : > { %v8904_v16 = vpop.permute.xlu1 %2448  ;;  %v854_v17 = vmul.f32 %v8667_v37, %v11778_v11  ;;  %v857_v48 = vmul.f32 %v8692_v28, %v11784_v25  ;;  %v2451_v25 = vmul.f32 %v8594_v10, %v8793_v8 }
 0x41c   : > { %11774 = vst [vmem:[#allocation91_spill] sm:$0xff] %v8904_v16  ;;  %v11780_v16 = vld [vmem:[#allocation223_spill] sm:$0xff] }
 0x41d   : > { %v8910_v46 = vpop.permute.xlu0 %5879  ;;  %v1732_v24 = vmul.f32 %v8643_v22, %v11780_v16  ;;  %v11785_v16 = vld [vmem:[#allocation272_spill] sm:$0xff] }
 0x41e   : > { %11777 = vst [vmem:[#allocation17_spill] sm:$0xff] %v8910_v46  ;;  %5944 = vrot.lane.b32.xlu1 %v5943_v57, %s7050_s13  ;;  %6199 = vrot.lane.b32.xlu0 %v6198_v13, %s7047_s24  ;;  %v853_v57 = vmul.f32 %v8681_v20, %v11782_v32  ;;  %v11783_v13 = vld [vmem:[#allocation45_spill] sm:$0xff]  ;;  %v2132_v11 = vmul.f32 %v8643_v22, %v11785_v16 }
 0x41f   : > { %v858_v47 = vmul.f32 %v8626_v62, %v11783_v13  ;;  %v6218_v45 = vpack.i.bf16 %v1732_v24, %v1731_v12 }
 0x420   : > { %v8920_v31 = vpop.permute.xlu1 %2472  ;;  %v5963_v14 = vpack.i.bf16 %v854_v17, %v853_v57  ;;  %v11789_v17 = vld [vmem:[#allocation48_spill] sm:$0xff]  ;;  %v2452_v57 = vmul.f32 %v8643_v22, %v8500_v59 }
 0x421   : > { %v8922_v55 = vpop.permute.xlu0 %5889  ;;  %v862_v12 = vmul.f32 %v8771_v23, %v11789_v17 }
 0x422   : > { %11781 = vst [vmem:[#allocation18_spill] sm:$0xff] %v8922_v55  ;;  %5954 = vrot.lane.b32.xlu1 %v5953_v38, %s7050_s13  ;;  %6209 = vrot.lane.b32.xlu0 %v6208_v41, %s7053_s17  ;;  %v2131_v55 = vmul.f32 %v8594_v10, %v11786_v18  ;;  %v5973_v38 = vpack.i.bf16 %v858_v47, %v857_v48  ;;  %v11788_v41 = vld [vmem:[#allocation44_spill] sm:$0xff]  ;;  %v11792_v47 = vld [vmem:[#allocation46_spill] sm:$0xff] }
 0x423   : > { %v861_v13 = vmul.f32 %v8709_v5, %v11788_v41  ;;  %v865_v48 = vmul.f32 %v8784_v52, %v11792_v47  ;;  %v6238_v41 = vpack.i.bf16 %v2452_v57, %v2451_v25  ;;  %v11799_v47 = vld [vmem:[#allocation49_spill] sm:$0xff] }
 0x424   : > { %v8936_v46 = vpop.permute.xlu1 %2476  ;;  %v6228_v24 = vpack.i.bf16 %v2132_v11, %v2131_v55  ;;  %v11794_v11 = vld [vmem:[#allocation141_spill] sm:$0xff] }
 0x425   : > { %v8938_v32 = vpop.permute.xlu0 %5899  ;;  %v1334_v59 = vmul.f32 %v8667_v37, %v11794_v11 }
 0x426   : > { %11787 = vst [vmem:[#allocation84_spill] sm:$0xff] %v8938_v32  ;;  %5964 = vrot.lane.b32.xlu1 %v5963_v14, %s7051_s14  ;;  %6219 = vrot.lane.b32.xlu0 %v6218_v45, %s7054_s18  ;;  %v5983_v14 = vpack.i.bf16 %v862_v12, %v861_v13  ;;  %v11793_v45 = vld [vmem:[#allocation51_spill] sm:$0xff] }
 0x427   : > { %v866_v55 = vmul.f32 %v8789_v36, %v11793_v45  ;;  %v11798_v13 = vld [vmem:[#allocation55_spill] sm:$0xff]  ;;  %v934_v45 = vmul.f32 %v8667_v37, %v11799_v47 }
 0x428   : > { %v8950_v16 = vpop.permute.xlu1 %2484  ;;  %v933_v12 = vmul.f32 %v8681_v20, %v11798_v13 }
 0x429   : > { %11790 = vst [vmem:[#allocation95_spill] sm:$0xff] %v8950_v16  ;;  %v8952_v18 = vpop.permute.xlu0 %5909 }
 0x42a   : > { %11791 = vst [vmem:[#allocation19_spill] sm:$0xff] %v8952_v18  ;;  %5974 = vrot.lane.b32.xlu1 %v5973_v38, %s7051_s14  ;;  %6229 = vrot.lane.b32.xlu0 %v6228_v24, %s7051_s14  ;;  %v11797_v18 = vld [vmem:[#allocation139_spill] sm:$0xff]  ;;  %v5993_v24 = vpack.i.bf16 %v866_v55, %v865_v48  ;;  %v11803_v48 = vld [vmem:[#allocation52_spill] sm:$0xff] }
 0x42b   : > { %v1333_v38 = vmul.f32 %v8681_v20, %v11797_v18  ;;  %v6003_v18 = vpack.i.bf16 %v934_v45, %v933_v12  ;;  %v938_v55 = vmul.f32 %v8626_v62, %v11803_v48  ;;  %v11810_v48 = vld [vmem:[#allocation67_spill] sm:$0xff] }
 0x42c   : > { %v8962_v8 = vpop.permute.xlu1 %2492 }
 0x42d   : > { %11795 = vst [vmem:[#allocation20_spill] sm:$0xff] %v8962_v8  ;;  %v8964_v17 = vpop.permute.xlu0 %5919  ;;  %v6248_v11 = vpack.i.bf16 %v1334_v59, %v1333_v38  ;;  %v11806_v38 = vld [vmem:[#allocation63_spill] sm:$0xff]  ;;  %v11838_v8 = vld [vmem:[#allocation293_spill] sm:$0xff] }
 0x42e   : > { %11796 = vst [vmem:[#allocation88_spill] sm:$0xff] %v8964_v17  ;;  %5984 = vrot.lane.b32.xlu1 %v5983_v14, %s7051_s14  ;;  %6239 = vrot.lane.b32.xlu0 %v6238_v41, %s7047_s24  ;;  %v11802_v14 = vld [vmem:[#allocation59_spill] sm:$0xff]  ;;  %v941_v47 = vmul.f32 %v8709_v5, %v11806_v38  ;;  %v11814_v38 = vld [vmem:[#allocation73_spill] sm:$0xff] }
 0x42f   : > { %v937_v41 = vmul.f32 %v8692_v28, %v11802_v14 }
 0x430   : > { %v8974_v57 = vpop.permute.xlu1 %2500 }
 0x431   : > { %11800 = vst [vmem:[#allocation99_spill] sm:$0xff] %v8974_v57  ;;  %v8976_v25 = vpop.permute.xlu0 %5929  ;;  %v6013_v59 = vpack.i.bf16 %v938_v55, %v937_v41  ;;  %v11818_v57 = vld [vmem:[#allocation77_spill] sm:$0xff] }
 0x432   : > { %11801 = vst [vmem:[#allocation21_spill] sm:$0xff] %v8976_v25  ;;  %5994 = vrot.lane.b32.xlu1 %v5993_v24, %s7051_s14  ;;  %6249 = vrot.lane.b32.xlu0 %v6248_v11, %s7049_s30  ;;  %v11807_v24 = vld [vmem:[#allocation56_spill] sm:$0xff]  ;;  %v11817_v25 = vld [vmem:[#allocation66_spill] sm:$0xff] }
 0x433   : > { %v942_v11 = vmul.f32 %v8771_v23, %v11807_v24  ;;  %v1014_v24 = vmul.f32 %v8667_v37, %v11814_v38 }
 0x434   : > { %v8984_v13 = vpop.permute.xlu1 %2508 }
 0x435   : > { %11804 = vst [vmem:[#allocation22_spill] sm:$0xff] %v8984_v13  ;;  %v8986_v32 = vpop.permute.xlu0 %5939  ;;  %v6023_v14 = vpack.i.bf16 %v942_v11, %v941_v47  ;;  %v945_v13 = vmul.f32 %v8784_v52, %v11810_v48  ;;  %v11815_v47 = vld [vmem:[#allocation71_spill] sm:$0xff] }
 0x436   : > { %11805 = vst [vmem:[#allocation92_spill] sm:$0xff] %v8986_v32  ;;  %6004 = vrot.lane.b32.xlu1 %v6003_v18, %s7052_s15  ;;  %v11811_v32 = vld [vmem:[#allocation60_spill] sm:$0xff]  ;;  %v1013_v11 = vmul.f32 %v8681_v20, %v11815_v47 }
 0x437   : > { %v946_v18 = vmul.f32 %v8789_v36, %v11811_v32 }
 0x438   : > { %v8993_v12 = vpop.permute.xlu1 %2516 }
 0x439   : > { %11808 = vst [vmem:[#allocation103_spill] sm:$0xff] %v8993_v12  ;;  %v8995_v45 = vpop.permute.xlu0 %5949  ;;  %v6033_v12 = vpack.i.bf16 %v946_v18, %v945_v13  ;;  %v1018_v13 = vmul.f32 %v8626_v62, %v11818_v57  ;;  %v2372_v18 = vmul.f32 %v8643_v22, %v8650_v2  ;;  %v11823_v2 = vld [vmem:[#allocation191_spill] sm:$0xff] }
 0x43a   : > { %11809 = vst [vmem:[#allocation23_spill] sm:$0xff] %v8995_v45  ;;  %6014 = vrot.lane.b32.xlu1 %v6013_v59, %s7052_s15  ;;  %v2612_v59 = vmul.f32 %v8643_v22, %v8678_v35  ;;  %v2371_v35 = vmul.f32 %v8594_v10, %v8419_v26  ;;  %v11822_v26 = vld [vmem:[#allocation168_spill] sm:$0xff] }
 0x43c   : > { %v9002_v41 = vpop.permute.xlu1 %2524 }
 0x43d   : > { %11812 = vst [vmem:[#allocation24_spill] sm:$0xff] %v9002_v41  ;;  %v9004_v55 = vpop.permute.xlu0 %5959  ;;  %v6043_v41 = vpack.i.bf16 %v1014_v24, %v1013_v11  ;;  %v11821_v24 = vld [vmem:[#allocation81_spill] sm:$0xff] }
 0x43e   : > { %11813 = vst [vmem:[#allocation94_spill] sm:$0xff] %v9004_v55  ;;  %6024 = vrot.lane.b32.xlu1 %v6023_v14, %s7052_s15  ;;  %v1017_v14 = vmul.f32 %v8692_v28, %v11817_v25  ;;  %v1022_v57 = vmul.f32 %v8771_v23, %v11821_v24 }
 0x440   : > { %v6053_v11 = vpack.i.bf16 %v1018_v13, %v1017_v14  ;;  %v11826_v14 = vld [vmem:[#allocation85_spill] sm:$0xff] }
 0x441   : > { %v2549_v48 = vpop.permute.xlu1 %2548  ;;  %v9013_v45 = vpop.permute.xlu0 %5969  ;;  %v1026_v13 = vmul.f32 %v8789_v36, %v11826_v14 }
 0x442   : > { %11816 = vst [vmem:[#allocation109_spill] sm:$0xff] %v9013_v45  ;;  %v2611_v32 = vmul.f32 %v8594_v10, %v2549_v48  ;;  %6034 = vrot.lane.b32.xlu1 %v6033_v12, %s7052_s15  ;;  %v11820_v12 = vld [vmem:[#allocation70_spill] sm:$0xff]  ;;  %v1574_v48 = vmul.f32 %v8667_v37, %v11822_v26  ;;  %v11827_v26 = vld [vmem:[#allocation228_spill] sm:$0xff] }
 0x443   : > { %v1021_v25 = vmul.f32 %v8709_v5, %v11820_v12 }
 0x444   : > { %v6258_v38 = vpack.i.bf16 %v2612_v59, %v2611_v32  ;;  %v1573_v59 = vmul.f32 %v8681_v20, %v11823_v2  ;;  %v6268_v32 = vpack.i.bf16 %v2372_v18, %v2371_v35  ;;  %v1894_v2 = vmul.f32 %v8667_v37, %v11827_v26  ;;  %v11828_v35 = vld [vmem:[#allocation259_spill] sm:$0xff] }
 0x445   : > { %v9025_v47 = vpop.permute.xlu1 %2556  ;;  %v9027_v45 = vpop.permute.xlu0 %5979  ;;  %v1893_v18 = vmul.f32 %v8681_v20, %v11828_v35 }
 0x446   : > { %11819 = vst [vmem:[#allocation26_spill] sm:$0xff] %v9027_v45  ;;  %6044 = vrot.lane.b32.xlu1 %v6043_v41, %s7053_s17  ;;  %6259 = vrot.lane.b32.xlu0 %v6258_v38, %s7049_s30  ;;  %v6063_v41 = vpack.i.bf16 %v1022_v57, %v1021_v25  ;;  %v11825_v38 = vld [vmem:[#allocation74_spill] sm:$0xff]  ;;  %v6278_v24 = vpack.i.bf16 %v1574_v48, %v1573_v59 }
 0x447   : > { %v1025_v12 = vmul.f32 %v8784_v52, %v11825_v38  ;;  %v11830_v25 = vld [vmem:[#allocation78_spill] sm:$0xff]  ;;  %v11832_v38 = vld [vmem:[#allocation277_spill] sm:$0xff] }
 0x448   : > { %v1094_v57 = vmul.f32 %v8667_v37, %v11830_v25  ;;  %v1974_v14 = vmul.f32 %v8667_v37, %v11832_v38  ;;  %v11835_v25 = vld [vmem:[#allocation82_spill] sm:$0xff] }
 0x449   : > { %v9039_v55 = vpop.permute.xlu1 %2560  ;;  %v9041_v45 = vpop.permute.xlu0 %5989  ;;  %v6073_v59 = vpack.i.bf16 %v1026_v13, %v1025_v12  ;;  %v11836_v12 = vld [vmem:[#allocation93_spill] sm:$0xff] }
 0x44a   : > { %11824 = vst [vmem:[#allocation98_spill] sm:$0xff] %v9041_v45  ;;  %6054 = vrot.lane.b32.xlu1 %v6053_v11, %s7053_s17  ;;  %6269 = vrot.lane.b32.xlu0 %v6268_v32, %s7054_s18  ;;  %v11831_v11 = vld [vmem:[#allocation89_spill] sm:$0xff]  ;;  %v6288_v32 = vpack.i.bf16 %v1894_v2, %v1893_v18  ;;  %v1097_v13 = vmul.f32 %v8692_v28, %v11836_v12  ;;  %v11837_v2 = vld [vmem:[#allocation258_spill] sm:$0xff]  ;;  %v11842_v12 = vld [vmem:[#allocation288_spill] sm:$0xff] }
 0x44b   : > { %v1093_v48 = vmul.f32 %v8681_v20, %v11831_v11  ;;  %v1098_v11 = vmul.f32 %v8626_v62, %v11835_v25  ;;  %v2054_v18 = vmul.f32 %v8667_v37, %v11837_v2 }
 0x44d   : > { %v9053_v17 = vpop.permute.xlu1 %2568  ;;  %v9055_v45 = vpop.permute.xlu0 %5999  ;;  %v6093_v25 = vpack.i.bf16 %v1098_v11, %v1097_v13  ;;  %v11845_v11 = vld [vmem:[#allocation101_spill] sm:$0xff] }
 0x44e   : > { %11829 = vst [vmem:[#allocation113_spill] sm:$0xff] %v9055_v45  ;;  %6064 = vrot.lane.b32.xlu1 %v6063_v41, %s7053_s17  ;;  %6279 = vrot.lane.b32.xlu0 %v6278_v24, %s7052_s15  ;;  %v11834_v45 = vld [vmem:[#allocation275_spill] sm:$0xff]  ;;  %v6083_v24 = vpack.i.bf16 %v1094_v57, %v1093_v48  ;;  %v11840_v57 = vld [vmem:[#allocation86_spill] sm:$0xff]  ;;  %v1105_v13 = vmul.f32 %v8784_v52, %v11845_v11  ;;  %v11851_v11 = vld [vmem:[#allocation96_spill] sm:$0xff] }
 0x44f   : > { %v1973_v41 = vmul.f32 %v8681_v20, %v11834_v45  ;;  %v1102_v48 = vmul.f32 %v8771_v23, %v11840_v57 }
 0x451   : > { %v9065_v26 = vpop.permute.xlu1 %2576  ;;  %v9067_v35 = vpop.permute.xlu0 %6009  ;;  %v6298_v38 = vpack.i.bf16 %v1974_v14, %v1973_v41  ;;  %v2214_v14 = vmul.f32 %v8667_v37, %v11842_v12 }
 0x452   : > { %11833 = vst [vmem:[#allocation25_spill] sm:$0xff] %v9067_v35  ;;  %6074 = vrot.lane.b32.xlu1 %v6073_v59, %s7053_s17  ;;  %6289 = vrot.lane.b32.xlu0 %v6288_v32, %s7048_s27  ;;  %v2053_v35 = vmul.f32 %v8681_v20, %v11838_v8  ;;  %v11841_v59 = vld [vmem:[#allocation97_spill] sm:$0xff]  ;;  %v2213_v8 = vmul.f32 %v8681_v20, %v8476_v51 }
 0x453   : > { %v1101_v32 = vmul.f32 %v8709_v5, %v11841_v59  ;;  %v2533_v51 = vmul.f32 %v8681_v20, %v8936_v46 }
 0x454   : > { %v6308_v41 = vpack.i.bf16 %v2054_v18, %v2053_v35  ;;  %v6318_v59 = vpack.i.bf16 %v2214_v14, %v2213_v8  ;;  %v2534_v35 = vmul.f32 %v8667_v37, %v8585_v44  ;;  %v2294_v14 = vmul.f32 %v8667_v37, %v8567_v49  ;;  %v11848_v44 = vld [vmem:[#allocation105_spill] sm:$0xff]  ;;  %v11852_v49 = vld [vmem:[#allocation111_spill] sm:$0xff] }
 0x455   : > { %v9081_v16 = vpop.permute.xlu1 %2584  ;;  %v9083_v45 = vpop.permute.xlu0 %6019  ;;  %v1173_v8 = vmul.f32 %v8681_v20, %v11848_v44 }
 0x456   : > { %11839 = vst [vmem:[#allocation28_spill] sm:$0xff] %v9083_v45  ;;  %6084 = vrot.lane.b32.xlu1 %v6083_v24, %s7054_s18  ;;  %6299 = vrot.lane.b32.xlu0 %v6298_v38, %s7049_s30  ;;  %v6103_v24 = vpack.i.bf16 %v1102_v48, %v1101_v32  ;;  %v11844_v38 = vld [vmem:[#allocation90_spill] sm:$0xff]  ;;  %v11847_v48 = vld [vmem:[#allocation107_spill] sm:$0xff] }
 0x457   : > { %v1106_v57 = vmul.f32 %v8789_v36, %v11844_v38  ;;  %v1174_v32 = vmul.f32 %v8667_v37, %v11847_v48  ;;  %v11854_v48 = vld [vmem:[#allocation159_spill] sm:$0xff] }
 0x458   : > { %v1415_v44 = vmul.f32 %v8654_v54, %v11854_v48 }
 0x459   : > { %v9095_v2 = vpop.permute.xlu1 %2592  ;;  %v9097_v45 = vpop.permute.xlu0 %6029 }
 0x45a   : > { %11843 = vst [vmem:[#allocation27_spill] sm:$0xff] %v9097_v45  ;;  %6094 = vrot.lane.b32.xlu1 %v6093_v25, %s7054_s18  ;;  %6309 = vrot.lane.b32.xlu0 %v6308_v41, %s7050_s13  ;;  %v6113_v25 = vpack.i.bf16 %v1106_v57, %v1105_v13  ;;  %v6328_v41 = vpack.i.bf16 %v2534_v35, %v2533_v51  ;;  %v11853_v35 = vld [vmem:[#allocation140_spill] sm:$0xff] }
 0x45b   : > { %v1177_v57 = vmul.f32 %v8692_v28, %v11851_v11  ;;  %v6123_v13 = vpack.i.bf16 %v1174_v32, %v1173_v8  ;;  %v1416_v51 = vmul.f32 %v8613_v15, %v11853_v35  ;;  %v11859_v35 = vld [vmem:[#allocation154_spill] sm:$0xff] }
 0x45c   : > { %v1495_v48 = vmul.f32 %v8654_v54, %v11859_v35 }
 0x45d   : > { %v9109_v18 = vpop.permute.xlu1 %2600  ;;  %v9111_v12 = vpop.permute.xlu0 %6039 }
 0x45e   : > { %11846 = vst [vmem:[#allocation102_spill] sm:$0xff] %v9109_v18  ;;  %6104 = vrot.lane.b32.xlu1 %v6103_v24, %s7054_s18  ;;  %6319 = vrot.lane.b32.xlu0 %v6318_v59, %s7052_s15  ;;  %v2293_v24 = vmul.f32 %v8681_v20, %v8557_v53  ;;  %v1178_v59 = vmul.f32 %v8626_v62, %v11852_v49 }
 0x45f   : > { %v6348_v49 = vpack.i.bf16 %v1416_v51, %v1415_v44  ;;  %v11864_v51 = vld [vmem:[#allocation119_spill] sm:$0xff] }
 0x460   : > { %v6338_v45 = vpack.i.bf16 %v2294_v14, %v2293_v24  ;;  %v6133_v11 = vpack.i.bf16 %v1178_v59, %v1177_v57  ;;  %v11860_v14 = vld [vmem:[#allocation177_spill] sm:$0xff]  ;;  %v1186_v44 = vmul.f32 %v8789_v36, %v11864_v51  ;;  %v11871_v51 = vld [vmem:[#allocation211_spill] sm:$0xff] }
 0x461   : > { %v9121_v46 = vpop.permute.xlu1 %2608  ;;  %v9123_v38 = vpop.permute.xlu0 %6049  ;;  %v1496_v24 = vmul.f32 %v8613_v15, %v11860_v14  ;;  %v11866_v14 = vld [vmem:[#allocation245_spill] sm:$0xff] }
 0x462   : > { %11849 = vst [vmem:[#allocation117_spill] sm:$0xff] %v9121_v46  ;;  %11850 = vst [vmem:[#allocation29_spill] sm:$0xff] %v9123_v38  ;;  %6114 = vrot.lane.b32.xlu1 %v6113_v25, %s7054_s18  ;;  %6329 = vrot.lane.b32.xlu0 %v6328_v41, %s7048_s27  ;;  %v11857_v25 = vld [vmem:[#allocation100_spill] sm:$0xff]  ;;  %v11858_v41 = vld [vmem:[#allocation115_spill] sm:$0xff] }
 0x463   : > { %v1181_v32 = vmul.f32 %v8709_v5, %v11857_v25  ;;  %v1182_v8 = vmul.f32 %v8771_v23, %v11858_v41  ;;  %v6879_v5 = vld [vmem:[%s11211_s7] sm:$0xff]   ;;  %v6358_v25 = vpack.i.bf16 %v1496_v24, %v1495_v48  ;;  %v11865_v41 = vld [vmem:[#allocation214_spill] sm:$0xff]  ;;  %v6881_v36 = vld [vmem:[%s11211_s7 + $0x8] sm:$0xff]  }
 0x464   : > { %v11863_v23 = vld [vmem:[#allocation104_spill] sm:$0xff]  ;;  %v1815_v35 = vmul.f32 %v8654_v54, %v11865_v41  ;;  %v11869_v48 = vld [vmem:[#allocation123_spill] sm:$0xff]  ;;  %v1656_v41 = vmul.f32 %v8613_v15, %v11871_v51 }
 0x465   : > { %v9137_v38 = vpop.permute.xlu1 %5804  ;;  %v9139_v53 = vpop.permute.xlu0 %6059  ;;  %v1185_v57 = vmul.f32 %v8784_v52, %v11863_v23  ;;  %v6143_v59 = vpack.i.bf16 %v1182_v8, %v1181_v32  ;;  %v11868_v32 = vld [vmem:[#allocation108_spill] sm:$0xff]  ;;  %v1253_v24 = vmul.f32 %v8681_v20, %v11869_v48 }
 0x466   : > { %11855 = vst [vmem:[#allocation30_spill] sm:$0xff] %v9137_v38  ;;  %11856 = vst [vmem:[#allocation106_spill] sm:$0xff] %v9139_v53  ;;  %6124 = vrot.lane.b32.xlu1 %v6123_v13, %s7047_s24  ;;  %6339 = vrot.lane.b32.xlu0 %v6338_v45, %s7053_s17  ;;  %v6878_v13 = vld [vmem:[%s11211_s7 + $0x40] sm:$0xff]   ;;  %v1254_v8 = vmul.f32 %v8667_v37, %v11868_v32  ;;  %v12071_v38 = vld [vmem:[#allocation249_spill] sm:$0xff] }
 0x467   : > { %5566 = vmatprep.subr.bf16.mxu0 %v6878_v13  ;;  %v6153_v13 = vpack.i.bf16 %v1186_v44, %v1185_v57  ;;  %v6883_v57 = vld [vmem:[%s11211_s7 + $0x10] sm:$0xff]   ;;  %v11874_v44 = vld [vmem:[#allocation112_spill] sm:$0xff] }
 0x468   : > { %5567 = vmatpush3.bf16.msra.mxu0 %v6879_v5  ;;  %v11870_v5 = vld [vmem:[#allocation184_spill] sm:$0xff] }
 0x469   : > { %v9154_v53 = vpop.permute.xlu1 %5814  ;;  %v9156_v45 = vpop.permute.xlu0 %6069  ;;  %v1655_v23 = vmul.f32 %v8654_v54, %v11870_v5  ;;  %v11876_v5 = vld [vmem:[#allocation200_spill] sm:$0xff] }
 0x46a   : > { %11861 = vst [vmem:[#allocation121_spill] sm:$0xff] %v9154_v53  ;;  %11862 = vst [vmem:[#allocation32_spill] sm:$0xff] %v9156_v45  ;;  %6134 = vrot.lane.b32.xlu1 %v6133_v11, %s7047_s24  ;;  %6349 = vrot.lane.b32.xlu0 %v6348_v49, %s7050_s13  ;;  %v1816_v45 = vmul.f32 %v8613_v15, %v11866_v14  ;;  %v6880_v11 = vld [vmem:[%s11211_s7 + $0x48] sm:$0xff]   ;;  %v1736_v51 = vmul.f32 %v8613_v15, %v11876_v5 }
 0x46b   : > { %5568 = vmatprep.subr.bf16.mxu0 %v6880_v11  ;;  %v6884_v11 = vld [vmem:[%s11211_s7 + $0x80] sm:$0xff]  }
 0x46c   : > { %v6368_v14 = vpack.i.bf16 %v1816_v45, %v1815_v35  ;;  %5569 = vmatpush3.bf16.msra.mxu0 %v6881_v36  ;;  %v1258_v45 = vmul.f32 %v8626_v62, %v11874_v44  ;;  %v6163_v35 = vpack.i.bf16 %v1254_v8, %v1253_v24  ;;  %v11875_v36 = vld [vmem:[#allocation127_spill] sm:$0xff]  ;;  %5100 = vmatpush1.bf16.msra.mxu1 %v6884_v11  ;;  %v11882_v44 = vmov 0   ;;  %v6887_v11 = vld [vmem:[%s11211_s7 + $0x88] sm:$0xff]  }
 0x46d   : > { %v9174_v49 = vpop.permute.xlu1 %5824  ;;  %v9176_v52 = vpop.permute.xlu0 %6079  ;;  %v1257_v48 = vmul.f32 %v8692_v28, %v11875_v36  ;;  %v6885_v8 = vld [vmem:[%s11211_s7 + $0x58] sm:$0xff]   ;;  %5101 = vmatprep.subr.bf16.mxu1 %v11882_v44 }
 0x46e   : > { %11867 = vst [vmem:[#allocation31_spill] sm:$0xff] %v9174_v49  ;;  %6144 = vrot.lane.b32.xlu1 %v6143_v59, %s7047_s24  ;;  %6359 = vrot.lane.b32.xlu0 %v6358_v25, %s7051_s14  ;;  %v6882_v59 = vld [vmem:[%s11211_s7 + $0x50] sm:$0xff]   ;;  %v11877_v49 = vld [vmem:[#allocation227_spill] sm:$0xff] }
 0x46f   : > { %5570 = vmatprep.subr.bf16.mxu0 %v6882_v59  ;;  %v6886_v59 = vld [vmem:[%s11211_s7 + $0x18] sm:$0xff]   ;;  %v6173_v36 = vpack.i.bf16 %v1258_v45, %v1257_v48  ;;  %v6889_v45 = vld [vmem:[%s11211_s7 + $0x20] sm:$0xff]  }
 0x470   : > { %5571 = vmatpush3.bf16.msra.mxu0 %v6883_v57  ;;  %5102 = vmatpush1.bf16.msra.mxu1 %v6887_v11 }
 0x471   : > { %v9194_v25 = vpop.permute.xlu1 %5834  ;;  %v9196_v32 = vpop.permute.xlu0 %6089  ;;  %5572 = vmatprep.subr.bf16.mxu0 %v6885_v8  ;;  %5103 = vmatprep.subr.bf16.mxu1 %v11882_v44 }
 0x472   : > { %11872 = vst [vmem:[#allocation110_spill] sm:$0xff] %v9194_v25  ;;  %11873 = vst [vmem:[#allocation125_spill] sm:$0xff] %v9196_v32  ;;  %6154 = vrot.lane.b32.xlu1 %v6153_v13, %s7047_s24  ;;  %6369 = vrot.lane.b32.xlu0 %v6368_v14, %s7047_s24  ;;  %v6378_v25 = vpack.i.bf16 %v1656_v41, %v1655_v23  ;;  %v1735_v13 = vmul.f32 %v8654_v54, %v11877_v49  ;;  %v11880_v23 = vld [vmem:[#allocation136_spill] sm:$0xff]  ;;  %v11881_v41 = vld [vmem:[#allocation155_spill] sm:$0xff] }
 0x473   : > { %v1411_v49 = vmul.f32 %v8594_v10, %v11880_v23  ;;  %v1412_v57 = vmul.f32 %v8643_v22, %v11881_v41  ;;  %v6888_v23 = vld [vmem:[%s11211_s7 + $0x60] sm:$0xff]   ;;  %v12008_v32 = vld [vmem:[#allocation179_spill] sm:$0xff] }
 0x474   : > { %v6388_v5 = vpack.i.bf16 %v1736_v51, %v1735_v13  ;;  %5573 = vmatpush3.bf16.msra.mxu0 %v6886_v59  ;;  %v6890_v13 = vld [vmem:[%s11211_s7 + $0x90] sm:$0xff]  }
 0x475   : > { %v9217_v24 = vpop.permute.xlu1 %5844  ;;  %v9219_v14 = vpop.permute.xlu0 %6099  ;;  %v6183_v48 = vpack.i.bf16 %v1412_v57, %v1411_v49  ;;  %5574 = vmatprep.subr.bf16.mxu0 %v6888_v23  ;;  %v2456_v49 = vmul.f32 %v8613_v15, %v8832_v7  ;;  %v6891_v57 = vld [vmem:[%s11211_s7 + $0x68] sm:$0xff]   ;;  %5104 = vmatpush1.bf16.msra.mxu1 %v6890_v13 }
 0x476   : > { %11878 = vst [vmem:[#allocation33_spill] sm:$0xff] %v9217_v24  ;;  %11879 = vst [vmem:[#allocation34_spill] sm:$0xff] %v9219_v14  ;;  %6164 = vrot.lane.b32.xlu1 %v6163_v35, %s7048_s27  ;;  %6379 = vrot.lane.b32.xlu0 %v6378_v25, %s7053_s17  ;;  %v11883_v14 = vld [vmem:[#allocation274_spill] sm:$0xff]  ;;  %v2136_v25 = vmul.f32 %v8613_v15, %v8401_v4 }
 0x477   : > { %v2135_v35 = vmul.f32 %v8654_v54, %v11883_v14  ;;  %v11886_v4 = vld [vmem:[#allocation166_spill] sm:$0xff]  ;;  %v11887_v14 = vld [vmem:[#allocation189_spill] sm:$0xff]  ;;  %5105 = vmatprep.subr.bf16.mxu1 %v11882_v44 }
 0x478   : > { %v1571_v51 = vmul.f32 %v8594_v10, %v11886_v4  ;;  %v1572_v59 = vmul.f32 %v8643_v22, %v11887_v14  ;;  %5575 = vmatpush3.bf16.msra.mxu0 %v6889_v45  ;;  %v6893_v4 = vld [vmem:[%s11211_s7 + $0x98] sm:$0xff]   ;;  %v11891_v14 = vld [vmem:[#allocation226_spill] sm:$0xff] }
 0x479   : > { %v9241_v8 = vpop.permute.xlu1 %5854  ;;  %v9243_v41 = vpop.permute.xlu0 %6109  ;;  %v6398_v11 = vpack.i.bf16 %v2136_v25, %v2135_v35  ;;  %v6892_v35 = vld [vmem:[%s11211_s7 + $0x28] sm:$0xff]   ;;  %5576 = vmatprep.subr.bf16.mxu0 %v6891_v57  ;;  %5106 = vmatpush1.bf16.msra.mxu1 %v6893_v4  ;;  %v6896_v4 = vld [vmem:[%s11211_s7 + $0xa0] sm:$0xff]  }
 0x47a   : > { %11884 = vst [vmem:[#allocation122_spill] sm:$0xff] %v9241_v8  ;;  %11885 = vst [vmem:[#allocation137_spill] sm:$0xff] %v9243_v41  ;;  %6174 = vrot.lane.b32.xlu1 %v6173_v36, %s7048_s27  ;;  %6389 = vrot.lane.b32.xlu0 %v6388_v5, %s7054_s18  ;;  %v2455_v36 = vmul.f32 %v8654_v54, %v8510_v63  ;;  %v11889_v63 = vld [vmem:[#allocation126_spill] sm:$0xff]  ;;  %v11890_v25 = vld [vmem:[#allocation145_spill] sm:$0xff]  ;;  %v6193_v13 = vpack.i.bf16 %v1572_v59, %v1571_v51 }
 0x47b   : > { %v1337_v7 = vmul.f32 %v8692_v28, %v11889_v63  ;;  %v1338_v45 = vmul.f32 %v8626_v62, %v11890_v25  ;;  %v1891_v41 = vmul.f32 %v8594_v10, %v11891_v14  ;;  %v6894_v63 = vld [vmem:[%s11211_s7 + $0x70] sm:$0xff]   ;;  %5107 = vmatprep.subr.bf16.mxu1 %v11882_v44 }
 0x47c   : > { %5577 = vmatpush3.bf16.msra.mxu0 %v6892_v35  ;;  %v6895_v51 = vld [vmem:[%s11211_s7 + $0x30] sm:$0xff]  }
 0x47d   : > { %v9265_v5 = vpop.permute.xlu1 %5864  ;;  %v9267_v23 = vpop.permute.xlu0 %6119  ;;  %v11895_v59 = vld [vmem:[#allocation242_spill] sm:$0xff]  ;;  %5578 = vmatprep.subr.bf16.mxu0 %v6894_v63  ;;  %v6418_v14 = vpack.i.bf16 %v1338_v45, %v1337_v7  ;;  %5108 = vmatpush1.bf16.msra.mxu1 %v6896_v4  ;;  %v6898_v63 = vld [vmem:[%s11211_s7 + $0x38] sm:$0xff]  }
 0x47e   : > { %11888 = vst [vmem:[#allocation36_spill] sm:$0xff] %v9265_v5  ;;  %6184 = vrot.lane.b32.xlu1 %v6183_v48, %s7050_s13  ;;  %6399 = vrot.lane.b32.xlu0 %v6398_v11, %s7051_s14  ;;  %v11892_v48 = vld [vmem:[#allocation257_spill] sm:$0xff]  ;;  %v6408_v5 = vpack.i.bf16 %v2456_v49, %v2455_v36  ;;  %v1972_v36 = vmul.f32 %v8643_v22, %v11895_v59 }
 0x47f   : > { %v1892_v11 = vmul.f32 %v8643_v22, %v11892_v48  ;;  %v11896_v49 = vld [vmem:[#allocation273_spill] sm:$0xff]  ;;  %5109 = vmatprep.subr.bf16.mxu1 %v11882_v44 }
 0x480   : > { %v1971_v35 = vmul.f32 %v8594_v10, %v11896_v49  ;;  %5579 = vmatpush3.bf16.msra.mxu0 %v6895_v51  ;;  %v11900_v51 = vld [vmem:[#allocation291_spill] sm:$0xff] }
 0x481   : > { %v9289_v57 = vpop.permute.xlu1 %5874  ;;  %v9291_v25 = vpop.permute.xlu0 %6129  ;;  %v6203_v48 = vpack.i.bf16 %v1892_v11, %v1891_v41  ;;  %v2615_v41 = vmul.f32 %v8654_v54, %v8700_v61  ;;  %v6899_v11 = vld [vmem:[%s11211_s7 + $0xa8] sm:$0xff]   ;;  %v2052_v4 = vmul.f32 %v8643_v22, %v11900_v51  ;;  %v2376_v61 = vmul.f32 %v8613_v15, %v8439_v34  ;;  %v11904_v51 = vld [vmem:[#allocation195_spill] sm:$0xff] }
 0x482   : > { %11893 = vst [vmem:[#allocation35_spill] sm:$0xff] %v9289_v57  ;;  %11894 = vst [vmem:[#allocation152_spill] sm:$0xff] %v9291_v25  ;;  %6194 = vrot.lane.b32.xlu1 %v6193_v13, %s7052_s15  ;;  %6409 = vrot.lane.b32.xlu0 %v6408_v5, %s7047_s24  ;;  %v2616_v13 = vmul.f32 %v8613_v15, %v9053_v17  ;;  %v6897_v5 = vld [vmem:[%s11211_s7 + $0x78] sm:$0xff]   ;;  %v11899_v17 = vld [vmem:[#allocation256_spill] sm:$0xff]  ;;  %v6213_v45 = vpack.i.bf16 %v1972_v36, %v1971_v35 }
 0x483   : > { %v2051_v7 = vmul.f32 %v8594_v10, %v11899_v17  ;;  %5580 = vmatprep.subr.bf16.mxu0 %v6897_v5  ;;  %5110 = vmatpush1.bf16.msra.mxu1 %v6899_v11  ;;  %v11903_v35 = vld [vmem:[#allocation172_spill] sm:$0xff]  ;;  %v1577_v34 = vmul.f32 %v8692_v28, %v11904_v51  ;;  %v11905_v15 = vld [vmem:[#allocation286_spill] sm:$0xff]  ;;  %v2532_v51 = vmul.f32 %v8643_v22, %v8920_v31  ;;  %v9379_v31 = vld [vmem:[%s7176_s12 + $0x38] sm:$0xff] }
 0x484   : > { %5581 = vmatpush3.bf16.msra.mxu0 %v6898_v63  ;;  %v1578_v5 = vmul.f32 %v8626_v62, %v11903_v35  ;;  %5111 = vmatprep.subr.bf16.mxu1 %v11882_v44  ;;  %v12025_v25 = vld [vmem:[#allocation163_spill] sm:$0xff] }
 0x485   : > { %v9311_v59 = vpop.permute.xlu1 %5884  ;;  %v9313_v49 = vpop.permute.xlu0 %6139 }
 0x486   : > { %11897 = vst [vmem:[#allocation171_spill] sm:$0xff] %v9311_v59  ;;  %11898 = vst [vmem:[#allocation37_spill] sm:$0xff] %v9313_v49  ;;  %6204 = vrot.lane.b32.xlu1 %v6203_v48, %s7048_s27  ;;  %6419 = vrot.lane.b32.xlu0 %v6418_v14, %s7049_s30  ;;  %v2375_v14 = vmul.f32 %v8654_v54, %v8686_v0  ;;  %v6428_v48 = vpack.i.bf16 %v2616_v13, %v2615_v41  ;;  %v6900_v41 = vld [vmem:[%s11211_s7 + $0xb0] sm:$0xff]   ;;  %v12072_v59 = vld [vmem:[#allocation268_spill] sm:$0xff] }
 0x487   : > { %v2211_v54 = vmul.f32 %v8594_v10, %v11905_v15  ;;  %v6223_v0 = vpack.i.bf16 %v2052_v4, %v2051_v7  ;;  %v2212_v13 = vmul.f32 %v8643_v22, %v8466_v9  ;;  %v11908_v7 = vld [vmem:[#allocation263_spill] sm:$0xff]  ;;  %5112 = vmatpush1.bf16.msra.mxu1 %v6900_v41  ;;  %v6448_v9 = vpack.i.bf16 %v1578_v5, %v1577_v34  ;;  %v11911_v5 = vld [vmem:[#allocation246_spill] sm:$0xff] }
 0x488   : > { %v6438_v63 = vpack.i.bf16 %v2376_v61, %v2375_v14  ;;  %v1897_v4 = vmul.f32 %v8692_v28, %v11908_v7  ;;  %v6937_v14 = vld [vmem:[%s7176_s12] sm:$0xff]  ;;  %5113 = vmatprep.subr.bf16.mxu1 %v11882_v44  ;;  %v6901_v15 = vld [vmem:[%s11211_s7 + $0xb8] sm:$0xff]   ;;  %v11965_v49 = vld [vmem:[#allocation230_spill] sm:$0xff] }
 0x489   : > { %v9334_v17 = vpop.permute.xlu1 %5894  ;;  %v9336_v36 = vpop.permute.xlu0 %6149  ;;  %v6233_v61 = vpack.i.bf16 %v2212_v13, %v2211_v54  ;;  %v2531_v35 = vmul.f32 %v6937_v14, %v8574_v29  ;;  %v1977_v29 = vmul.f32 %v8692_v28, %v11911_v5  ;;  %v11912_v54 = vld [vmem:[#allocation281_spill] sm:$0xff] }
 0x48a   : > { %11901 = vst [vmem:[#allocation38_spill] sm:$0xff] %v9334_v17  ;;  %11902 = vst [vmem:[#allocation212_spill] sm:$0xff] %v9336_v36  ;;  %6214 = vrot.lane.b32.xlu1 %v6213_v45, %s7049_s30  ;;  %6429 = vrot.lane.b32.xlu0 %v6428_v48, %s7049_s30  ;;  %v11907_v48 = vld [vmem:[#allocation232_spill] sm:$0xff]  ;;  %v1978_v13 = vmul.f32 %v9379_v31, %v11912_v54  ;;  %v11918_v5 = vld [vmem:[#allocation297_spill] sm:$0xff] }
 0x48b   : > { %v1898_v10 = vmul.f32 %v8626_v62, %v11907_v48  ;;  %5114 = vmatpush1.bf16.msra.mxu1 %v6901_v15  ;;  %v2291_v48 = vmul.f32 %v6937_v14, %v8547_v60  ;;  %v6243_v7 = vpack.i.bf16 %v2532_v51, %v2531_v35  ;;  %v11916_v60 = vld [vmem:[#allocation157_spill] sm:$0xff]  ;;  %v11917_v35 = vld [vmem:[#allocation262_spill] sm:$0xff]  ;;  %v2057_v54 = vmul.f32 %v8692_v28, %v11918_v5  ;;  %v9417_v28 = vld [vmem:[%s7176_s12 + $0x40] sm:$0xff] }
 0x48c   : > { %5115 = vmatprep.subr.bf16.mxu1 %v11882_v44  ;;  %v1413_v14 = vmul.f32 %v8681_v20, %v11916_v60  ;;  %v2058_v51 = vmul.f32 %v9379_v31, %v11917_v35  ;;  %v6468_v15 = vpack.i.bf16 %v1978_v13, %v1977_v29  ;;  %v11920_v29 = vld [vmem:[#allocation114_spill] sm:$0xff] }
 0x48d   : > { %v9352_v45 = vpop.permute.xlu1 %5904  ;;  %v9354_v11 = vpop.permute.xlu0 %6159  ;;  %v6458_v34 = vpack.i.bf16 %v1898_v10, %v1897_v4  ;;  %v11915_v4 = vld [vmem:[#allocation138_spill] sm:$0xff]  ;;  %v1260_v13 = vmul.f32 %v8742_v6, %v11920_v29 }
 0x48e   : > { %11906 = vst [vmem:[#allocation239_spill] sm:$0xff] %v9352_v45  ;;  %6224 = vrot.lane.b32.xlu1 %v6223_v0, %s7050_s13  ;;  %6439 = vrot.lane.b32.xlu0 %v6438_v63, %s7054_s18  ;;  %v11913_v63 = vld [vmem:[#allocation302_spill] sm:$0xff]  ;;  %v6478_v35 = vpack.i.bf16 %v2058_v51, %v2057_v54  ;;  %v11926_v54 = vld [vmem:[#allocation243_spill] sm:$0xff] }
 0x48f   : > { %v2292_v41 = vmul.f32 %v8643_v22, %v11913_v63  ;;  %v1414_v22 = vmul.f32 %v8667_v37, %v11915_v4  ;;  %v11922_v4 = vld [vmem:[#allocation175_spill] sm:$0xff]  ;;  %v9435_v29 = vld [vmem:[%s7176_s12 + $0x10] sm:$0xff] }
 0x491   : > { %v9370_v62 = vpop.permute.xlu1 %5914  ;;  %v9372_v0 = vpop.permute.xlu0 %6169  ;;  %v6253_v63 = vpack.i.bf16 %v2292_v41, %v2291_v48  ;;  %v11921_v41 = vld [vmem:[#allocation129_spill] sm:$0xff] }
 0x492   : > { %11909 = vst [vmem:[#allocation40_spill] sm:$0xff] %v9370_v62  ;;  %11910 = vst [vmem:[#allocation39_spill] sm:$0xff] %v9372_v0  ;;  %6234 = vrot.lane.b32.xlu1 %v6233_v61, %s7052_s15  ;;  %6449 = vrot.lane.b32.xlu0 %v6448_v9, %s7052_s15  ;;  %v6902_v9 = vld [vmem:[%s11211_s7 + $0xc0] sm:$0xff]   ;;  %v1259_v48 = vmul.f32 %v9417_v28, %v11921_v41  ;;  %v9444_v41 = vld [vmem:[%s7176_s12 + $0x30] sm:$0xff]  ;;  %v2458_v62 = vmul.f32 %v9379_v31, %v8848_v50 }
 0x493   : > { %5116 = vmatpush1.bf16.msra.mxu1 %v6902_v9  ;;  %v9422_v9 = vld [vmem:[%s7176_s12 + $0x18] sm:$0xff]  ;;  %v12038_v0 = vld [vmem:[#allocation186_spill] sm:$0xff] }
 0x494   : > { %5117 = vmatprep.subr.bf16.mxu1 %v11882_v44  ;;  %v1494_v60 = vmul.f32 %v9422_v9, %v11922_v4  ;;  %v6488_v51 = vpack.i.bf16 %v1260_v13, %v1259_v48  ;;  %v2457_v4 = vmul.f32 %v9444_v41, %v8520_v3  ;;  %v11929_v48 = vld [vmem:[#allocation128_spill] sm:$0xff] }
 0x495   : > { %v9390_v61 = vpop.permute.xlu1 %5924  ;;  %v9392_v10 = vpop.permute.xlu0 %6179 }
 0x496   : > { %11914 = vst [vmem:[#allocation182_spill] sm:$0xff] %v9390_v61  ;;  %6244 = vrot.lane.b32.xlu1 %v6243_v7, %s7048_s27  ;;  %6459 = vrot.lane.b32.xlu0 %v6458_v34, %s7048_s27  ;;  %v6903_v34 = vld [vmem:[%s11211_s7 + $0xc8] sm:$0xff]   ;;  %v6263_v7 = vpack.i.bf16 %v1414_v22, %v1413_v14 }
 0x497   : > { %5118 = vmatpush1.bf16.msra.mxu1 %v6903_v34  ;;  %v11925_v22 = vld [vmem:[#allocation173_spill] sm:$0xff]  ;;  %v1814_v34 = vmul.f32 %v9422_v9, %v11926_v54  ;;  %v6498_v54 = vpack.i.bf16 %v2458_v62, %v2457_v4  ;;  %v2618_v62 = vmul.f32 %v9379_v31, %v9065_v26  ;;  %v2377_v26 = vmul.f32 %v9444_v41, %v8703_v40 }
 0x498   : > { %5119 = vmatprep.subr.bf16.mxu1 %v11882_v44  ;;  %v1493_v14 = vmul.f32 %v9435_v29, %v11925_v22  ;;  %v11943_v40 = vld [vmem:[#allocation197_spill] sm:$0xff] }
 0x499   : > { %v9408_v37 = vpop.permute.xlu1 %5934  ;;  %v9410_v20 = vpop.permute.xlu0 %6189 }
 0x49a   : > { %11919 = vst [vmem:[#allocation205_spill] sm:$0xff] %v9408_v37  ;;  %6254 = vrot.lane.b32.xlu1 %v6253_v63, %s7053_s17  ;;  %6469 = vrot.lane.b32.xlu0 %v6468_v15, %s7049_s30  ;;  %v6904_v15 = vld [vmem:[%s11211_s7 + $0xd0] sm:$0xff]   ;;  %v6273_v44 = vpack.i.bf16 %v1494_v60, %v1493_v14  ;;  %v1339_v60 = vmul.f32 %v9417_v28, %v11929_v48 }
 0x49b   : > { %5120 = vmatpush1.bf16.msra.mxu1 %v6904_v15  ;;  %v11931_v15 = vld [vmem:[#allocation209_spill] sm:$0xff] }
 0x49c   : > { %v1654_v50 = vmul.f32 %v9422_v9, %v11931_v15 }
 0x49d   : > { %v9430_v5 = vpop.permute.xlu1 %5944  ;;  %v9432_v63 = vpop.permute.xlu0 %6199 }
 0x49e   : > { %11923 = vst [vmem:[#allocation43_spill] sm:$0xff] %v9430_v5  ;;  %11924 = vst [vmem:[#allocation196_spill] sm:$0xff] %v9432_v63  ;;  %6264 = vrot.lane.b32.xlu1 %v6263_v7, %s7050_s13  ;;  %6479 = vrot.lane.b32.xlu0 %v6478_v35, %s7050_s13  ;;  %v11928_v7 = vld [vmem:[#allocation241_spill] sm:$0xff]  ;;  %v11930_v35 = vld [vmem:[#allocation147_spill] sm:$0xff] }
 0x49f   : > { %v1813_v13 = vmul.f32 %v9435_v29, %v11928_v7  ;;  %v1340_v3 = vmul.f32 %v8742_v6, %v11930_v35  ;;  %v11933_v7 = vld [vmem:[#allocation207_spill] sm:$0xff]  ;;  %v11935_v6 = vld [vmem:[#allocation225_spill] sm:$0xff] }
 0x4a0   : > { %v1733_v35 = vmul.f32 %v9435_v29, %v11935_v6 }
 0x4a1   : > { %v9450_v57 = vpop.permute.xlu1 %5954  ;;  %v9452_v22 = vpop.permute.xlu0 %6209  ;;  %v6283_v14 = vpack.i.bf16 %v1814_v34, %v1813_v13  ;;  %v6508_v15 = vpack.i.bf16 %v1340_v3, %v1339_v60  ;;  %v2378_v3 = vmul.f32 %v9379_v31, %v8449_v39  ;;  %v11942_v39 = vld [vmem:[#allocation174_spill] sm:$0xff] }
 0x4a2   : > { %11927 = vst [vmem:[#allocation223_spill] sm:$0xff] %v9450_v57  ;;  %6274 = vrot.lane.b32.xlu1 %v6273_v44, %s7051_s14  ;;  %6489 = vrot.lane.b32.xlu0 %v6488_v51, %s7048_s27  ;;  %v1653_v44 = vmul.f32 %v9435_v29, %v11933_v7  ;;  %v11934_v51 = vld [vmem:[#allocation198_spill] sm:$0xff]  ;;  %v11938_v7 = vld [vmem:[#allocation311_spill] sm:$0xff] }
 0x4a3   : > { %v1734_v48 = vmul.f32 %v9422_v9, %v11934_v51  ;;  %v2134_v60 = vmul.f32 %v9422_v9, %v11938_v7  ;;  %v11940_v51 = vld [vmem:[#allocation309_spill] sm:$0xff] }
 0x4a4   : > { %v6293_v34 = vpack.i.bf16 %v1654_v50, %v1653_v44 }
 0x4a5   : > { %v9464_v57 = vpop.permute.xlu1 %5964  ;;  %v9466_v36 = vpop.permute.xlu0 %6219 }
 0x4a6   : > { %11932 = vst [vmem:[#allocation42_spill] sm:$0xff] %v9464_v57  ;;  %6284 = vrot.lane.b32.xlu1 %v6283_v14, %s7047_s24  ;;  %6499 = vrot.lane.b32.xlu0 %v6498_v54, %s7047_s24  ;;  %v2617_v14 = vmul.f32 %v9444_v41, %v8717_v21  ;;  %v6303_v54 = vpack.i.bf16 %v1734_v48, %v1733_v35  ;;  %v9501_v48 = vld [vmem:[%s7176_s12 + $0x48] sm:$0xff]  ;;  %v12067_v57 = vld [vmem:[#allocation314_spill] sm:$0xff] }
 0x4a7   : > { %v2133_v21 = vmul.f32 %v9435_v29, %v11940_v51  ;;  %v1580_v35 = vmul.f32 %v9501_v48, %v11942_v39  ;;  %v11945_v51 = vld [vmem:[#allocation124_spill] sm:$0xff] }
 0x4a8   : > { %v6518_v50 = vpack.i.bf16 %v2618_v62, %v2617_v14  ;;  %v6528_v62 = vpack.i.bf16 %v2378_v3, %v2377_v26  ;;  %v2454_v14 = vmul.f32 %v9422_v9, %v8821_v42  ;;  %v11947_v26 = vld [vmem:[#allocation234_spill] sm:$0xff] }
 0x4a9   : > { %v9478_v4 = vpop.permute.xlu1 %5974  ;;  %v9480_v13 = vpop.permute.xlu0 %6229 }
 0x4aa   : > { %11936 = vst [vmem:[#allocation45_spill] sm:$0xff] %v9478_v4  ;;  %11937 = vst [vmem:[#allocation41_spill] sm:$0xff] %v9480_v13  ;;  %6294 = vrot.lane.b32.xlu1 %v6293_v34, %s7053_s17  ;;  %6509 = vrot.lane.b32.xlu0 %v6508_v15, %s7049_s30  ;;  %v1579_v15 = vmul.f32 %v9417_v28, %v11943_v40  ;;  %v6313_v34 = vpack.i.bf16 %v2134_v60, %v2133_v21  ;;  %v9521_v40 = vld [vmem:[%s7176_s12 + $0x28] sm:$0xff]  ;;  %v11946_v60 = vld [vmem:[#allocation143_spill] sm:$0xff] }
 0x4ab   : > { %v1336_v3 = vmul.f32 %v9521_v40, %v11946_v60  ;;  %v1900_v21 = vmul.f32 %v9501_v48, %v11947_v26  ;;  %v11952_v60 = vld [vmem:[#allocation283_spill] sm:$0xff] }
 0x4ac   : > { %v6538_v42 = vpack.i.bf16 %v1580_v35, %v1579_v15  ;;  %v1980_v35 = vmul.f32 %v9501_v48, %v11952_v60  ;;  %v9687_v4 = vld [vmem:[%s7176_s12 + $0x78] sm:$0xff] }
 0x4ad   : > { %v9492_v44 = vpop.permute.xlu1 %5984  ;;  %v9496_v6 = vpop.permute.xlu0 %6239 }
 0x4ae   : > { %11939 = vst [vmem:[#allocation272_spill] sm:$0xff] %v9492_v44  ;;  %11941 = vst [vmem:[#allocation307_spill] sm:$0xff] %v9496_v6  ;;  %6304 = vrot.lane.b32.xlu1 %v6303_v54, %s7054_s18  ;;  %6519 = vrot.lane.b32.xlu0 %v6518_v50, %s7049_s30  ;;  %v2453_v54 = vmul.f32 %v9435_v29, %v8803_v33  ;;  %v9516_v50 = vld [vmem:[%s7176_s12 + $0x20] sm:$0xff] }
 0x4af   : > { %v1335_v39 = vmul.f32 %v9516_v50, %v11945_v51  ;;  %v11951_v51 = vld [vmem:[#allocation248_spill] sm:$0xff] }
 0x4b0   : > { %v1979_v5 = vmul.f32 %v9417_v28, %v11951_v51  ;;  %v2373_v51 = vmul.f32 %v9435_v29, %v8663_v58  ;;  %v11961_v58 = vld [vmem:[#allocation170_spill] sm:$0xff] }
 0x4b1   : > { %v9509_v7 = vpop.permute.xlu1 %5994  ;;  %v9529_v44 = vpop.permute.xlu0 %6249  ;;  %v6333_v15 = vpack.i.bf16 %v1336_v3, %v1335_v39 }
 0x4b2   : > { %11944 = vst [vmem:[#allocation44_spill] sm:$0xff] %v9509_v7  ;;  %6314 = vrot.lane.b32.xlu1 %v6313_v34, %s7051_s14  ;;  %6529 = vrot.lane.b32.xlu0 %v6528_v62, %s7054_s18  ;;  %v11948_v7 = vld [vmem:[#allocation265_spill] sm:$0xff]  ;;  %v6323_v34 = vpack.i.bf16 %v2454_v14, %v2453_v54  ;;  %11949 = vst [vmem:[#allocation48_spill] sm:$0xff] %v9529_v44  ;;  %v6558_v3 = vpack.i.bf16 %v1980_v35, %v1979_v5  ;;  %v11959_v5 = vld [vmem:[#allocation116_spill] sm:$0xff] }
 0x4b3   : > { %v1899_v33 = vmul.f32 %v9417_v28, %v11948_v7  ;;  %v2614_v7 = vmul.f32 %v9422_v9, %v9039_v55 }
 0x4b5   : > { %v9531_v62 = vpop.permute.xlu1 %6004  ;;  %v6548_v26 = vpack.i.bf16 %v1900_v21, %v1899_v33  ;;  %v11956_v21 = vld [vmem:[#allocation299_spill] sm:$0xff]  ;;  %v2374_v33 = vmul.f32 %v9422_v9, %v8429_v30 }
 0x4b6   : > { %11950 = vst [vmem:[#allocation46_spill] sm:$0xff] %v9531_v62  ;;  %6324 = vrot.lane.b32.xlu1 %v6323_v34, %s7047_s24  ;;  %6539 = vrot.lane.b32.xlu0 %v6538_v42, %s7052_s15  ;;  %v2613_v42 = vmul.f32 %v9435_v29, %v9025_v47  ;;  %v11955_v34 = vld [vmem:[#allocation264_spill] sm:$0xff]  ;;  %v2059_v55 = vmul.f32 %v9417_v28, %v11956_v21  ;;  %v11960_v30 = vld [vmem:[#allocation131_spill] sm:$0xff] }
 0x4b7   : > { %v2060_v39 = vmul.f32 %v9501_v48, %v11955_v34  ;;  %v1576_v29 = vmul.f32 %v9521_v40, %v11961_v58  ;;  %v6353_v21 = vpack.i.bf16 %v2374_v33, %v2373_v51  ;;  %v2459_v51 = vmul.f32 %v9417_v28, %v8530_v19  ;;  %v12045_v62 = vld [vmem:[#allocation188_spill] sm:$0xff] }
 0x4b8   : > { %v9541_v14 = vpop.permute.xlu0 %6259  ;;  %v6343_v60 = vpack.i.bf16 %v2614_v7, %v2613_v42  ;;  %v11962_v7 = vld [vmem:[#allocation193_spill] sm:$0xff]  ;;  %v9820_v44 = vmul.f32 %v9417_v28, %v12045_v62  ;;  %v12057_v62 = vld [vmem:[#allocation204_spill] sm:$0xff] }
 0x4b9   : > { %11953 = vst [vmem:[#allocation51_spill] sm:$0xff] %v9541_v14  ;;  %v9543_v54 = vpop.permute.xlu1 %6014  ;;  %v1575_v42 = vmul.f32 %v9516_v50, %v11962_v7  ;;  %v6568_v34 = vpack.i.bf16 %v2060_v39, %v2059_v55  ;;  %v2460_v39 = vmul.f32 %v9501_v48, %v8860_v1  ;;  %v12082_v14 = vld [vmem:[#allocation14_spill] sm:$0xff] }
 0x4ba   : > { %11954 = vst [vmem:[#allocation141_spill] sm:$0xff] %v9543_v54  ;;  %6334 = vrot.lane.b32.xlu1 %v6333_v15, %s7049_s30  ;;  %6549 = vrot.lane.b32.xlu0 %v6548_v26, %s7048_s27  ;;  %v9564_v15 = vld [vmem:[%s7176_s12 + $0x58] sm:$0xff]  ;;  %v9569_v26 = vld [vmem:[%s7176_s12 + $0x50] sm:$0xff]  ;;  %v11966_v54 = vld [vmem:[#allocation261_spill] sm:$0xff]  ;;  %v5841_v6 = vunpack.i.l.bf16 %v12082_v14 }
 0x4bb   : > { %v1262_v35 = vmul.f32 %v9564_v15, %v11959_v5  ;;  %v1261_v9 = vmul.f32 %v9569_v26, %v11960_v30  ;;  %v1896_v30 = vmul.f32 %v9521_v40, %v11965_v49  ;;  %v1895_v58 = vmul.f32 %v9516_v50, %v11966_v54  ;;  %12046 = vst [vmem:[#allocation90_spill] sm:$0xff] %v9820_v44 }
 0x4bc   : > { %v9557_v45 = vpop.permute.xlu0 %6269 }
 0x4bd   : > { %11957 = vst [vmem:[#allocation139_spill] sm:$0xff] %v9557_v45  ;;  %v9559_v47 = vpop.permute.xlu1 %6024  ;;  %v6578_v5 = vpack.i.bf16 %v1262_v35, %v1261_v9  ;;  %v11969_v35 = vld [vmem:[#allocation130_spill] sm:$0xff]  ;;  %v11970_v9 = vld [vmem:[#allocation149_spill] sm:$0xff]  ;;  %v6373_v7 = vpack.i.bf16 %v1896_v30, %v1895_v58  ;;  %v2620_v58 = vmul.f32 %v9501_v48, %v9081_v16  ;;  %v2215_v16 = vmul.f32 %v9516_v50, %v8486_v56 }
 0x4be   : > { %11958 = vst [vmem:[#allocation55_spill] sm:$0xff] %v9559_v47  ;;  %6344 = vrot.lane.b32.xlu1 %v6343_v60, %s7049_s30  ;;  %6559 = vrot.lane.b32.xlu0 %v6558_v3, %s7049_s30  ;;  %v6363_v47 = vpack.i.bf16 %v1576_v29, %v1575_v42  ;;  %v1341_v49 = vmul.f32 %v9569_v26, %v11969_v35  ;;  %v11971_v29 = vld [vmem:[#allocation244_spill] sm:$0xff]  ;;  %v11972_v42 = vld [vmem:[#allocation279_spill] sm:$0xff]  ;;  %v11985_v56 = vld [vmem:[#allocation53_spill] sm:$0xff] }
 0x4bf   : > { %v1342_v54 = vmul.f32 %v9564_v15, %v11970_v9  ;;  %v1975_v1 = vmul.f32 %v9516_v50, %v11971_v29  ;;  %v11976_v35 = vld [vmem:[#allocation295_spill] sm:$0xff] }
 0x4c0   : > { %v9577_v60 = vpop.permute.xlu0 %6279  ;;  %v2055_v9 = vmul.f32 %v9516_v50, %v11976_v35 }
 0x4c1   : > { %11963 = vst [vmem:[#allocation49_spill] sm:$0xff] %v9577_v60  ;;  %v9579_v3 = vpop.permute.xlu1 %6034  ;;  %v6598_v29 = vpack.i.bf16 %v1342_v54, %v1341_v49  ;;  %v2380_v49 = vmul.f32 %v9501_v48, %v8459_v43  ;;  %v11980_v54 = vld [vmem:[#allocation64_spill] sm:$0xff] }
 0x4c2   : > { %11964 = vst [vmem:[#allocation59_spill] sm:$0xff] %v9579_v3  ;;  %6354 = vrot.lane.b32.xlu1 %v6353_v21, %s7054_s18  ;;  %6569 = vrot.lane.b32.xlu0 %v6568_v34, %s7050_s13  ;;  %v1976_v34 = vmul.f32 %v9521_v40, %v11972_v42  ;;  %v6588_v21 = vpack.i.bf16 %v2460_v39, %v2459_v51  ;;  %v11979_v42 = vld [vmem:[#allocation290_spill] sm:$0xff] }
 0x4c4   : > { %v9589_v55 = vpop.permute.xlu0 %6289  ;;  %v6383_v30 = vpack.i.bf16 %v1976_v34, %v1975_v1  ;;  %v2379_v1 = vmul.f32 %v9417_v28, %v11980_v54 }
 0x4c5   : > { %11967 = vst [vmem:[#allocation52_spill] sm:$0xff] %v9589_v55  ;;  %v9591_v33 = vpop.permute.xlu1 %6044  ;;  %v12039_v55 = vld [vmem:[#allocation201_spill] sm:$0xff] }
 0x4c6   : > { %11968 = vst [vmem:[#allocation63_spill] sm:$0xff] %v9591_v33  ;;  %6364 = vrot.lane.b32.xlu1 %v6363_v47, %s7052_s15  ;;  %6579 = vrot.lane.b32.xlu0 %v6578_v5, %s7048_s27  ;;  %v11975_v47 = vld [vmem:[#allocation260_spill] sm:$0xff]  ;;  %v6618_v54 = vpack.i.bf16 %v2380_v49, %v2379_v1 }
 0x4c7   : > { %v2056_v5 = vmul.f32 %v9521_v40, %v11975_v47  ;;  %v11991_v49 = vld [vmem:[#allocation304_spill] sm:$0xff] }
 0x4c8   : > { %v9605_v3 = vpop.permute.xlu0 %6299  ;;  %v2295_v1 = vmul.f32 %v9516_v50, %v11991_v49 }
 0x4c9   : > { %11973 = vst [vmem:[#allocation56_spill] sm:$0xff] %v9605_v3  ;;  %v9607_v19 = vpop.permute.xlu1 %6054  ;;  %v6393_v47 = vpack.i.bf16 %v2056_v5, %v2055_v9  ;;  %v11984_v9 = vld [vmem:[#allocation199_spill] sm:$0xff]  ;;  %v12026_v3 = vld [vmem:[#allocation158_spill] sm:$0xff] }
 0x4ca   : > { %11974 = vst [vmem:[#allocation67_spill] sm:$0xff] %v9607_v19  ;;  %6374 = vrot.lane.b32.xlu1 %v6373_v7, %s7048_s27  ;;  %6589 = vrot.lane.b32.xlu0 %v6588_v21, %s7047_s24  ;;  %v2619_v7 = vmul.f32 %v9417_v28, %v8731_v27  ;;  %v2216_v21 = vmul.f32 %v9521_v40, %v11979_v42 }
 0x4cb   : > { %v1581_v43 = vmul.f32 %v9569_v26, %v11984_v9  ;;  %v2536_v42 = vmul.f32 %v9521_v40, %v11985_v56  ;;  %v11992_v9 = vld [vmem:[#allocation330_spill] sm:$0xff] }
 0x4cc   : > { %v9617_v39 = vpop.permute.xlu0 %6309  ;;  %v6608_v34 = vpack.i.bf16 %v2620_v58, %v2619_v7  ;;  %v11986_v58 = vld [vmem:[#allocation95_spill] sm:$0xff]  ;;  %v2296_v56 = vmul.f32 %v9521_v40, %v11992_v9 }
 0x4cd   : > { %11977 = vst [vmem:[#allocation60_spill] sm:$0xff] %v9617_v39  ;;  %v9619_v51 = vpop.permute.xlu1 %6064  ;;  %v2535_v7 = vmul.f32 %v9516_v50, %v11986_v58 }
 0x4ce   : > { %11978 = vst [vmem:[#allocation73_spill] sm:$0xff] %v9619_v51  ;;  %6384 = vrot.lane.b32.xlu1 %v6383_v30, %s7049_s30  ;;  %6599 = vrot.lane.b32.xlu0 %v6598_v29, %s7049_s30  ;;  %v11983_v29 = vld [vmem:[#allocation176_spill] sm:$0xff]  ;;  %v6403_v30 = vpack.i.bf16 %v2216_v21, %v2215_v16  ;;  %v11990_v21 = vld [vmem:[#allocation267_spill] sm:$0xff]  ;;  %v6423_v49 = vpack.i.bf16 %v2296_v56, %v2295_v1  ;;  %v9699_v56 = vld [vmem:[%s7176_s12 + $0x70] sm:$0xff] }
 0x4cf   : > { %v1582_v5 = vmul.f32 %v9564_v15, %v11983_v29  ;;  %v1901_v16 = vmul.f32 %v9569_v26, %v11990_v21  ;;  %v6413_v58 = vpack.i.bf16 %v2536_v42, %v2535_v7  ;;  %v11998_v7 = vld [vmem:[#allocation285_spill] sm:$0xff] }
 0x4d0   : > { %v9633_v35 = vpop.permute.xlu0 %6319  ;;  %v1982_v21 = vmul.f32 %v9564_v15, %v11998_v7  ;;  %v12004_v7 = vld [vmem:[#allocation135_spill] sm:$0xff] }
 0x4d1   : > { %11981 = vst [vmem:[#allocation71_spill] sm:$0xff] %v9633_v35  ;;  %v9635_v27 = vpop.permute.xlu1 %6074  ;;  %v9703_v37 = vmul.f32 %v9699_v56, %v12004_v7  ;;  %v1498_v7 = vmul.f32 %v9379_v31, %v12008_v32 }
 0x4d2   : > { %11982 = vst [vmem:[#allocation66_spill] sm:$0xff] %v9635_v27  ;;  %6394 = vrot.lane.b32.xlu1 %v6393_v47, %s7050_s13  ;;  %6609 = vrot.lane.b32.xlu0 %v6608_v34, %s7049_s30  ;;  %v6628_v47 = vpack.i.bf16 %v1582_v5, %v1581_v43  ;;  %v11989_v34 = vld [vmem:[#allocation236_spill] sm:$0xff]  ;;  %v11995_v5 = vld [vmem:[#allocation142_spill] sm:$0xff] }
 0x4d3   : > { %v1902_v29 = vmul.f32 %v9564_v15, %v11989_v34  ;;  %v1418_v43 = vmul.f32 %v9379_v31, %v11995_v5  ;;  %v11997_v34 = vld [vmem:[#allocation250_spill] sm:$0xff] }
 0x4d4   : > { %v9647_v51 = vpop.permute.xlu0 %6329  ;;  %v1981_v40 = vmul.f32 %v9569_v26, %v11997_v34 }
 0x4d5   : > { %11987 = vst [vmem:[#allocation77_spill] sm:$0xff] %v9647_v51  ;;  %v9649_v27 = vpop.permute.xlu1 %6084  ;;  %v6638_v42 = vpack.i.bf16 %v1902_v29, %v1901_v16  ;;  %v9694_v29 = vld [vmem:[%s7176_s12 + $0x60] sm:$0xff]  ;;  %v12003_v16 = vld [vmem:[#allocation133_spill] sm:$0xff]  ;;  %v12012_v51 = vld [vmem:[#allocation134_spill] sm:$0xff] }
 0x4d6   : > { %11988 = vst [vmem:[#allocation70_spill] sm:$0xff] %v9649_v27  ;;  %6404 = vrot.lane.b32.xlu1 %v6403_v30, %s7052_s15  ;;  %6619 = vrot.lane.b32.xlu0 %v6618_v54, %s7054_s18  ;;  %v11996_v54 = vld [vmem:[#allocation161_spill] sm:$0xff]  ;;  %v1263_v1 = vmul.f32 %v9694_v29, %v12003_v16  ;;  %v12007_v16 = vld [vmem:[#allocation156_spill] sm:$0xff]  ;;  %v9802_v46 = vmul.f32 %v9694_v29, %v12039_v55  ;;  %v12043_v27 = vld [vmem:[#allocation87_spill] sm:$0xff] }
 0x4d7   : > { %v1417_v50 = vmul.f32 %v9444_v41, %v11996_v54  ;;  %v12002_v54 = vld [vmem:[#allocation120_spill] sm:$0xff]  ;;  %v1497_v8 = vmul.f32 %v9444_v41, %v12007_v16  ;;  %v2462_v33 = vmul.f32 %v9564_v15, %v12043_v27 }
 0x4d8   : > { %v9661_v19 = vpop.permute.xlu0 %6339  ;;  %v9691_v34 = vmul.f32 %v9687_v4, %v12002_v54  ;;  %v12006_v54 = vld [vmem:[#allocation151_spill] sm:$0xff] }
 0x4d9   : > { %11993 = vst [vmem:[#allocation81_spill] sm:$0xff] %v9661_v19  ;;  %v9663_v30 = vpop.permute.xlu1 %6094  ;;  %v6433_v17 = vpack.i.bf16 %v1418_v43, %v1417_v50  ;;  %v6648_v19 = vpack.i.bf16 %v1982_v21, %v1981_v40  ;;  %v12014_v43 = vld [vmem:[#allocation153_spill] sm:$0xff]  ;;  %v12022_v40 = vld [vmem:[#allocation216_spill] sm:$0xff] }
 0x4da   : > { %11994 = vst [vmem:[#allocation168_spill] sm:$0xff] %v9663_v30  ;;  %6414 = vrot.lane.b32.xlu1 %v6413_v58, %s7048_s27  ;;  %6629 = vrot.lane.b32.xlu0 %v6628_v47, %s7052_s15  ;;  %v9678_v58 = vld [vmem:[%s7176_s12 + $0x68] sm:$0xff]  ;;  %v12000_v30 = vld [vmem:[#allocation118_spill] sm:$0xff]  ;;  %v9731_v50 = vmul.f32 %v9687_v4, %v12014_v43 }
 0x4db   : > { %v9682_v47 = vmul.f32 %v9678_v58, %v12000_v30  ;;  %v12005_v30 = vld [vmem:[#allocation132_spill] sm:$0xff]  ;;  %v9713_v53 = vmul.f32 %v9678_v58, %v12006_v54  ;;  %v9727_v54 = vmul.f32 %v9699_v56, %v12012_v51 }
 0x4dc   : > { %v9675_v9 = vpop.permute.xlu0 %6349  ;;  %12015 = vst [vmem:[#allocation259_spill] sm:$0xff] %v9731_v50  ;;  %v12017_v51 = vld [vmem:[#allocation144_spill] sm:$0xff] }
 0x4dd   : > { %11999 = vst [vmem:[#allocation191_spill] sm:$0xff] %v9675_v9  ;;  %v9684_v5 = vpop.permute.xlu1 %6104  ;;  %v12009_v9 = vld [vmem:[#allocation266_spill] sm:$0xff]  ;;  %12013 = vst [vmem:[#allocation228_spill] sm:$0xff] %v9727_v54  ;;  %v6668_v32 = vpack.i.bf16 %v9682_v47, %v1263_v1  ;;  %v6443_v1 = vpack.i.bf16 %v1498_v7, %v1497_v8  ;;  %v12027_v8 = vld [vmem:[#allocation165_spill] sm:$0xff] }
 0x4de   : > { %12001 = vst [vmem:[#allocation74_spill] sm:$0xff] %v9684_v5  ;;  %6424 = vrot.lane.b32.xlu1 %v6423_v49, %s7053_s17  ;;  %6639 = vrot.lane.b32.xlu0 %v6638_v42, %s7048_s27  ;;  %v9709_v5 = vmul.f32 %v9694_v29, %v12005_v30  ;;  %v2062_v49 = vmul.f32 %v9564_v15, %v12009_v9  ;;  %v12010_v42 = vld [vmem:[#allocation301_spill] sm:$0xff] }
 0x4df   : > { %v2061_v35 = vmul.f32 %v9569_v26, %v12010_v42  ;;  %v9744_v9 = vmul.f32 %v9501_v48, %v12017_v51  ;;  %v12018_v42 = vld [vmem:[#allocation146_spill] sm:$0xff]  ;;  %v9772_v7 = vmul.f32 %v9569_v26, %v12027_v8 }
 0x4e0   : > { %v9723_v30 = vpop.permute.xlu0 %6359  ;;  %v9748_v43 = vmul.f32 %v9564_v15, %v12018_v42  ;;  %v9764_v42 = vmul.f32 %v9417_v28, %v12025_v25  ;;  %v12033_v25 = vld [vmem:[#allocation178_spill] sm:$0xff] }
 0x4e1   : > { %12011 = vst [vmem:[#allocation85_spill] sm:$0xff] %v9723_v30  ;;  %v9733_v16 = vpop.permute.xlu1 %6114  ;;  %v6658_v21 = vpack.i.bf16 %v2062_v49, %v2061_v35  ;;  %12028 = vst [vmem:[#allocation82_spill] sm:$0xff] %v9772_v7  ;;  %v12030_v35 = vld [vmem:[#allocation160_spill] sm:$0xff] }
 0x4e2   : > { %12016 = vst [vmem:[#allocation78_spill] sm:$0xff] %v9733_v16  ;;  %6434 = vrot.lane.b32.xlu1 %v6433_v17, %s7050_s13  ;;  %6649 = vrot.lane.b32.xlu0 %v6648_v19, %s7049_s30  ;;  %12019 = vst [vmem:[#allocation89_spill] sm:$0xff] %v9748_v43  ;;  %v12020_v16 = vld [vmem:[#allocation148_spill] sm:$0xff]  ;;  %v1817_v17 = vmul.f32 %v9444_v41, %v12022_v40  ;;  %v12023_v19 = vld [vmem:[#allocation247_spill] sm:$0xff]  ;;  %v9778_v49 = vmul.f32 %v9569_v26, %v12030_v35 }
 0x4e3   : > { %v9752_v47 = vmul.f32 %v9678_v58, %v12020_v16  ;;  %v1818_v30 = vmul.f32 %v9379_v31, %v12023_v19  ;;  %v9768_v16 = vmul.f32 %v9417_v28, %v12026_v3  ;;  %v12032_v19 = vld [vmem:[#allocation181_spill] sm:$0xff]  ;;  %v12034_v3 = vld [vmem:[#allocation183_spill] sm:$0xff] }
 0x4e4   : > { %v9758_v39 = vpop.permute.xlu0 %6369  ;;  %12031 = vst [vmem:[#allocation258_spill] sm:$0xff] %v9778_v49  ;;  %v9782_v51 = vmul.f32 %v9501_v48, %v12032_v19  ;;  %v9792_v8 = vmul.f32 %v9564_v15, %v12034_v3  ;;  %v1657_v19 = vmul.f32 %v9444_v41, %v12038_v0  ;;  %v12052_v0 = vld [vmem:[#allocation327_spill] sm:$0xff]  ;;  %v12058_v49 = vld [vmem:[#allocation206_spill] sm:$0xff] }
 0x4e5   : > { %12021 = vst [vmem:[#allocation277_spill] sm:$0xff] %v9752_v47  ;;  %12024 = vst [vmem:[#allocation275_spill] sm:$0xff] %v9758_v39  ;;  %v9774_v40 = vpop.permute.xlu1 %6124  ;;  %v9786_v39 = vmul.f32 %v9678_v58, %v12033_v25  ;;  %v12036_v47 = vld [vmem:[#allocation180_spill] sm:$0xff]  ;;  %v12040_v25 = vld [vmem:[#allocation203_spill] sm:$0xff]  ;;  %v6453_v3 = vpack.i.bf16 %v1818_v30, %v1817_v17  ;;  %v2461_v55 = vmul.f32 %v9569_v26, %v12052_v0 }
 0x4e6   : > { %12029 = vst [vmem:[#allocation93_spill] sm:$0xff] %v9774_v40  ;;  %6444 = vrot.lane.b32.xlu1 %v6443_v1, %s7051_s14  ;;  %6659 = vrot.lane.b32.xlu0 %v6658_v21, %s7050_s13  ;;  %12035 = vst [vmem:[#allocation293_spill] sm:$0xff] %v9792_v8  ;;  %v9796_v35 = vmul.f32 %v9687_v4, %v12036_v47  ;;  %v9806_v1 = vmul.f32 %v9699_v56, %v12040_v25  ;;  %v12042_v21 = vld [vmem:[#allocation213_spill] sm:$0xff]  ;;  %v12047_v25 = vld [vmem:[#allocation215_spill] sm:$0xff] }
 0x4e7   : > { %v1658_v60 = vmul.f32 %v9379_v31, %v12042_v21  ;;  %v9824_v40 = vmul.f32 %v9501_v48, %v12047_v25  ;;  %v12050_v17 = vld [vmem:[#allocation167_spill] sm:$0xff]  ;;  %v12053_v25 = vld [vmem:[#allocation190_spill] sm:$0xff]  ;;  %v6678_v7 = vpack.i.bf16 %v2462_v33, %v2461_v55  ;;  %v12061_v33 = vld [vmem:[#allocation252_spill] sm:$0xff] }
 0x4e8   : > { %12037 = vst [vmem:[#allocation86_spill] sm:$0xff] %v9796_v35  ;;  %12041 = vst [vmem:[#allocation97_spill] sm:$0xff] %v9806_v1  ;;  %v9812_v47 = vpop.permute.xlu0 %6379  ;;  %v9830_v27 = vmul.f32 %v9694_v29, %v12050_v17  ;;  %v9860_v17 = vmul.f32 %v9564_v15, %v12058_v49  ;;  %v12059_v8 = vld [vmem:[#allocation238_spill] sm:$0xff]  ;;  %v9872_v55 = vmul.f32 %v9694_v29, %v12061_v33  ;;  %v12063_v0 = vld [vmem:[#allocation287_spill] sm:$0xff] }
 0x4e9   : > { %12044 = vst [vmem:[#allocation288_spill] sm:$0xff] %v9812_v47  ;;  %12048 = vst [vmem:[#allocation101_spill] sm:$0xff] %v9824_v40  ;;  %v9826_v30 = vpop.permute.xlu1 %6134  ;;  %v6463_v47 = vpack.i.bf16 %v1658_v60, %v1657_v19  ;;  %v9866_v60 = vmul.f32 %v9678_v58, %v12059_v8  ;;  %v9880_v49 = vmul.f32 %v9678_v58, %v12063_v0  ;;  %v12064_v8 = vld [vmem:[#allocation217_spill] sm:$0xff]  ;;  %v12068_v35 = vld [vmem:[#allocation231_spill] sm:$0xff] }
 0x4ea   : > { %12049 = vst [vmem:[#allocation107_spill] sm:$0xff] %v9826_v30  ;;  %12051 = vst [vmem:[#allocation105_spill] sm:$0xff] %v9830_v27  ;;  %6454 = vrot.lane.b32.xlu1 %v6453_v3, %s7047_s24  ;;  %6669 = vrot.lane.b32.xlu0 %v6668_v32, %s7048_s27  ;;  %v9842_v30 = vmul.f32 %v9569_v26, %v12053_v25  ;;  %v12054_v27 = vld [vmem:[#allocation202_spill] sm:$0xff]  ;;  %v12055_v3 = vld [vmem:[#allocation229_spill] sm:$0xff]  ;;  %v9856_v25 = vmul.f32 %v9501_v48, %v12057_v62 }
 0x4eb   : > { %v1738_v21 = vmul.f32 %v9379_v31, %v12054_v27  ;;  %v1737_v32 = vmul.f32 %v9444_v41, %v12055_v3  ;;  %v12062_v3 = vld [vmem:[#allocation269_spill] sm:$0xff]  ;;  %v9886_v27 = vmul.f32 %v9564_v15, %v12064_v8  ;;  %v2138_v1 = vmul.f32 %v9379_v31, %v12067_v57  ;;  %v12086_v40 = vld [vmem:[#allocation20_spill] sm:$0xff] }
 0x4ec   : > { %v9852_v43 = vpop.permute.xlu0 %6389  ;;  %v9876_v62 = vmul.f32 %v9694_v29, %v12062_v3  ;;  %v2622_v8 = vmul.f32 %v9564_v15, %v9095_v2  ;;  %v9914_v57 = vmul.f32 %v9678_v58, %v12072_v59  ;;  %v12077_v59 = vpack.i.bf16 %v9713_v53, %v9709_v5 }
 0x4ed   : > { %12056 = vst [vmem:[#allocation96_spill] sm:$0xff] %v9852_v43  ;;  %v9868_v19 = vpop.permute.xlu1 %6144  ;;  %v12066_v43 = vld [vmem:[#allocation276_spill] sm:$0xff]  ;;  %v6473_v0 = vpack.i.bf16 %v1738_v21, %v1737_v32  ;;  %v12074_v32 = vld [vmem:[#allocation322_spill] sm:$0xff]  ;;  %v2537_v63 = vmul.f32 %v9444_v41, %v12086_v40 }
 0x4ee   : > { %12060 = vst [vmem:[#allocation111_spill] sm:$0xff] %v9868_v19  ;;  %6464 = vrot.lane.b32.xlu1 %v6463_v47, %s7053_s17  ;;  %6679 = vrot.lane.b32.xlu0 %v6678_v7, %s7047_s24  ;;  %v12065_v19 = vld [vmem:[#allocation218_spill] sm:$0xff]  ;;  %v2137_v3 = vmul.f32 %v9444_v41, %v12066_v43  ;;  %v9898_v47 = vmul.f32 %v9417_v28, %v12068_v35  ;;  %v12069_v7 = vld [vmem:[#allocation233_spill] sm:$0xff]  ;;  %v12073_v21 = vld [vmem:[#allocation292_spill] sm:$0xff] }
 0x4ef   : > { %v9890_v33 = vmul.f32 %v9417_v28, %v12065_v19  ;;  %v9902_v61 = vmul.f32 %v9569_v26, %v12069_v7  ;;  %v9910_v43 = vmul.f32 %v9501_v48, %v12071_v38  ;;  %v2218_v35 = vmul.f32 %v9379_v31, %v12073_v21  ;;  %v12076_v38 = vld [vmem:[#allocation10_spill] sm:$0xff]  ;;  %v12078_v21 = vld [vmem:[#allocation303_spill] sm:$0xff]  ;;  %v12089_v40 = vld [vmem:[#allocation88_spill] sm:$0xff] }
 0x4f0   : > { %v9906_v19 = vpop.permute.xlu0 %6399  ;;  %v2217_v7 = vmul.f32 %v9444_v41, %v12074_v32  ;;  %v2621_v45 = vmul.f32 %v9569_v26, %v12076_v38  ;;  %v9935_v32 = vmul.f32 %v9694_v29, %v12078_v21  ;;  %v6483_v54 = vpack.i.bf16 %v2138_v1, %v2137_v3  ;;  %v12081_v38 = vld [vmem:[#allocation75_spill] sm:$0xff]  ;;  %v12084_v1 = vld [vmem:[#allocation17_spill] sm:$0xff] }
 0x4f1   : > { %12070 = vst [vmem:[#allocation140_spill] sm:$0xff] %v9906_v19  ;;  %v9920_v24 = vpop.permute.xlu1 %6154  ;;  %v12080_v19 = vld [vmem:[#allocation331_spill] sm:$0xff]  ;;  %v5881_v3 = vunpack.i.l.bf16 %v12084_v1 }
 0x4f2   : > { %12075 = vst [vmem:[#allocation159_spill] sm:$0xff] %v9920_v24  ;;  %6474 = vrot.lane.b32.xlu1 %v6473_v0, %s7054_s18  ;;  %6689 = vrot.lane.b32.xlu0 %v12077_v59, %s7049_s30  ;;  %v12079_v24 = vld [vmem:[#allocation306_spill] sm:$0xff]  ;;  %v9943_v50 = vmul.f32 %v9379_v31, %v12080_v19  ;;  %v2381_v0 = vmul.f32 %v9569_v26, %v12081_v38  ;;  %v12083_v59 = vld [vmem:[#allocation319_spill] sm:$0xff]  ;;  %v12085_v19 = vld [vmem:[#allocation12_spill] sm:$0xff]  ;;  %v5882_v38 = vunpack.i.h.bf16 %v12084_v1 }
 0x4f3   : > { %v9939_v2 = vmul.f32 %v9444_v41, %v12079_v24  ;;  %v6698_v53 = vpack.i.bf16 %v2622_v8, %v2621_v45  ;;  %v2382_v21 = vmul.f32 %v9564_v15, %v12083_v59  ;;  %v6493_v13 = vpack.i.bf16 %v2218_v35, %v2217_v7 }
 0x4f4   : > { %v9948_v5 = vpop.permute.xlu0 %6409  ;;  %v5842_v24 = vunpack.i.h.bf16 %v12082_v14  ;;  %v5801_v44 = vunpack.i.l.bf16 %v12085_v19  ;;  %v12087_v14 = vld [vmem:[#allocation57_spill] sm:$0xff]  ;;  %v5802_v35 = vunpack.i.h.bf16 %v12085_v19 }
 0x4f5   : > { %v9954_v18 = vpop.permute.xlu1 %6164  ;;  %v6513_v45 = vpack.i.bf16 %v9943_v50, %v9939_v2  ;;  %v2538_v8 = vmul.f32 %v9379_v31, %v12087_v14  ;;  %v6708_v7 = vpack.i.bf16 %v2382_v21, %v2381_v0  ;;  %v5921_v50 = vunpack.i.l.bf16 %v12089_v40 }
 0x4f6   : > { %6484 = vrot.lane.b32.xlu1 %v6483_v54, %s7051_s14  ;;  %6699 = vrot.lane.b32.xlu0 %v6698_v53, %s7049_s30  ;;  %v3652_v59 = vsel %vm3651_vm1, %v5801_v44, %v5841_v6  ;;  %v3653_v41 = vsel %vm3651_vm1, %v5802_v35, %v5842_v24  ;;  %v5922_v53 = vunpack.i.h.bf16 %v12089_v40  ;;  %v6162_v0 = vunpack.i.h.bf16 %v9354_v11  ;;  %v12091_v6 = vld [vmem:[#allocation94_spill] sm:$0xff]  ;;  %v12092_v35 = vld [vmem:[#allocation113_spill] sm:$0xff] }
 0x4f7   : > { %v3669_v54 = vsel %vm428_vm0, %v3652_v59, %v5881_v3  ;;  %v3670_v31 = vsel %vm428_vm0, %v3653_v41, %v5882_v38  ;;  %v6503_v19 = vpack.i.bf16 %v2538_v8, %v2537_v63  ;;  %v6161_v44 = vunpack.i.l.bf16 %v9354_v11 }
 0x4f8   : > { %v9968_v1 = vpop.permute.xlu0 %6419  ;;  %v5962_v21 = vunpack.i.h.bf16 %v12091_v6  ;;  %v5961_v24 = vunpack.i.l.bf16 %v12091_v6  ;;  %v6182_v3 = vunpack.i.h.bf16 %v9392_v10  ;;  %v6181_v14 = vunpack.i.l.bf16 %v9392_v10 }
 0x4f9   : > { %12088 = vst [vmem:[#allocation100_spill] sm:$0xff] %v9968_v1  ;;  %v9974_v2 = vpop.permute.xlu1 %6174  ;;  %v6002_v59 = vunpack.i.h.bf16 %v12092_v35  ;;  %v6001_v63 = vunpack.i.l.bf16 %v12092_v35  ;;  %v6122_v38 = vunpack.i.h.bf16 %v9267_v23  ;;  %v6121_v11 = vunpack.i.l.bf16 %v9267_v23 }
 0x4fa   : > { %12090 = vst [vmem:[#allocation115_spill] sm:$0xff] %v9974_v2  ;;  %6494 = vrot.lane.b32.xlu1 %v6493_v13, %s7052_s15  ;;  %6709 = vrot.lane.b32.xlu0 %v6708_v7, %s7054_s18  ;;  %v3686_v13 = vsel %vm3685_vm2, %v3669_v54, %v5921_v50  ;;  %v3687_v8 = vsel %vm3685_vm2, %v3670_v31, %v5922_v53  ;;  %v6041_v7 = vunpack.i.l.bf16 %v9111_v12 }
 0x4fb   : > { %v3770_v40 = vsel %vm3651_vm1, %v6121_v11, %v6161_v44  ;;  %v3771_v10 = vsel %vm3651_vm1, %v6122_v38, %v6162_v0  ;;  %v12093_v23 = vpack.i.bf16 %v9786_v39, %v9802_v46  ;;  %v3703_v54 = vsel %vm3702_vm3, %v3686_v13, %v5961_v24 }
 0x4fc   : > { %v9994_v6 = vpop.permute.xlu0 %6429  ;;  %v3704_v53 = vsel %vm3702_vm3, %v3687_v8, %v5962_v21  ;;  %v3786_v50 = vsel %vm428_vm0, %v3770_v40, %v6181_v14  ;;  %v3787_v31 = vsel %vm428_vm0, %v3771_v10, %v6182_v3  ;;  %v3720_v0 = vsel %vm3719_vm4, %v3703_v54, %v6001_v63 }
 0x4fd   : > { %v6185_v41 = vpop.permute.xlu1 %6184  ;;  %v3721_v44 = vsel %vm3719_vm4, %v3704_v53, %v6002_v59  ;;  %v6042_v11 = vunpack.i.h.bf16 %v9111_v12  ;;  %v6081_v46 = vunpack.i.l.bf16 %v9176_v52  ;;  %v6192_v39 = vunpack.i.h.bf16 %v9410_v20 }
 0x4fe   : > { %v6187_v1 = vunpack.i.h.bf16 %v6185_v41  ;;  %v6186_v35 = vunpack.i.l.bf16 %v6185_v41  ;;  %6504 = vrot.lane.b32.xlu1 %v6503_v19, %s7048_s27  ;;  %6719 = vrot.lane.b32.xlu0 %v12093_v23, %s7052_s15  ;;  %v6191_v21 = vunpack.i.l.bf16 %v9410_v20  ;;  %v6082_v14 = vunpack.i.h.bf16 %v9176_v52 }
 0x4ff   : > { %v12094_v59 = vpack.i.bf16 %v9866_v60, %v9876_v62  ;;  %v3737_v12 = vsel %vm3736_vm5, %v3720_v0, %v6041_v7  ;;  %v6211_v63 = vunpack.i.l.bf16 %v9452_v22  ;;  %v6222_v52 = vunpack.i.h.bf16 %v9466_v36  ;;  %v12098_v0 = vld [vmem:[#allocation220_spill] sm:$0xff] }
 0x500   : > { %v3802_v38 = vsel %vm3685_vm2, %v3786_v50, %v6186_v35  ;;  %v3803_v19 = vsel %vm3685_vm2, %v3787_v31, %v6187_v1  ;;  %v6212_v1 = vunpack.i.h.bf16 %v9452_v22  ;;  %v6221_v41 = vunpack.i.l.bf16 %v9466_v36  ;;  %v12128_v31 = vld [vmem:[#allocation90_spill] sm:$0xff] }
 0x501   : > { %v6195_v24 = vpop.permute.xlu1 %6194  ;;  %v3818_v20 = vsel %vm3702_vm3, %v3802_v38, %v6191_v21  ;;  %v3819_v8 = vsel %vm3702_vm3, %v3803_v19, %v6192_v39  ;;  %v3738_v10 = vsel %vm3736_vm5, %v3721_v44, %v6042_v11  ;;  %v3754_v35 = vsel %vm3753_vm6, %v3737_v12, %v6081_v46  ;;  %v12100_v19 = vld [vmem:[#allocation251_spill] sm:$0xff]  ;;  %v12101_v39 = vld [vmem:[#allocation254_spill] sm:$0xff] }
 0x502   : > { %v6197_v3 = vunpack.i.h.bf16 %v6195_v24  ;;  %v6196_v13 = vunpack.i.l.bf16 %v6195_v24  ;;  %6514 = vrot.lane.b32.xlu1 %v6513_v45, %s7053_s17  ;;  %6729 = vrot.lane.b32.xlu0 %v12094_v59, %s7048_s27  ;;  %v10026_v45 = vpop.permute.xlu0 %6439  ;;  %v12096_v36 = vpack.i.bf16 %v9744_v9, %v9764_v42  ;;  %v12097_v23 = vpack.i.bf16 %v9880_v49, %v9872_v55  ;;  %v12099_v49 = vld [vmem:[#allocation240_spill] sm:$0xff]  ;;  %v12102_v24 = vld [vmem:[#allocation271_spill] sm:$0xff]  ;;  %v12133_v9 = vld [vmem:[#allocation41_spill] sm:$0xff] }
 0x503   : > { %12095 = vst [vmem:[#allocation154_spill] sm:$0xff] %v10026_v45  ;;  %v3755_v50 = vsel %vm3753_vm6, %v3738_v10, %v6082_v14  ;;  %v10051_v44 = vmul.f32 %v9569_v26, %v12098_v0  ;;  %v10059_v38 = vmul.f32 %v9687_v4, %v12099_v49  ;;  %v10063_v11 = vmul.f32 %v9564_v15, %v12100_v19  ;;  %v12116_v19 = vld [vmem:[#allocation324_spill] sm:$0xff] }
 0x504   : > { %v3834_v40 = vsel %vm3719_vm4, %v3818_v20, %v6196_v13  ;;  %v3835_v60 = vsel %vm3719_vm4, %v3819_v8, %v6197_v3  ;;  %v6748_v46 = vpack.i.bf16 %v9914_v57, %v9935_v32  ;;  %v10069_v21 = vmul.f32 %v9699_v56, %v12101_v39  ;;  %v12103_v3 = vld [vmem:[#allocation289_spill] sm:$0xff]  ;;  %v12104_v57 = vld [vmem:[#allocation270_spill] sm:$0xff] }
 0x505   : > { %v10030_v62 = vpop.permute.xlu1 %6204  ;;  %v3850_v7 = vsel %vm3736_vm5, %v3834_v40, %v6211_v63  ;;  %v3851_v22 = vsel %vm3736_vm5, %v3835_v60, %v6212_v1  ;;  %v10073_v14 = vmul.f32 %v9699_v56, %v12102_v24  ;;  %v10077_v13 = vmul.f32 %v9687_v4, %v12103_v3  ;;  %v12105_v63 = vld [vmem:[#allocation305_spill] sm:$0xff]  ;;  %v12110_v60 = vld [vmem:[#allocation315_spill] sm:$0xff]  ;;  %v12117_v24 = vld [vmem:[#allocation300_spill] sm:$0xff] }
 0x506   : > { %6524 = vrot.lane.b32.xlu1 %v12096_v36, %s7050_s13  ;;  %6739 = vrot.lane.b32.xlu0 %v12097_v23, %s7049_s30  ;;  %v3866_v54 = vsel %vm3753_vm6, %v3850_v7, %v6221_v41  ;;  %v3867_v53 = vsel %vm3753_vm6, %v3851_v22, %v6222_v52  ;;  %v4730_v12 = vpack.c.bf16 %v3755_v50, %v3754_v35  ;;  %v10091_v8 = vpop.permute.xlu0 %6449  ;;  %v12108_v41 = vld [vmem:[#allocation278_spill] sm:$0xff]  ;;  %v12111_v22 = vld [vmem:[#allocation316_spill] sm:$0xff]  ;;  %v12113_v36 = vld [vmem:[#allocation323_spill] sm:$0xff] }
 0x507   : > { %v4731_v42 = vpack.c.bf16 %v3867_v53, %v3866_v54  ;;  %v6543_v1 = vpack.i.bf16 %v9910_v43, %v9890_v33  ;;  %v10085_v32 = vmul.f32 %v9687_v4, %v12104_v57  ;;  %v10089_v20 = vmul.f32 %v9699_v56, %v12105_v63  ;;  %12106 = vst [vmem:[#allocation177_spill] sm:$0xff] %v10091_v8  ;;  %v12109_v43 = vld [vmem:[#allocation280_spill] sm:$0xff]  ;;  %v12134_v8 = vld [vmem:[#allocation307_spill] sm:$0xff] }
 0x508   : > { %v12107_v52 = vpack.i.bf16 %v9782_v51, %v9768_v16  ;;  %v10100_v33 = vmul.f32 %v9417_v28, %v12108_v41  ;;  %v10104_v40 = vmul.f32 %v9569_v26, %v12109_v43  ;;  %v10108_v7 = vmul.f32 %v9501_v48, %v12110_v60  ;;  %v12112_v16 = vld [vmem:[#allocation294_spill] sm:$0xff]  ;;  %v12114_v54 = vld [vmem:[#allocation16_spill] sm:$0xff] }
 0x509   : > { %v10079_v59 = vpop.permute.xlu1 %6214  ;;  %5034 = vmatprep.mubr.bf16.mxu0 %v4731_v42  ;;  %v10112_v10 = vmul.f32 %v9564_v15, %v12111_v22  ;;  %v10118_v35 = vmul.f32 %v9501_v48, %v12112_v16  ;;  %v10122_v23 = vmul.f32 %v9417_v28, %v12113_v36  ;;  %v2464_v53 = vmul.f32 %v9678_v58, %v12114_v54  ;;  %v12115_v42 = vld [vmem:[#allocation296_spill] sm:$0xff]  ;;  %v12121_v60 = vld [vmem:[#allocation310_spill] sm:$0xff] }
 0x50a   : > { %6534 = vrot.lane.b32.xlu1 %v12107_v52, %s7051_s14  ;;  %6749 = vrot.lane.b32.xlu0 %v6748_v46, %s7050_s13  ;;  %v10132_v49 = vmul.f32 %v9564_v15, %v12115_v42  ;;  %v10136_v46 = vmul.f32 %v9569_v26, %v12116_v19  ;;  %v10140_v3 = vmul.f32 %v9687_v4, %v12117_v24  ;;  %v12118_v57 = vld [vmem:[#allocation328_spill] sm:$0xff]  ;;  %v6206_v42 = vunpack.i.l.bf16 %v10030_v62  ;;  %v10170_v19 = vpop.permute.xlu0 %6459  ;;  %v12127_v24 = vld [vmem:[#allocation101_spill] sm:$0xff] }
 0x50b   : > { %5035 = vmatmul.mubr.bf16.vlgmr.msra.gmra.mrb[0].mxu0 %v4730_v12  ;;  %v2463_v63 = vmul.f32 %v9694_v29, %v12118_v57  ;;  %v12119_v52 = vpack.i.bf16 %v9691_v34, %v9703_v37  ;;  %v12120_v41 = vld [vmem:[#allocation308_spill] sm:$0xff]  ;;  %v10157_v22 = vmul.f32 %v9569_v26, %v12121_v60  ;;  %v6573_v16 = vpack.i.bf16 %v10108_v7, %v10100_v33  ;;  %v12124_v57 = vld [vmem:[#allocation326_spill] sm:$0xff]  ;;  %v12125_v60 = vld [vmem:[#allocation47_spill] sm:$0xff] }
 0x50c   : > { %v10153_v43 = vmul.f32 %v9417_v28, %v12120_v41  ;;  %12123 = vst [vmem:[#allocation104_spill] sm:$0xff] %v10170_v19  ;;  %v10176_v33 = vmul.f32 %v9699_v56, %v12124_v57  ;;  %v6207_v7 = vunpack.i.h.bf16 %v10030_v62  ;;  %v6217_v36 = vunpack.i.h.bf16 %v10079_v59  ;;  %v12130_v62 = vld [vmem:[#allocation68_spill] sm:$0xff]  ;;  %v12131_v12 = vld [vmem:[#allocation79_spill] sm:$0xff]  ;;  %v12132_v37 = vld [vmem:[#allocation102_spill] sm:$0xff] }
 0x50d   : > { %v6225_v39 = vpop.permute.xlu1 %6224  ;;  %v6768_v34 = vpack.i.bf16 %v2464_v53, %v2463_v63  ;;  %v12126_v53 = vld [vmem:[#allocation196_spill] sm:$0xff]  ;;  %v12129_v51 = vpack.i.bf16 %v12127_v24, %v12128_v31  ;;  %v2383_v57 = vmul.f32 %v9694_v29, %v12130_v62  ;;  %v2623_v0 = vmul.f32 %v9694_v29, %v12131_v12 }
 0x50e   : > { %6544 = vrot.lane.b32.xlu1 %v6543_v1, %s7047_s24  ;;  %6759 = vrot.lane.b32.xlu0 %v12119_v52, %s7048_s27  ;;  %v12122_v1 = vld [vmem:[#allocation320_spill] sm:$0xff]  ;;  %v6216_v52 = vunpack.i.l.bf16 %v10079_v59  ;;  %v6201_v63 = vunpack.i.l.bf16 %v12126_v53  ;;  %v6226_v55 = vunpack.i.l.bf16 %v6225_v39  ;;  %v6227_v50 = vunpack.i.h.bf16 %v6225_v39 }
 0x50f   : > { %v10165_v54 = vmul.f32 %v9678_v58, %v12122_v1  ;;  %v10182_v1 = vmul.f32 %v9501_v48, %v12125_v60  ;;  %v6202_v60 = vunpack.i.h.bf16 %v12126_v53  ;;  %v2624_v59 = vmul.f32 %v9678_v58, %v12132_v37  ;;  %v10206_v53 = vpop.permute.xlu0 %6469 }
 0x510   : > { %v6231_v19 = vunpack.i.l.bf16 %v12133_v9  ;;  %v6242_v2 = vunpack.i.h.bf16 %v12134_v8  ;;  %v4586_v31 = vsel %vm3651_vm1, %v6201_v63, %v6206_v42  ;;  %v12136_v42 = vpack.i.bf16 %v9856_v25, %v9898_v47  ;;  %v12138_v63 = vld [vmem:[#allocation228_spill] sm:$0xff]  ;;  %v12140_v25 = vld [vmem:[#allocation50_spill] sm:$0xff] }
 0x511   : > { %v6235_v41 = vpop.permute.xlu1 %6234  ;;  %v4587_v62 = vsel %vm3651_vm1, %v6202_v60, %v6207_v7  ;;  %v4602_v29 = vsel %vm428_vm0, %v4586_v31, %v6216_v52  ;;  %v10224_v47 = vmul.f32 %v9564_v15, %v12140_v25  ;;  %v12146_v25 = vld [vmem:[#allocation76_spill] sm:$0xff] }
 0x512   : > { %6554 = vrot.lane.b32.xlu1 %v12129_v51, %s7053_s17  ;;  %6769 = vrot.lane.b32.xlu0 %v6768_v34, %s7047_s24  ;;  %v6241_v51 = vunpack.i.l.bf16 %v12134_v8  ;;  %v12135_v34 = vld [vmem:[#allocation51_spill] sm:$0xff]  ;;  %v4603_v39 = vsel %vm428_vm0, %v4587_v62, %v6217_v36  ;;  %v4618_v58 = vsel %vm3685_vm2, %v4602_v29, %v6226_v55  ;;  %v6237_v60 = vunpack.i.h.bf16 %v6235_v41 }
 0x513   : > { %v6262_v24 = vunpack.i.h.bf16 %v12135_v34  ;;  %v12137_v8 = vld [vmem:[#allocation259_spill] sm:$0xff]  ;;  %v6261_v52 = vunpack.i.l.bf16 %v12135_v34  ;;  %v4619_v36 = vsel %vm3685_vm2, %v4603_v39, %v6227_v50  ;;  %v6236_v31 = vunpack.i.l.bf16 %v6235_v41 }
 0x514   : > { %v12139_v7 = vpack.i.bf16 %v12137_v8, %v12138_v63  ;;  %v6788_v62 = vpack.i.bf16 %v2624_v59, %v2623_v0  ;;  %v6232_v55 = vunpack.i.h.bf16 %v12133_v9  ;;  %v10239_v63 = vpop.permute.xlu0 %6479 }
 0x515   : > { %v6245_v12 = vpop.permute.xlu1 %6244 }
 0x516   : > { %v6247_v37 = vunpack.i.h.bf16 %v6245_v12  ;;  %v6246_v45 = vunpack.i.l.bf16 %v6245_v12  ;;  %6564 = vrot.lane.b32.xlu1 %v12136_v42, %s7054_s18  ;;  %6779 = vrot.lane.b32.xlu0 %v12139_v7, %s7049_s30  ;;  %v4634_v42 = vsel %vm3702_vm3, %v4618_v58, %v6231_v19  ;;  %v4635_v41 = vsel %vm3702_vm3, %v4619_v36, %v6232_v55 }
 0x517   : > { %v4650_v19 = vsel %vm3719_vm4, %v4634_v42, %v6236_v31  ;;  %v4651_v39 = vsel %vm3719_vm4, %v4635_v41, %v6237_v60  ;;  %v6798_v58 = vpack.i.bf16 %v10165_v54, %v2383_v57  ;;  %v6603_v36 = vpack.i.bf16 %v10182_v1, %v10153_v43  ;;  %v12143_v57 = vld [vmem:[#allocation61_spill] sm:$0xff] }
 0x518   : > { %v4698_v29 = vsel %vm3651_vm1, %v6241_v51, %v6246_v45  ;;  %v4699_v12 = vsel %vm3651_vm1, %v6242_v2, %v6247_v37  ;;  %v12141_v45 = vld [vmem:[#allocation139_spill] sm:$0xff]  ;;  %v2540_v31 = vmul.f32 %v9501_v48, %v12143_v57  ;;  %v5851_v42 = vunpack.i.l.bf16 %v12146_v25  ;;  %v12153_v57 = vld [vmem:[#allocation97_spill] sm:$0xff] }
 0x519   : > { %v6255_v8 = vpop.permute.xlu1 %6254  ;;  %v4714_v34 = vsel %vm428_vm0, %v4698_v29, %v6261_v52  ;;  %v4715_v50 = vsel %vm428_vm0, %v4699_v12, %v6262_v24  ;;  %v6272_v9 = vunpack.i.h.bf16 %v12141_v45  ;;  %v6271_v51 = vunpack.i.l.bf16 %v12141_v45  ;;  %v12142_v24 = vld [vmem:[#allocation99_spill] sm:$0xff] }
 0x51a   : > { %v6257_v0 = vunpack.i.h.bf16 %v6255_v8  ;;  %v6256_v59 = vunpack.i.l.bf16 %v6255_v8  ;;  %6574 = vrot.lane.b32.xlu1 %v6573_v16, %s7051_s14  ;;  %6789 = vrot.lane.b32.xlu0 %v6788_v62, %s7049_s30  ;;  %v4733_v2 = vpack.c.bf16 %v4715_v50, %v4714_v34  ;;  %v2539_v37 = vmul.f32 %v9417_v28, %v12142_v24  ;;  %v12144_v62 = vld [vmem:[#allocation33_spill] sm:$0xff]  ;;  %v12147_v8 = vld [vmem:[#allocation171_spill] sm:$0xff]  ;;  %v12148_v50 = vld [vmem:[#allocation62_spill] sm:$0xff] }
 0x51b   : > { %v6848_v52 = vpack.i.bf16 %v10140_v3, %v10176_v33  ;;  %v5847_v55 = vunpack.i.h.bf16 %v12144_v62  ;;  %v5846_v29 = vunpack.i.l.bf16 %v12144_v62  ;;  %v12145_v12 = vpack.i.bf16 %v10118_v35, %v10122_v23  ;;  %v12181_v33 = vld [vmem:[#allocation52_spill] sm:$0xff] }
 0x51c   : > { %5547 = vmatprep.mubr.msk.bf16.mxu1 %vm3685_vm2, %v4733_v2  ;;  %v4666_v16 = vsel %vm3736_vm5, %v4650_v19, %v6256_v59  ;;  %v4667_v7 = vsel %vm3736_vm5, %v4651_v39, %v6257_v0  ;;  %v5887_v34 = vunpack.i.h.bf16 %v12147_v8  ;;  %v5886_v48 = vunpack.i.l.bf16 %v12147_v8  ;;  %v12149_v59 = vld [vmem:[#allocation30_spill] sm:$0xff]  ;;  %v12150_v2 = vld [vmem:[#allocation72_spill] sm:$0xff] }
 0x51d   : > { %v10248_v60 = vpop.permute.xlu1 %6264  ;;  %v4682_v54 = vsel %vm3753_vm6, %v4666_v16, %v6271_v51  ;;  %v4683_v28 = vsel %vm3753_vm6, %v4667_v7, %v6272_v9  ;;  %v10268_v41 = vmul.f32 %v9687_v4, %v12148_v50  ;;  %v6593_v0 = vpack.i.bf16 %v2540_v31, %v2539_v37  ;;  %v12151_v51 = vld [vmem:[#allocation182_spill] sm:$0xff]  ;;  %v12156_v50 = vld [vmem:[#allocation93_spill] sm:$0xff] }
 0x51e   : > { %6584 = vrot.lane.b32.xlu1 %v12145_v12, %s7052_s15  ;;  %6799 = vrot.lane.b32.xlu0 %v6798_v58, %s7054_s18  ;;  %v4732_v43 = vpack.c.bf16 %v4683_v28, %v4682_v54  ;;  %v5807_v35 = vunpack.i.h.bf16 %v12149_v59  ;;  %v5806_v23 = vunpack.i.l.bf16 %v12149_v59  ;;  %v5812_v45 = vunpack.i.h.bf16 %v12150_v2  ;;  %v10280_v54 = vpop.permute.xlu0 %6489  ;;  %v12152_v28 = vld [vmem:[#allocation86_spill] sm:$0xff] }
 0x51f   : > { %v5811_v9 = vunpack.i.l.bf16 %v12150_v2  ;;  %v5927_v19 = vunpack.i.h.bf16 %v12151_v51  ;;  %v5926_v39 = vunpack.i.l.bf16 %v12151_v51  ;;  %v6167_v37 = vunpack.i.h.bf16 %v9954_v18 }
 0x520   : > { %5132 = vmatmul.mubr.bf16.vlgmr.msra.gmra.mrb[0].mxu1 %v4732_v43  ;;  %v3654_v24 = vsel %vm3651_vm1, %v5806_v23, %v5846_v29  ;;  %v3655_v16 = vsel %vm3651_vm1, %v5807_v35, %v5847_v55  ;;  %v6166_v7 = vunpack.i.l.bf16 %v9954_v18  ;;  %v12154_v31 = vpack.i.bf16 %v12152_v28, %v12153_v57  ;;  %v12155_v43 = vld [vmem:[#allocation42_spill] sm:$0xff] }
 0x521   : > { %v6275_v58 = vpop.permute.xlu1 %6274  ;;  %v5852_v62 = vunpack.i.h.bf16 %v12146_v25  ;;  %v10289_v12 = vsel %vm3651_vm1, %v5811_v9, %v5851_v42  ;;  %v3672_v55 = vsel %vm428_vm0, %v3655_v16, %v5887_v34  ;;  %v3671_v29 = vsel %vm428_vm0, %v3654_v24, %v5886_v48  ;;  %v12157_v35 = vld [vmem:[#allocation18_spill] sm:$0xff] }
 0x522   : > { %6594 = vrot.lane.b32.xlu1 %v6593_v0, %s7048_s27  ;;  %6809 = vrot.lane.b32.xlu0 %v12154_v31, %s7052_s15  ;;  %v5967_v18 = vunpack.i.h.bf16 %v12155_v43  ;;  %v5966_v8 = vunpack.i.l.bf16 %v12155_v43  ;;  %v6127_v0 = vunpack.i.h.bf16 %v12156_v50  ;;  %v6126_v59 = vunpack.i.l.bf16 %v12156_v50  ;;  %v12160_v43 = vld [vmem:[#allocation46_spill] sm:$0xff] }
 0x523   : > { %v5891_v51 = vunpack.i.l.bf16 %v12157_v35  ;;  %v3689_v28 = vsel %vm3685_vm2, %v3672_v55, %v5927_v19  ;;  %v3688_v42 = vsel %vm3685_vm2, %v3671_v29, %v5926_v39  ;;  %v6267_v24 = vunpack.i.h.bf16 %v10248_v60  ;;  %v12159_v19 = vld [vmem:[#allocation48_spill] sm:$0xff] }
 0x524   : > { %v3773_v34 = vsel %vm3651_vm1, %v6127_v0, %v6167_v37  ;;  %v3772_v48 = vsel %vm3651_vm1, %v6126_v59, %v6166_v7  ;;  %v6266_v16 = vunpack.i.l.bf16 %v10248_v60  ;;  %v12158_v57 = vpack.i.bf16 %v10059_v38, %v10073_v14  ;;  %v12161_v0 = vld [vmem:[#allocation63_spill] sm:$0xff] }
 0x525   : > { %v10301_v9 = vpop.permute.xlu1 %6284  ;;  %v6252_v31 = vunpack.i.h.bf16 %v12159_v19  ;;  %v6251_v39 = vunpack.i.l.bf16 %v12159_v19  ;;  %v6277_v55 = vunpack.i.h.bf16 %v6275_v58  ;;  %v6276_v29 = vunpack.i.l.bf16 %v6275_v58  ;;  %v12162_v58 = vld [vmem:[#allocation70_spill] sm:$0xff] }
 0x526   : > { %6604 = vrot.lane.b32.xlu1 %v6603_v36, %s7053_s17  ;;  %6819 = vrot.lane.b32.xlu0 %v12158_v57, %s7048_s27  ;;  %v3706_v37 = vsel %vm3702_vm3, %v3689_v28, %v5967_v18  ;;  %v3705_v7 = vsel %vm3702_vm3, %v3688_v42, %v5966_v8  ;;  %v6007_v50 = vunpack.i.h.bf16 %v12160_v43  ;;  %v6006_v60 = vunpack.i.l.bf16 %v12160_v43  ;;  %v10318_v36 = vpop.permute.xlu0 %6499  ;;  %v12163_v42 = vld [vmem:[#allocation89_spill] sm:$0xff]  ;;  %v12164_v43 = vld [vmem:[#allocation82_spill] sm:$0xff] }
 0x527   : > { %v6047_v59 = vunpack.i.h.bf16 %v12161_v0  ;;  %v6046_v38 = vunpack.i.l.bf16 %v12161_v0  ;;  %v3788_v14 = vsel %vm428_vm0, %v3772_v48, %v6251_v39  ;;  %v3789_v57 = vsel %vm428_vm0, %v3773_v34, %v6252_v31 }
 0x528   : > { %v6087_v1 = vunpack.i.h.bf16 %v12162_v58  ;;  %v6086_v18 = vunpack.i.l.bf16 %v12162_v58  ;;  %v3804_v8 = vsel %vm3685_vm2, %v3788_v14, %v6266_v16  ;;  %v3805_v28 = vsel %vm3685_vm2, %v3789_v57, %v6267_v24  ;;  %v12167_v14 = vld [vmem:[#allocation49_spill] sm:$0xff] }
 0x529   : > { %v6295_v19 = vpop.permute.xlu1 %6294  ;;  %v12165_v23 = vpack.i.bf16 %v12163_v42, %v12164_v43  ;;  %v12166_v48 = vpack.i.bf16 %v10077_v13, %v10069_v21  ;;  %v3820_v34 = vsel %vm3702_vm3, %v3804_v8, %v6276_v29  ;;  %v3821_v31 = vsel %vm3702_vm3, %v3805_v28, %v6277_v55  ;;  %v12169_v43 = vld [vmem:[#allocation24_spill] sm:$0xff] }
 0x52a   : > { %v6297_v39 = vunpack.i.h.bf16 %v6295_v19  ;;  %v6296_v0 = vunpack.i.l.bf16 %v6295_v19  ;;  %v3723_v16 = vsel %vm3719_vm4, %v3706_v37, %v6007_v50  ;;  %v3722_v24 = vsel %vm3719_vm4, %v3705_v7, %v6006_v60  ;;  %v10347_v8 = vpop.permute.xlu0 %6509  ;;  %v12170_v7 = vld [vmem:[#allocation293_spill] sm:$0xff]  ;;  %v12171_v50 = vld [vmem:[#allocation258_spill] sm:$0xff] }
 0x52b   : > { %6614 = vrot.lane.b32.xlu1 %v12165_v23, %s7050_s13  ;;  %6829 = vrot.lane.b32.xlu0 %v12166_v48, %s7049_s30  ;;  %v6282_v57 = vunpack.i.h.bf16 %v12167_v14  ;;  %v6281_v58 = vunpack.i.l.bf16 %v12167_v14  ;;  %v12168_v23 = vld [vmem:[#allocation21_spill] sm:$0xff]  ;;  %v2545_v21 = vmul.f32 %v9699_v56, %v12169_v43  ;;  %v3739_v29 = vsel %vm3736_vm5, %v3722_v24, %v6046_v38 }
 0x52c   : > { %v5931_v42 = vunpack.i.l.bf16 %v12168_v23  ;;  %v3740_v55 = vsel %vm3736_vm5, %v3723_v16, %v6047_v59  ;;  %v12172_v60 = vpack.i.bf16 %v12170_v7, %v12171_v50  ;;  %v12173_v28 = vpack.i.bf16 %v10085_v32, %v10089_v20 }
 0x52d   : > { %v6305_v13 = vpop.permute.xlu1 %6304  ;;  %v3836_v48 = vsel %vm3719_vm4, %v3820_v34, %v6281_v58  ;;  %v3837_v38 = vsel %vm3719_vm4, %v3821_v31, %v6282_v57  ;;  %v3756_v24 = vsel %vm3753_vm6, %v3739_v29, %v6086_v18  ;;  %v3757_v14 = vsel %vm3753_vm6, %v3740_v55, %v6087_v1  ;;  %v12175_v1 = vld [vmem:[#allocation109_spill] sm:$0xff] }
 0x52e   : > { %v6307_v19 = vunpack.i.h.bf16 %v6305_v13  ;;  %v6306_v37 = vunpack.i.l.bf16 %v6305_v13  ;;  %v3852_v59 = vsel %vm3736_vm5, %v3836_v48, %v6296_v0  ;;  %v3853_v16 = vsel %vm3736_vm5, %v3837_v38, %v6297_v39  ;;  %v12174_v39 = vld [vmem:[#allocation22_spill] sm:$0xff]  ;;  %v12180_v55 = vld [vmem:[#allocation117_spill] sm:$0xff]  ;;  %v12184_v48 = vld [vmem:[#allocation39_spill] sm:$0xff] }
 0x52f   : > { %6624 = vrot.lane.b32.xlu1 %v12172_v60, %s7051_s14  ;;  %6839 = vrot.lane.b32.xlu0 %v12173_v28, %s7050_s13  ;;  %v3657_v43 = vsel %vm3651_vm1, %v5812_v45, %v5852_v62  ;;  %v3673_v32 = vsel %vm428_vm0, %v10289_v12, %v5891_v51  ;;  %v5932_v31 = vunpack.i.h.bf16 %v12168_v23  ;;  %v10375_v18 = vmul.f32 %v9569_v26, %v12174_v39  ;;  %v12177_v51 = vld [vmem:[#allocation65_spill] sm:$0xff] }
 0x530   : > { %v3868_v20 = vsel %vm3753_vm6, %v3852_v59, %v6306_v37  ;;  %v3869_v34 = vsel %vm3753_vm6, %v3853_v16, %v6307_v19  ;;  %v5971_v0 = vunpack.i.l.bf16 %v12175_v1  ;;  %v5972_v2 = vunpack.i.h.bf16 %v12175_v1  ;;  %v12185_v59 = vld [vmem:[#allocation56_spill] sm:$0xff] }
 0x531   : > { %v6315_v25 = vpop.permute.xlu1 %6314  ;;  %v4735_v57 = vpack.c.bf16 %v3869_v34, %v3868_v20  ;;  %v6287_v45 = vunpack.i.h.bf16 %v10301_v9  ;;  %v6286_v62 = vunpack.i.l.bf16 %v10301_v9  ;;  %v12176_v12 = vpack.i.bf16 %v10063_v11, %v10051_v44  ;;  %v12179_v44 = vld [vmem:[#allocation25_spill] sm:$0xff]  ;;  %v12187_v34 = vld [vmem:[#allocation152_spill] sm:$0xff] }
 0x532   : > { %v4734_v26 = vpack.c.bf16 %v3757_v14, %v3756_v24  ;;  %v10391_v58 = vmul.f32 %v9564_v15, %v12177_v51  ;;  %v12178_v23 = vunpack.i.h.bf16 %v12157_v35  ;;  %v3690_v9 = vsel %vm3685_vm2, %v3673_v32, %v5931_v42  ;;  %v10403_v15 = vpop.permute.xlu0 %6519  ;;  %v12182_v35 = vld [vmem:[#allocation11_spill] sm:$0xff]  ;;  %v12186_v32 = vld [vmem:[#allocation29_spill] sm:$0xff] }
 0x533   : > { %6634 = vrot.lane.b32.xlu1 %v12176_v12, %s7047_s24  ;;  %6849 = vrot.lane.b32.xlu0 %v6848_v52, %s7052_s15  ;;  %v6858_v29 = vpack.i.bf16 %v10268_v41, %v2545_v21  ;;  %v6011_v11 = vunpack.i.l.bf16 %v12179_v44  ;;  %v2626_v3 = vmul.f32 %v9687_v4, %v12180_v55  ;;  %v6292_v52 = vunpack.i.h.bf16 %v12181_v33 }
 0x534   : > { %v3674_v13 = vsel %vm428_vm0, %v3657_v43, %v12178_v23  ;;  %5042 = vmatprep.mubr.bf16.mxu0 %v4735_v57  ;;  %v6291_v19 = vunpack.i.l.bf16 %v12181_v33  ;;  %v2625_v37 = vmul.f32 %v9699_v56, %v12182_v35  ;;  %v6683_v41 = vpack.i.bf16 %v10391_v58, %v10375_v18  ;;  %v12191_v35 = vld [vmem:[#allocation71_spill] sm:$0xff]  ;;  %v12199_v18 = vld [vmem:[#allocation96_spill] sm:$0xff] }
 0x535   : > { %5043 = vmatmul.mubr.bf16.gmra.mrb[4].mxu0 %v4734_v26  ;;  %v3691_v42 = vsel %vm3685_vm2, %v3674_v13, %v5932_v31  ;;  %v3707_v21 = vsel %vm3702_vm3, %v3690_v9, %v5971_v0  ;;  %v6325_v7 = vpop.permute.xlu1 %6324  ;;  %v4589_v60 = vsel %vm3651_vm1, %v6287_v45, %v6292_v52  ;;  %v12183_v28 = vpack.i.bf16 %v9886_v27, %v9842_v30  ;;  %v12188_v45 = vld [vmem:[#allocation60_spill] sm:$0xff] }
 0x536   : > { %v10412_v4 = vsel %vm3702_vm3, %v3691_v42, %v5972_v2  ;;  %v4588_v50 = vsel %vm3651_vm1, %v6286_v62, %v6291_v19  ;;  %v6012_v56 = vunpack.i.h.bf16 %v12179_v44  ;;  %v6171_v38 = vunpack.i.l.bf16 %v12184_v48  ;;  %v10436_v26 = vpop.permute.xlu0 %6529 }
 0x537   : > { %6644 = vrot.lane.b32.xlu1 %v12183_v28, %s7053_s17  ;;  %6859 = vrot.lane.b32.xlu0 %v6858_v29, %s7048_s27  ;;  %v6302_v16 = vunpack.i.h.bf16 %v12185_v59  ;;  %v6301_v24 = vunpack.i.l.bf16 %v12185_v59  ;;  %v10426_v14 = vsel %vm3719_vm4, %v3707_v21, %v6011_v11  ;;  %v6868_v43 = vpack.i.bf16 %v2626_v3, %v2625_v37  ;;  %v12190_v29 = vld [vmem:[#allocation77_spill] sm:$0xff] }
 0x538   : > { %v6052_v20 = vunpack.i.h.bf16 %v12186_v32  ;;  %v6131_v31 = vunpack.i.l.bf16 %v12187_v34  ;;  %v6317_v39 = vunpack.i.h.bf16 %v6315_v25  ;;  %v6316_v1 = vunpack.i.l.bf16 %v6315_v25 }
 0x539   : > { %v4604_v30 = vsel %vm428_vm0, %v4588_v50, %v6301_v24  ;;  %v4605_v27 = vsel %vm428_vm0, %v4589_v60, %v6302_v16  ;;  %v6335_v0 = vpop.permute.xlu1 %6334  ;;  %v6051_v57 = vunpack.i.l.bf16 %v12186_v32  ;;  %v6132_v2 = vunpack.i.h.bf16 %v12187_v34  ;;  %v12193_v60 = vld [vmem:[#allocation81_spill] sm:$0xff] }
 0x53a   : > { %v6312_v62 = vunpack.i.h.bf16 %v12188_v45  ;;  %v6311_v12 = vunpack.i.l.bf16 %v12188_v45  ;;  %v12189_v51 = vpack.i.bf16 %v9860_v17, %v9902_v61  ;;  %v6172_v25 = vunpack.i.h.bf16 %v12184_v48  ;;  %v10461_v16 = vpop.permute.xlu0 %6539 }
 0x53b   : > { %6869 = vrot.lane.b32.xlu0 %v6868_v43, %s7049_s30  ;;  %v6327_v23 = vunpack.i.h.bf16 %v6325_v7  ;;  %v6326_v13 = vunpack.i.l.bf16 %v6325_v7  ;;  %v3774_v9 = vsel %vm3651_vm1, %v6131_v31, %v6171_v38  ;;  %v6332_v44 = vunpack.i.h.bf16 %v12190_v29 }
 0x53c   : > { %6654 = vrot.lane.b32.xlu1 %v12189_v51, %s7054_s18  ;;  %v6331_v11 = vunpack.i.l.bf16 %v12190_v29  ;;  %v4620_v55 = vsel %vm3685_vm2, %v4604_v30, %v6311_v12  ;;  %v4621_v3 = vsel %vm3685_vm2, %v4605_v27, %v6312_v62  ;;  %v6337_v17 = vunpack.i.h.bf16 %v6335_v0 }
 0x53d   : > { %v4636_v33 = vsel %vm3702_vm3, %v4620_v55, %v6316_v1  ;;  %v4637_v61 = vsel %vm3702_vm3, %v4621_v3, %v6317_v39  ;;  %v6336_v52 = vunpack.i.l.bf16 %v6335_v0  ;;  %v6345_v19 = vpop.permute.xlu1 %6344  ;;  %v6322_v37 = vunpack.i.h.bf16 %v12191_v35  ;;  %v12194_v1 = vld [vmem:[#allocation191_spill] sm:$0xff]  ;;  %v12197_v55 = vld [vmem:[#allocation85_spill] sm:$0xff] }
 0x53e   : > { %v6321_v42 = vunpack.i.l.bf16 %v12191_v35  ;;  %v6347_v21 = vunpack.i.h.bf16 %v6345_v19  ;;  %v6346_v7 = vunpack.i.l.bf16 %v6345_v19  ;;  %v12192_v50 = vpack.i.bf16 %v10112_v10, %v10104_v40 }
 0x53f   : > { %v6342_v28 = vunpack.i.h.bf16 %v12193_v60  ;;  %v3775_v48 = vsel %vm3651_vm1, %v6132_v2, %v6172_v25  ;;  %v4700_v38 = vsel %vm3651_vm1, %v6326_v13, %v6331_v11  ;;  %v4701_v59 = vsel %vm3651_vm1, %v6327_v23, %v6332_v44  ;;  %v12196_v25 = vld [vmem:[#allocation125_spill] sm:$0xff] }
 0x540   : > { %6664 = vrot.lane.b32.xlu1 %v12192_v50, %s7051_s14  ;;  %v4716_v24 = vsel %vm428_vm0, %v4700_v38, %v6346_v7  ;;  %v4717_v43 = vsel %vm428_vm0, %v4701_v59, %v6347_v21  ;;  %v4652_v34 = vsel %vm3719_vm4, %v4636_v33, %v6321_v42  ;;  %v4653_v31 = vsel %vm3719_vm4, %v4637_v61, %v6322_v37  ;;  %v10489_v61 = vpop.permute.xlu0 %6549  ;;  %v12198_v37 = vld [vmem:[#allocation288_spill] sm:$0xff] }
 0x541   : > { %v6341_v40 = vunpack.i.l.bf16 %v12193_v60  ;;  %v3790_v10 = vsel %vm428_vm0, %v3774_v9, %v6336_v52  ;;  %v3791_v30 = vsel %vm428_vm0, %v3775_v48, %v6337_v17  ;;  %v4737_v27 = vpack.c.bf16 %v4717_v43, %v4716_v24  ;;  %v6355_v39 = vpop.permute.xlu1 %6354 }
 0x542   : > { %v6352_v0 = vunpack.i.h.bf16 %v12194_v1  ;;  %v6351_v2 = vunpack.i.l.bf16 %v12194_v1  ;;  %v6357_v45 = vunpack.i.h.bf16 %v6355_v39  ;;  %v6356_v62 = vunpack.i.l.bf16 %v6355_v39  ;;  %v10528_v39 = vld [vmem:[%s7176_s12 + $0x68] sm:$0xff] }
 0x543   : > { %v12195_v12 = vpack.i.bf16 %v10132_v49, %v10136_v46  ;;  %v3725_v51 = vsel %vm3719_vm4, %v10412_v4, %v6012_v56  ;;  %v6092_v23 = vunpack.i.h.bf16 %v12196_v25  ;;  %5548 = vmatprep.mubr.msk.bf16.mxu1 %vm3685_vm2, %v4737_v27  ;;  %v4668_v13 = vsel %vm3736_vm5, %v4652_v34, %v6341_v40  ;;  %v12201_v34 = vld [vmem:[#allocation105_spill] sm:$0xff] }
 0x544   : > { %v4669_v9 = vsel %vm3736_vm5, %v4653_v31, %v6342_v28  ;;  %v3806_v29 = vsel %vm3685_vm2, %v3790_v10, %v6351_v2  ;;  %v3807_v44 = vsel %vm3685_vm2, %v3791_v30, %v6352_v0  ;;  %v4684_v11 = vsel %vm3753_vm6, %v4668_v13, %v6356_v62  ;;  %v12202_v31 = vld [vmem:[#allocation277_spill] sm:$0xff]  ;;  %v10523_v10 = vld [vmem:[%s7176_s12 + $0x60] sm:$0xff]  ;;  %v12203_v30 = vld [vmem:[#allocation162_spill] sm:$0xff] }
 0x545   : > { %6674 = vrot.lane.b32.xlu1 %v12195_v12, %s7052_s15  ;;  %v4685_v49 = vsel %vm3753_vm6, %v4669_v9, %v6357_v45  ;;  %v6091_v46 = vunpack.i.l.bf16 %v12196_v25  ;;  %v6362_v4 = vunpack.i.h.bf16 %v12197_v55  ;;  %v6361_v56 = vunpack.i.l.bf16 %v12197_v55  ;;  %v6365_v3 = vpop.permute.xlu1 %6364  ;;  %v12204_v1 = vld [vmem:[#allocation185_spill] sm:$0xff]  ;;  %v12205_v62 = vld [vmem:[#allocation222_spill] sm:$0xff]  ;;  %v12207_v9 = vld [vmem:[#allocation192_spill] sm:$0xff] }
 0x546   : > { %v4736_v33 = vpack.c.bf16 %v4685_v49, %v4684_v11  ;;  %v6367_v17 = vunpack.i.h.bf16 %v6365_v3  ;;  %v6366_v52 = vunpack.i.l.bf16 %v6365_v3  ;;  %v3741_v19 = vsel %vm3736_vm5, %v10426_v14, %v6051_v57  ;;  %v12209_v49 = vld [vmem:[#allocation219_spill] sm:$0xff] }
 0x547   : > { %v3742_v35 = vsel %vm3736_vm5, %v3725_v51, %v6052_v20  ;;  %v6382_v42 = vunpack.i.h.bf16 %v12198_v37  ;;  %v6381_v21 = vunpack.i.l.bf16 %v12198_v37  ;;  %v3822_v7 = vsel %vm3702_vm3, %v3806_v29, %v6361_v56  ;;  %v12206_v51 = vld [vmem:[#allocation253_spill] sm:$0xff]  ;;  %v12210_v55 = vld [vmem:[#allocation235_spill] sm:$0xff] }
 0x548   : > { %v3823_v50 = vsel %vm3702_vm3, %v3807_v44, %v6362_v4  ;;  %5140 = vmatmul.mubr.bf16.gmra.mrb[4].mxu1 %v4736_v33  ;;  %v6392_v58 = vunpack.i.h.bf16 %v12199_v18  ;;  %v3838_v14 = vsel %vm3719_vm4, %v3822_v7, %v6366_v52  ;;  %v3758_v28 = vsel %vm3753_vm6, %v3741_v19, %v6091_v46  ;;  %v12208_v44 = vld [vmem:[#allocation208_spill] sm:$0xff]  ;;  %v10551_v33 = vld [vmem:[%s7176_s12 + $0x78] sm:$0xff] }
 0x549   : > { %6684 = vrot.lane.b32.xlu1 %v6683_v41, %s7048_s27  ;;  %v6391_v41 = vunpack.i.l.bf16 %v12199_v18  ;;  %v3839_v32 = vsel %vm3719_vm4, %v3823_v50, %v6367_v17  ;;  %v6375_v20 = vpop.permute.xlu1 %6374  ;;  %v3854_v57 = vsel %vm3736_vm5, %v3838_v14, %v6381_v21  ;;  %v3759_v48 = vsel %vm3753_vm6, %v3742_v35, %v6092_v23  ;;  %v12211_v17 = vld [vmem:[#allocation150_spill] sm:$0xff]  ;;  %v12212_v21 = vld [vmem:[#allocation169_spill] sm:$0xff]  ;;  %v12213_v50 = vld [vmem:[#allocation275_spill] sm:$0xff] }
 0x54a   : > { %v3855_v60 = vsel %vm3736_vm5, %v3839_v32, %v6382_v42  ;;  %v12200_v38 = vpack.i.bf16 %v10224_v47, %v10157_v22  ;;  %v6703_v40 = vpack.i.bf16 %v12202_v31, %v12201_v34  ;;  %v1503_v27 = vmul.f32 %v10523_v10, %v12203_v30  ;;  %v10532_v22 = vpop.permute.xlu0 %6559  ;;  %v10558_v42 = vld [vmem:[%s7176_s12 + $0x70] sm:$0xff]  ;;  %s5555_s12 = sshll.u32 %s7007_s1, 3 }
 0x54b   : > { %v3870_v59 = vsel %vm3753_vm6, %v3854_v57, %v6391_v41  ;;  %v3871_v24 = vsel %vm3753_vm6, %v3855_v60, %v6392_v58  ;;  %v1504_v0 = vmul.f32 %v10528_v39, %v12204_v1  ;;  %v4738_v47 = vpack.c.bf16 %v3759_v48, %v3758_v28  ;;  %v12215_v48 = vld [vmem:[#allocation140_spill] sm:$0xff] }
 0x54c   : > { %v4739_v43 = vpack.c.bf16 %v3871_v24, %v3870_v59  ;;  %v1823_v12 = vmul.f32 %v10523_v10, %v12205_v62  ;;  %v1824_v25 = vmul.f32 %v10528_v39, %v12206_v51  ;;  %v1663_v29 = vmul.f32 %v10523_v10, %v12207_v9  ;;  %v12216_v51 = vld [vmem:[#allocation317_spill] sm:$0xff] }
 0x54d   : > { %6694 = vrot.lane.b32.xlu1 %v12200_v38, %s7053_s17  ;;  %v6385_v2 = vpop.permute.xlu1 %6384  ;;  %v6713_v45 = vpack.i.bf16 %v1504_v0, %v1503_v27  ;;  %v1744_v11 = vmul.f32 %v10528_v39, %v12208_v44  ;;  %v1664_v46 = vmul.f32 %v10528_v39, %v12209_v49  ;;  %v1743_v4 = vmul.f32 %v10523_v10, %v12210_v55  ;;  %v12217_v44 = vld [vmem:[#allocation298_spill] sm:$0xff] }
 0x54e   : > { %5050 = vmatprep.mubr.bf16.mxu0 %v4739_v43  ;;  %v10539_v13 = vpop.permute.xlu0 %6569  ;;  %v6723_v56 = vpack.i.bf16 %v1824_v25, %v1823_v12  ;;  %v6376_v3 = vunpack.i.l.bf16 %v6375_v20  ;;  %v10555_v52 = vmul.f32 %v10551_v33, %v12211_v17  ;;  %v6377_v19 = vunpack.i.h.bf16 %v6375_v20  ;;  %v12214_v20 = vld [vmem:[#allocation282_spill] sm:$0xff] }
 0x54f   : > { %5051 = vmatmul.mubr.bf16.gmra.mrb[8].mxu0 %v4738_v47  ;;  %v6386_v35 = vunpack.i.l.bf16 %v6385_v2  ;;  %v10562_v7 = vmul.f32 %v10558_v42, %v12212_v21  ;;  %v6371_v18 = vunpack.i.l.bf16 %v12213_v50  ;;  %v6387_v58 = vunpack.i.h.bf16 %v6385_v2 }
 0x550   : > { %v6733_v14 = vpack.i.bf16 %v1664_v46, %v1663_v29  ;;  %v6743_v32 = vpack.i.bf16 %v1744_v11, %v1743_v4  ;;  %v6372_v57 = vunpack.i.h.bf16 %v12213_v50  ;;  %v2143_v28 = vmul.f32 %v10523_v10, %v12214_v20 }
 0x551   : > { %6704 = vrot.lane.b32.xlu1 %v6703_v40, %s7050_s13  ;;  %v6395_v23 = vpop.permute.xlu1 %6394  ;;  %v6401_v38 = vunpack.i.l.bf16 %v12215_v48  ;;  %v6412_v59 = vunpack.i.h.bf16 %v9948_v5  ;;  %v4590_v43 = vsel %vm3651_vm1, %v6371_v18, %v6376_v3  ;;  %v6411_v34 = vunpack.i.l.bf16 %v9948_v5 }
 0x552   : > { %v6396_v41 = vunpack.i.l.bf16 %v6395_v23  ;;  %v6397_v60 = vunpack.i.h.bf16 %v6395_v23  ;;  %v10571_v24 = vpop.permute.xlu0 %6579  ;;  %v6432_v31 = vunpack.i.h.bf16 %v9994_v6  ;;  %v4591_v40 = vsel %vm3651_vm1, %v6372_v57, %v6377_v19 }
 0x553   : > { %v4606_v30 = vsel %vm428_vm0, %v4590_v43, %v6386_v35  ;;  %v4607_v1 = vsel %vm428_vm0, %v4591_v40, %v6387_v58  ;;  %v2144_v25 = vmul.f32 %v10528_v39, %v12216_v51  ;;  %v6402_v23 = vunpack.i.h.bf16 %v12215_v48  ;;  %v12218_v35 = vld [vmem:[#allocation154_spill] sm:$0xff]  ;;  %v12222_v40 = vld [vmem:[#allocation103_spill] sm:$0xff] }
 0x554   : > { %v4622_v0 = vsel %vm3685_vm2, %v4606_v30, %v6396_v41  ;;  %v4623_v62 = vsel %vm3685_vm2, %v4607_v1, %v6397_v60  ;;  %v2224_v11 = vmul.f32 %v10528_v39, %v12217_v44  ;;  %v6441_v21 = vunpack.i.l.bf16 %v12218_v35  ;;  %v12219_v41 = vld [vmem:[#allocation325_spill] sm:$0xff]  ;;  %v12225_v51 = vld [vmem:[#allocation54_spill] sm:$0xff] }
 0x555   : > { %6714 = vrot.lane.b32.xlu1 %v6713_v45, %s7051_s14  ;;  %v6405_v37 = vpop.permute.xlu1 %6404  ;;  %v6431_v45 = vunpack.i.l.bf16 %v9994_v6  ;;  %v4638_v49 = vsel %vm3702_vm3, %v4622_v0, %v6401_v38  ;;  %v6753_v58 = vpack.i.bf16 %v2144_v25, %v2143_v28  ;;  %v12220_v38 = vld [vmem:[#allocation122_spill] sm:$0xff]  ;;  %v2543_v30 = vmul.f32 %v10523_v10, %v12222_v40 }
 0x556   : > { %v6407_v5 = vunpack.i.h.bf16 %v6405_v37  ;;  %v6406_v12 = vunpack.i.l.bf16 %v6405_v37  ;;  %v10593_v4 = vpop.permute.xlu0 %6589  ;;  %v6442_v37 = vunpack.i.h.bf16 %v12218_v35  ;;  %v5856_v43 = vunpack.i.l.bf16 %v12220_v38 }
 0x557   : > { %v2304_v25 = vmul.f32 %v10528_v39, %v12225_v51 }
 0x558   : > { %v4654_v50 = vsel %vm3719_vm4, %v4638_v49, %v6406_v12 }
 0x559   : > { %6724 = vrot.lane.b32.xlu1 %v6723_v56, %s7047_s24  ;;  %v6415_v27 = vpop.permute.xlu1 %6414  ;;  %v4639_v56 = vsel %vm3702_vm3, %v4623_v62, %v6402_v23  ;;  %v12226_v23 = vld [vmem:[#allocation69_spill] sm:$0xff] }
 0x55a   : > { %v6417_v47 = vunpack.i.h.bf16 %v6415_v27  ;;  %v6416_v2 = vunpack.i.l.bf16 %v6415_v27  ;;  %v4655_v18 = vsel %vm3719_vm4, %v4639_v56, %v6407_v5  ;;  %v12223_v27 = vld [vmem:[#allocation38_spill] sm:$0xff]  ;;  %v10625_v12 = vpop.permute.xlu0 %6599 }
 0x55b   : > { %v5897_v1 = vunpack.i.h.bf16 %v12223_v27  ;;  %v5896_v0 = vunpack.i.l.bf16 %v12223_v27 }
 0x55c   : > { %v4702_v9 = vsel %vm3651_vm1, %v6411_v34, %v6416_v2  ;;  %v4703_v29 = vsel %vm3651_vm1, %v6412_v59, %v6417_v47  ;;  %v5857_v59 = vunpack.i.h.bf16 %v12220_v38  ;;  %v12221_v34 = vld [vmem:[#allocation164_spill] sm:$0xff]  ;;  %v6793_v47 = vpack.i.bf16 %v10555_v52, %v10562_v7 }
 0x55d   : > { %6734 = vrot.lane.b32.xlu1 %v6733_v14, %s7053_s17  ;;  %v4718_v6 = vsel %vm428_vm0, %v4702_v9, %v6431_v45  ;;  %v4719_v46 = vsel %vm428_vm0, %v4703_v29, %v6432_v31  ;;  %v6425_v55 = vpop.permute.xlu1 %6424  ;;  %v2223_v14 = vmul.f32 %v10523_v10, %v12219_v41  ;;  %v10615_v31 = vmul.f32 %v10558_v42, %v12221_v34  ;;  %v12224_v45 = vld [vmem:[#allocation121_spill] sm:$0xff] }
 0x55e   : > { %v6427_v3 = vunpack.i.h.bf16 %v6425_v55  ;;  %v6426_v17 = vunpack.i.l.bf16 %v6425_v55  ;;  %v4741_v19 = vpack.c.bf16 %v4719_v46, %v4718_v6  ;;  %v5817_v62 = vunpack.i.h.bf16 %v12224_v45  ;;  %v12227_v29 = vld [vmem:[#allocation205_spill] sm:$0xff]  ;;  %v12228_v55 = vld [vmem:[#allocation115_spill] sm:$0xff] }
 0x55f   : > { %v6763_v2 = vpack.i.bf16 %v2224_v11, %v2223_v14  ;;  %v5816_v5 = vunpack.i.l.bf16 %v12224_v45  ;;  %v2544_v9 = vmul.f32 %v10528_v39, %v12226_v23  ;;  %v5937_v44 = vunpack.i.h.bf16 %v12227_v29  ;;  %v12235_v23 = vld [vmem:[#allocation67_spill] sm:$0xff] }
 0x560   : > { %v4670_v57 = vsel %vm3736_vm5, %v4654_v50, %v6426_v17  ;;  %v4671_v60 = vsel %vm3736_vm5, %v4655_v18, %v6427_v3  ;;  %5549 = vmatprep.mubr.msk.bf16.mxu1 %vm3685_vm2, %v4741_v19  ;;  %v5936_v49 = vunpack.i.l.bf16 %v12227_v29  ;;  %v3659_v46 = vsel %vm3651_vm1, %v5817_v62, %v5857_v59  ;;  %v12229_v17 = vld [vmem:[#allocation312_spill] sm:$0xff] }
 0x561   : > { %6744 = vrot.lane.b32.xlu1 %v6743_v32, %s7054_s18  ;;  %v10606_v32 = vpop.permute.xlu1 %6434  ;;  %v4686_v20 = vsel %vm3753_vm6, %v4670_v57, %v6441_v21  ;;  %v4687_v48 = vsel %vm3753_vm6, %v4671_v60, %v6442_v37  ;;  %v3658_v11 = vsel %vm3651_vm1, %v5816_v5, %v5856_v43  ;;  %v6177_v56 = vunpack.i.h.bf16 %v12228_v55  ;;  %v12230_v21 = vld [vmem:[#allocation45_spill] sm:$0xff]  ;;  %v12232_v57 = vld [vmem:[#allocation187_spill] sm:$0xff] }
 0x562   : > { %v4740_v28 = vpack.c.bf16 %v4687_v48, %v4686_v20  ;;  %v6176_v3 = vunpack.i.l.bf16 %v12228_v55  ;;  %v2303_v19 = vmul.f32 %v10523_v10, %v12229_v17  ;;  %v6773_v35 = vpack.i.bf16 %v2544_v9, %v2543_v30  ;;  %v12233_v30 = vld [vmem:[#allocation100_spill] sm:$0xff]  ;;  %v12234_v5 = vld [vmem:[#allocation141_spill] sm:$0xff] }
 0x563   : > { %v3676_v39 = vsel %vm428_vm0, %v3659_v46, %v5897_v1  ;;  %v3675_v37 = vsel %vm428_vm0, %v3658_v11, %v5896_v0  ;;  %v5977_v50 = vunpack.i.h.bf16 %v12230_v21  ;;  %v5976_v18 = vunpack.i.l.bf16 %v12230_v21  ;;  %v12236_v11 = vld [vmem:[#allocation168_spill] sm:$0xff]  ;;  %v12237_v21 = vld [vmem:[#allocation177_spill] sm:$0xff] }
 0x564   : > { %5148 = vmatmul.mubr.bf16.gmra.mrb[8].mxu1 %v4740_v28  ;;  %v1506_v60 = vmul.f32 %v10551_v33, %v12232_v57  ;;  %v6783_v20 = vpack.i.bf16 %v2304_v25, %v2303_v19  ;;  %v3693_v48 = vsel %vm3685_vm2, %v3676_v39, %v5937_v44  ;;  %v3692_v10 = vsel %vm3685_vm2, %v3675_v37, %v5936_v49  ;;  %v10654_v28 = vpop.permute.xlu0 %6609 }
 0x565   : > { %6754 = vrot.lane.b32.xlu1 %v6753_v58, %s7051_s14  ;;  %v6445_v6 = vpop.permute.xlu1 %6444  ;;  %v12231_v58 = vld [vmem:[#allocation107_spill] sm:$0xff]  ;;  %v6437_v34 = vunpack.i.h.bf16 %v10606_v32  ;;  %v6436_v40 = vunpack.i.l.bf16 %v10606_v32  ;;  %v6422_v27 = vunpack.i.h.bf16 %v12233_v30  ;;  %v6421_v1 = vunpack.i.l.bf16 %v12233_v30  ;;  %v12238_v30 = vld [vmem:[#allocation224_spill] sm:$0xff] }
 0x566   : > { %v6137_v41 = vunpack.i.h.bf16 %v12231_v58  ;;  %v6136_v14 = vunpack.i.l.bf16 %v12231_v58  ;;  %v6447_v0 = vunpack.i.h.bf16 %v6445_v6  ;;  %v3710_v45 = vsel %vm3702_vm3, %v3693_v48, %v5977_v50 }
 0x567   : > { %v3709_v62 = vsel %vm3702_vm3, %v3692_v10, %v5976_v18  ;;  %v6017_v51 = vunpack.i.h.bf16 %v12234_v5  ;;  %v6016_v25 = vunpack.i.l.bf16 %v12234_v5  ;;  %v6057_v9 = vunpack.i.h.bf16 %v12235_v23 }
 0x568   : > { %v3777_v59 = vsel %vm3651_vm1, %v6137_v41, %v6177_v56  ;;  %v3776_v43 = vsel %vm3651_vm1, %v6136_v14, %v6176_v3  ;;  %v6056_v32 = vunpack.i.l.bf16 %v12235_v23  ;;  %v6097_v46 = vunpack.i.h.bf16 %v12236_v11  ;;  %v10680_v58 = vpop.permute.xlu0 %6619  ;;  %v12241_v23 = vld [vmem:[#allocation210_spill] sm:$0xff] }
 0x569   : > { %6764 = vrot.lane.b32.xlu1 %v6763_v2, %s7052_s15  ;;  %v10650_v38 = vpop.permute.xlu1 %6454  ;;  %v6446_v2 = vunpack.i.l.bf16 %v6445_v6  ;;  %v3792_v29 = vsel %vm428_vm0, %v3776_v43, %v6421_v1  ;;  %v3793_v44 = vsel %vm428_vm0, %v3777_v59, %v6422_v27  ;;  %v6096_v6 = vunpack.i.l.bf16 %v12236_v11  ;;  %v12239_v1 = vld [vmem:[#allocation255_spill] sm:$0xff] }
 0x56a   : > { %v3808_v55 = vsel %vm3685_vm2, %v3792_v29, %v6436_v40  ;;  %v3809_v56 = vsel %vm3685_vm2, %v3793_v44, %v6437_v34  ;;  %v3727_v39 = vsel %vm3719_vm4, %v3710_v45, %v6017_v51  ;;  %v3726_v37 = vsel %vm3719_vm4, %v3709_v62, %v6016_v25  ;;  %v12243_v44 = vld [vmem:[#allocation237_spill] sm:$0xff] }
 0x56b   : > { %v3824_v3 = vsel %vm3702_vm3, %v3808_v55, %v6446_v2  ;;  %v3825_v17 = vsel %vm3702_vm3, %v3809_v56, %v6447_v0  ;;  %v6452_v50 = vunpack.i.h.bf16 %v12237_v21  ;;  %v6451_v18 = vunpack.i.l.bf16 %v12237_v21  ;;  %v12245_v21 = vld [vmem:[#allocation284_spill] sm:$0xff] }
 0x56c   : > { %v6803_v41 = vpack.i.bf16 %v1506_v60, %v10615_v31  ;;  %v3743_v57 = vsel %vm3736_vm5, %v3726_v37, %v6056_v32  ;;  %v1825_v27 = vmul.f32 %v10558_v42, %v12238_v30  ;;  %v1826_v0 = vmul.f32 %v10551_v33, %v12239_v1  ;;  %v10703_v5 = vpop.permute.xlu0 %6629  ;;  %v12242_v32 = vld [vmem:[#allocation221_spill] sm:$0xff]  ;;  %v12246_v1 = vld [vmem:[#allocation318_spill] sm:$0xff] }
 0x56d   : > { %6774 = vrot.lane.b32.xlu1 %v6773_v35, %s7048_s27  ;;  %v6465_v49 = vpop.permute.xlu1 %6464  ;;  %v3840_v48 = vsel %vm3719_vm4, %v3824_v3, %v6451_v18  ;;  %v3841_v10 = vsel %vm3719_vm4, %v3825_v17, %v6452_v50  ;;  %v3760_v60 = vsel %vm3753_vm6, %v3743_v57, %v6096_v6  ;;  %v6456_v51 = vunpack.i.l.bf16 %v10650_v38  ;;  %v12244_v6 = vld [vmem:[#allocation104_spill] sm:$0xff] }
 0x56e   : > { %v6467_v19 = vunpack.i.h.bf16 %v6465_v49  ;;  %v6466_v35 = vunpack.i.l.bf16 %v6465_v49  ;;  %v1666_v29 = vmul.f32 %v10551_v33, %v12242_v32  ;;  %v1745_v49 = vmul.f32 %v10558_v42, %v12243_v44 }
 0x56f   : > { %v6457_v11 = vunpack.i.h.bf16 %v10650_v38  ;;  %v6461_v55 = vunpack.i.l.bf16 %v12244_v6  ;;  %v6462_v56 = vunpack.i.h.bf16 %v12244_v6  ;;  %v7055_v17 = vmov 0.0   ;;  %v12247_v6 = vld [vmem:[#allocation91_spill] sm:$0xff] }
 0x570   : > { %v3856_v34 = vsel %vm3736_vm5, %v3840_v48, %v6466_v35  ;;  %v3857_v31 = vsel %vm3736_vm5, %v3841_v10, %v6467_v19  ;;  %5642 = vmatprep.subr.bf16.mxu0 %v7055_v17  ;;  %v6471_v37 = vunpack.i.l.bf16 %v10206_v53  ;;  %v2145_v50 = vmul.f32 %v10558_v42, %v12245_v21  ;;  %v10726_v57 = vpop.permute.xlu0 %6639 }
 0x571   : > { %6784 = vrot.lane.b32.xlu1 %v6783_v20, %s7053_s17  ;;  %v6475_v14 = vpop.permute.xlu1 %6474  ;;  %v3744_v20 = vsel %vm3736_vm5, %v3727_v39, %v6057_v9  ;;  %v1746_v9 = vmul.f32 %v10551_v33, %v12241_v23  ;;  %v4592_v19 = vsel %vm3651_vm1, %v6456_v51, %v6461_v55  ;;  %v4593_v38 = vsel %vm3651_vm1, %v6457_v11, %v6462_v56 }
 0x572   : > { %v6477_v59 = vunpack.i.h.bf16 %v6475_v14  ;;  %v6476_v43 = vunpack.i.l.bf16 %v6475_v14  ;;  %v3761_v40 = vsel %vm3753_vm6, %v3744_v20, %v6097_v46  ;;  %v6813_v46 = vpack.i.bf16 %v1826_v0, %v1825_v27 }
 0x573   : > { %v4742_v25 = vpack.c.bf16 %v3761_v40, %v3760_v60  ;;  %v6833_v39 = vpack.i.bf16 %v1746_v9, %v1745_v49  ;;  %v6472_v18 = vunpack.i.h.bf16 %v10206_v53  ;;  %v6481_v14 = vunpack.i.l.bf16 %v10239_v63 }
 0x574   : > { %v3872_v2 = vsel %vm3753_vm6, %v3856_v34, %v6476_v43  ;;  %v3873_v45 = vsel %vm3753_vm6, %v3857_v31, %v6477_v59  ;;  %v6502_v20 = vunpack.i.h.bf16 %v10318_v36  ;;  %v6501_v48 = vunpack.i.l.bf16 %v10318_v36  ;;  %v10744_v51 = vpop.permute.xlu0 %6649 }
 0x575   : > { %6794 = vrot.lane.b32.xlu1 %v6793_v47, %s7050_s13  ;;  %v6485_v52 = vpop.permute.xlu1 %6484  ;;  %v4743_v7 = vpack.c.bf16 %v3873_v45, %v3872_v2  ;;  %v12240_v47 = vld [vmem:[#allocation194_spill] sm:$0xff]  ;;  %v4608_v10 = vsel %vm428_vm0, %v4592_v19, %v6471_v37  ;;  %v4609_v34 = vsel %vm428_vm0, %v4593_v38, %v6472_v18  ;;  %v6522_v53 = vunpack.i.h.bf16 %v10403_v15 }
 0x576   : > { %v1665_v62 = vmul.f32 %v10558_v42, %v12240_v47  ;;  %v6486_v59 = vunpack.i.l.bf16 %v6485_v52  ;;  %v6487_v31 = vunpack.i.h.bf16 %v6485_v52  ;;  %v2146_v36 = vmul.f32 %v10551_v33, %v12246_v1  ;;  %v12249_v38 = vld [vmem:[#allocation58_spill] sm:$0xff] }
 0x577   : > { %5058 = vmatprep.mubr.bf16.mxu0 %v4743_v7  ;;  %v4624_v0 = vsel %vm3685_vm2, %v4608_v10, %v6481_v14  ;;  %v6531_v44 = vunpack.i.l.bf16 %v10436_v26  ;;  %v2466_v55 = vmul.f32 %v10551_v33, %v12247_v6  ;;  %v2306_v21 = vmul.f32 %v10551_v33, %v12249_v38  ;;  %v12251_v14 = vld [vmem:[#allocation313_spill] sm:$0xff] }
 0x578   : > { %5059 = vmatmul.mubr.bf16.gmra.mrb[12].mxu0 %v4742_v25  ;;  %v6823_v35 = vpack.i.bf16 %v1666_v29, %v1665_v62  ;;  %v4640_v7 = vsel %vm3702_vm3, %v4624_v0, %v6486_v59  ;;  %v6532_v29 = vunpack.i.h.bf16 %v10436_v26  ;;  %v12248_v26 = vld [vmem:[#allocation329_spill] sm:$0xff] }
 0x579   : > { %6804 = vrot.lane.b32.xlu1 %v6803_v41, %s7051_s14  ;;  %v6495_v3 = vpop.permute.xlu1 %6494  ;;  %v6482_v41 = vunpack.i.h.bf16 %v10239_v63  ;;  %v6521_v63 = vunpack.i.l.bf16 %v10403_v15  ;;  %v2465_v37 = vmul.f32 %v10558_v42, %v12248_v26  ;;  %v12258_v6 = vld [vmem:[#allocation37_spill] sm:$0xff] }
 0x57a   : > { %v6497_v30 = vunpack.i.h.bf16 %v6495_v3  ;;  %v6496_v27 = vunpack.i.l.bf16 %v6495_v3 }
 0x57b   : > { %v4625_v52 = vsel %vm3685_vm2, %v4609_v34, %v6482_v41 }
 0x57c   : > { %v4641_v25 = vsel %vm3702_vm3, %v4625_v52, %v6487_v31  ;;  %v4656_v49 = vsel %vm3719_vm4, %v4640_v7, %v6496_v27  ;;  %v6853_v31 = vpack.i.bf16 %v2466_v55, %v2465_v37  ;;  %v6142_v55 = vunpack.i.h.bf16 %v12258_v6 }
 0x57d   : > { %6814 = vrot.lane.b32.xlu1 %v6813_v46, %s7047_s24  ;;  %v6505_v43 = vpop.permute.xlu1 %6504  ;;  %v4657_v11 = vsel %vm3719_vm4, %v4641_v25, %v6497_v30  ;;  %v6843_v46 = vpack.i.bf16 %v2146_v36, %v2145_v50  ;;  %v12250_v50 = vld [vmem:[#allocation9_spill] sm:$0xff]  ;;  %v12255_v30 = vld [vmem:[#allocation83_spill] sm:$0xff] }
 0x57e   : > { %v6507_v60 = vunpack.i.h.bf16 %v6505_v43  ;;  %v6506_v40 = vunpack.i.l.bf16 %v6505_v43  ;;  %v2385_v18 = vmul.f32 %v10558_v42, %v12250_v50  ;;  %v12253_v43 = vld [vmem:[#allocation321_spill] sm:$0xff]  ;;  %v5822_v27 = vunpack.i.h.bf16 %v12255_v30 }
 0x57f   : > { %v2386_v34 = vmul.f32 %v10551_v33, %v12253_v43  ;;  %v5821_v1 = vunpack.i.l.bf16 %v12255_v30  ;;  %v12261_v43 = vld [vmem:[#allocation34_spill] sm:$0xff] }
 0x580   : > { %v4704_v2 = vsel %vm3651_vm1, %v6501_v48, %v6506_v40  ;;  %v4705_v45 = vsel %vm3651_vm1, %v6502_v20, %v6507_v60  ;;  %v2305_v20 = vmul.f32 %v10558_v42, %v12251_v14  ;;  %v12252_v48 = vld [vmem:[#allocation15_spill] sm:$0xff]  ;;  %v12254_v60 = vld [vmem:[#allocation84_spill] sm:$0xff]  ;;  %v12260_v14 = vld [vmem:[#allocation106_spill] sm:$0xff] }
 0x581   : > { %6824 = vrot.lane.b32.xlu1 %v6823_v35, %s7053_s17  ;;  %v4720_v47 = vsel %vm428_vm0, %v4704_v2, %v6521_v63  ;;  %v4721_v62 = vsel %vm428_vm0, %v4705_v45, %v6522_v53  ;;  %v6515_v15 = vpop.permute.xlu1 %6514  ;;  %v5862_v10 = vunpack.i.h.bf16 %v12252_v48  ;;  %v5861_v59 = vunpack.i.l.bf16 %v12252_v48  ;;  %v10774_v63 = vpop.permute.xlu0 %6659  ;;  %v12256_v42 = vld [vmem:[#allocation92_spill] sm:$0xff] }
 0x582   : > { %v6517_v23 = vunpack.i.h.bf16 %v6515_v15  ;;  %v6516_v9 = vunpack.i.l.bf16 %v6515_v15  ;;  %v4745_v32 = vpack.c.bf16 %v4721_v62, %v4720_v47  ;;  %v5902_v40 = vunpack.i.h.bf16 %v12254_v60  ;;  %v12257_v47 = vld [vmem:[#allocation26_spill] sm:$0xff] }
 0x583   : > { %v5901_v53 = vunpack.i.l.bf16 %v12254_v60  ;;  %v5942_v36 = vunpack.i.h.bf16 %v12256_v42  ;;  %v5941_v0 = vunpack.i.l.bf16 %v12256_v42  ;;  %v6863_v45 = vpack.i.bf16 %v2306_v21, %v2305_v20  ;;  %v12259_v21 = vld [vmem:[#allocation28_spill] sm:$0xff] }
 0x584   : > { %v4672_v56 = vsel %vm3736_vm5, %v4656_v49, %v6516_v9  ;;  %v4673_v3 = vsel %vm3736_vm5, %v4657_v11, %v6517_v23  ;;  %5550 = vmatprep.mubr.msk.bf16.mxu1 %vm3685_vm2, %v4745_v32  ;;  %v6873_v52 = vpack.i.bf16 %v2386_v34, %v2385_v18  ;;  %v3660_v33 = vsel %vm3651_vm1, %v5821_v1, %v5861_v59 }
 0x585   : > { %6834 = vrot.lane.b32.xlu1 %v6833_v39, %s7054_s18  ;;  %v6525_v19 = vpop.permute.xlu1 %6524  ;;  %v4688_v35 = vsel %vm3753_vm6, %v4672_v56, %v6531_v44  ;;  %v4689_v39 = vsel %vm3753_vm6, %v4673_v3, %v6532_v29  ;;  %v3661_v7 = vsel %vm3651_vm1, %v5822_v27, %v5862_v10  ;;  %v5982_v62 = vunpack.i.h.bf16 %v12257_v47  ;;  %v10795_v3 = vpop.permute.xlu0 %6669 }
 0x586   : > { %v4744_v41 = vpack.c.bf16 %v4689_v39, %v4688_v35  ;;  %v5981_v15 = vunpack.i.l.bf16 %v12257_v47  ;;  %v3677_v25 = vsel %vm428_vm0, %v3660_v33, %v5901_v53  ;;  %v3678_v23 = vsel %vm428_vm0, %v3661_v7, %v5902_v40 }
 0x587   : > { %v6492_v9 = vunpack.i.h.bf16 %v10280_v54  ;;  %v6491_v32 = vunpack.i.l.bf16 %v10280_v54  ;;  %v3694_v29 = vsel %vm3685_vm2, %v3677_v25, %v5941_v0  ;;  %v3695_v44 = vsel %vm3685_vm2, %v3678_v23, %v5942_v36 }
 0x588   : > { %5156 = vmatmul.mubr.bf16.gmra.mrb[12].mxu1 %v4744_v41  ;;  %v6512_v49 = vunpack.i.h.bf16 %v10347_v8  ;;  %v6511_v11 = vunpack.i.l.bf16 %v10347_v8  ;;  %v6141_v56 = vunpack.i.l.bf16 %v12258_v6  ;;  %v6527_v35 = vunpack.i.h.bf16 %v6525_v19 }
 0x589   : > { %6844 = vrot.lane.b32.xlu1 %v6843_v46, %s7051_s14  ;;  %v6535_v2 = vpop.permute.xlu1 %6534  ;;  %v6526_v39 = vunpack.i.l.bf16 %v6525_v19  ;;  %v3711_v54 = vsel %vm3702_vm3, %v3694_v29, %v5981_v15  ;;  %v3712_v26 = vsel %vm3702_vm3, %v3695_v44, %v5982_v62  ;;  %v6022_v50 = vunpack.i.h.bf16 %v12259_v21 }
 0x58a   : > { %v6537_v37 = vunpack.i.h.bf16 %v6535_v2  ;;  %v6536_v38 = vunpack.i.l.bf16 %v6535_v2  ;;  %v6021_v8 = vunpack.i.l.bf16 %v12259_v21  ;;  %v3778_v18 = vsel %vm3651_vm1, %v6141_v56, %v6491_v32 }
 0x58b   : > { %v3779_v41 = vsel %vm3651_vm1, %v6142_v55, %v6492_v9  ;;  %v6062_v20 = vunpack.i.h.bf16 %v12260_v14  ;;  %v6061_v19 = vunpack.i.l.bf16 %v12260_v14  ;;  %v3794_v48 = vsel %vm428_vm0, %v3778_v18, %v6511_v11 }
 0x58c   : > { %v3795_v10 = vsel %vm428_vm0, %v3779_v41, %v6512_v49  ;;  %v6102_v34 = vunpack.i.h.bf16 %v12261_v43  ;;  %v3810_v60 = vsel %vm3685_vm2, %v3794_v48, %v6526_v39  ;;  %v3728_v42 = vsel %vm3719_vm4, %v3711_v54, %v6021_v8 }
 0x58d   : > { %6854 = vrot.lane.b32.xlu1 %v6853_v31, %s7047_s24  ;;  %v6545_v46 = vpop.permute.xlu1 %6544  ;;  %v6101_v31 = vunpack.i.l.bf16 %v12261_v43  ;;  %v3811_v40 = vsel %vm3685_vm2, %v3795_v10, %v6527_v35  ;;  %v3826_v53 = vsel %vm3702_vm3, %v3810_v60, %v6536_v38  ;;  %v3729_v36 = vsel %vm3719_vm4, %v3712_v26, %v6022_v50 }
 0x58e   : > { %v3827_v30 = vsel %vm3702_vm3, %v3811_v40, %v6537_v37  ;;  %v6542_v0 = vunpack.i.h.bf16 %v10461_v16  ;;  %v6541_v2 = vunpack.i.l.bf16 %v10461_v16  ;;  %v3745_v7 = vsel %vm3736_vm5, %v3728_v42, %v6061_v19 }
 0x58f   : > { %v3762_v32 = vsel %vm3753_vm6, %v3745_v7, %v6101_v31  ;;  %v6546_v55 = vunpack.i.l.bf16 %v6545_v46  ;;  %v6547_v35 = vunpack.i.h.bf16 %v6545_v46  ;;  %v6551_v39 = vunpack.i.l.bf16 %v10489_v61 }
 0x590   : > { %v3842_v47 = vsel %vm3719_vm4, %v3826_v53, %v6541_v2  ;;  %v3843_v62 = vsel %vm3719_vm4, %v3827_v30, %v6542_v0  ;;  %v6552_v54 = vunpack.i.h.bf16 %v10489_v61  ;;  %v6561_v38 = vunpack.i.l.bf16 %v10532_v22 }
 0x591   : > { %6864 = vrot.lane.b32.xlu1 %v6863_v45, %s7053_s17  ;;  %v6555_v59 = vpop.permute.xlu1 %6554  ;;  %v10819_v45 = vpop.permute.xlu0 %6679  ;;  %v4594_v37 = vsel %vm3651_vm1, %v6546_v55, %v6551_v39  ;;  %v6562_v50 = vunpack.i.h.bf16 %v10532_v22  ;;  %v6572_v8 = vunpack.i.h.bf16 %v10539_v13  ;;  %v6571_v18 = vunpack.i.l.bf16 %v10539_v13 }
 0x592   : > { %v6557_v27 = vunpack.i.h.bf16 %v6555_v59  ;;  %v6556_v1 = vunpack.i.l.bf16 %v6555_v59  ;;  %v4595_v21 = vsel %vm3651_vm1, %v6547_v35, %v6552_v54  ;;  %v6592_v41 = vunpack.i.h.bf16 %v10593_v4  ;;  %v12264_v35 = vld [vmem:[#allocation31_spill] sm:$0xff] }
 0x593   : > { %v6591_v14 = vunpack.i.l.bf16 %v10593_v4  ;;  %v4610_v61 = vsel %vm428_vm0, %v4594_v37, %v6561_v38  ;;  %v4611_v48 = vsel %vm428_vm0, %v4595_v21, %v6562_v50  ;;  %v6612_v22 = vunpack.i.h.bf16 %v10654_v28 }
 0x594   : > { %v3858_v23 = vsel %vm3736_vm5, %v3842_v47, %v6556_v1  ;;  %v3859_v9 = vsel %vm3736_vm5, %v3843_v62, %v6557_v27  ;;  %v4626_v60 = vsel %vm3685_vm2, %v4610_v61, %v6571_v18  ;;  %v4627_v53 = vsel %vm3685_vm2, %v4611_v48, %v6572_v8  ;;  %v12266_v18 = vld [vmem:[#allocation272_spill] sm:$0xff] }
 0x595   : > { %6874 = vrot.lane.b32.xlu1 %v6873_v52, %s7054_s18  ;;  %v6565_v33 = vpop.permute.xlu1 %6564  ;;  %v3746_v52 = vsel %vm3736_vm5, %v3729_v36, %v6062_v20  ;;  %v10831_v6 = vpop.permute.xlu0 %6689  ;;  %v6622_v7 = vunpack.i.h.bf16 %v10680_v58  ;;  %v5827_v39 = vunpack.i.h.bf16 %v12264_v35  ;;  %v5826_v54 = vunpack.i.l.bf16 %v12264_v35 }
 0x596   : > { %v6567_v15 = vunpack.i.h.bf16 %v6565_v33  ;;  %v6566_v25 = vunpack.i.l.bf16 %v6565_v33  ;;  %v3763_v16 = vsel %vm3753_vm6, %v3746_v52, %v6102_v34  ;;  %v6611_v34 = vunpack.i.l.bf16 %v10654_v28 }
 0x597   : > { %v4746_v56 = vpack.c.bf16 %v3763_v16, %v3762_v32  ;;  %v6621_v52 = vunpack.i.l.bf16 %v10680_v58  ;;  %v6581_v48 = vunpack.i.l.bf16 %v10571_v24  ;;  %v6632_v35 = vunpack.i.h.bf16 %v10703_v5 }
 0x598   : > { %v3874_v29 = vsel %vm3753_vm6, %v3858_v23, %v6566_v25  ;;  %v3875_v44 = vsel %vm3753_vm6, %v3859_v9, %v6567_v15 }
 0x599   : > { %v6575_v49 = vpop.permute.xlu1 %6574  ;;  %v4747_v11 = vpack.c.bf16 %v3875_v44, %v3874_v29  ;;  %v10841_v46 = vpop.permute.xlu0 %6699  ;;  %v12262_v29 = vld [vmem:[#allocation36_spill] sm:$0xff] }
 0x59a   : > { %v6576_v20 = vunpack.i.l.bf16 %v6575_v49  ;;  %v6577_v10 = vunpack.i.h.bf16 %v6575_v49  ;;  %v5867_v44 = vunpack.i.h.bf16 %v12262_v29  ;;  %v5866_v58 = vunpack.i.l.bf16 %v12262_v29  ;;  %v12263_v49 = vld [vmem:[#allocation239_spill] sm:$0xff] }
 0x59b   : > { %5066 = vmatprep.mubr.bf16.mxu0 %v4747_v11  ;;  %v5907_v11 = vunpack.i.h.bf16 %v12263_v49  ;;  %v5906_v55 = vunpack.i.l.bf16 %v12263_v49 }
 0x59c   : > { %5067 = vmatmul.mubr.bf16.gmra.mrb[16].mxu0 %v4746_v56  ;;  %v4642_v30 = vsel %vm3702_vm3, %v4626_v60, %v6576_v20  ;;  %v4643_v28 = vsel %vm3702_vm3, %v4627_v53, %v6577_v10  ;;  %v3662_v50 = vsel %vm3651_vm1, %v5826_v54, %v5866_v58  ;;  %v3663_v8 = vsel %vm3651_vm1, %v5827_v39, %v5867_v44 }
 0x59d   : > { %v6585_v26 = vpop.permute.xlu1 %6584  ;;  %v10856_v36 = vpop.permute.xlu0 %6709  ;;  %v3680_v61 = vsel %vm428_vm0, %v3663_v8, %v5907_v11  ;;  %v3679_v20 = vsel %vm428_vm0, %v3662_v50, %v5906_v55  ;;  %v6631_v39 = vunpack.i.l.bf16 %v10703_v5 }
 0x59e   : > { %v6587_v13 = vunpack.i.h.bf16 %v6585_v26  ;;  %v6586_v31 = vunpack.i.l.bf16 %v6585_v26  ;;  %v12265_v26 = vld [vmem:[#allocation43_spill] sm:$0xff] }
 0x59f   : > { %v5947_v37 = vunpack.i.h.bf16 %v12265_v26  ;;  %v5946_v38 = vunpack.i.l.bf16 %v12265_v26 }
 0x5a0   : > { %v4658_v47 = vsel %vm3719_vm4, %v4642_v30, %v6586_v31  ;;  %v4659_v62 = vsel %vm3719_vm4, %v4643_v28, %v6587_v13  ;;  %v12267_v13 = vld [vmem:[#allocation111_spill] sm:$0xff] }
 0x5a1   : > { %v6595_v19 = vpop.permute.xlu1 %6594  ;;  %v10872_v56 = vpop.permute.xlu0 %6719  ;;  %v3697_v10 = vsel %vm3685_vm2, %v3680_v61, %v5947_v37  ;;  %v6147_v31 = vunpack.i.h.bf16 %v12267_v13  ;;  %v6146_v60 = vunpack.i.l.bf16 %v12267_v13 }
 0x5a2   : > { %v6597_v59 = vunpack.i.h.bf16 %v6595_v19  ;;  %v6596_v43 = vunpack.i.l.bf16 %v6595_v19  ;;  %v6582_v19 = vunpack.i.h.bf16 %v10571_v24 }
 0x5a4   : > { %v4706_v40 = vsel %vm3651_vm1, %v6591_v14, %v6596_v43  ;;  %v4707_v4 = vsel %vm3651_vm1, %v6592_v41, %v6597_v59  ;;  %v5987_v41 = vunpack.i.h.bf16 %v12266_v18  ;;  %v5986_v14 = vunpack.i.l.bf16 %v12266_v18 }
 0x5a5   : > { %v4722_v27 = vsel %vm428_vm0, %v4706_v40, %v6611_v34  ;;  %v4723_v1 = vsel %vm428_vm0, %v4707_v4, %v6612_v22  ;;  %v6605_v42 = vpop.permute.xlu1 %6604  ;;  %v3696_v59 = vsel %vm3685_vm2, %v3679_v20, %v5946_v38  ;;  %v6602_v43 = vunpack.i.h.bf16 %v10625_v12  ;;  %v10892_v40 = vpop.permute.xlu0 %6729 }
 0x5a6   : > { %v6607_v0 = vunpack.i.h.bf16 %v6605_v42  ;;  %v6606_v2 = vunpack.i.l.bf16 %v6605_v42  ;;  %v4749_v33 = vpack.c.bf16 %v4723_v1, %v4722_v27  ;;  %v6601_v22 = vunpack.i.l.bf16 %v10625_v12  ;;  %v12268_v42 = vld [vmem:[#allocation55_spill] sm:$0xff] }
 0x5a7   : > { %v3714_v30 = vsel %vm3702_vm3, %v3697_v10, %v5987_v41  ;;  %v3713_v24 = vsel %vm3702_vm3, %v3696_v59, %v5986_v14  ;;  %v6027_v28 = vunpack.i.h.bf16 %v12268_v42  ;;  %v3780_v12 = vsel %vm3651_vm1, %v6146_v60, %v6581_v48 }
 0x5a8   : > { %v4674_v15 = vsel %vm3736_vm5, %v4658_v47, %v6606_v2  ;;  %v4675_v25 = vsel %vm3736_vm5, %v4659_v62, %v6607_v0  ;;  %5551 = vmatprep.mubr.msk.bf16.mxu1 %vm3685_vm2, %v4749_v33  ;;  %v6026_v0 = vunpack.i.l.bf16 %v12268_v42  ;;  %v3781_v2 = vsel %vm3651_vm1, %v6147_v31, %v6582_v19  ;;  %v12269_v33 = vld [vmem:[#allocation73_spill] sm:$0xff] }
 0x5a9   : > { %v6615_v23 = vpop.permute.xlu1 %6614  ;;  %v4690_v9 = vsel %vm3753_vm6, %v4674_v15, %v6621_v52  ;;  %v4691_v32 = vsel %vm3753_vm6, %v4675_v25, %v6622_v7  ;;  %v6067_v7 = vunpack.i.h.bf16 %v12269_v33  ;;  %v6066_v52 = vunpack.i.l.bf16 %v12269_v33  ;;  %v12270_v25 = vld [vmem:[#allocation74_spill] sm:$0xff]  ;;  %v10914_v54 = vpop.permute.xlu0 %6739 }
 0x5aa   : > { %v4748_v16 = vpack.c.bf16 %v4691_v32, %v4690_v9  ;;  %v6617_v4 = vunpack.i.h.bf16 %v6615_v23  ;;  %v6616_v53 = vunpack.i.l.bf16 %v6615_v23  ;;  %v3796_v47 = vsel %vm428_vm0, %v3780_v12, %v6601_v22 }
 0x5ab   : > { %v3797_v62 = vsel %vm428_vm0, %v3781_v2, %v6602_v43  ;;  %v6107_v23 = vunpack.i.h.bf16 %v12270_v25  ;;  %v6106_v9 = vunpack.i.l.bf16 %v12270_v25  ;;  %v3731_v11 = vsel %vm3719_vm4, %v3714_v30, %v6027_v28 }
 0x5ac   : > { %5164 = vmatmul.mubr.bf16.gmra.mrb[16].mxu1 %v4748_v16  ;;  %v3812_v32 = vsel %vm3685_vm2, %v3796_v47, %v6616_v53  ;;  %v3813_v16 = vsel %vm3685_vm2, %v3797_v62, %v6617_v4  ;;  %v3730_v55 = vsel %vm3719_vm4, %v3713_v24, %v6026_v0  ;;  %v3748_v38 = vsel %vm3736_vm5, %v3731_v11, %v6067_v7 }
 0x5ad   : > { %v6625_v21 = vpop.permute.xlu1 %6624  ;;  %v3747_v37 = vsel %vm3736_vm5, %v3730_v55, %v6066_v52  ;;  %v3765_v5 = vsel %vm3753_vm6, %v3748_v38, %v6107_v23  ;;  %v10926_v59 = vpop.permute.xlu0 %6749  ;;  %v6641_v31 = vunpack.i.l.bf16 %v10726_v57  ;;  %v6642_v60 = vunpack.i.h.bf16 %v10726_v57 }
 0x5ae   : > { %v6627_v27 = vunpack.i.h.bf16 %v6625_v21  ;;  %v6626_v1 = vunpack.i.l.bf16 %v6625_v21  ;;  %v3764_v61 = vsel %vm3753_vm6, %v3747_v37, %v6106_v9  ;;  %v6651_v30 = vunpack.i.l.bf16 %v10744_v51 }
 0x5af   : > { %v4750_v22 = vpack.c.bf16 %v3765_v5, %v3764_v61  ;;  %v6661_v42 = vunpack.i.l.bf16 %v10774_v63  ;;  %v6682_v28 = vunpack.i.h.bf16 %v10819_v45  ;;  %v6681_v0 = vunpack.i.l.bf16 %v10819_v45  ;;  %v12272_v5 = vld [vmem:[#allocation19_spill] sm:$0xff] }
 0x5b0   : > { %v3828_v29 = vsel %vm3702_vm3, %v3812_v32, %v6626_v1  ;;  %v3829_v44 = vsel %vm3702_vm3, %v3813_v16, %v6627_v27  ;;  %v6652_v27 = vunpack.i.h.bf16 %v10744_v51  ;;  %v6662_v1 = vunpack.i.h.bf16 %v10774_v63 }
 0x5b1   : > { %v6635_v34 = vpop.permute.xlu1 %6634  ;;  %v3844_v21 = vsel %vm3719_vm4, %v3828_v29, %v6631_v39  ;;  %v3845_v50 = vsel %vm3719_vm4, %v3829_v44, %v6632_v35  ;;  %v6702_v51 = vunpack.i.h.bf16 %v10841_v46  ;;  %v6701_v62 = vunpack.i.l.bf16 %v10841_v46 }
 0x5b2   : > { %v6636_v43 = vunpack.i.l.bf16 %v6635_v34  ;;  %v6637_v13 = vunpack.i.h.bf16 %v6635_v34  ;;  %v10936_v34 = vpop.permute.xlu0 %6759  ;;  %v6712_v35 = vunpack.i.h.bf16 %v10856_v36  ;;  %v6711_v39 = vunpack.i.l.bf16 %v10856_v36 }
 0x5b4   : > { %v4596_v53 = vsel %vm3651_vm1, %v6636_v43, %v6641_v31  ;;  %v4597_v24 = vsel %vm3651_vm1, %v6637_v13, %v6642_v60  ;;  %v12274_v13 = vld [vmem:[#allocation23_spill] sm:$0xff] }
 0x5b5   : > { %v6645_v15 = vpop.permute.xlu1 %6644  ;;  %v4612_v57 = vsel %vm428_vm0, %v4596_v53, %v6651_v30  ;;  %v4613_v33 = vsel %vm428_vm0, %v4597_v24, %v6652_v27  ;;  %v5952_v31 = vunpack.i.h.bf16 %v12274_v13  ;;  %v5951_v60 = vunpack.i.l.bf16 %v12274_v13  ;;  %v12275_v24 = vld [vmem:[#allocation98_spill] sm:$0xff] }
 0x5b6   : > { %v6647_v58 = vunpack.i.h.bf16 %v6645_v15  ;;  %v6646_v49 = vunpack.i.l.bf16 %v6645_v15  ;;  %v4628_v25 = vsel %vm3685_vm2, %v4612_v57, %v6661_v42  ;;  %v4629_v9 = vsel %vm3685_vm2, %v4613_v33, %v6662_v1 }
 0x5b7   : > { %v5992_v27 = vunpack.i.h.bf16 %v12275_v24  ;;  %v5991_v1 = vunpack.i.l.bf16 %v12275_v24  ;;  %v6671_v57 = vunpack.i.l.bf16 %v10795_v3  ;;  %v6692_v33 = vunpack.i.h.bf16 %v10831_v6 }
 0x5b8   : > { %v3860_v41 = vsel %vm3736_vm5, %v3844_v21, %v6646_v49  ;;  %v3861_v14 = vsel %vm3736_vm5, %v3845_v50, %v6647_v58  ;;  %v10951_v58 = vpop.permute.xlu0 %6769 }
 0x5b9   : > { %v6655_v26 = vpop.permute.xlu1 %6654 }
 0x5ba   : > { %v6657_v8 = vunpack.i.h.bf16 %v6655_v26  ;;  %v6656_v18 = vunpack.i.l.bf16 %v6655_v26 }
 0x5bc   : > { %v3876_v20 = vsel %vm3753_vm6, %v3860_v41, %v6656_v18  ;;  %v3877_v19 = vsel %vm3753_vm6, %v3861_v14, %v6657_v8  ;;  %v12271_v14 = vld [vmem:[#allocation80_spill] sm:$0xff] }
 0x5bd   : > { %v6665_v48 = vpop.permute.xlu1 %6664  ;;  %v4751_v10 = vpack.c.bf16 %v3877_v19, %v3876_v20  ;;  %v5872_v61 = vunpack.i.h.bf16 %v12271_v14  ;;  %v5871_v36 = vunpack.i.l.bf16 %v12271_v14  ;;  %v5912_v20 = vunpack.i.h.bf16 %v12272_v5 }
 0x5be   : > { %v6666_v12 = vunpack.i.l.bf16 %v6665_v48  ;;  %v6667_v7 = vunpack.i.h.bf16 %v6665_v48  ;;  %v5911_v19 = vunpack.i.l.bf16 %v12272_v5  ;;  %v10967_v48 = vpop.permute.xlu0 %6779  ;;  %v6722_v5 = vunpack.i.h.bf16 %v10872_v56 }
 0x5bf   : > { %5074 = vmatprep.mubr.bf16.mxu0 %v4751_v10  ;;  %v12273_v10 = vld [vmem:[#allocation13_spill] sm:$0xff] }
 0x5c0   : > { %5075 = vmatmul.mubr.bf16.gmra.mrb[20].mxu0 %v4750_v22  ;;  %v4644_v32 = vsel %vm3702_vm3, %v4628_v25, %v6666_v12  ;;  %v4645_v46 = vsel %vm3702_vm3, %v4629_v9, %v6667_v7  ;;  %v5832_v43 = vunpack.i.h.bf16 %v12273_v10  ;;  %v5831_v22 = vunpack.i.l.bf16 %v12273_v10 }
 0x5c1   : > { %v6675_v4 = vpop.permute.xlu1 %6674  ;;  %v6691_v7 = vunpack.i.l.bf16 %v10831_v6 }
 0x5c2   : > { %v6677_v63 = vunpack.i.h.bf16 %v6675_v4  ;;  %v6676_v15 = vunpack.i.l.bf16 %v6675_v4  ;;  %v3664_v53 = vsel %vm3651_vm1, %v5831_v22, %v5871_v36  ;;  %v3665_v30 = vsel %vm3651_vm1, %v5832_v43, %v5872_v61 }
 0x5c3   : > { %v3681_v42 = vsel %vm428_vm0, %v3664_v53, %v5911_v19 }
 0x5c4   : > { %v4660_v26 = vsel %vm3719_vm4, %v4644_v32, %v6676_v15  ;;  %v4661_v37 = vsel %vm3719_vm4, %v4645_v46, %v6677_v63  ;;  %v3698_v12 = vsel %vm3685_vm2, %v3681_v42, %v5951_v60  ;;  %v10989_v63 = vpop.permute.xlu0 %6789  ;;  %v12277_v32 = vld [vmem:[#allocation27_spill] sm:$0xff]  ;;  %v12278_v46 = vld [vmem:[#allocation32_spill] sm:$0xff] }
 0x5c5   : > { %v6685_v2 = vpop.permute.xlu1 %6684  ;;  %v6031_v6 = vunpack.i.l.bf16 %v12277_v32 }
 0x5c6   : > { %v6687_v52 = vunpack.i.h.bf16 %v6685_v2  ;;  %v6686_v47 = vunpack.i.l.bf16 %v6685_v2 }
 0x5c8   : > { %v4708_v23 = vsel %vm3651_vm1, %v6681_v0, %v6686_v47  ;;  %v4709_v45 = vsel %vm3651_vm1, %v6682_v28, %v6687_v52  ;;  %v3682_v28 = vsel %vm428_vm0, %v3665_v30, %v5912_v20  ;;  %v6672_v0 = vunpack.i.h.bf16 %v10795_v3  ;;  %v12276_v47 = vld [vmem:[#allocation212_spill] sm:$0xff]  ;;  %v11011_v19 = vpop.permute.xlu0 %6799 }
 0x5c9   : > { %v4724_v16 = vsel %vm428_vm0, %v4708_v23, %v6701_v62  ;;  %v4725_v29 = vsel %vm428_vm0, %v4709_v45, %v6702_v51  ;;  %v6695_v44 = vpop.permute.xlu1 %6694  ;;  %v3699_v2 = vsel %vm3685_vm2, %v3682_v28, %v5952_v31  ;;  %v6152_v51 = vunpack.i.h.bf16 %v12276_v47 }
 0x5ca   : > { %v6697_v49 = vunpack.i.h.bf16 %v6695_v44  ;;  %v6696_v11 = vunpack.i.l.bf16 %v6695_v44  ;;  %v4753_v55 = vpack.c.bf16 %v4725_v29, %v4724_v16  ;;  %v6151_v62 = vunpack.i.l.bf16 %v12276_v47 }
 0x5cb   : > { %v3715_v3 = vsel %vm3702_vm3, %v3698_v12, %v5991_v1  ;;  %v3716_v23 = vsel %vm3702_vm3, %v3699_v2, %v5992_v27  ;;  %v6032_v16 = vunpack.i.h.bf16 %v12277_v32  ;;  %v3783_v44 = vsel %vm3651_vm1, %v6152_v51, %v6672_v0 }
 0x5cc   : > { %v4676_v38 = vsel %vm3736_vm5, %v4660_v26, %v6696_v11  ;;  %v4677_v21 = vsel %vm3736_vm5, %v4661_v37, %v6697_v49  ;;  %5552 = vmatprep.mubr.msk.bf16.mxu1 %vm3685_vm2, %v4753_v55  ;;  %v3782_v29 = vsel %vm3651_vm1, %v6151_v62, %v6671_v57  ;;  %v6072_v49 = vunpack.i.h.bf16 %v12278_v46  ;;  %v12279_v26 = vld [vmem:[#allocation137_spill] sm:$0xff] }
 0x5cd   : > { %v6705_v50 = vpop.permute.xlu1 %6704  ;;  %v4692_v8 = vsel %vm3753_vm6, %v4676_v38, %v6711_v39  ;;  %v4693_v18 = vsel %vm3753_vm6, %v4677_v21, %v6712_v35  ;;  %v6071_v11 = vunpack.i.l.bf16 %v12278_v46  ;;  %v3798_v55 = vsel %vm428_vm0, %v3782_v29, %v6691_v7  ;;  %v11025_v7 = vpop.permute.xlu0 %6809 }
 0x5ce   : > { %v4752_v41 = vpack.c.bf16 %v4693_v18, %v4692_v8  ;;  %v6707_v15 = vunpack.i.h.bf16 %v6705_v50  ;;  %v6706_v25 = vunpack.i.l.bf16 %v6705_v50  ;;  %v3799_v35 = vsel %vm428_vm0, %v3783_v44, %v6692_v33 }
 0x5cf   : > { %v6112_v37 = vunpack.i.h.bf16 %v12279_v26  ;;  %v6111_v38 = vunpack.i.l.bf16 %v12279_v26  ;;  %v3732_v61 = vsel %vm3719_vm4, %v3715_v3, %v6031_v6  ;;  %v3733_v36 = vsel %vm3719_vm4, %v3716_v23, %v6032_v16 }
 0x5d0   : > { %5172 = vmatmul.mubr.bf16.gmra.mrb[20].mxu1 %v4752_v41  ;;  %v3814_v21 = vsel %vm3685_vm2, %v3798_v55, %v6706_v25  ;;  %v3815_v50 = vsel %vm3685_vm2, %v3799_v35, %v6707_v15  ;;  %v6721_v20 = vunpack.i.l.bf16 %v10872_v56  ;;  %v3749_v43 = vsel %vm3736_vm5, %v3732_v61, %v6071_v11 }
 0x5d1   : > { %v6715_v4 = vpop.permute.xlu1 %6714  ;;  %v3750_v22 = vsel %vm3736_vm5, %v3733_v36, %v6072_v49  ;;  %v3766_v56 = vsel %vm3753_vm6, %v3749_v43, %v6111_v38  ;;  %v6731_v25 = vunpack.i.l.bf16 %v10892_v40  ;;  %v6732_v3 = vunpack.i.h.bf16 %v10892_v40 }
 0x5d2   : > { %v6717_v45 = vunpack.i.h.bf16 %v6715_v4  ;;  %v6716_v9 = vunpack.i.l.bf16 %v6715_v4  ;;  %v3767_v1 = vsel %vm3753_vm6, %v3750_v22, %v6112_v37  ;;  %v6742_v16 = vunpack.i.h.bf16 %v10914_v54 }
 0x5d3   : > { %v4754_v62 = vpack.c.bf16 %v3767_v1, %v3766_v56  ;;  %v6752_v6 = vunpack.i.h.bf16 %v10926_v59  ;;  %v6751_v29 = vunpack.i.l.bf16 %v10926_v59  ;;  %v6772_v44 = vunpack.i.h.bf16 %v10951_v58 }
 0x5d4   : > { %v3830_v8 = vsel %vm3702_vm3, %v3814_v21, %v6716_v9  ;;  %v3831_v18 = vsel %vm3702_vm3, %v3815_v50, %v6717_v45  ;;  %v6741_v9 = vunpack.i.l.bf16 %v10914_v54  ;;  %v6771_v46 = vunpack.i.l.bf16 %v10951_v58 }
 0x5d5   : > { %v10985_v52 = vpop.permute.xlu1 %6724  ;;  %v3846_v13 = vsel %vm3719_vm4, %v3830_v8, %v6721_v20  ;;  %v3847_v31 = vsel %vm3719_vm4, %v3831_v18, %v6722_v5  ;;  %v6792_v54 = vunpack.i.h.bf16 %v10989_v63  ;;  %v6791_v37 = vunpack.i.l.bf16 %v10989_v63 }
 0x5d6   : > { %v6726_v47 = vunpack.i.l.bf16 %v10985_v52  ;;  %v6727_v15 = vunpack.i.h.bf16 %v10985_v52  ;;  %v11039_v52 = vpop.permute.xlu0 %6819  ;;  %v6802_v43 = vunpack.i.h.bf16 %v11011_v19  ;;  %v6801_v22 = vunpack.i.l.bf16 %v11011_v19 }
 0x5d8   : > { %v4598_v45 = vsel %vm3651_vm1, %v6726_v47, %v6731_v25  ;;  %v4599_v32 = vsel %vm3651_vm1, %v6727_v15, %v6732_v3 }
 0x5d9   : > { %v6735_v39 = vpop.permute.xlu1 %6734  ;;  %v4614_v40 = vsel %vm428_vm0, %v4598_v45, %v6741_v9  ;;  %v4615_v55 = vsel %vm428_vm0, %v4599_v32, %v6742_v16 }
 0x5da   : > { %v6737_v41 = vunpack.i.h.bf16 %v6735_v39  ;;  %v6736_v14 = vunpack.i.l.bf16 %v6735_v39  ;;  %v4630_v21 = vsel %vm3685_vm2, %v4614_v40, %v6751_v29  ;;  %v4631_v8 = vsel %vm3685_vm2, %v4615_v55, %v6752_v6  ;;  %v11054_v36 = vpop.permute.xlu0 %6829 }
 0x5dc   : > { %v3862_v30 = vsel %vm3736_vm5, %v3846_v13, %v6736_v14  ;;  %v3863_v24 = vsel %vm3736_vm5, %v3847_v31, %v6737_v41 }
 0x5dd   : > { %v6745_v10 = vpop.permute.xlu1 %6744 }
 0x5de   : > { %v6747_v60 = vunpack.i.h.bf16 %v6745_v10  ;;  %v6746_v4 = vunpack.i.l.bf16 %v6745_v10  ;;  %v5582_v53 = vpop.f32.mrb[0].mxu0  ;;  %v11073_v25 = vpop.permute.xlu0 %6839 }
 0x5df   : > { %v5583_v27 = vpop.f32.mrb[1].mxu0 }
 0x5e0   : > { %v11021_v42 = vadd.f32 %v5583_v27, %v5582_v53  ;;  %v5585_v28 = vpop.f32.mrb[2].mxu0  ;;  %v3878_v0 = vsel %vm3753_vm6, %v3862_v30, %v6746_v4  ;;  %v3879_v57 = vsel %vm3753_vm6, %v3863_v24, %v6747_v60  ;;  %v12280_v27 = vld [vmem:[#allocation35_spill] sm:$0xff] }
 0x5e1   : > { %v5586_v12 = vpop.f32.mrb[3].mxu0  ;;  %v6755_v2 = vpop.permute.xlu1 %6754  ;;  %v4755_v33 = vpack.c.bf16 %v3879_v57, %v3878_v0  ;;  %v5877_v56 = vunpack.i.h.bf16 %v12280_v27  ;;  %v5876_v1 = vunpack.i.l.bf16 %v12280_v27 }
 0x5e2   : > { %v11028_v51 = vadd.f32 %v5586_v12, %v5585_v28  ;;  %v6756_v49 = vunpack.i.l.bf16 %v6755_v2  ;;  %v6757_v35 = vunpack.i.h.bf16 %v6755_v2  ;;  %v12281_v28 = vld [vmem:[#allocation40_spill] sm:$0xff]  ;;  %v12282_v2 = vld [vmem:[#allocation110_spill] sm:$0xff] }
 0x5e3   : > { %5082 = vmatprep.mubr.bf16.mxu0 %v4755_v33  ;;  %v5917_v0 = vunpack.i.h.bf16 %v12281_v28  ;;  %v5916_v57 = vunpack.i.l.bf16 %v12281_v28  ;;  %v5837_v33 = vunpack.i.h.bf16 %v12282_v2  ;;  %v5836_v47 = vunpack.i.l.bf16 %v12282_v2 }
 0x5e4   : > { %5083 = vmatmul.mubr.bf16.gmra.mrb[24].mxu0 %v4754_v62  ;;  %v4646_v18 = vsel %vm3702_vm3, %v4630_v21, %v6756_v49  ;;  %v4647_v63 = vsel %vm3702_vm3, %v4631_v8, %v6757_v35  ;;  %v12283_v62 = vld [vmem:[#allocation223_spill] sm:$0xff]  ;;  %v12284_v49 = vld [vmem:[#allocation44_spill] sm:$0xff]  ;;  %v6762_v35 = vunpack.i.h.bf16 %v10936_v34  ;;  %v6812_v2 = vunpack.i.h.bf16 %v11025_v7 }
 0x5e5   : > { %v6765_v23 = vpop.permute.xlu1 %6764  ;;  %v5957_v15 = vunpack.i.h.bf16 %v12283_v62  ;;  %v5956_v45 = vunpack.i.l.bf16 %v12283_v62  ;;  %v3666_v16 = vsel %vm3651_vm1, %v5836_v47, %v5876_v1  ;;  %v3667_v6 = vsel %vm3651_vm1, %v5837_v33, %v5877_v56 }
 0x5e6   : > { %v6767_v59 = vunpack.i.h.bf16 %v6765_v23  ;;  %v6766_v38 = vunpack.i.l.bf16 %v6765_v23  ;;  %v3683_v40 = vsel %vm428_vm0, %v3666_v16, %v5916_v57  ;;  %v6811_v33 = vunpack.i.l.bf16 %v11025_v7 }
 0x5e8   : > { %v4662_v13 = vsel %vm3719_vm4, %v4646_v18, %v6766_v38  ;;  %v4663_v31 = vsel %vm3719_vm4, %v4647_v63, %v6767_v59  ;;  %v6782_v59 = vunpack.i.h.bf16 %v10967_v48  ;;  %v6781_v38 = vunpack.i.l.bf16 %v10967_v48  ;;  %v11093_v18 = vpop.permute.xlu0 %6849 }
 0x5e9   : > { %v6775_v11 = vpop.permute.xlu1 %6774 }
 0x5ea   : > { %v6777_v39 = vunpack.i.h.bf16 %v6775_v11  ;;  %v6776_v26 = vunpack.i.l.bf16 %v6775_v11  ;;  %v5997_v11 = vunpack.i.h.bf16 %v12284_v49 }
 0x5ec   : > { %v4710_v50 = vsel %vm3651_vm1, %v6771_v46, %v6776_v26  ;;  %v4711_v58 = vsel %vm3651_vm1, %v6772_v44, %v6777_v39  ;;  %v3684_v46 = vsel %vm428_vm0, %v3667_v6, %v5917_v0  ;;  %v6761_v39 = vunpack.i.l.bf16 %v10936_v34  ;;  %v6860_v47 = vpop.permute.xlu0 %6859 }
 0x5ed   : > { %v4726_v41 = vsel %vm428_vm0, %v4710_v50, %v6791_v37  ;;  %v4727_v14 = vsel %vm428_vm0, %v4711_v58, %v6792_v54  ;;  %v6785_v61 = vpop.permute.xlu1 %6784  ;;  %v3701_v55 = vsel %vm3685_vm2, %v3684_v46, %v5957_v15  ;;  %v3700_v54 = vsel %vm3685_vm2, %v3683_v40, %v5956_v45  ;;  %v12285_v37 = vld [vmem:[#allocation59_spill] sm:$0xff] }
 0x5ee   : > { %v6787_v5 = vunpack.i.h.bf16 %v6785_v61  ;;  %v6786_v20 = vunpack.i.l.bf16 %v6785_v61  ;;  %v4757_v10 = vpack.c.bf16 %v4727_v14, %v4726_v41  ;;  %v12286_v50 = vld [vmem:[#allocation159_spill] sm:$0xff]  ;;  %v3718_v34 = vsel %vm3702_vm3, %v3701_v55, %v5997_v11 }
 0x5ef   : > { %v6157_v58 = vunpack.i.h.bf16 %v12286_v50  ;;  %v6156_v8 = vunpack.i.l.bf16 %v12286_v50  ;;  %v6037_v48 = vunpack.i.h.bf16 %v12285_v37  ;;  %v6821_v11 = vunpack.i.l.bf16 %v11039_v52 }
 0x5f0   : > { %v4678_v60 = vsel %vm3736_vm5, %v4662_v13, %v6786_v20  ;;  %v4679_v4 = vsel %vm3736_vm5, %v4663_v31, %v6787_v5  ;;  %5553 = vmatprep.mubr.msk.bf16.mxu1 %vm3685_vm2, %v4757_v10  ;;  %v12287_v20 = vld [vmem:[#allocation66_spill] sm:$0xff]  ;;  %v6862_v50 = vunpack.i.h.bf16 %v6860_v47 }
 0x5f1   : > { %v6795_v53 = vpop.permute.xlu1 %6794  ;;  %v4694_v30 = vsel %vm3753_vm6, %v4678_v60, %v6801_v22  ;;  %v4695_v24 = vsel %vm3753_vm6, %v4679_v4, %v6802_v43  ;;  %v6076_v10 = vunpack.i.l.bf16 %v12287_v20  ;;  %v3784_v43 = vsel %vm3651_vm1, %v6156_v8, %v6761_v39  ;;  %v12288_v31 = vld [vmem:[#allocation78_spill] sm:$0xff]  ;;  %v6870_v39 = vpop.permute.xlu0 %6869 }
 0x5f2   : > { %v4756_v19 = vpack.c.bf16 %v4695_v24, %v4694_v30  ;;  %v6797_v41 = vunpack.i.h.bf16 %v6795_v53  ;;  %v6796_v14 = vunpack.i.l.bf16 %v6795_v53  ;;  %v3785_v22 = vsel %vm3651_vm1, %v6157_v58, %v6762_v35 }
 0x5f3   : > { %v5133_v12 = vpop.f32.mrb[0].mxu1  ;;  %v6077_v13 = vunpack.i.h.bf16 %v12287_v20  ;;  %v6116_v60 = vunpack.i.l.bf16 %v12288_v31  ;;  %v3800_v4 = vsel %vm428_vm0, %v3784_v43, %v6781_v38  ;;  %v3801_v53 = vsel %vm428_vm0, %v3785_v22, %v6782_v59 }
 0x5f4   : > { %v5134_v3 = vadd.f32 %v11021_v42, %v5133_v12  ;;  %v5135_v23 = vpop.f32.mrb[1].mxu1  ;;  %5180 = vmatmul.mubr.bf16.gmra.mrb[24].mxu1 %v4756_v19  ;;  %v5996_v42 = vunpack.i.l.bf16 %v12284_v49  ;;  %v6117_v27 = vunpack.i.h.bf16 %v12288_v31  ;;  %v3816_v56 = vsel %vm3685_vm2, %v3800_v4, %v6796_v14 }
 0x5f5   : > { %v6805_v9 = vpop.permute.xlu1 %6804  ;;  %v5136_v32 = vpop.f32.mrb[2].mxu1  ;;  %v3817_v1 = vsel %vm3685_vm2, %v3801_v53, %v6797_v41  ;;  %v3735_v12 = vsel %vm3719_vm4, %v3718_v34, %v6037_v48  ;;  %v6822_v35 = vunpack.i.h.bf16 %v11039_v52  ;;  %v6831_v59 = vunpack.i.l.bf16 %v11054_v36 }
 0x5f6   : > { %v5137_v29 = vadd.f32 %v11028_v51, %v5136_v32  ;;  %v5138_v44 = vpop.f32.mrb[3].mxu1  ;;  %v6036_v51 = vunpack.i.l.bf16 %v12285_v37  ;;  %v3717_v61 = vsel %vm3702_vm3, %v3700_v54, %v5996_v42  ;;  %v6807_v63 = vunpack.i.h.bf16 %v6805_v9 }
 0x5f7   : > { %v6806_v5 = vunpack.i.l.bf16 %v6805_v9  ;;  %v6861_v58 = vunpack.i.l.bf16 %v6860_v47  ;;  %v6872_v8 = vunpack.i.h.bf16 %v6870_v39  ;;  %v6871_v34 = vunpack.i.l.bf16 %v6870_v39 }
 0x5f8   : > { %v5211_v26 = vpack.c.bf16 %v5137_v29, %v5134_v3  ;;  %v3734_v24 = vsel %vm3719_vm4, %v3717_v61, %v6036_v51  ;;  %v3833_v28 = vsel %vm3702_vm3, %v3817_v1, %v6807_v63  ;;  %v3752_v3 = vsel %vm3736_vm5, %v3735_v12, %v6077_v13 }
 0x5f9   : > { %v6815_v21 = vpop.permute.xlu1 %6814  ;;  %v3832_v19 = vsel %vm3702_vm3, %v3816_v56, %v6806_v5  ;;  %v3751_v62 = vsel %vm3736_vm5, %v3734_v24, %v6076_v10  ;;  %v3849_v9 = vsel %vm3719_vm4, %v3833_v28, %v6812_v2  ;;  %v3769_v7 = vsel %vm3753_vm6, %v3752_v3, %v6117_v27 }
 0x5fa   : > { %5643 = vmatpush3.bf16.msra.mxu0 %v5211_v26  ;;  %v3768_v23 = vsel %vm3753_vm6, %v3751_v62, %v6116_v60  ;;  %v3848_v45 = vsel %vm3719_vm4, %v3832_v19, %v6811_v33  ;;  %v6816_v6 = vunpack.i.l.bf16 %v6815_v21  ;;  %v6817_v46 = vunpack.i.h.bf16 %v6815_v21 }
 0x5fb   : > { %5644 = vmatprep.subr.bf16.mxu0 %v7055_v17  ;;  %v4758_v26 = vpack.c.bf16 %v3769_v7, %v3768_v23  ;;  %v6832_v51 = vunpack.i.h.bf16 %v11054_v36  ;;  %v6842_v22 = vunpack.i.h.bf16 %v11073_v25  ;;  %v6841_v13 = vunpack.i.l.bf16 %v11073_v25 }
 0x5fc   : > { %v4600_v54 = vsel %vm3651_vm1, %v6816_v6, %v6821_v11  ;;  %v4601_v38 = vsel %vm3651_vm1, %v6817_v46, %v6822_v35 }
 0x5fd   : > { %v6825_v30 = vpop.permute.xlu1 %6824  ;;  %v4616_v61 = vsel %vm428_vm0, %v4600_v54, %v6831_v59  ;;  %v4617_v20 = vsel %vm428_vm0, %v4601_v38, %v6832_v51 }
 0x5fe   : > { %v6827_v0 = vunpack.i.h.bf16 %v6825_v30  ;;  %v6826_v57 = vunpack.i.l.bf16 %v6825_v30  ;;  %v4632_v24 = vsel %vm3685_vm2, %v4616_v61, %v6841_v13  ;;  %v4633_v27 = vsel %vm3685_vm2, %v4617_v20, %v6842_v22 }
 0x600   : > { %v3864_v29 = vsel %vm3736_vm5, %v3848_v45, %v6826_v57  ;;  %v3865_v44 = vsel %vm3736_vm5, %v3849_v9, %v6827_v0  ;;  %v6852_v0 = vunpack.i.h.bf16 %v11093_v18  ;;  %v6851_v57 = vunpack.i.l.bf16 %v11093_v18 }
 0x601   : > { %v6835_v15 = vpop.permute.xlu1 %6834 }
 0x602   : > { %v6837_v32 = vunpack.i.h.bf16 %v6835_v15  ;;  %v6836_v16 = vunpack.i.l.bf16 %v6835_v15 }
 0x604   : > { %v3880_v40 = vsel %vm3753_vm6, %v3864_v29, %v6836_v16  ;;  %v3881_v49 = vsel %vm3753_vm6, %v3865_v44, %v6837_v32 }
 0x605   : > { %v6845_v42 = vpop.permute.xlu1 %6844  ;;  %v4759_v55 = vpack.c.bf16 %v3881_v49, %v3880_v40 }
 0x606   : > { %v6847_v10 = vunpack.i.h.bf16 %v6845_v42  ;;  %v6846_v36 = vunpack.i.l.bf16 %v6845_v42 }
 0x607   : > { %5090 = vmatprep.mubr.bf16.mxu0 %v4759_v55 }
 0x608   : > { %v5588_v37 = vpop.f32.mrb[4].mxu0  ;;  %5091 = vmatmul.mubr.bf16.gmra.mrb[28].mxu0 %v4758_v26  ;;  %v4648_v1 = vsel %vm3702_vm3, %v4632_v24, %v6846_v36  ;;  %v4649_v19 = vsel %vm3702_vm3, %v4633_v27, %v6847_v10 }
 0x609   : > { %v5589_v21 = vpop.f32.mrb[5].mxu0  ;;  %v6855_v14 = vpop.permute.xlu1 %6854  ;;  %v4664_v2 = vsel %vm3719_vm4, %v4648_v1, %v6851_v57  ;;  %v4665_v33 = vsel %vm3719_vm4, %v4649_v19, %v6852_v0  ;;  %5658 = vmatprep.mubr.msk.bf16.mxu0 %vm7056_vm7, %v7055_v17 }
 0x60a   : > { %v5590_v41 = vadd.f32 %v5589_v21, %v5588_v37  ;;  %v5591_v52 = vpop.f32.mrb[6].mxu0  ;;  %v6857_v63 = vunpack.i.h.bf16 %v6855_v14  ;;  %v6856_v5 = vunpack.i.l.bf16 %v6855_v14 }
 0x60b   : > { %v5592_v48 = vpop.f32.mrb[7].mxu0 }
 0x60c   : > { %v5593_v43 = vadd.f32 %v5592_v48, %v5591_v52  ;;  %v4712_v31 = vsel %vm3651_vm1, %v6856_v5, %v6861_v58  ;;  %v4713_v60 = vsel %vm3651_vm1, %v6857_v63, %v6862_v50 }
 0x60d   : > { %v4728_v4 = vsel %vm428_vm0, %v4712_v31, %v6871_v34  ;;  %v4729_v53 = vsel %vm428_vm0, %v4713_v60, %v6872_v8  ;;  %v6865_v30 = vpop.permute.xlu1 %6864 }
 0x60e   : > { %v4761_v56 = vpack.c.bf16 %v4729_v53, %v4728_v4  ;;  %v6867_v28 = vunpack.i.h.bf16 %v6865_v30  ;;  %v6866_v25 = vunpack.i.l.bf16 %v6865_v30 }
 0x610   : > { %5554 = vmatprep.mubr.msk.bf16.mxu1 %vm3685_vm2, %v4761_v56  ;;  %v4680_v15 = vsel %vm3736_vm5, %v4664_v2, %v6866_v25  ;;  %v4681_v3 = vsel %vm3736_vm5, %v4665_v33, %v6867_v28 }
 0x611   : > { %v6875_v12 = vpop.permute.xlu1 %6874 }
 0x612   : > { %v6877_v47 = vunpack.i.h.bf16 %v6875_v12  ;;  %v6876_v62 = vunpack.i.l.bf16 %v6875_v12 }
 0x614   : > { %v4696_v23 = vsel %vm3753_vm6, %v4680_v15, %v6876_v62  ;;  %v4697_v45 = vsel %vm3753_vm6, %v4681_v3, %v6877_v47 }
 0x615   : > { %v4760_v9 = vpack.c.bf16 %v4697_v45, %v4696_v23 }
 0x617   : > { %5188 = vmatmul.mubr.bf16.gmra.mrb[28].mxu1 %v4760_v9 }
 0x61b   : > { %v5141_v18 = vpop.f32.mrb[4].mxu1 }
 0x61c   : > { %v5142_v32 = vadd.f32 %v5590_v41, %v5141_v18  ;;  %v5143_v16 = vpop.f32.mrb[5].mxu1 }
 0x61d   : > { %v5144_v6 = vpop.f32.mrb[6].mxu1 }
 0x61e   : > { %v5145_v29 = vadd.f32 %v5593_v43, %v5144_v6  ;;  %v5146_v44 = vpop.f32.mrb[7].mxu1 }
 0x620   : > { %v5212_v7 = vpack.c.bf16 %v5145_v29, %v5142_v32 }
 0x622   : > { %v5594_v46 = vpop.f32.mrb[8].mxu0  ;;  %5645 = vmatpush3.bf16.msra.mxu0 %v5212_v7 }
 0x623   : > { %v5595_v40 = vpop.f32.mrb[9].mxu0  ;;  %5646 = vmatprep.subr.bf16.mxu0 %v7055_v17 }
 0x624   : > { %v5596_v49 = vadd.f32 %v5595_v40, %v5594_v46  ;;  %v5597_v11 = vpop.f32.mrb[10].mxu0 }
 0x625   : > { %v5598_v42 = vpop.f32.mrb[11].mxu0 }
 0x626   : > { %v5599_v55 = vadd.f32 %v5598_v42, %v5597_v11 }
 0x637   : > { %v5149_v35 = vpop.f32.mrb[8].mxu1 }
 0x638   : > { %v5150_v39 = vadd.f32 %v5596_v49, %v5149_v35  ;;  %v5151_v26 = vpop.f32.mrb[9].mxu1 }
 0x639   : > { %v5152_v54 = vpop.f32.mrb[10].mxu1  ;;  %v5197_v26 = vlaneseq }
 0x63a   : > { %v5153_v37 = vadd.f32 %v5599_v55, %v5152_v54  ;;  %v5154_v51 = vpop.f32.mrb[11].mxu1 }
 0x63b   : > { %v5198_v54 = vshrl.u32 %v5197_v26, 7 }
 0x63c   : > { %v5213_v59 = vpack.c.bf16 %v5153_v37, %v5150_v39  ;;  %v5199_v37 = vstv %s5555_s12 }
 0x63e   : > { %5647 = vmatpush3.bf16.msra.mxu0 %v5213_v59  ;;  %v5200_v59 = vadd.s32 %v5199_v37, %v5198_v54 }
 0x63f   : > { %5648 = vmatprep.subr.bf16.mxu0 %v7055_v17 }
 0x64b   : > { %v5600_v38 = vpop.f32.mrb[12].mxu0 }
 0x64c   : > { %v5601_v21 = vpop.f32.mrb[13].mxu0 }
 0x64d   : > { %v5602_v50 = vadd.f32 %v5601_v21, %v5600_v38  ;;  %v5603_v58 = vpop.f32.mrb[14].mxu0 }
 0x64e   : > { %v5604_v8 = vpop.f32.mrb[15].mxu0 }
 0x64f   : > { %v5605_v41 = vadd.f32 %v5604_v8, %v5603_v58 }
 0x65b   : > { %v5157_v14 = vpop.f32.mrb[12].mxu1 }
 0x65c   : > { %v5158_v52 = vadd.f32 %v5602_v50, %v5157_v14  ;;  %v5159_v34 = vpop.f32.mrb[13].mxu1  ;;  %v5556_v50 = vld [vmem:[%s404_s16] ss:$0 sm:$0xff]  ;;  %v7057_v14 = vmov 1.0|1.0  }
 0x65d   : > { %v5160_v61 = vpop.f32.mrb[14].mxu1  ;;  %vm5206_vm8 = vcmp.eq.s32.totalorder %v5200_v59, %v5556_v50 }
 0x65e   : > { %v5161_v63 = vadd.f32 %v5605_v41, %v5160_v61  ;;  %v5162_v5 = vpop.f32.mrb[15].mxu1  ;;  %vm5558_vm9 = vmpackc.low %vm5206_vm8, %vm5206_vm8 }
 0x660   : > { %v5214_v48 = vpack.c.bf16 %v5161_v63, %v5158_v52  ;;  %v5210_v52 = vld [vmem:[#allocation2] sm:$0xff] }
 0x662   : > { %5649 = vmatpush3.bf16.msra.mxu0 %v5214_v48 }
 0x663   : > { %5650 = vmatprep.subr.bf16.mxu0 %v7055_v17 }
 0x66f   : > { %v5606_v20 = vpop.f32.mrb[16].mxu0 }
 0x670   : > { %v5607_v10 = vpop.f32.mrb[17].mxu0 }
 0x671   : > { %v5608_v36 = vadd.f32 %v5607_v10, %v5606_v20  ;;  %v5609_v43 = vpop.f32.mrb[18].mxu0 }
 0x672   : > { %v5610_v22 = vpop.f32.mrb[19].mxu0 }
 0x673   : > { %v5611_v13 = vadd.f32 %v5610_v22, %v5609_v43 }
 0x67f   : > { %v5165_v31 = vpop.f32.mrb[16].mxu1 }
 0x680   : > { %v5166_v60 = vadd.f32 %v5608_v36, %v5165_v31  ;;  %v5167_v4 = vpop.f32.mrb[17].mxu1 }
 0x681   : > { %v5168_v53 = vpop.f32.mrb[18].mxu1 }
 0x682   : > { %v5169_v30 = vadd.f32 %v5611_v13, %v5168_v53  ;;  %v5170_v24 = vpop.f32.mrb[19].mxu1 }
 0x684   : > { %v5215_v27 = vpack.c.bf16 %v5169_v30, %v5166_v60 }
 0x686   : > { %5651 = vmatpush3.bf16.msra.mxu0 %v5215_v27 }
 0x687   : > { %5652 = vmatprep.subr.bf16.mxu0 %v7055_v17 }
 0x693   : > { %v5612_v56 = vpop.f32.mrb[20].mxu0 }
 0x694   : > { %v5613_v1 = vpop.f32.mrb[21].mxu0 }
 0x695   : > { %v5614_v19 = vadd.f32 %v5613_v1, %v5612_v56  ;;  %v5615_v28 = vpop.f32.mrb[22].mxu0 }
 0x696   : > { %v5616_v25 = vpop.f32.mrb[23].mxu0 }
 0x697   : > { %v5617_v0 = vadd.f32 %v5616_v25, %v5615_v28 }
 0x6a3   : > { %v5173_v57 = vpop.f32.mrb[20].mxu1 }
 0x6a4   : > { %v5174_v12 = vadd.f32 %v5614_v19, %v5173_v57  ;;  %v5175_v2 = vpop.f32.mrb[21].mxu1 }
 0x6a5   : > { %v5176_v33 = vpop.f32.mrb[22].mxu1 }
 0x6a6   : > { %v5177_v47 = vadd.f32 %v5617_v0, %v5176_v33  ;;  %v5178_v62 = vpop.f32.mrb[23].mxu1 }
 0x6a8   : > { %v5216_v15 = vpack.c.bf16 %v5177_v47, %v5174_v12 }
 0x6aa   : > { %5653 = vmatpush3.bf16.msra.mxu0 %v5216_v15 }
 0x6ab   : > { %5654 = vmatprep.subr.bf16.mxu0 %v7055_v17 }
 0x6b7   : > { %v5618_v3 = vpop.f32.mrb[24].mxu0 }
 0x6b8   : > { %v5619_v23 = vpop.f32.mrb[25].mxu0 }
 0x6b9   : > { %v5620_v45 = vadd.f32 %v5619_v23, %v5618_v3  ;;  %v5621_v9 = vpop.f32.mrb[26].mxu0 }
 0x6ba   : > { %v5622_v18 = vpop.f32.mrb[27].mxu0 }
 0x6bb   : > { %v5623_v32 = vadd.f32 %v5622_v18, %v5621_v9 }
 0x6c7   : > { %v5181_v16 = vpop.f32.mrb[24].mxu1 }
 0x6c8   : > { %v5182_v6 = vadd.f32 %v5620_v45, %v5181_v16  ;;  %v5183_v29 = vpop.f32.mrb[25].mxu1 }
 0x6c9   : > { %v5184_v44 = vpop.f32.mrb[26].mxu1 }
 0x6ca   : > { %v5185_v7 = vadd.f32 %v5623_v32, %v5184_v44  ;;  %v5186_v46 = vpop.f32.mrb[27].mxu1 }
 0x6cc   : > { %v5217_v40 = vpack.c.bf16 %v5185_v7, %v5182_v6 }
 0x6ce   : > { %5655 = vmatpush3.bf16.msra.mxu0 %v5217_v40 }
 0x6cf   : > { %5656 = vmatprep.subr.bf16.mxu0 %v7055_v17 }
 0x6db   : > { %v5624_v49 = vpop.f32.mrb[28].mxu0 }
 0x6dc   : > { %v5625_v11 = vpop.f32.mrb[29].mxu0 }
 0x6dd   : > { %v5626_v42 = vadd.f32 %v5625_v11, %v5624_v49  ;;  %v5627_v55 = vpop.f32.mrb[30].mxu0 }
 0x6de   : > { %v5628_v35 = vpop.f32.mrb[31].mxu0 }
 0x6df   : > { %v5629_v39 = vadd.f32 %v5628_v35, %v5627_v55 }
 0x6ea   : > { %v5189_v51 = vpop.f32.mrb[28].mxu1 }
 0x6eb   : > { %v5190_v38 = vadd.f32 %v5626_v42, %v5189_v51  ;;  %v5191_v21 = vpop.f32.mrb[29].mxu1 }
 0x6ec   : > { %v5192_v17 = vpop.f32.mrb[30].mxu1 }
 0x6ed   : > { %v5193_v58 = vadd.f32 %v5629_v39, %v5192_v17  ;;  %v5194_v8 = vpop.f32.mrb[31].mxu1 }
 0x6ef   : > { %v5218_v41 = vpack.c.bf16 %v5193_v58, %v5190_v38 }
 0x6f1   : > { %5657 = vmatpush3.bf16.msra.mxu0 %v5218_v41 }
 0x6f4   : > { %5659 = vmatmul.mubr.msk.bf16.vlgmr.msra.gmra.mrb[32].mxu0 %vm5558_vm9, %v7057_v14 }
 0x7c7   : > { %v5253_v34 = vpop.f32.mrb[32].mxu0 }
 0x7c8   : > { %v5259_v61 = vadd.f32 %v5253_v34, %v5210_v52  ;;  %v5660_v63 = vpop.f32.mrb[33].mxu0 }
 0x7c9   : > { %v5256_v5 = vpop.f32.mrb[34].mxu0 }
 0x7ca   : > { %5260 = vst.msk [vmem:[#allocation2] sm:$0xff] %vm428_vm0, %v5259_v61  ;;  %v5661_v48 = vpop.f32.mrb[35].mxu0 }
 0x7cb PF: > { %v5273_v20 = vld [vmem:[%s11212_s8] sm:$0xff]  ;;  %v5274_v10 = vld [vmem:[%s11212_s8 + $0x8] sm:$0xff]  ;;  %v7058_v36 = vmov 0.0|0.0   ;;  %vm7059_vm10 = vmmov 0   ;;  %v12289_v22 = vmov 0.0   ;;  %v7060_v31 = vmov 0   ;;  %s12290_s18 = scalar_lea.vmem %s11208_s4, %s7153_s29  ;;  %s12291_s27 = scalar_lea.vmem %s11214_s10, %s7153_s29 }
 0x7cc   : > { %5669 = vmatprep.subr.bf16.mxu0 %v7058_v36  ;;  %v5670_v43 = vpack.c.bf16 %v5274_v10, %v5273_v20  ;;  %5666 = vmatprep.mubr.msk.f32.mxu0 %vm7059_vm10, %v12289_v22  ;;  %v5265_v13 = vld [vmem:[%s418_s25] sm:$0xff]  ;;  %vm5275_vm11 = vcmask 130048   ;;  %s7061_s25 = smov 104   ;;  %s7062_s11 = smov 8   ;;  %vm5399_vm12 = vcmask 64512  }
 0x7cd   : > { %6956 = vset.pattern.permute.xlu0 %v7060_v31  ;;  %v5272_v60 = vld [vmem:[%s12290_s18] sm:$0xff]  ;;  %s7063_s20 = smov 16   ;;  %s7064_s12 = smov 120  }
 0x7ce   : > { %5671 = vmatpush3.bf16.msra.mxu0 %v5670_v43  ;;  %5268 = vperm.xlu0 %6956, %v5265_v13   ;;  %v5561_v27 = vld [vmem:[%s11213_s9] ss:$0 sm:$0xff] }
 0x7cf   : > { %v5358_v28 = vld [vmem:[%s414_s19] sm:$0xff] }
 0x7d1   : > { %5667 = vmatmul.mubr.msk.f32.vlgmr.msra.gmra.mrb[0].mxu0 %vm5275_vm11, %v5272_v60  ;;  %v5264_v53 = vld [vmem:[#allocation2] sm:$0xff] }
 0x84d   : > { %v5269_v4 = vpop.permute.xlu0 %5268 }
 0x84e   : > { %v5271_v30 = vmul.f32 %v5269_v4, %v5264_v53 }
 0x8a4   : > { %v5345_v24 = vpop.f32.mrb[0].mxu0 }
 0x8a5   : > { %v5349_v56 = vadd.f32 %v5345_v24, %v5271_v30  ;;  %v5668_v1 = vpop.f32.mrb[1].mxu0 }
 0x8a7   : > { %v5357_v19 = vadd.f32 %v5561_v27, %v5349_v56 }
 0x8a9   : > { %5360 = vrot.lane.b32.xlu0 %v5357_v19, %s7061_s25  ;;  %v5563_v23 = vmul.f32 -1.442695, %v5357_v19 }
 0x8ad   : > { %5390 = vrot.lane.b32.xlu0 %v5358_v28, %s7062_s11 }
 0x91b   : > { %v5361_v25 = vpop.permute.xlu0 %5360 }
 0x91c   : > { %v5363_v0 = vadd.f32 %v5361_v25, %v5357_v19 }
 0x91e   : > { %v5562_v57 = vmul.f32 -1.442695, %v5363_v0 }
 0x91f   : > { %v5391_v32 = vpop.permute.xlu0 %5390 }
 0x920   : > { %6957 = vpow2.f32 %v5562_v57 }
 0x92a   : > { %v6958_v12 = vpop.eup %6957 }
 0x92b   : > { %v5367_v2 = vadd.f32 1.0, %v6958_v12 }
 0x92d   : > { %6959 = vrcp.f32 %v5367_v2 }
 0x937   : > { %v6960_v33 = vpop.eup %6959 }
 0x938   : > { %v5376_v47 = vmul.f32 %v6960_v33, %v5361_v25 }
 0x93a   : > { %5378 = vrot.lane.b32.xlu1 %v5376_v47, %s7063_s20 }
 0x9ac   : > { %v5379_v62 = vpop.permute.xlu1 %5378 }
 0x9ad   : > { %v5381_v15 = vadd.f32 %v5379_v62, %v5357_v19 }
 0x9af   : > { %6961 = vtanh.f32 %v5381_v15 }
 0x9b0   : > { %6963 = vpow2.f32 %v5563_v23 }
 0x9b9   : > { %v6962_v3 = vpop.eup %6961 }
 0x9ba   : > { %5385 = vrot.lane.b32.xlu1 %v6962_v3, %s7064_s12  ;;  %v6964_v45 = vpop.eup %6963 }
 0x9bb   : > { %v5373_v9 = vadd.f32 1.0, %v6964_v45 }
 0x9bd   : > { %6965 = vrcp.f32 %v5373_v9 }
 0x9c7   : > { %v6966_v18 = vpop.eup %6965 }
 0x9c8   : > { %v5383_v16 = vsub.f32 1.0, %v6966_v18  ;;  %v5393_v29 = vmul.f32 %v6966_v18, %v5391_v32 }
 0xa2c   : > { %v5386_v6 = vpop.permute.xlu1 %5385 }
 0xa2d   : > { %v5388_v44 = vmul.f32 %v5386_v6, %v5383_v16 }
 0xa2f   : > { %v5394_v7 = vadd.f32 %v5393_v29, %v5388_v44 }
 0xa31   : > { %5396 = vrot.lane.b32.xlu1 %v5394_v7, %s7064_s12 }
 0xaa3   : > { %v5397_v46 = vpop.permute.xlu1 %5396 }
 0xaa4   : > { %5400 = vst.msk [vmem:[%s12291_s27] sm:$0xff] %vm5399_vm12, %v5397_v46 }
 0xaa5 PF: > { %s30_s23 = sadd.s32 1, %s7015_s23   ;;  %s12292_s1 = sld [smem:[#allocation7_spill]] }
 0xaa6   : > { %p27_p4 = scmp.ge.s32.totalorder %s30_s23, 4   ;;  %s12293_s22 = sld [smem:[#allocation8_spill]] }
 0xaa8   :  { %29 = sbr.rel (!%p27_p4) target bundleno = 27 (0x1b), region = 106 }

</bundles_post_ra>
